<compile_context>
chip_gen: v7x
topology: tpu7x:2x2x1
jax: 0.10.0
libtpu: 0.0.40
codegen_flags: <defaults>
</compile_context>

<pallas_src>
import functools

import jax
import jax.numpy as jnp
from jax.experimental import pallas as pl
from jax.experimental.pallas import tpu as pltpu


# ------------------------------ fused kernel -------------------------------- #

def _pixelcnn_kernel(cols_ref, w0_ref, b0_ref,
                     w1s_ref, b1s_ref, w2s_ref, w2c_ref, b2s_ref,
                     w3s_ref, b3s_ref,
                     wh1_ref, bh1_ref, wh2_ref, bh2_ref,
                     o_ref, *, img_w, img_hw, num_blocks, out_channels):
    rows = cols_ref.shape[0]

    # Stem: masked 7x7 'A' conv as an im2col matmul (only the 4x7 window at /
    # above the centre row is live since rows below it are fully masked).
    h = (jnp.dot(cols_ref[...], w0_ref[...],
                 preferred_element_type=jnp.float32) + b0_ref[...])

    # Per-pixel boundary masks, computed once and reused by every block.
    # Rows are laid out p = (img * H + y) * W + x inside the block, so the
    # same masks also zero any cross-image leakage of the flat row shifts.
    p = jax.lax.broadcasted_iota(jnp.int32, (rows, 1), 0)
    x_in_row = p % img_w
    p_in_img = p % img_hw
    left_ok = x_in_row >= 1
    right_ok = x_in_row < (img_w - 1)
    top_ok = p_in_img >= img_w
    topleft_ok = jnp.logical_and(top_ok, left_ok)
    topright_ok = jnp.logical_and(top_ok, right_ok)

    for l in range(num_blocks):
        # relu -> 1x1 (nf -> nh)
        a = jnp.maximum(h, 0.0).astype(jnp.bfloat16)
        h1 = jnp.maximum(
            jnp.dot(a, w1s_ref[l], preferred_element_type=jnp.float32)
            + b1s_ref[l], 0.0)                                   # (R, nh) f32
        nh = h1.shape[-1]
        h1b = h1.astype(jnp.bfloat16)

        # relu -> masked-'B' 3x3: 4 shifted causal taps built in VMEM via
        # static row shifts (W+1 zero rows on top) + boundary masks.  Selects
        # stay f32 (v5e has no bf16 VPU); each chunk is cast to bf16 before
        # the concat.  The centre tap is not packed -- it gets its own dot.
        hp = jnp.concatenate(
            [jnp.zeros((img_w + 1, nh), jnp.float32), h1], axis=0)
        t_ul = jnp.where(topleft_ok, hp[0:rows, :], 0.0).astype(jnp.bfloat16)
        t_u = jnp.where(top_ok, hp[1:1 + rows, :], 0.0).astype(jnp.bfloat16)
        t_ur = jnp.where(topright_ok, hp[2:2 + rows, :], 0.0).astype(jnp.bfloat16)
        t_l = jnp.where(left_ok, hp[img_w:img_w + rows, :], 0.0).astype(jnp.bfloat16)
        taps = jnp.concatenate([t_ul, t_u, t_ur, t_l], axis=-1)  # (R, 4*nh)

        h2 = jnp.maximum(
            jnp.dot(taps, w2s_ref[l], preferred_element_type=jnp.float32)
            + jnp.dot(h1b, w2c_ref[l], preferred_element_type=jnp.float32)
            + b2s_ref[l], 0.0)                                   # (R, nh) f32

        # relu -> 1x1 (nh -> nf) -> + residual
        h = (h
             + jnp.dot(h2.astype(jnp.bfloat16), w3s_ref[l],
                       preferred_element_type=jnp.float32)
             + b3s_ref[l])

    # Head: relu -> 1x1 (nf -> 256) -> relu -> 1x1 (256 -> cl).  The final dot
    # runs at a lane-padded (>= 128) width; only the real logits are stored.
    a = jnp.maximum(h, 0.0).astype(jnp.bfloat16)
    hd = jnp.maximum(
        jnp.dot(a, wh1_ref[...], preferred_element_type=jnp.float32)
        + bh1_ref[...], 0.0).astype(jnp.bfloat16)
    logits = (jnp.dot(hd, wh2_ref[...], preferred_element_type=jnp.float32)
              + bh2_ref[...])
    o_ref[...] = logits[:, :out_channels]


# --------------------------------- wrapper ---------------------------------- #

def _pick_group(n, hwp, target_rows=4096):
    """Images per grid step: a divisor of n giving ~target_rows rows/step,
    and >= 2 grid steps when possible (v7x megacore needs a >=2 parallel grid)."""
    g = min(n, max(1, target_rows // hwp))
    while n % g:
        g -= 1
    if n // g < 2 and g > 1:
        g = max(1, g // 2)
        while n % g:
            g -= 1
    return g


def _full_spec(arr):
    nd = arr.ndim
    return pl.BlockSpec(arr.shape, lambda i, _nd=nd: (0,) * _nd)


def pixelcnn_forward(image_nchw, prep, *, color_levels=1):
    """PixelCNN forward: (N, 1, H, W) f32 -> (N, color_levels, H, W) f32."""
    n, cin, hh, ww = image_nchw.shape
    assert cin == 1
    # TODO(synk): pad H*W up to a multiple of 8 for arbitrary spatial sizes.
    assert (hh * ww) % 8 == 0
    hwp = hh * ww
    m = n * hwp

    w0, b0 = prep["stem"]
    w1s, b1s, w2s, w2c, b2s, w3s, b3s = prep["blocks"]
    wh1, bh1, wh2, bh2 = prep["head"]
    num_blocks = w1s.shape[0]

    # Stem im2col (Cin == 1, 28 live taps), built once straight to bf16.  The
    # stem's (M, nf) f32 output never touches HBM -- it's fused below.
    x = jnp.transpose(image_nchw, (0, 2, 3, 1)).astype(jnp.float32)
    xp = jnp.pad(x, ((0, 0), (3, 0), (3, 3), (0, 0)))
    cols = jnp.concatenate(
        [xp[:, kr:kr + hh, kc:kc + ww, :]
         for kr in range(4) for kc in range(7)], axis=-1)        # (N, H, W, 28)
    cols = cols.reshape(m, 4 * 7).astype(jnp.bfloat16)
    k0 = cols.shape[1]

    g = _pick_group(n, hwp)
    rows = g * hwp
    steps = n // g

    # Explicit VMEM budget: double-buffered I/O + all weights + an estimate of
    # the in-kernel tap/intermediate slabs, capped for v7x's 64 MiB VMEM.
    w_bytes = sum(int(a.size) * a.dtype.itemsize
                  for a in jax.tree_util.tree_leaves(prep))
    est = 2 * w_bytes + 4 * rows * 128 * 4 + rows * 8 * 1024
    vmem_limit = int(min(64 * 2 ** 20, max(32 * 2 ** 20, est)))

    kernel = functools.partial(
        _pixelcnn_kernel, img_w=ww, img_hw=hwp,
        num_blocks=num_blocks, out_channels=color_levels)

    out_flat = pl.pallas_call(
        kernel,
        out_shape=jax.ShapeDtypeStruct((m, color_levels), jnp.float32),
        grid=(steps,),
        in_specs=[
            pl.BlockSpec((rows, k0), lambda i: (i, 0)),
            _full_spec(w0), _full_spec(b0),
            _full_spec(w1s), _full_spec(b1s),
            _full_spec(w2s), _full_spec(w2c), _full_spec(b2s),
            _full_spec(w3s), _full_spec(b3s),
            _full_spec(wh1), _full_spec(bh1),
            _full_spec(wh2), _full_spec(bh2),
        ],
        out_specs=pl.BlockSpec((rows, color_levels), lambda i: (i, 0)),
        compiler_params=pltpu.CompilerParams(
            dimension_semantics=("parallel",),
            vmem_limit_bytes=vmem_limit),
    )(cols, w0, b0, w1s, b1s, w2s, w2c, b2s, w3s, b3s, wh1, bh1, wh2, bh2)

    out = out_flat.reshape(n, hh, ww, color_levels)
    return jnp.transpose(out, (0, 3, 1, 2))


# ---------------------- one-time weight preparation -------------------------- #

def prepare_params(params):
    """Convert PyTorch-layout weights to Pallas-ready form once per model:
    apply the causal masks, pack the 4 shifted 'B'-mask taps (+ separate centre
    tap), stack per-block weights along a leading L axis, transpose to
    (in, out), cast MXU operands to bf16, keep biases f32, lane-pad the final
    projection for the dot (the kernel stores only the real channels).
    (MaskedConv2d's in-place `weight.data *= mask` is folded in here.)"""
    w0 = params["conv0"]["w"]                        # (nf, 1, 7, 7)
    nf = w0.shape[0]
    mask_a = jnp.ones_like(w0)
    mask_a = mask_a.at[:, :, 3, 3:].set(0.0)         # type 'A': centre masked
    mask_a = mask_a.at[:, :, 4:, :].set(0.0)
    w0 = w0 * mask_a
    w0p = (w0[:, :, :4, :].transpose(2, 3, 1, 0)     # (kr, kc, cin, out)
           .reshape(4 * 7 * 1, nf).astype(jnp.bfloat16))
    b0p = params["conv0"]["b"].reshape(1, nf).astype(jnp.float32)

    w1l, b1l, w2sl, w2cl, b2l, w3l, b3l = [], [], [], [], [], [], []
    for bp in params["blocks"]:
        nh = bp["w1"].shape[0]
        w1l.append(bp["w1"].reshape(nh, nf).T.astype(jnp.bfloat16))   # (nf, nh)
        b1l.append(bp["b1"].reshape(1, nh).astype(jnp.float32))
        # 'B'-mask 3x3 keeps (0,0),(0,1),(0,2),(1,0) [packed] and (1,1) [centre].
        w2sl.append(jnp.concatenate(
            [bp["w2"][:, :, kr, kc].T
             for (kr, kc) in ((0, 0), (0, 1), (0, 2), (1, 0))],
            axis=0).astype(jnp.bfloat16))                             # (4*nh, nh)
        w2cl.append(bp["w2"][:, :, 1, 1].T.astype(jnp.bfloat16))      # (nh, nh)
        b2l.append(bp["b2"].reshape(1, nh).astype(jnp.float32))
        w3l.append(bp["w3"].reshape(nf, nh).T.astype(jnp.bfloat16))   # (nh, nf)
        b3l.append(bp["b3"].reshape(1, nf).astype(jnp.float32))
    blocks = tuple(jnp.stack(t) for t in (w1l, b1l, w2sl, w2cl, b2l, w3l, b3l))

    hid = params["head"]["w1"].shape[0]
    cl = params["head"]["w2"].shape[0]
    clp = ((cl + 127) // 128) * 128
    wh1 = params["head"]["w1"].reshape(hid, nf).T.astype(jnp.bfloat16)  # (nf, hid)
    bh1 = params["head"]["b1"].reshape(1, hid).astype(jnp.float32)
    wh2 = jnp.zeros((hid, clp), jnp.float32)
    wh2 = wh2.at[:, :cl].set(params["head"]["w2"].reshape(cl, hid).T)
    wh2 = wh2.astype(jnp.bfloat16)
    bh2 = jnp.zeros((1, clp), jnp.float32).at[:, :cl].set(
        params["head"]["b2"].reshape(1, cl))
    return {"stem": (w0p, b0p), "blocks": blocks, "head": (wh1, bh1, wh2, bh2)}


# ------------------------- deterministic param init -------------------------- #

def init_params(key, num_layers=2, num_filters=128, color_levels=1):
    nf = num_filters
    keys = iter(jax.random.split(key, 6 + 6 * num_layers))

    def w(shape, scale=0.1):
        return scale * jax.random.normal(next(keys), shape, jnp.float32)

    return {
        "conv0": {"w": w((nf, 1, 7, 7)), "b": w((nf,), 0.05)},
        "blocks": [
            {"w1": w((nf // 2, nf, 1, 1)), "b1": w((nf // 2,), 0.05),
             "w2": w((nf // 2, nf // 2, 3, 3)), "b2": w((nf // 2,), 0.05),
             "w3": w((nf, nf // 2, 1, 1)), "b3": w((nf,), 0.05)}
            for _ in range(num_layers)],
        "head": {"w1": w((256, nf, 1, 1)), "b1": w((256,), 0.05),
                 "w2": w((color_levels, 256, 1, 1)), "b2": w((color_levels,), 0.05)},
    }


# ---------------------------- pure-JAX reference ------------------------------ #

def _conv_nchw(x, w, b, pad):
    out = jax.lax.conv_general_dilated(
        x, w, window_strides=(1, 1),
        padding=((pad[0], pad[0]), (pad[1], pad[1])),
        dimension_numbers=("NCHW", "OIHW", "NCHW"),
        precision=jax.lax.Precision.HIGHEST)
    return out + b[None, :, None, None]


def reference_forward(x, params):
    w0 = params["conv0"]["w"]
    mask_a = jnp.ones_like(w0).at[:, :, 3, 3:].set(0.0).at[:, :, 4:, :].set(0.0)
    h = _conv_nchw(x, w0 * mask_a, params["conv0"]["b"], (3, 3))
    for bp in params["blocks"]:
        t = jax.nn.relu(h)
        t = _conv_nchw(t, bp["w1"], bp["b1"], (0, 0))
        t = jax.nn.relu(t)
        mask_b = jnp.ones_like(bp["w2"]).at[:, :, 1, 2:].set(0.0) \
                                        .at[:, :, 2:, :].set(0.0)
        t = _conv_nchw(t, bp["w2"] * mask_b, bp["b2"], (1, 1))
        t = jax.nn.relu(t)
        t = _conv_nchw(t, bp["w3"], bp["b3"], (0, 0))
        h = t + h
    t = jax.nn.relu(h)
    t = _conv_nchw(t, params["head"]["w1"], params["head"]["b1"], (0, 0))
    t = jax.nn.relu(t)
    return _conv_nchw(t, params["head"]["w2"], params["head"]["b2"], (0, 0))


# ------------------------------------ main ------------------------------------ #

if __name__ == "__main__":
    N, H, W = 4, 16, 16
    NUM_LAYERS, NUM_FILTERS, COLOR_LEVELS = 2, 128, 1

    key = jax.random.PRNGKey(0)
    k_img, k_par = jax.random.split(key)
    image = jax.random.normal(k_img, (N, 1, H, W), jnp.float32)
    params = init_params(k_par, NUM_LAYERS, NUM_FILTERS, COLOR_LEVELS)
    prep = prepare_params(params)

    forward = jax.jit(pixelcnn_forward, static_argnames=("color_levels",))
    out = forward(image, prep, color_levels=COLOR_LEVELS)
    jax.block_until_ready(out)

    ref = reference_forward(image, params)
    assert out.shape == (N, COLOR_LEVELS, H, W)
    assert jnp.allclose(out, ref, atol=5e-2, rtol=5e-2), (
        f"max abs err {float(jnp.max(jnp.abs(out - ref)))}")

    print("KERNEL_OK")
</pallas_src>

<mosaic_0001>
module attributes {stable_mosaic.version = 11 : i64} {
  func.func @_pixelcnn_kernel(%arg0: i32, %arg1: memref<512x28xbf16, #tpu.memory_space<vmem>>, %arg2: memref<28x128xbf16, #tpu.memory_space<vmem>>, %arg3: memref<1x128xf32, #tpu.memory_space<vmem>>, %arg4: memref<2x128x64xbf16, #tpu.memory_space<vmem>>, %arg5: memref<2x1x64xf32, #tpu.memory_space<vmem>>, %arg6: memref<2x256x64xbf16, #tpu.memory_space<vmem>>, %arg7: memref<2x64x64xbf16, #tpu.memory_space<vmem>>, %arg8: memref<2x1x64xf32, #tpu.memory_space<vmem>>, %arg9: memref<2x64x128xbf16, #tpu.memory_space<vmem>>, %arg10: memref<2x1x128xf32, #tpu.memory_space<vmem>>, %arg11: memref<128x256xbf16, #tpu.memory_space<vmem>>, %arg12: memref<1x256xf32, #tpu.memory_space<vmem>>, %arg13: memref<256x128xbf16, #tpu.memory_space<vmem>>, %arg14: memref<1x128xf32, #tpu.memory_space<vmem>>, %arg15: memref<512x1xf32, #tpu.memory_space<vmem>>) attributes {dimension_semantics = [#tpu.dimension_semantics<parallel>], iteration_bounds = array<i64: 2>, scalar_prefetch = 0 : i64, scratch_operands = 0 : i64, tpu.core_type = #tpu.core_type<tc>, window_params = [{transform_indices = @transform_0, window_bounds = array<i64: 512, 28>}, {pipeline_mode = #tpu.pipeline_mode<synchronous>, transform_indices = @transform_1, window_bounds = array<i64: 28, 128>}, {pipeline_mode = #tpu.pipeline_mode<synchronous>, transform_indices = @transform_2, window_bounds = array<i64: 1, 128>}, {pipeline_mode = #tpu.pipeline_mode<synchronous>, transform_indices = @transform_3, window_bounds = array<i64: 2, 128, 64>}, {pipeline_mode = #tpu.pipeline_mode<synchronous>, transform_indices = @transform_4, window_bounds = array<i64: 2, 1, 64>}, {pipeline_mode = #tpu.pipeline_mode<synchronous>, transform_indices = @transform_5, window_bounds = array<i64: 2, 256, 64>}, {pipeline_mode = #tpu.pipeline_mode<synchronous>, transform_indices = @transform_6, window_bounds = array<i64: 2, 64, 64>}, {pipeline_mode = #tpu.pipeline_mode<synchronous>, transform_indices = @transform_7, window_bounds = array<i64: 2, 1, 64>}, {pipeline_mode = #tpu.pipeline_mode<synchronous>, transform_indices = @transform_8, window_bounds = array<i64: 2, 64, 128>}, {pipeline_mode = #tpu.pipeline_mode<synchronous>, transform_indices = @transform_9, window_bounds = array<i64: 2, 1, 128>}, {pipeline_mode = #tpu.pipeline_mode<synchronous>, transform_indices = @transform_10, window_bounds = array<i64: 128, 256>}, {pipeline_mode = #tpu.pipeline_mode<synchronous>, transform_indices = @transform_11, window_bounds = array<i64: 1, 256>}, {pipeline_mode = #tpu.pipeline_mode<synchronous>, transform_indices = @transform_12, window_bounds = array<i64: 256, 128>}, {pipeline_mode = #tpu.pipeline_mode<synchronous>, transform_indices = @transform_13, window_bounds = array<i64: 1, 128>}, {transform_indices = @transform_14, window_bounds = array<i64: 512, 1>}]} {
    %c0 = arith.constant 0 : index
    %c0_0 = arith.constant 0 : index
    %0 = vector.load %arg1[%c0, %c0_0] : memref<512x28xbf16, #tpu.memory_space<vmem>>, vector<512x28xbf16>
    %c0_1 = arith.constant 0 : index
    %c0_2 = arith.constant 0 : index
    %1 = vector.load %arg2[%c0_1, %c0_2] : memref<28x128xbf16, #tpu.memory_space<vmem>>, vector<28x128xbf16>
    %cst = arith.constant dense<0.000000e+00> : vector<512x128xf32>
    %2 = tpu.matmul %0, %1, %cst {dimension_numbers = #tpu.dot_dimension_numbers<[1], [0], [0], [1], [0, 0, 1, 1], [], []>} : vector<512x28xbf16>, vector<28x128xbf16>, vector<512x128xf32> -> vector<512x128xf32>
    %c0_3 = arith.constant 0 : index
    %c0_4 = arith.constant 0 : index
    %3 = vector.load %arg3[%c0_3, %c0_4] : memref<1x128xf32, #tpu.memory_space<vmem>>, vector<1x128xf32>
    %4 = vector.broadcast %3 : vector<1x128xf32> to vector<512x128xf32>
    %5 = arith.addf %2, %4 : vector<512x128xf32>
    %6 = tpu.iota {dimensions = array<i32: 0>} : vector<512x1xi32>
    %c16_i32 = arith.constant 16 : i32
    %c0_i32 = arith.constant 0 : i32
    %7 = arith.cmpi eq, %c16_i32, %c0_i32 : i32
    %c1_i32 = arith.constant 1 : i32
    %8 = arith.select %7, %c1_i32, %c16_i32 : i32
    %9 = vector.broadcast %8 : i32 to vector<512x1xi32>
    %10 = arith.remsi %6, %9 : vector<512x1xi32>
    %c0_i32_5 = arith.constant 0 : i32
    %11 = vector.broadcast %c0_i32_5 : i32 to vector<512x1xi32>
    %12 = arith.cmpi ne, %10, %11 : vector<512x1xi32>
    %c0_i32_6 = arith.constant 0 : i32
    %13 = vector.broadcast %c0_i32_6 : i32 to vector<512x1xi32>
    %14 = arith.cmpi slt, %10, %13 : vector<512x1xi32>
    %c0_i32_7 = arith.constant 0 : i32
    %15 = arith.cmpi slt, %8, %c0_i32_7 : i32
    %16 = vector.broadcast %15 : i1 to vector<512x1xi1>
    %17 = vector.broadcast %16 : vector<512x1xi1> to vector<512x1xi1>
    %18 = arith.xori %14, %17 : vector<512x1xi1>
    %19 = arith.andi %18, %12 : vector<512x1xi1>
    %20 = vector.broadcast %8 : i32 to vector<512x1xi32>
    %21 = arith.addi %10, %20 : vector<512x1xi32>
    %22 = arith.select %19, %21, %10 : vector<512x1xi1>, vector<512x1xi32>
    %c256_i32 = arith.constant 256 : i32
    %c0_i32_8 = arith.constant 0 : i32
    %23 = arith.cmpi eq, %c256_i32, %c0_i32_8 : i32
    %c1_i32_9 = arith.constant 1 : i32
    %24 = arith.select %23, %c1_i32_9, %c256_i32 : i32
    %25 = vector.broadcast %24 : i32 to vector<512x1xi32>
    %26 = arith.remsi %6, %25 : vector<512x1xi32>
    %c0_i32_10 = arith.constant 0 : i32
    %27 = vector.broadcast %c0_i32_10 : i32 to vector<512x1xi32>
    %28 = arith.cmpi ne, %26, %27 : vector<512x1xi32>
    %c0_i32_11 = arith.constant 0 : i32
    %29 = vector.broadcast %c0_i32_11 : i32 to vector<512x1xi32>
    %30 = arith.cmpi slt, %26, %29 : vector<512x1xi32>
    %c0_i32_12 = arith.constant 0 : i32
    %31 = arith.cmpi slt, %24, %c0_i32_12 : i32
    %32 = vector.broadcast %31 : i1 to vector<512x1xi1>
    %33 = vector.broadcast %32 : vector<512x1xi1> to vector<512x1xi1>
    %34 = arith.xori %30, %33 : vector<512x1xi1>
    %35 = arith.andi %34, %28 : vector<512x1xi1>
    %36 = vector.broadcast %24 : i32 to vector<512x1xi32>
    %37 = arith.addi %26, %36 : vector<512x1xi32>
    %38 = arith.select %35, %37, %26 : vector<512x1xi1>, vector<512x1xi32>
    %c1_i32_13 = arith.constant 1 : i32
    %39 = vector.broadcast %c1_i32_13 : i32 to vector<512x1xi32>
    %40 = arith.cmpi sge, %22, %39 : vector<512x1xi32>
    %c15_i32 = arith.constant 15 : i32
    %41 = vector.broadcast %c15_i32 : i32 to vector<512x1xi32>
    %42 = arith.cmpi slt, %22, %41 : vector<512x1xi32>
    %c16_i32_14 = arith.constant 16 : i32
    %43 = vector.broadcast %c16_i32_14 : i32 to vector<512x1xi32>
    %44 = arith.cmpi sge, %38, %43 : vector<512x1xi32>
    %45 = arith.andi %44, %40 : vector<512x1xi1>
    %46 = arith.andi %44, %42 : vector<512x1xi1>
    %cst_15 = arith.constant 0.000000e+00 : f32
    %47 = vector.broadcast %cst_15 : f32 to vector<512x128xf32>
    %48 = arith.maximumf %5, %47 : vector<512x128xf32>
    %49 = arith.truncf %48 : vector<512x128xf32> to vector<512x128xbf16>
    %c0_16 = arith.constant 0 : index
    %c0_17 = arith.constant 0 : index
    %c0_18 = arith.constant 0 : index
    %50 = vector.load %arg4[%c0_16, %c0_17, %c0_18] : memref<2x128x64xbf16, #tpu.memory_space<vmem>>, vector<1x128x64xbf16>
    %51 = vector.shape_cast %50 : vector<1x128x64xbf16> to vector<128x64xbf16>
    %cst_19 = arith.constant dense<0.000000e+00> : vector<512x64xf32>
    %52 = tpu.matmul %49, %51, %cst_19 {dimension_numbers = #tpu.dot_dimension_numbers<[1], [0], [0], [1], [0, 0, 1, 1], [], []>} : vector<512x128xbf16>, vector<128x64xbf16>, vector<512x64xf32> -> vector<512x64xf32>
    %c0_20 = arith.constant 0 : index
    %c0_21 = arith.constant 0 : index
    %c0_22 = arith.constant 0 : index
    %53 = vector.load %arg5[%c0_20, %c0_21, %c0_22] : memref<2x1x64xf32, #tpu.memory_space<vmem>>, vector<1x1x64xf32>
    %54 = vector.shape_cast %53 : vector<1x1x64xf32> to vector<1x64xf32>
    %55 = vector.broadcast %54 : vector<1x64xf32> to vector<512x64xf32>
    %56 = arith.addf %52, %55 : vector<512x64xf32>
    %cst_23 = arith.constant 0.000000e+00 : f32
    %57 = vector.broadcast %cst_23 : f32 to vector<512x64xf32>
    %58 = arith.maximumf %56, %57 : vector<512x64xf32>
    %59 = arith.truncf %58 : vector<512x64xf32> to vector<512x64xbf16>
    %cst_24 = arith.constant 0.000000e+00 : f32
    %60 = vector.broadcast %cst_24 : f32 to vector<17x64xf32>
    %61 = tpu.concatenate %60, %58 in 0 : vector<17x64xf32>, vector<512x64xf32> -> vector<529x64xf32>
    %62 = vector.extract_strided_slice %61 {offsets = [0, 0], sizes = [512, 64], strides = [1, 1]} : vector<529x64xf32> to vector<512x64xf32>
    %cst_25 = arith.constant 0.000000e+00 : f32
    %63 = vector.shape_cast %45 : vector<512x1xi1> to vector<512x1xi1>
    %64 = vector.broadcast %63 : vector<512x1xi1> to vector<512x64xi1>
    %65 = vector.broadcast %cst_25 : f32 to vector<512x64xf32>
    %66 = arith.select %64, %62, %65 : vector<512x64xi1>, vector<512x64xf32>
    %67 = arith.truncf %66 : vector<512x64xf32> to vector<512x64xbf16>
    %68 = vector.extract_strided_slice %61 {offsets = [1, 0], sizes = [512, 64], strides = [1, 1]} : vector<529x64xf32> to vector<512x64xf32>
    %cst_26 = arith.constant 0.000000e+00 : f32
    %69 = vector.shape_cast %44 : vector<512x1xi1> to vector<512x1xi1>
    %70 = vector.broadcast %69 : vector<512x1xi1> to vector<512x64xi1>
    %71 = vector.broadcast %cst_26 : f32 to vector<512x64xf32>
    %72 = arith.select %70, %68, %71 : vector<512x64xi1>, vector<512x64xf32>
    %73 = arith.truncf %72 : vector<512x64xf32> to vector<512x64xbf16>
    %74 = vector.extract_strided_slice %61 {offsets = [2, 0], sizes = [512, 64], strides = [1, 1]} : vector<529x64xf32> to vector<512x64xf32>
    %cst_27 = arith.constant 0.000000e+00 : f32
    %75 = vector.shape_cast %46 : vector<512x1xi1> to vector<512x1xi1>
    %76 = vector.broadcast %75 : vector<512x1xi1> to vector<512x64xi1>
    %77 = vector.broadcast %cst_27 : f32 to vector<512x64xf32>
    %78 = arith.select %76, %74, %77 : vector<512x64xi1>, vector<512x64xf32>
    %79 = arith.truncf %78 : vector<512x64xf32> to vector<512x64xbf16>
    %80 = vector.extract_strided_slice %61 {offsets = [16, 0], sizes = [512, 64], strides = [1, 1]} : vector<529x64xf32> to vector<512x64xf32>
    %cst_28 = arith.constant 0.000000e+00 : f32
    %81 = vector.shape_cast %40 : vector<512x1xi1> to vector<512x1xi1>
    %82 = vector.broadcast %81 : vector<512x1xi1> to vector<512x64xi1>
    %83 = vector.broadcast %cst_28 : f32 to vector<512x64xf32>
    %84 = arith.select %82, %80, %83 : vector<512x64xi1>, vector<512x64xf32>
    %85 = arith.truncf %84 : vector<512x64xf32> to vector<512x64xbf16>
    %86 = tpu.concatenate %67, %73, %79, %85 in 1 : vector<512x64xbf16>, vector<512x64xbf16>, vector<512x64xbf16>, vector<512x64xbf16> -> vector<512x256xbf16>
    %c0_29 = arith.constant 0 : index
    %c0_30 = arith.constant 0 : index
    %c0_31 = arith.constant 0 : index
    %87 = vector.load %arg6[%c0_29, %c0_30, %c0_31] : memref<2x256x64xbf16, #tpu.memory_space<vmem>>, vector<1x256x64xbf16>
    %88 = vector.shape_cast %87 : vector<1x256x64xbf16> to vector<256x64xbf16>
    %cst_32 = arith.constant dense<0.000000e+00> : vector<512x64xf32>
    %89 = tpu.matmul %86, %88, %cst_32 {dimension_numbers = #tpu.dot_dimension_numbers<[1], [0], [0], [1], [0, 0, 1, 1], [], []>} : vector<512x256xbf16>, vector<256x64xbf16>, vector<512x64xf32> -> vector<512x64xf32>
    %c0_33 = arith.constant 0 : index
    %c0_34 = arith.constant 0 : index
    %c0_35 = arith.constant 0 : index
    %90 = vector.load %arg7[%c0_33, %c0_34, %c0_35] : memref<2x64x64xbf16, #tpu.memory_space<vmem>>, vector<1x64x64xbf16>
    %91 = vector.shape_cast %90 : vector<1x64x64xbf16> to vector<64x64xbf16>
    %cst_36 = arith.constant dense<0.000000e+00> : vector<512x64xf32>
    %92 = tpu.matmul %59, %91, %cst_36 {dimension_numbers = #tpu.dot_dimension_numbers<[1], [0], [0], [1], [0, 0, 1, 1], [], []>} : vector<512x64xbf16>, vector<64x64xbf16>, vector<512x64xf32> -> vector<512x64xf32>
    %93 = arith.addf %89, %92 : vector<512x64xf32>
    %c0_37 = arith.constant 0 : index
    %c0_38 = arith.constant 0 : index
    %c0_39 = arith.constant 0 : index
    %94 = vector.load %arg8[%c0_37, %c0_38, %c0_39] : memref<2x1x64xf32, #tpu.memory_space<vmem>>, vector<1x1x64xf32>
    %95 = vector.shape_cast %94 : vector<1x1x64xf32> to vector<1x64xf32>
    %96 = vector.broadcast %95 : vector<1x64xf32> to vector<512x64xf32>
    %97 = arith.addf %93, %96 : vector<512x64xf32>
    %cst_40 = arith.constant 0.000000e+00 : f32
    %98 = vector.broadcast %cst_40 : f32 to vector<512x64xf32>
    %99 = arith.maximumf %97, %98 : vector<512x64xf32>
    %100 = arith.truncf %99 : vector<512x64xf32> to vector<512x64xbf16>
    %c0_41 = arith.constant 0 : index
    %c0_42 = arith.constant 0 : index
    %c0_43 = arith.constant 0 : index
    %101 = vector.load %arg9[%c0_41, %c0_42, %c0_43] : memref<2x64x128xbf16, #tpu.memory_space<vmem>>, vector<1x64x128xbf16>
    %102 = vector.shape_cast %101 : vector<1x64x128xbf16> to vector<64x128xbf16>
    %cst_44 = arith.constant dense<0.000000e+00> : vector<512x128xf32>
    %103 = tpu.matmul %100, %102, %cst_44 {dimension_numbers = #tpu.dot_dimension_numbers<[1], [0], [0], [1], [0, 0, 1, 1], [], []>} : vector<512x64xbf16>, vector<64x128xbf16>, vector<512x128xf32> -> vector<512x128xf32>
    %104 = arith.addf %5, %103 : vector<512x128xf32>
    %c0_45 = arith.constant 0 : index
    %c0_46 = arith.constant 0 : index
    %c0_47 = arith.constant 0 : index
    %105 = vector.load %arg10[%c0_45, %c0_46, %c0_47] : memref<2x1x128xf32, #tpu.memory_space<vmem>>, vector<1x1x128xf32>
    %106 = vector.shape_cast %105 : vector<1x1x128xf32> to vector<1x128xf32>
    %107 = vector.broadcast %106 : vector<1x128xf32> to vector<512x128xf32>
    %108 = arith.addf %104, %107 : vector<512x128xf32>
    %cst_48 = arith.constant 0.000000e+00 : f32
    %109 = vector.broadcast %cst_48 : f32 to vector<512x128xf32>
    %110 = arith.maximumf %108, %109 : vector<512x128xf32>
    %111 = arith.truncf %110 : vector<512x128xf32> to vector<512x128xbf16>
    %c1 = arith.constant 1 : index
    %c0_49 = arith.constant 0 : index
    %c0_50 = arith.constant 0 : index
    %112 = vector.load %arg4[%c1, %c0_49, %c0_50] : memref<2x128x64xbf16, #tpu.memory_space<vmem>>, vector<1x128x64xbf16>
    %113 = vector.shape_cast %112 : vector<1x128x64xbf16> to vector<128x64xbf16>
    %cst_51 = arith.constant dense<0.000000e+00> : vector<512x64xf32>
    %114 = tpu.matmul %111, %113, %cst_51 {dimension_numbers = #tpu.dot_dimension_numbers<[1], [0], [0], [1], [0, 0, 1, 1], [], []>} : vector<512x128xbf16>, vector<128x64xbf16>, vector<512x64xf32> -> vector<512x64xf32>
    %c1_52 = arith.constant 1 : index
    %c0_53 = arith.constant 0 : index
    %c0_54 = arith.constant 0 : index
    %115 = vector.load %arg5[%c1_52, %c0_53, %c0_54] : memref<2x1x64xf32, #tpu.memory_space<vmem>>, vector<1x1x64xf32>
    %116 = vector.shape_cast %115 : vector<1x1x64xf32> to vector<1x64xf32>
    %117 = vector.broadcast %116 : vector<1x64xf32> to vector<512x64xf32>
    %118 = arith.addf %114, %117 : vector<512x64xf32>
    %cst_55 = arith.constant 0.000000e+00 : f32
    %119 = vector.broadcast %cst_55 : f32 to vector<512x64xf32>
    %120 = arith.maximumf %118, %119 : vector<512x64xf32>
    %121 = arith.truncf %120 : vector<512x64xf32> to vector<512x64xbf16>
    %cst_56 = arith.constant 0.000000e+00 : f32
    %122 = vector.broadcast %cst_56 : f32 to vector<17x64xf32>
    %123 = tpu.concatenate %122, %120 in 0 : vector<17x64xf32>, vector<512x64xf32> -> vector<529x64xf32>
    %124 = vector.extract_strided_slice %123 {offsets = [0, 0], sizes = [512, 64], strides = [1, 1]} : vector<529x64xf32> to vector<512x64xf32>
    %cst_57 = arith.constant 0.000000e+00 : f32
    %125 = vector.shape_cast %45 : vector<512x1xi1> to vector<512x1xi1>
    %126 = vector.broadcast %125 : vector<512x1xi1> to vector<512x64xi1>
    %127 = vector.broadcast %cst_57 : f32 to vector<512x64xf32>
    %128 = arith.select %126, %124, %127 : vector<512x64xi1>, vector<512x64xf32>
    %129 = arith.truncf %128 : vector<512x64xf32> to vector<512x64xbf16>
    %130 = vector.extract_strided_slice %123 {offsets = [1, 0], sizes = [512, 64], strides = [1, 1]} : vector<529x64xf32> to vector<512x64xf32>
    %cst_58 = arith.constant 0.000000e+00 : f32
    %131 = vector.shape_cast %44 : vector<512x1xi1> to vector<512x1xi1>
    %132 = vector.broadcast %131 : vector<512x1xi1> to vector<512x64xi1>
    %133 = vector.broadcast %cst_58 : f32 to vector<512x64xf32>
    %134 = arith.select %132, %130, %133 : vector<512x64xi1>, vector<512x64xf32>
    %135 = arith.truncf %134 : vector<512x64xf32> to vector<512x64xbf16>
    %136 = vector.extract_strided_slice %123 {offsets = [2, 0], sizes = [512, 64], strides = [1, 1]} : vector<529x64xf32> to vector<512x64xf32>
    %cst_59 = arith.constant 0.000000e+00 : f32
    %137 = vector.shape_cast %46 : vector<512x1xi1> to vector<512x1xi1>
    %138 = vector.broadcast %137 : vector<512x1xi1> to vector<512x64xi1>
    %139 = vector.broadcast %cst_59 : f32 to vector<512x64xf32>
    %140 = arith.select %138, %136, %139 : vector<512x64xi1>, vector<512x64xf32>
    %141 = arith.truncf %140 : vector<512x64xf32> to vector<512x64xbf16>
    %142 = vector.extract_strided_slice %123 {offsets = [16, 0], sizes = [512, 64], strides = [1, 1]} : vector<529x64xf32> to vector<512x64xf32>
    %cst_60 = arith.constant 0.000000e+00 : f32
    %143 = vector.shape_cast %40 : vector<512x1xi1> to vector<512x1xi1>
    %144 = vector.broadcast %143 : vector<512x1xi1> to vector<512x64xi1>
    %145 = vector.broadcast %cst_60 : f32 to vector<512x64xf32>
    %146 = arith.select %144, %142, %145 : vector<512x64xi1>, vector<512x64xf32>
    %147 = arith.truncf %146 : vector<512x64xf32> to vector<512x64xbf16>
    %148 = tpu.concatenate %129, %135, %141, %147 in 1 : vector<512x64xbf16>, vector<512x64xbf16>, vector<512x64xbf16>, vector<512x64xbf16> -> vector<512x256xbf16>
    %c1_61 = arith.constant 1 : index
    %c0_62 = arith.constant 0 : index
    %c0_63 = arith.constant 0 : index
    %149 = vector.load %arg6[%c1_61, %c0_62, %c0_63] : memref<2x256x64xbf16, #tpu.memory_space<vmem>>, vector<1x256x64xbf16>
    %150 = vector.shape_cast %149 : vector<1x256x64xbf16> to vector<256x64xbf16>
    %cst_64 = arith.constant dense<0.000000e+00> : vector<512x64xf32>
    %151 = tpu.matmul %148, %150, %cst_64 {dimension_numbers = #tpu.dot_dimension_numbers<[1], [0], [0], [1], [0, 0, 1, 1], [], []>} : vector<512x256xbf16>, vector<256x64xbf16>, vector<512x64xf32> -> vector<512x64xf32>
    %c1_65 = arith.constant 1 : index
    %c0_66 = arith.constant 0 : index
    %c0_67 = arith.constant 0 : index
    %152 = vector.load %arg7[%c1_65, %c0_66, %c0_67] : memref<2x64x64xbf16, #tpu.memory_space<vmem>>, vector<1x64x64xbf16>
    %153 = vector.shape_cast %152 : vector<1x64x64xbf16> to vector<64x64xbf16>
    %cst_68 = arith.constant dense<0.000000e+00> : vector<512x64xf32>
    %154 = tpu.matmul %121, %153, %cst_68 {dimension_numbers = #tpu.dot_dimension_numbers<[1], [0], [0], [1], [0, 0, 1, 1], [], []>} : vector<512x64xbf16>, vector<64x64xbf16>, vector<512x64xf32> -> vector<512x64xf32>
    %155 = arith.addf %151, %154 : vector<512x64xf32>
    %c1_69 = arith.constant 1 : index
    %c0_70 = arith.constant 0 : index
    %c0_71 = arith.constant 0 : index
    %156 = vector.load %arg8[%c1_69, %c0_70, %c0_71] : memref<2x1x64xf32, #tpu.memory_space<vmem>>, vector<1x1x64xf32>
    %157 = vector.shape_cast %156 : vector<1x1x64xf32> to vector<1x64xf32>
    %158 = vector.broadcast %157 : vector<1x64xf32> to vector<512x64xf32>
    %159 = arith.addf %155, %158 : vector<512x64xf32>
    %cst_72 = arith.constant 0.000000e+00 : f32
    %160 = vector.broadcast %cst_72 : f32 to vector<512x64xf32>
    %161 = arith.maximumf %159, %160 : vector<512x64xf32>
    %162 = arith.truncf %161 : vector<512x64xf32> to vector<512x64xbf16>
    %c1_73 = arith.constant 1 : index
    %c0_74 = arith.constant 0 : index
    %c0_75 = arith.constant 0 : index
    %163 = vector.load %arg9[%c1_73, %c0_74, %c0_75] : memref<2x64x128xbf16, #tpu.memory_space<vmem>>, vector<1x64x128xbf16>
    %164 = vector.shape_cast %163 : vector<1x64x128xbf16> to vector<64x128xbf16>
    %cst_76 = arith.constant dense<0.000000e+00> : vector<512x128xf32>
    %165 = tpu.matmul %162, %164, %cst_76 {dimension_numbers = #tpu.dot_dimension_numbers<[1], [0], [0], [1], [0, 0, 1, 1], [], []>} : vector<512x64xbf16>, vector<64x128xbf16>, vector<512x128xf32> -> vector<512x128xf32>
    %166 = arith.addf %108, %165 : vector<512x128xf32>
    %c1_77 = arith.constant 1 : index
    %c0_78 = arith.constant 0 : index
    %c0_79 = arith.constant 0 : index
    %167 = vector.load %arg10[%c1_77, %c0_78, %c0_79] : memref<2x1x128xf32, #tpu.memory_space<vmem>>, vector<1x1x128xf32>
    %168 = vector.shape_cast %167 : vector<1x1x128xf32> to vector<1x128xf32>
    %169 = vector.broadcast %168 : vector<1x128xf32> to vector<512x128xf32>
    %170 = arith.addf %166, %169 : vector<512x128xf32>
    %cst_80 = arith.constant 0.000000e+00 : f32
    %171 = vector.broadcast %cst_80 : f32 to vector<512x128xf32>
    %172 = arith.maximumf %170, %171 : vector<512x128xf32>
    %173 = arith.truncf %172 : vector<512x128xf32> to vector<512x128xbf16>
    %c0_81 = arith.constant 0 : index
    %c0_82 = arith.constant 0 : index
    %174 = vector.load %arg11[%c0_81, %c0_82] : memref<128x256xbf16, #tpu.memory_space<vmem>>, vector<128x256xbf16>
    %cst_83 = arith.constant dense<0.000000e+00> : vector<512x256xf32>
    %175 = tpu.matmul %173, %174, %cst_83 {dimension_numbers = #tpu.dot_dimension_numbers<[1], [0], [0], [1], [0, 0, 1, 1], [], []>} : vector<512x128xbf16>, vector<128x256xbf16>, vector<512x256xf32> -> vector<512x256xf32>
    %c0_84 = arith.constant 0 : index
    %c0_85 = arith.constant 0 : index
    %176 = vector.load %arg12[%c0_84, %c0_85] : memref<1x256xf32, #tpu.memory_space<vmem>>, vector<1x256xf32>
    %177 = vector.broadcast %176 : vector<1x256xf32> to vector<512x256xf32>
    %178 = arith.addf %175, %177 : vector<512x256xf32>
    %cst_86 = arith.constant 0.000000e+00 : f32
    %179 = vector.broadcast %cst_86 : f32 to vector<512x256xf32>
    %180 = arith.maximumf %178, %179 : vector<512x256xf32>
    %181 = arith.truncf %180 : vector<512x256xf32> to vector<512x256xbf16>
    %c0_87 = arith.constant 0 : index
    %c0_88 = arith.constant 0 : index
    %182 = vector.load %arg13[%c0_87, %c0_88] : memref<256x128xbf16, #tpu.memory_space<vmem>>, vector<256x128xbf16>
    %cst_89 = arith.constant dense<0.000000e+00> : vector<512x128xf32>
    %183 = tpu.matmul %181, %182, %cst_89 {dimension_numbers = #tpu.dot_dimension_numbers<[1], [0], [0], [1], [0, 0, 1, 1], [], []>} : vector<512x256xbf16>, vector<256x128xbf16>, vector<512x128xf32> -> vector<512x128xf32>
    %c0_90 = arith.constant 0 : index
    %c0_91 = arith.constant 0 : index
    %184 = vector.load %arg14[%c0_90, %c0_91] : memref<1x128xf32, #tpu.memory_space<vmem>>, vector<1x128xf32>
    %185 = vector.broadcast %184 : vector<1x128xf32> to vector<512x128xf32>
    %186 = arith.addf %183, %185 : vector<512x128xf32>
    %187 = vector.extract_strided_slice %186 {offsets = [0, 0], sizes = [512, 1], strides = [1, 1]} : vector<512x128xf32> to vector<512x1xf32>
    %c0_92 = arith.constant 0 : index
    %c0_93 = arith.constant 0 : index
    %188 = vector.load %arg15[%c0_92, %c0_93] : memref<512x1xf32, #tpu.memory_space<vmem>>, vector<512x1xf32>
    tpu.vector_store %arg15[%c0_92, %c0_93], %187 {strides = array<i32>} : memref<512x1xf32, #tpu.memory_space<vmem>>, vector<512x1xf32>,
    return
  }
  func.func @transform_0(%arg0: i32) -> (i32, i32) {
    %c0_i32 = arith.constant 0 : i32
    %c0_i32_0 = arith.constant 0 : i32
    return %arg0, %c0_i32 : i32, i32
  }
  func.func @transform_1(%arg0: i32) -> (i32, i32) {
    %c0_i32 = arith.constant 0 : i32
    %c0_i32_0 = arith.constant 0 : i32
    %c0_i32_1 = arith.constant 0 : i32
    return %c0_i32, %c0_i32_0 : i32, i32
  }
  func.func @transform_2(%arg0: i32) -> (i32, i32) {
    %c0_i32 = arith.constant 0 : i32
    %c0_i32_0 = arith.constant 0 : i32
    %c0_i32_1 = arith.constant 0 : i32
    return %c0_i32, %c0_i32_0 : i32, i32
  }
  func.func @transform_3(%arg0: i32) -> (i32, i32, i32) {
    %c0_i32 = arith.constant 0 : i32
    %c0_i32_0 = arith.constant 0 : i32
    %c0_i32_1 = arith.constant 0 : i32
    %c0_i32_2 = arith.constant 0 : i32
    return %c0_i32, %c0_i32_0, %c0_i32_1 : i32, i32, i32
  }
  func.func @transform_4(%arg0: i32) -> (i32, i32, i32) {
    %c0_i32 = arith.constant 0 : i32
    %c0_i32_0 = arith.constant 0 : i32
    %c0_i32_1 = arith.constant 0 : i32
    %c0_i32_2 = arith.constant 0 : i32
    return %c0_i32, %c0_i32_0, %c0_i32_1 : i32, i32, i32
  }
  func.func @transform_5(%arg0: i32) -> (i32, i32, i32) {
    %c0_i32 = arith.constant 0 : i32
    %c0_i32_0 = arith.constant 0 : i32
    %c0_i32_1 = arith.constant 0 : i32
    %c0_i32_2 = arith.constant 0 : i32
    return %c0_i32, %c0_i32_0, %c0_i32_1 : i32, i32, i32
  }
  func.func @transform_6(%arg0: i32) -> (i32, i32, i32) {
    %c0_i32 = arith.constant 0 : i32
    %c0_i32_0 = arith.constant 0 : i32
    %c0_i32_1 = arith.constant 0 : i32
    %c0_i32_2 = arith.constant 0 : i32
    return %c0_i32, %c0_i32_0, %c0_i32_1 : i32, i32, i32
  }
  func.func @transform_7(%arg0: i32) -> (i32, i32, i32) {
    %c0_i32 = arith.constant 0 : i32
    %c0_i32_0 = arith.constant 0 : i32
    %c0_i32_1 = arith.constant 0 : i32
    %c0_i32_2 = arith.constant 0 : i32
    return %c0_i32, %c0_i32_0, %c0_i32_1 : i32, i32, i32
  }
  func.func @transform_8(%arg0: i32) -> (i32, i32, i32) {
    %c0_i32 = arith.constant 0 : i32
    %c0_i32_0 = arith.constant 0 : i32
    %c0_i32_1 = arith.constant 0 : i32
    %c0_i32_2 = arith.constant 0 : i32
    return %c0_i32, %c0_i32_0, %c0_i32_1 : i32, i32, i32
  }
  func.func @transform_9(%arg0: i32) -> (i32, i32, i32) {
    %c0_i32 = arith.constant 0 : i32
    %c0_i32_0 = arith.constant 0 : i32
    %c0_i32_1 = arith.constant 0 : i32
    %c0_i32_2 = arith.constant 0 : i32
    return %c0_i32, %c0_i32_0, %c0_i32_1 : i32, i32, i32
  }
  func.func @transform_10(%arg0: i32) -> (i32, i32) {
    %c0_i32 = arith.constant 0 : i32
    %c0_i32_0 = arith.constant 0 : i32
    %c0_i32_1 = arith.constant 0 : i32
    return %c0_i32, %c0_i32_0 : i32, i32
  }
  func.func @transform_11(%arg0: i32) -> (i32, i32) {
    %c0_i32 = arith.constant 0 : i32
    %c0_i32_0 = arith.constant 0 : i32
    %c0_i32_1 = arith.constant 0 : i32
    return %c0_i32, %c0_i32_0 : i32, i32
  }
  func.func @transform_12(%arg0: i32) -> (i32, i32) {
    %c0_i32 = arith.constant 0 : i32
    %c0_i32_0 = arith.constant 0 : i32
    %c0_i32_1 = arith.constant 0 : i32
    return %c0_i32, %c0_i32_0 : i32, i32
  }
  func.func @transform_13(%arg0: i32) -> (i32, i32) {
    %c0_i32 = arith.constant 0 : i32
    %c0_i32_0 = arith.constant 0 : i32
    %c0_i32_1 = arith.constant 0 : i32
    return %c0_i32, %c0_i32_0 : i32, i32
  }
  func.func @transform_14(%arg0: i32) -> (i32, i32) {
    %c0_i32 = arith.constant 0 : i32
    %c0_i32_0 = arith.constant 0 : i32
    return %arg0, %c0_i32 : i32, i32
  }
}

</mosaic_0001>

<bundles_post_ra>
// kernel: pixelcnn_forward.1
= control target key start
LH: loop header
LB: loop body
LE: loop exit
PB: predicated region body
PF: predicated region fallthrough
CT: control target
= control target key end

     0   :  { %s13376_s29 = smov 0   ;;  %s18135_s0 = inlined_call_operand.vmem [shape: bf16[1024,28], index: 0, kind: input, shape index: {}]   ;;  %s18136_s1 = inlined_call_operand.vmem [shape: bf16[28,128], index: 1, kind: input, shape index: {}]   ;;  %s18137_s2 = inlined_call_operand.vmem [shape: f32[1,128], index: 2, kind: input, shape index: {}]   ;;  %s18138_s3 = inlined_call_operand.vmem [shape: bf16[2,128,64], index: 3, kind: input, shape index: {}]   ;;  %s18139_s4 = inlined_call_operand.vmem [shape: f32[2,1,64], index: 4, kind: input, shape index: {}]   ;;  %s18140_s5 = inlined_call_operand.vmem [shape: bf16[2,256,64], index: 5, kind: input, shape index: {}]   ;;  %s18141_s6 = inlined_call_operand.vmem [shape: bf16[2,64,64], index: 6, kind: input, shape index: {}]   ;;  %s18142_s7 = inlined_call_operand.vmem [shape: f32[2,1,64], index: 7, kind: input, shape index: {}]   ;;  %s18143_s8 = inlined_call_operand.vmem [shape: bf16[2,64,128], index: 8, kind: input, shape index: {}]   ;;  %s18144_s9 = inlined_call_operand.vmem [shape: f32[2,1,128], index: 9, kind: input, shape index: {}]   ;;  %s18145_s10 = inlined_call_operand.vmem [shape: bf16[128,256], index: 10, kind: input, shape index: {}]   ;;  %s18146_s11 = inlined_call_operand.vmem [shape: f32[1,256], index: 11, kind: input, shape index: {}]   ;;  %s18147_s12 = inlined_call_operand.vmem [shape: bf16[256,128], index: 12, kind: input, shape index: {}]   ;;  %s18148_s13 = inlined_call_operand.vmem [shape: f32[1,128], index: 13, kind: input, shape index: {}]   ;;  %s18149_s14 = inlined_call_operand.vmem [shape: f32[1024,1], index: 14, kind: output, shape index: {}]  }
   0x1 LB: > { %s11982_s30 = sadd.s32 4294967295, %s13296_s29   ;;  %p11986_p0 = scmp.ge.s32.totalorder %s13296_s29, 1  ;;  %s13296_s29 = sphi %s13376_s29, %s24_s29  }
   0x2   : > { %p413_p1 = scmp.lt.s32.totalorder %s13296_s29, 3 }
   0x4   : > { %p414_p2 = pnand %p11986_p0, %p413_p1 }
   0x6   : > { %417 = sbr.rel (%p414_p2) target bundleno = 2611 (0xa33), region = 76 }
   0xd   : > { %v13149_v0 = vld [vmem:[%s18136_s1] sm:$0xff]   ;;  %vm18237_vm0 = vcmask 1045504   ;;  %v13150_v1 = vld [vmem:[%s18136_s1 + $0x8] sm:$0x3f]   ;;  %s11987_s19 = sshll.u32 %s11982_s30, 6  ;;  %vm718_vm1 = vcmask 228352  }
   0xe   : > { %12616 = vmatprep.subr.bf16.mxu0 %v13149_v0  ;;  %13132 = vmatprep.subr.bf16.mxu1 %v13149_v0  ;;  %v817_v2 = vsel %vm18237_vm0, %v13150_v1, 0  ;;  %p460_p3 = scmp.lt.s32.totalorder %s11987_s19, 127  ;;  %v13183_v3 = vld [vmem:[%s18138_s3] sm:$0xff]   ;;  %v13184_v12 = vld [vmem:[%s18138_s3 + $0x8] sm:$0xff]   ;;  %v13185_v15 = vld [vmem:[%s18138_s3 + $0x10] sm:$0xff]   ;;  %vm18283_vm2 = vcmask 1040384  }
   0xf   : > { %12617 = vmatpush3.bf16.msra.mxu0 %v13149_v0  ;;  %13134 = vmatpush3.bf16.msra.mxu1 %v13149_v0  ;;  %v13186_v20 = vld [vmem:[%s18138_s3 + $0x18] sm:$0xff]   ;;  %v13187_v21 = vld [vmem:[%s18138_s3 + $0x20] sm:$0xff]   ;;  %v13188_v26 = vld [vmem:[%s18138_s3 + $0x28] sm:$0xff]   ;;  %vm18244_vm4 = vcmask 523264   ;;  %vm18248_vm6 = vcmask 1046528  }
  0x10   : > { %13136 = vmatprep.subr.msk.bf16.mxu0 %vm18237_vm0, %v13150_v1  ;;  %13137 = vmatprep.subr.msk.bf16.mxu1 %vm18237_vm0, %v13150_v1  ;;  %s19783_s19 = smov (!%p460_p3, %s11987_s19), 127  ;;  %v13189_v27 = vld [vmem:[%s18138_s3 + $0x30] sm:$0xff]   ;;  %v13190_v42 = vld [vmem:[%s18138_s3 + $0x38] sm:$0xff]   ;;  %v13492_v43 = vld [vmem:[%s18137_s2] ss:$0 sm:$0xff] }
  0x11   : > { %s11988_s22 = sshll.u32 %s19783_s19, 2  ;;  %v13191_v51 = vld [vmem:[%s18141_s6] sm:$0xff]   ;;  %v13192_v52 = vld [vmem:[%s18141_s6 + $0x8] sm:$0xff]   ;;  %s11990_s20 = sshll.u32 %s19783_s19, 3 }
  0x12   : > { %s13402_s25 = scalar_lea.vmem %s18135_s0, %s11988_s22  ;;  %s17922_s26 = scalar_lea.vmem %s18149_s14, %s11990_s20 }
  0x13   : > { %12619 = vmatpush3.bf16.msra.mxu0 %v817_v2  ;;  %13135 = vmatpush3.bf16.msra.mxu1 %v817_v2  ;;  %v13151_v4 = vld [vmem:[%s13402_s25] sm:$0xff]   ;;  %v13152_v5 = vld [vmem:[%s13402_s25 + $0x8] sm:$0xff]   ;;  %v13153_v6 = vld [vmem:[%s13402_s25 + $0x10] sm:$0xff]  }
  0x14   : > { %12684 = vmatprep.subr.bf16.mxu1 %v13183_v3  ;;  %12620 = vmatprep.mubr.msk.bf16.mxu0 %vm718_vm1, %v13151_v4  ;;  %v13154_v7 = vld [vmem:[%s13402_s25 + $0x18] sm:$0xff]   ;;  %v13155_v8 = vld [vmem:[%s13402_s25 + $0x20] sm:$0xff]   ;;  %v13156_v9 = vld [vmem:[%s13402_s25 + $0x28] sm:$0xff]  }
  0x15   : > { %v13157_v10 = vld [vmem:[%s13402_s25 + $0x30] sm:$0xff]   ;;  %v13167_v11 = vld [vmem:[%s13402_s25 + $0x80] sm:$0xff]   ;;  %v13168_v13 = vld [vmem:[%s13402_s25 + $0x88] sm:$0xff]   ;;  %12764 = vmatprep.subr.bf16.mxu0 %v13191_v51 }
  0x16   : > { %12621 = vmatmul.mubr.msk.bf16.vlgmr.msra.gmra.mrb[0].mxu0 %vm718_vm1, %v13152_v5  ;;  %12652 = vmatprep.mubr.msk.bf16.mxu1 %vm718_vm1, %v13167_v11  ;;  %v13169_v14 = vld [vmem:[%s13402_s25 + $0x90] sm:$0xff]   ;;  %v13158_v16 = vld [vmem:[%s13402_s25 + $0x38] sm:$0xff]   ;;  %v13159_v17 = vld [vmem:[%s13402_s25 + $0x40] sm:$0xff]  }
  0x17   : > { %12624 = vmatprep.mubr.msk.bf16.mxu0 %vm718_vm1, %v13153_v6  ;;  %12653 = vmatmul.mubr.msk.bf16.vlgmr.msra.gmra.mrb[0].mxu1 %vm718_vm1, %v13168_v13  ;;  %v13170_v18 = vld [vmem:[%s13402_s25 + $0x98] sm:$0xff]   ;;  %v13171_v19 = vld [vmem:[%s13402_s25 + $0xa0] sm:$0xff]   ;;  %v13160_v22 = vld [vmem:[%s13402_s25 + $0x48] sm:$0xff]  }
  0x18   : > { %12656 = vmatprep.mubr.msk.bf16.mxu1 %vm718_vm1, %v13169_v14  ;;  %12685 = vmatpush3.bf16.msra.mxu1 %v13183_v3  ;;  %v13161_v23 = vld [vmem:[%s13402_s25 + $0x50] sm:$0xff]   ;;  %v13172_v24 = vld [vmem:[%s13402_s25 + $0xa8] sm:$0xff]   ;;  %v13162_v28 = vld [vmem:[%s13402_s25 + $0x58] sm:$0xff]  }
  0x19   : > { %12686 = vmatprep.subr.bf16.mxu1 %v13184_v12  ;;  %v13173_v25 = vld [vmem:[%s13402_s25 + $0xb0] sm:$0xff]   ;;  %v13174_v29 = vld [vmem:[%s13402_s25 + $0xb8] sm:$0xff]   ;;  %v13163_v30 = vld [vmem:[%s13402_s25 + $0x60] sm:$0xff]   ;;  %12765 = vmatpush3.bf16.msra.mxu0 %v13191_v51 }
  0x1a   : > { %v13175_v31 = vld [vmem:[%s13402_s25 + $0xc0] sm:$0xff]   ;;  %v13164_v32 = vld [vmem:[%s13402_s25 + $0x68] sm:$0xff]   ;;  %v13165_v34 = vld [vmem:[%s13402_s25 + $0x70] sm:$0xff]   ;;  %12766 = vmatprep.subr.bf16.mxu0 %v13192_v52 }
  0x1b   : > { %v13176_v33 = vld [vmem:[%s13402_s25 + $0xc8] sm:$0xff]   ;;  %v13177_v35 = vld [vmem:[%s13402_s25 + $0xd0] sm:$0xff]   ;;  %v13166_v36 = vld [vmem:[%s13402_s25 + $0x78] sm:$0xff]  }
  0x1c   : > { %12687 = vmatpush3.bf16.msra.mxu1 %v13184_v12  ;;  %v13178_v37 = vld [vmem:[%s13402_s25 + $0xd8] sm:$0xff]   ;;  %v13179_v38 = vld [vmem:[%s13402_s25 + $0xe0] sm:$0xff]   ;;  %v13180_v39 = vld [vmem:[%s13402_s25 + $0xe8] sm:$0xff]  }
  0x1d   : > { %12688 = vmatprep.subr.bf16.mxu1 %v13185_v15  ;;  %v13181_v40 = vld [vmem:[%s13402_s25 + $0xf0] sm:$0xff]   ;;  %v13182_v41 = vld [vmem:[%s13402_s25 + $0xf8] sm:$0xff]   ;;  %12767 = vmatpush3.bf16.msra.mxu0 %v13192_v52  ;;  %s13299_s25 = smov 64  }
  0x1e   : > { %12625 = vmatmul.mubr.msk.bf16.gmra.mrb[4].mxu0 %vm718_vm1, %v13154_v7 }
  0x1f   : > { %12628 = vmatprep.mubr.msk.bf16.mxu0 %vm718_vm1, %v13155_v8  ;;  %12657 = vmatmul.mubr.msk.bf16.gmra.mrb[4].mxu1 %vm718_vm1, %v13170_v18 }
  0x20   : > { %12660 = vmatprep.mubr.msk.bf16.mxu1 %vm718_vm1, %v13171_v19  ;;  %12689 = vmatpush3.bf16.msra.mxu1 %v13185_v15 }
  0x21   : > { %12690 = vmatprep.subr.bf16.mxu1 %v13186_v20 }
  0x24   : > { %12691 = vmatpush3.bf16.msra.mxu1 %v13186_v20 }
  0x25   : > { %12692 = vmatprep.subr.bf16.mxu1 %v13187_v21 }
  0x26   : > { %12629 = vmatmul.mubr.msk.bf16.gmra.mrb[8].mxu0 %vm718_vm1, %v13156_v9 }
  0x27   : > { %12632 = vmatprep.mubr.msk.bf16.mxu0 %vm718_vm1, %v13157_v10  ;;  %12661 = vmatmul.mubr.msk.bf16.gmra.mrb[8].mxu1 %vm718_vm1, %v13172_v24 }
  0x28   : > { %12664 = vmatprep.mubr.msk.bf16.mxu1 %vm718_vm1, %v13173_v25  ;;  %12693 = vmatpush3.bf16.msra.mxu1 %v13187_v21 }
  0x29   : > { %12694 = vmatprep.subr.bf16.mxu1 %v13188_v26 }
  0x2c   : > { %12695 = vmatpush3.bf16.msra.mxu1 %v13188_v26 }
  0x2d   : > { %12696 = vmatprep.subr.bf16.mxu1 %v13189_v27 }
  0x2e   : > { %12633 = vmatmul.mubr.msk.bf16.gmra.mrb[12].mxu0 %vm718_vm1, %v13158_v16 }
  0x2f   : > { %12636 = vmatprep.mubr.msk.bf16.mxu0 %vm718_vm1, %v13159_v17  ;;  %12665 = vmatmul.mubr.msk.bf16.gmra.mrb[12].mxu1 %vm718_vm1, %v13174_v29 }
  0x30   : > { %12668 = vmatprep.mubr.msk.bf16.mxu1 %vm718_vm1, %v13175_v31  ;;  %12697 = vmatpush3.bf16.msra.mxu1 %v13189_v27 }
  0x31   : > { %12698 = vmatprep.subr.bf16.mxu1 %v13190_v42 }
  0x34   : > { %12699 = vmatpush3.bf16.msra.mxu1 %v13190_v42 }
  0x36   : > { %12637 = vmatmul.mubr.msk.bf16.gmra.mrb[16].mxu0 %vm718_vm1, %v13160_v22 }
  0x37   : > { %12640 = vmatprep.mubr.msk.bf16.mxu0 %vm718_vm1, %v13161_v23  ;;  %12669 = vmatmul.mubr.msk.bf16.gmra.mrb[16].mxu1 %vm718_vm1, %v13176_v33 }
  0x38   : > { %12672 = vmatprep.mubr.msk.bf16.mxu1 %vm718_vm1, %v13177_v35 }
  0x3e   : > { %12641 = vmatmul.mubr.msk.bf16.gmra.mrb[20].mxu0 %vm718_vm1, %v13162_v28 }
  0x3f   : > { %12644 = vmatprep.mubr.msk.bf16.mxu0 %vm718_vm1, %v13163_v30  ;;  %12673 = vmatmul.mubr.msk.bf16.gmra.mrb[20].mxu1 %vm718_vm1, %v13178_v37 }
  0x40   : > { %12676 = vmatprep.mubr.msk.bf16.mxu1 %vm718_vm1, %v13179_v38 }
  0x46   : > { %12645 = vmatmul.mubr.msk.bf16.gmra.mrb[24].mxu0 %vm718_vm1, %v13164_v32 }
  0x47   : > { %12648 = vmatprep.mubr.msk.bf16.mxu0 %vm718_vm1, %v13165_v34  ;;  %12677 = vmatmul.mubr.msk.bf16.gmra.mrb[24].mxu1 %vm718_vm1, %v13180_v39 }
  0x48   : > { %12680 = vmatprep.mubr.msk.bf16.mxu1 %vm718_vm1, %v13181_v40 }
  0x4e   : > { %12649 = vmatmul.mubr.msk.bf16.gmra.mrb[28].mxu0 %vm718_vm1, %v13166_v36 }
  0x4f   : > { %12681 = vmatmul.mubr.msk.bf16.gmra.mrb[28].mxu1 %vm718_vm1, %v13182_v41 }
  0xe9   : > { %v12622_v44 = vpop.f32.mrb[0].mxu0 }
  0xea   : > { %v853_v45 = vpop.f32.mrb[1].mxu0  ;;  %v13498_v48 = vadd.f32 %v12622_v44, %v13492_v43  ;;  %v13532_v11 = vpop.f32.mrb[0].mxu1 }
  0xeb   : > { %v13495_v46 = vadd.f32 %v13492_v43, %v853_v45  ;;  %v12623_v47 = vpop.f32.mrb[2].mxu0  ;;  %v13537_v14 = vpop.f32.mrb[1].mxu1 }
  0xec   : > { %18511 = vst [vmem:[#allocation3_spill] sm:$0xff] %v13498_v48  ;;  %v13501_v49 = vadd.f32 %v12623_v47, %v13492_v43  ;;  %v856_v50 = vpop.f32.mrb[3].mxu0  ;;  %v3029_v57 = vmax.f32 %v13498_v48, 0.0  ;;  %v13542_v17 = vpop.f32.mrb[2].mxu1  ;;  %v18213_v48 = vmov 0.0|0.0  }
  0xed   : > { %18510 = vst [vmem:[#allocation2_spill] sm:$0xff] %v13495_v46  ;;  %v13510_v53 = vadd.f32 %v13492_v43, %v856_v50  ;;  %v3027_v55 = vmax.f32 %v13495_v46, 0.0  ;;  %v13548_v21 = vpop.f32.mrb[3].mxu1 }
  0xee   : > { %18512 = vst [vmem:[#allocation4_spill] sm:$0xff] %v13501_v49  ;;  %v3030_v54 = vmax.f32 %v13501_v49, 0.0 }
  0xef   : > { %18513 = vst [vmem:[#allocation5_spill] sm:$0xff] %v13510_v53  ;;  %v3028_v56 = vmax.f32 %v13510_v53, 0.0 }
  0xf0   : > { %v3092_v60 = vpack.c.bf16 %v3030_v54, %v3029_v57 }
  0xf1   : > { %v12626_v58 = vpop.f32.mrb[4].mxu0  ;;  %v3091_v59 = vpack.c.bf16 %v3028_v56, %v3027_v55 }
  0xf2   : > { %v13517_v61 = vadd.f32 %v12626_v58, %v13492_v43  ;;  %v869_v62 = vpop.f32.mrb[5].mxu0  ;;  %v13556_v29 = vpop.f32.mrb[4].mxu1 }
  0xf3   : > { %v13520_v63 = vadd.f32 %v13492_v43, %v869_v62  ;;  %v12627_v0 = vpop.f32.mrb[6].mxu0  ;;  %12700 = vmatprep.mubr.bf16.mxu1 %v3091_v59  ;;  %v13561_v32 = vpop.f32.mrb[5].mxu1 }
  0xf4   : > { %18514 = vst [vmem:[#allocation6_spill] sm:$0xff] %v13517_v61  ;;  %v3033_v1 = vmax.f32 %v13517_v61, 0.0  ;;  %v13524_v2 = vadd.f32 %v12627_v0, %v13492_v43  ;;  %v872_v3 = vpop.f32.mrb[7].mxu0  ;;  %12701 = vmatmul.mubr.bf16.vlgmr.msra.gmra.mrb[32].mxu1 %v3092_v60  ;;  %v13566_v35 = vpop.f32.mrb[6].mxu1 }
  0xf5   : > { %18515 = vst [vmem:[#allocation7_spill] sm:$0xff] %v13520_v63  ;;  %v3031_v4 = vmax.f32 %v13520_v63, 0.0  ;;  %v13528_v5 = vadd.f32 %v13492_v43, %v872_v3  ;;  %v13572_v39 = vpop.f32.mrb[7].mxu1  ;;  %v18591_v63 = vmov 0 }
  0xf6   : > { %18516 = vst [vmem:[#allocation8_spill] sm:$0xff] %v13524_v2  ;;  %v3034_v6 = vmax.f32 %v13524_v2, 0.0 }
  0xf7   : > { %18517 = vst [vmem:[#allocation9_spill] sm:$0xff] %v13528_v5  ;;  %v3032_v7 = vmax.f32 %v13528_v5, 0.0 }
  0xf8   : > { %v3094_v8 = vpack.c.bf16 %v3034_v6, %v3033_v1 }
  0xf9   : > { %v12630_v9 = vpop.f32.mrb[8].mxu0  ;;  %v3093_v10 = vpack.c.bf16 %v3032_v7, %v3031_v4 }
  0xfa   : > { %v13535_v12 = vadd.f32 %v12630_v9, %v13492_v43  ;;  %v885_v13 = vpop.f32.mrb[9].mxu0  ;;  %v13580_v51 = vpop.f32.mrb[8].mxu1 }
  0xfb   : > { %v13540_v15 = vadd.f32 %v13492_v43, %v885_v13  ;;  %v12631_v16 = vpop.f32.mrb[10].mxu0  ;;  %12704 = vmatprep.mubr.bf16.mxu1 %v3093_v10  ;;  %v13585_v55 = vpop.f32.mrb[9].mxu1 }
  0xfc   : > { %18518 = vst [vmem:[#allocation10_spill] sm:$0xff] %v13535_v12  ;;  %v3037_v18 = vmax.f32 %v13535_v12, 0.0  ;;  %v13546_v19 = vadd.f32 %v12631_v16, %v13492_v43  ;;  %v888_v20 = vpop.f32.mrb[11].mxu0  ;;  %12705 = vmatmul.mubr.bf16.gmra.mrb[36].mxu1 %v3094_v8  ;;  %v13590_v58 = vpop.f32.mrb[10].mxu1 }
  0xfd   : > { %18519 = vst [vmem:[#allocation11_spill] sm:$0xff] %v13540_v15  ;;  %v3035_v22 = vmax.f32 %v13540_v15, 0.0  ;;  %v13552_v23 = vadd.f32 %v13492_v43, %v888_v20  ;;  %v13596_v0 = vpop.f32.mrb[11].mxu1 }
  0xfe   : > { %18520 = vst [vmem:[#allocation12_spill] sm:$0xff] %v13546_v19  ;;  %v3038_v24 = vmax.f32 %v13546_v19, 0.0 }
  0xff   : > { %18521 = vst [vmem:[#allocation13_spill] sm:$0xff] %v13552_v23  ;;  %v3036_v25 = vmax.f32 %v13552_v23, 0.0 }
 0x100   : > { %v3096_v26 = vpack.c.bf16 %v3038_v24, %v3037_v18 }
 0x101   : > { %v12634_v27 = vpop.f32.mrb[12].mxu0  ;;  %v3095_v28 = vpack.c.bf16 %v3036_v25, %v3035_v22 }
 0x102   : > { %v13559_v30 = vadd.f32 %v12634_v27, %v13492_v43  ;;  %v901_v31 = vpop.f32.mrb[13].mxu0  ;;  %v13604_v10 = vpop.f32.mrb[12].mxu1 }
 0x103   : > { %v13564_v33 = vadd.f32 %v13492_v43, %v901_v31  ;;  %v12635_v34 = vpop.f32.mrb[14].mxu0  ;;  %12708 = vmatprep.mubr.bf16.mxu1 %v3095_v28  ;;  %v13609_v18 = vpop.f32.mrb[13].mxu1 }
 0x104   : > { %18522 = vst [vmem:[#allocation14_spill] sm:$0xff] %v13559_v30  ;;  %v3041_v36 = vmax.f32 %v13559_v30, 0.0  ;;  %v13570_v37 = vadd.f32 %v12635_v34, %v13492_v43  ;;  %v904_v38 = vpop.f32.mrb[15].mxu0  ;;  %12709 = vmatmul.mubr.bf16.gmra.mrb[40].mxu1 %v3096_v26  ;;  %v13614_v24 = vpop.f32.mrb[14].mxu1 }
 0x105   : > { %18523 = vst [vmem:[#allocation15_spill] sm:$0xff] %v13564_v33  ;;  %v3039_v40 = vmax.f32 %v13564_v33, 0.0  ;;  %v13576_v41 = vadd.f32 %v13492_v43, %v904_v38  ;;  %v13620_v28 = vpop.f32.mrb[15].mxu1 }
 0x106   : > { %18524 = vst [vmem:[#allocation16_spill] sm:$0xff] %v13570_v37  ;;  %v3042_v42 = vmax.f32 %v13570_v37, 0.0 }
 0x107   : > { %18525 = vst [vmem:[#allocation17_spill] sm:$0xff] %v13576_v41  ;;  %v3040_v44 = vmax.f32 %v13576_v41, 0.0 }
 0x108   : > { %v3098_v45 = vpack.c.bf16 %v3042_v42, %v3041_v36 }
 0x109   : > { %v12638_v47 = vpop.f32.mrb[16].mxu0  ;;  %v3097_v50 = vpack.c.bf16 %v3040_v44, %v3039_v40 }
 0x10a   : > { %v13583_v52 = vadd.f32 %v12638_v47, %v13492_v43  ;;  %v917_v54 = vpop.f32.mrb[17].mxu0 }
 0x10b   : > { %v13588_v56 = vadd.f32 %v13492_v43, %v917_v54  ;;  %v12639_v57 = vpop.f32.mrb[18].mxu0  ;;  %12712 = vmatprep.mubr.bf16.mxu1 %v3097_v50 }
 0x10c   : > { %18526 = vst [vmem:[#allocation18_spill] sm:$0xff] %v13583_v52  ;;  %v3045_v59 = vmax.f32 %v13583_v52, 0.0  ;;  %v13594_v60 = vadd.f32 %v12639_v57, %v13492_v43  ;;  %v920_v62 = vpop.f32.mrb[19].mxu0  ;;  %12713 = vmatmul.mubr.bf16.gmra.mrb[44].mxu1 %v3098_v45  ;;  %v13628_v45 = vpop.f32.mrb[16].mxu1 }
 0x10d   : > { %18527 = vst [vmem:[#allocation19_spill] sm:$0xff] %v13588_v56  ;;  %v3043_v1 = vmax.f32 %v13588_v56, 0.0  ;;  %v13600_v3 = vadd.f32 %v13492_v43, %v920_v62  ;;  %v13633_v54 = vpop.f32.mrb[17].mxu1 }
 0x10e   : > { %18528 = vst [vmem:[#allocation20_spill] sm:$0xff] %v13594_v60  ;;  %v3046_v4 = vmax.f32 %v13594_v60, 0.0  ;;  %v13638_v62 = vpop.f32.mrb[18].mxu1 }
 0x10f   : > { %18529 = vst [vmem:[#allocation21_spill] sm:$0xff] %v13600_v3  ;;  %v3044_v6 = vmax.f32 %v13600_v3, 0.0 }
 0x110   : > { %v3100_v7 = vpack.c.bf16 %v3046_v4, %v3045_v59 }
 0x111   : > { %v12642_v8 = vpop.f32.mrb[20].mxu0  ;;  %v3099_v9 = vpack.c.bf16 %v3044_v6, %v3043_v1 }
 0x112   : > { %v13607_v13 = vadd.f32 %v12642_v8, %v13492_v43  ;;  %v933_v16 = vpop.f32.mrb[21].mxu0 }
 0x113   : > { %v13612_v20 = vadd.f32 %v13492_v43, %v933_v16  ;;  %v12643_v22 = vpop.f32.mrb[22].mxu0  ;;  %12716 = vmatprep.mubr.bf16.mxu1 %v3099_v9 }
 0x114   : > { %18530 = vst [vmem:[#allocation22_spill] sm:$0xff] %v13607_v13  ;;  %v3049_v25 = vmax.f32 %v13607_v13, 0.0  ;;  %v13618_v26 = vadd.f32 %v12643_v22, %v13492_v43  ;;  %v936_v27 = vpop.f32.mrb[23].mxu0  ;;  %12717 = vmatmul.mubr.bf16.gmra.mrb[48].mxu1 %v3100_v7  ;;  %v13644_v7 = vpop.f32.mrb[19].mxu1 }
 0x115   : > { %18531 = vst [vmem:[#allocation23_spill] sm:$0xff] %v13612_v20  ;;  %v3047_v31 = vmax.f32 %v13612_v20, 0.0  ;;  %v13624_v34 = vadd.f32 %v13492_v43, %v936_v27 }
 0x116   : > { %18532 = vst [vmem:[#allocation24_spill] sm:$0xff] %v13618_v26  ;;  %v3050_v36 = vmax.f32 %v13618_v26, 0.0  ;;  %v18579_v26 = vmov 0 }
 0x117   : > { %18533 = vst [vmem:[#allocation25_spill] sm:$0xff] %v13624_v34  ;;  %v3048_v38 = vmax.f32 %v13624_v34, 0.0 }
 0x118   : > { %v3102_v40 = vpack.c.bf16 %v3050_v36, %v3049_v25  ;;  %v13654_v36 = vadd.f32 %v13492_v43, %v13537_v14 }
 0x119   : > { %v12646_v42 = vpop.f32.mrb[24].mxu0  ;;  %v3101_v44 = vpack.c.bf16 %v3048_v38, %v3047_v31  ;;  %v13658_v38 = vadd.f32 %v13492_v43, %v13548_v21 }
 0x11a   : > { %v13631_v47 = vadd.f32 %v12646_v42, %v13492_v43  ;;  %v949_v50 = vpop.f32.mrb[25].mxu0  ;;  %18538 = vst [vmem:[#allocation30_spill] sm:$0xff] %v13654_v36 }
 0x11b   : > { %v13636_v57 = vadd.f32 %v13492_v43, %v949_v50  ;;  %v12647_v59 = vpop.f32.mrb[26].mxu0  ;;  %12720 = vmatprep.mubr.bf16.mxu1 %v3101_v44  ;;  %18539 = vst [vmem:[#allocation31_spill] sm:$0xff] %v13658_v38 }
 0x11c   : > { %18534 = vst [vmem:[#allocation26_spill] sm:$0xff] %v13631_v47  ;;  %v3053_v1 = vmax.f32 %v13631_v47, 0.0  ;;  %v13642_v4 = vadd.f32 %v12647_v59, %v13492_v43  ;;  %v952_v6 = vpop.f32.mrb[27].mxu0  ;;  %12721 = vmatmul.mubr.bf16.gmra.mrb[52].mxu1 %v3102_v40  ;;  %v13660_v40 = vpop.f32.mrb[20].mxu1 }
 0x11d   : > { %18535 = vst [vmem:[#allocation27_spill] sm:$0xff] %v13636_v57  ;;  %v3051_v8 = vmax.f32 %v13636_v57, 0.0  ;;  %v13648_v9 = vadd.f32 %v13492_v43, %v952_v6  ;;  %v13665_v50 = vpop.f32.mrb[21].mxu1 }
 0x11e   : > { %18536 = vst [vmem:[#allocation28_spill] sm:$0xff] %v13642_v4  ;;  %v3054_v16 = vmax.f32 %v13642_v4, 0.0  ;;  %v13670_v6 = vpop.f32.mrb[22].mxu1 }
 0x11f   : > { %18537 = vst [vmem:[#allocation29_spill] sm:$0xff] %v13648_v9  ;;  %v3052_v22 = vmax.f32 %v13648_v9, 0.0 }
 0x120   : > { %v3104_v25 = vpack.c.bf16 %v3054_v16, %v3053_v1  ;;  %v13676_v16 = vpop.f32.mrb[23].mxu1 }
 0x121   : > { %v12650_v27 = vpop.f32.mrb[28].mxu0  ;;  %v3103_v31 = vpack.c.bf16 %v3052_v22, %v3051_v8 }
 0x122   : > { %v13663_v42 = vadd.f32 %v12650_v27, %v13492_v43  ;;  %v965_v44 = vpop.f32.mrb[29].mxu0 }
 0x123   : > { %v13668_v59 = vadd.f32 %v13492_v43, %v965_v44  ;;  %v12651_v1 = vpop.f32.mrb[30].mxu0  ;;  %12724 = vmatprep.mubr.bf16.mxu1 %v3103_v31  ;;  %v3059_v44 = vmax.f32 %v13654_v36, 0.0  ;;  %v3060_v31 = vmax.f32 %v13658_v38, 0.0  ;;  %v13700_v38 = vadd.f32 %v13492_v43, %v13572_v39 }
 0x124   : > { %18540 = vst [vmem:[#allocation32_spill] sm:$0xff] %v13663_v42  ;;  %v3057_v14 = vmax.f32 %v13663_v42, 0.0  ;;  %v13674_v21 = vadd.f32 %v12651_v1, %v13492_v43  ;;  %v968_v8 = vpop.f32.mrb[31].mxu0  ;;  %12725 = vmatmul.mubr.bf16.gmra.mrb[56].mxu1 %v3104_v25  ;;  %v13688_v1 = vadd.f32 %v13532_v11, %v13492_v43  ;;  %v13692_v25 = vadd.f32 %v13542_v17, %v13492_v43 }
 0x125   : > { %18541 = vst [vmem:[#allocation33_spill] sm:$0xff] %v13668_v59  ;;  %v3055_v22 = vmax.f32 %v13668_v59, 0.0  ;;  %v13680_v27 = vadd.f32 %v13492_v43, %v968_v8  ;;  %v13696_v8 = vadd.f32 %v13492_v43, %v13561_v32  ;;  %v3107_v36 = vpack.c.bf16 %v3060_v31, %v3059_v44  ;;  %18547 = vst [vmem:[#allocation39_spill] sm:$0xff] %v13700_v38 }
 0x126   : > { %18542 = vst [vmem:[#allocation34_spill] sm:$0xff] %v13674_v21  ;;  %v3058_v9 = vmax.f32 %v13674_v21, 0.0  ;;  %18544 = vst [vmem:[#allocation36_spill] sm:$0xff] %v13688_v1  ;;  %v3061_v17 = vmax.f32 %v13688_v1, 0.0  ;;  %v3064_v39 = vmax.f32 %v13700_v38, 0.0  ;;  %v13724_v44 = vadd.f32 %v13492_v43, %v13585_v55 }
 0x127   : > { %18543 = vst [vmem:[#allocation35_spill] sm:$0xff] %v13680_v27  ;;  %v3056_v42 = vmax.f32 %v13680_v27, 0.0  ;;  %18545 = vst [vmem:[#allocation37_spill] sm:$0xff] %v13692_v25  ;;  %v13702_v27 = vpop.f32.mrb[24].mxu1  ;;  %v3063_v32 = vmax.f32 %v13696_v8, 0.0  ;;  %v13728_v31 = vadd.f32 %v13492_v43, %v13596_v0  ;;  %v13744_v0 = vadd.f32 %v13580_v51, %v13492_v43 }
 0x128   : > { %v3106_v59 = vpack.c.bf16 %v3058_v9, %v3057_v14  ;;  %18546 = vst [vmem:[#allocation38_spill] sm:$0xff] %v13696_v8  ;;  %v13704_v21 = vpop.f32.mrb[25].mxu1  ;;  %v3062_v9 = vmax.f32 %v13692_v25, 0.0  ;;  %v13716_v14 = vadd.f32 %v13556_v29, %v13492_v43  ;;  %18550 = vst [vmem:[#allocation42_spill] sm:$0xff] %v13724_v44  ;;  %v3067_v55 = vmax.f32 %v13724_v44, 0.0 }
 0x129   : > { %v3105_v4 = vpack.c.bf16 %v3056_v42, %v3055_v22  ;;  %v13706_v11 = vpop.f32.mrb[26].mxu1  ;;  %18551 = vst [vmem:[#allocation43_spill] sm:$0xff] %v13728_v31  ;;  %18552 = vst [vmem:[#allocation44_spill] sm:$0xff] %v13744_v0  ;;  %v13756_v44 = vadd.f32 %v13492_v43, %v13620_v28 }
 0x12a   : > { %v13710_v42 = vpop.f32.mrb[27].mxu1  ;;  %18548 = vst [vmem:[#allocation40_spill] sm:$0xff] %v13716_v14  ;;  %v3108_v22 = vpack.c.bf16 %v3062_v9, %v3061_v17  ;;  %v3065_v8 = vmax.f32 %v13716_v14, 0.0  ;;  %v3068_v9 = vmax.f32 %v13728_v31, 0.0 }
 0x12b   : > { %12728 = vmatprep.mubr.bf16.mxu1 %v3105_v4  ;;  %v13720_v4 = vadd.f32 %v13566_v35, %v13492_v43  ;;  %18555 = vst [vmem:[#allocation47_spill] sm:$0xff] %v13756_v44 }
 0x12c   : > { %12729 = vmatmul.mubr.bf16.gmra.mrb[60].mxu1 %v3106_v59  ;;  %v3109_v59 = vpack.c.bf16 %v3064_v39, %v3063_v32  ;;  %v13748_v32 = vadd.f32 %v13590_v58, %v13492_v43  ;;  %v3072_v58 = vmax.f32 %v13756_v44, 0.0  ;;  %v13210_v44 = vld [vmem:[%s18140_s5 + $0x78] sm:$0xff]  }
 0x12d   : > { %12732 = vmatprep.mubr.bf16.mxu1 %v3107_v36  ;;  %18549 = vst [vmem:[#allocation41_spill] sm:$0xff] %v13720_v4  ;;  %v13730_v36 = vpop.f32.mrb[28].mxu1  ;;  %v3066_v35 = vmax.f32 %v13720_v4, 0.0  ;;  %v13752_v4 = vadd.f32 %v13492_v43, %v13609_v18  ;;  %v13768_v18 = vadd.f32 %v13614_v24, %v13492_v43 }
 0x12e   : > { %v13732_v38 = vpop.f32.mrb[29].mxu1  ;;  %18553 = vst [vmem:[#allocation45_spill] sm:$0xff] %v13748_v32  ;;  %v3070_v31 = vmax.f32 %v13748_v32, 0.0 }
 0x12f   : > { %v13734_v29 = vpop.f32.mrb[30].mxu1  ;;  %v3110_v39 = vpack.c.bf16 %v3066_v35, %v3065_v8  ;;  %18554 = vst [vmem:[#allocation46_spill] sm:$0xff] %v13752_v4  ;;  %v3071_v51 = vmax.f32 %v13752_v4, 0.0  ;;  %v13764_v8 = vadd.f32 %v13604_v10, %v13492_v43  ;;  %18557 = vst [vmem:[#allocation49_spill] sm:$0xff] %v13768_v18  ;;  %v13772_v35 = vadd.f32 %v13492_v43, %v13633_v54 }
 0x130   : > { %v13738_v17 = vpop.f32.mrb[31].mxu1  ;;  %v13788_v54 = vadd.f32 %v13638_v62, %v13492_v43 }
 0x131   : > { %18556 = vst [vmem:[#allocation48_spill] sm:$0xff] %v13764_v8  ;;  %18558 = vst [vmem:[#allocation50_spill] sm:$0xff] %v13772_v35  ;;  %v3075_v10 = vmax.f32 %v13772_v35, 0.0 }
 0x132   : > { %18561 = vst [vmem:[#allocation53_spill] sm:$0xff] %v13788_v54  ;;  %v3078_v62 = vmax.f32 %v13788_v54, 0.0  ;;  %v18576_v54 = vmov 0 }
 0x134   : > { %12733 = vmatmul.mubr.bf16.gmra.mrb[64].mxu1 %v3108_v22  ;;  %v3111_v22 = vpack.c.bf16 %v3068_v9, %v3067_v55  ;;  %v3113_v55 = vpack.c.bf16 %v3072_v58, %v3071_v51  ;;  %v13776_v9 = vadd.f32 %v13492_v43, %v13644_v7  ;;  %v13795_v51 = vadd.f32 %v13492_v43, %v13665_v50 }
 0x135   : > { %12736 = vmatprep.mubr.bf16.mxu1 %v3109_v59  ;;  %v3069_v59 = vmax.f32 %v13744_v0, 0.0 }
 0x136   : > { %18559 = vst [vmem:[#allocation51_spill] sm:$0xff] %v13776_v9  ;;  %v3076_v24 = vmax.f32 %v13776_v9, 0.0  ;;  %18562 = vst [vmem:[#allocation54_spill] sm:$0xff] %v13795_v51 }
 0x137   : > { %v3112_v28 = vpack.c.bf16 %v3070_v31, %v3069_v59  ;;  %v13784_v31 = vadd.f32 %v13628_v45, %v13492_v43  ;;  %v13193_v59 = vld [vmem:[%s18141_s6 + $0x10] sm:$0xff]  }
 0x138   : > { %v3115_v58 = vpack.c.bf16 %v3076_v24, %v3075_v10  ;;  %12768 = vmatprep.subr.bf16.mxu0 %v13193_v59  ;;  %v13817_v10 = vadd.f32 %v13670_v6, %v13492_v43 }
 0x139   : > { %18560 = vst [vmem:[#allocation52_spill] sm:$0xff] %v13784_v31  ;;  %12769 = vmatpush3.bf16.msra.mxu0 %v13193_v59  ;;  %v3077_v45 = vmax.f32 %v13784_v31, 0.0  ;;  %v13822_v59 = vadd.f32 %v13492_v43, %v13704_v21  ;;  %v13196_v21 = vld [vmem:[%s18140_s5 + $0x8] sm:$0xff]  }
 0x13a   : > { %18565 = vst [vmem:[#allocation57_spill] sm:$0xff] %v13817_v10  ;;  %v3082_v6 = vmax.f32 %v13817_v10, 0.0 }
 0x13b   : > { %v3116_v24 = vpack.c.bf16 %v3078_v62, %v3077_v45  ;;  %18566 = vst [vmem:[#allocation58_spill] sm:$0xff] %v13822_v59  ;;  %v3083_v45 = vmax.f32 %v13822_v59, 0.0 }
 0x13c   : > { %12737 = vmatmul.mubr.bf16.gmra.mrb[68].mxu1 %v3110_v39  ;;  %v3073_v39 = vmax.f32 %v13764_v8, 0.0 }
 0x13d   : > { %12740 = vmatprep.mubr.bf16.mxu1 %v3111_v22  ;;  %v3074_v22 = vmax.f32 %v13768_v18, 0.0 }
 0x13f   : > { %v3114_v7 = vpack.c.bf16 %v3074_v22, %v3073_v39  ;;  %v3079_v39 = vmax.f32 %v13795_v51, 0.0  ;;  %v13813_v22 = vadd.f32 %v13660_v40, %v13492_v43 }
 0x141   : > { %18564 = vst [vmem:[#allocation56_spill] sm:$0xff] %v13813_v22  ;;  %v3081_v40 = vmax.f32 %v13813_v22, 0.0 }
 0x144   : > { %12741 = vmatmul.mubr.bf16.gmra.mrb[72].mxu1 %v3112_v28  ;;  %v13799_v28 = vadd.f32 %v13492_v43, %v13676_v16  ;;  %v13194_v16 = vld [vmem:[%s18140_s5] sm:$0xff]  }
 0x145   : > { %12744 = vmatprep.mubr.bf16.mxu1 %v3113_v55  ;;  %v13195_v55 = vld [vmem:[%s18141_s6 + $0x18] sm:$0xff]  }
 0x146   : > { %18563 = vst [vmem:[#allocation55_spill] sm:$0xff] %v13799_v28  ;;  %v3080_v50 = vmax.f32 %v13799_v28, 0.0  ;;  %12770 = vmatprep.subr.bf16.mxu0 %v13195_v55 }
 0x147   : > { %12771 = vmatpush3.bf16.msra.mxu0 %v13195_v55  ;;  %v13826_v55 = vadd.f32 %v13492_v43, %v13710_v42  ;;  %v13838_v42 = vadd.f32 %v13702_v27, %v13492_v43 }
 0x149   : > { %18567 = vst [vmem:[#allocation59_spill] sm:$0xff] %v13826_v55  ;;  %v3084_v62 = vmax.f32 %v13826_v55, 0.0  ;;  %18568 = vst [vmem:[#allocation60_spill] sm:$0xff] %v13838_v42  ;;  %v3085_v27 = vmax.f32 %v13838_v42, 0.0 }
 0x14c   : > { %12745 = vmatmul.mubr.bf16.gmra.mrb[76].mxu1 %v3114_v7  ;;  %v18164_v7 = vmov 0  }
 0x14d   : > { %12748 = vmatprep.mubr.bf16.mxu1 %v3115_v58  ;;  %6107 = vmatprep.subr.bf16.mxu1 %v18164_v7  ;;  %v3117_v58 = vpack.c.bf16 %v3080_v50, %v3079_v39  ;;  %v13842_v39 = vadd.f32 %v13706_v11, %v13492_v43  ;;  %v3118_v50 = vpack.c.bf16 %v3082_v6, %v3081_v40 }
 0x14e   : > { %6108 = vmatpush1.bf16.msra.mxu1 %v13194_v16  ;;  %v13846_v16 = vadd.f32 %v13492_v43, %v13732_v38  ;;  %v13197_v38 = vld [vmem:[%s18140_s5 + $0x10] sm:$0xff]   ;;  %v13866_v6 = vadd.f32 %v13734_v29, %v13492_v43  ;;  %v13200_v29 = vld [vmem:[%s18140_s5 + $0x28] sm:$0xff]  }
 0x14f   : > { %6109 = vmatprep.subr.bf16.mxu1 %v18164_v7  ;;  %18569 = vst [vmem:[#allocation61_spill] sm:$0xff] %v13842_v39  ;;  %v3086_v55 = vmax.f32 %v13842_v39, 0.0 }
 0x150   : > { %18570 = vst [vmem:[#allocation62_spill] sm:$0xff] %v13846_v16  ;;  %v3087_v11 = vmax.f32 %v13846_v16, 0.0  ;;  %18573 = vst [vmem:[#allocation65_spill] sm:$0xff] %v13866_v6 }
 0x152   : > { %6110 = vmatpush1.bf16.msra.mxu1 %v13196_v21 }
 0x153   : > { %6111 = vmatprep.subr.bf16.mxu1 %v18164_v7 }
 0x154   : > { %12749 = vmatmul.mubr.bf16.gmra.mrb[80].mxu1 %v3116_v24  ;;  %v3119_v24 = vpack.c.bf16 %v3084_v62, %v3083_v45  ;;  %v3120_v45 = vpack.c.bf16 %v3086_v55, %v3085_v27  ;;  %v13201_v55 = vld [vmem:[%s18140_s5 + $0x30] sm:$0xff]   ;;  %v13202_v27 = vld [vmem:[%s18140_s5 + $0x38] sm:$0xff]  }
 0x155   : > { %12752 = vmatprep.mubr.bf16.mxu1 %v3117_v58  ;;  %v13850_v58 = vadd.f32 %v13492_v43, %v13738_v17  ;;  %v13862_v17 = vadd.f32 %v13730_v36, %v13492_v43  ;;  %v13198_v36 = vld [vmem:[%s18140_s5 + $0x18] sm:$0xff]   ;;  %v13199_v43 = vld [vmem:[%s18140_s5 + $0x20] sm:$0xff]  }
 0x156   : > { %6112 = vmatpush1.bf16.msra.mxu1 %v13197_v38  ;;  %v13205_v38 = vld [vmem:[%s18140_s5 + $0x50] sm:$0xff]  }
 0x157   : > { %18571 = vst [vmem:[#allocation63_spill] sm:$0xff] %v13850_v58  ;;  %v3088_v40 = vmax.f32 %v13850_v58, 0.0  ;;  %18572 = vst [vmem:[#allocation64_spill] sm:$0xff] %v13862_v17  ;;  %6113 = vmatprep.subr.bf16.mxu1 %v18164_v7  ;;  %v3089_v21 = vmax.f32 %v13862_v17, 0.0 }
 0x159   : > { %v3121_v62 = vpack.c.bf16 %v3088_v40, %v3087_v11  ;;  %v13203_v11 = vld [vmem:[%s18140_s5 + $0x40] sm:$0xff]   ;;  %v13204_v40 = vld [vmem:[%s18140_s5 + $0x48] sm:$0xff]  }
 0x15a   : > { %6114 = vmatpush1.bf16.msra.mxu1 %v13198_v36  ;;  %v13208_v36 = vld [vmem:[%s18140_s5 + $0x68] sm:$0xff]  }
 0x15b   : > { %6115 = vmatprep.subr.bf16.mxu1 %v18164_v7 }
 0x15c   : > { %12753 = vmatmul.mubr.bf16.gmra.mrb[84].mxu1 %v3118_v50  ;;  %v3090_v50 = vmax.f32 %v13866_v6, 0.0 }
 0x15d   : > { %12756 = vmatprep.mubr.bf16.mxu1 %v3119_v24 }
 0x15e   : > { %v3122_v24 = vpack.c.bf16 %v3090_v50, %v3089_v21  ;;  %6116 = vmatpush1.bf16.msra.mxu1 %v13199_v43  ;;  %v1108_v21 = vlaneseq }
 0x15f   : > { %6117 = vmatprep.subr.bf16.mxu1 %v18164_v7 }
 0x160   : > { %v13911_v50 = vshrl.u32 %v1108_v21, 7 }
 0x162   : > { %6118 = vmatpush1.bf16.msra.mxu1 %v13200_v29  ;;  %18574 = vst [vmem:[#allocation66_spill] sm:$0xff] %v13911_v50  ;;  %v13921_v43 = vadd.s32 32, %v13911_v50  ;;  %v13924_v29 = vadd.s32 24, %v13911_v50  ;;  %v13942_v21 = vadd.s32 112, %v13911_v50  ;;  %v13949_v58 = vadd.s32 128, %v13911_v50 }
 0x163   : > { %6119 = vmatprep.subr.bf16.mxu1 %v18164_v7  ;;  %v13952_v6 = vadd.s32 144, %v13911_v50  ;;  %v13955_v16 = vadd.s32 160, %v13911_v50  ;;  %v13960_v17 = vadd.s32 176, %v13911_v50  ;;  %v13963_v39 = vadd.s32 192, %v13911_v50 }
 0x164   : > { %12757 = vmatmul.mubr.bf16.gmra.mrb[88].mxu1 %v3120_v45  ;;  %v13206_v45 = vld [vmem:[%s18140_s5 + $0x58] sm:$0xff]   ;;  %v13968_v42 = vadd.s32 208, %v13911_v50  ;;  %v13971_v28 = vadd.s32 224, %v13911_v50  ;;  %v13976_v10 = vadd.s32 240, %v13911_v50  ;;  %v13979_v51 = vadd.s32 256, %v13911_v50 }
 0x165   : > { %12760 = vmatprep.mubr.bf16.mxu1 %v3121_v62  ;;  %v13207_v62 = vld [vmem:[%s18140_s5 + $0x60] sm:$0xff]   ;;  %v13988_v9 = vadd.s32 288, %v13911_v50  ;;  %v14005_v22 = vadd.s32 320, %v13911_v50  ;;  %v14013_v18 = vadd.s32 352, %v13911_v50  ;;  %v14019_v32 = vadd.s32 368, %v13911_v50 }
 0x166   : > { %6120 = vmatpush1.bf16.msra.mxu1 %v13201_v55  ;;  %v13927_v55 = vadd.s32 48, %v13911_v50  ;;  %v14027_v25 = vadd.s32 384, %v13911_v50  ;;  %v14030_v59 = vadd.s32 400, %v13911_v50  ;;  %v14036_v47 = vadd.s32 416, %v13911_v50 }
 0x167   : > { %6121 = vmatprep.subr.bf16.mxu1 %v18164_v7  ;;  %v14048_v3 = vadd.s32 432, %v13911_v50 }
 0x16a   : > { %6122 = vmatpush1.bf16.msra.mxu1 %v13202_v27  ;;  %v13930_v27 = vadd.s32 64, %v13911_v50 }
 0x16b   : > { %6123 = vmatprep.subr.bf16.mxu1 %v18164_v7 }
 0x16c   : > { %12761 = vmatmul.mubr.bf16.gmra.mrb[92].mxu1 %v3122_v24  ;;  %v13918_v24 = vadd.s32 16, %v13911_v50 }
 0x16e   : > { %6124 = vmatpush1.bf16.msra.mxu1 %v13203_v11  ;;  %v1177_v11 = vand.u32 15, %v13911_v50 }
 0x16f   : > { %6125 = vmatprep.subr.bf16.mxu1 %v18164_v7 }
 0x170   : > { %vm13995_vm3 = vcmp.ge.s32.totalorder %v1177_v11, 1  ;;  %v14010_v11 = vadd.s32 336, %v13911_v50 }
 0x171   : > { %v18577_v54 = vsel %vm13995_vm3, 4294967295, %v18576_v54 }
 0x172   : > { %6126 = vmatpush1.bf16.msra.mxu1 %v13204_v40  ;;  %v13934_v40 = vadd.s32 80, %v13911_v50  ;;  %18578 = vst [vmem:[#allocation67_spill] sm:$0xff] %v18577_v54 }
 0x173   : > { %6127 = vmatprep.subr.bf16.mxu1 %v18164_v7 }
 0x176   : > { %6128 = vmatpush1.bf16.msra.mxu1 %v13205_v38  ;;  %v13937_v38 = vadd.s32 96, %v13911_v50 }
 0x177   : > { %6129 = vmatprep.subr.bf16.mxu1 %v18164_v7 }
 0x17a   : > { %6130 = vmatpush1.bf16.msra.mxu1 %v13206_v45  ;;  %v1191_v45 = vand.u32 15, %v13918_v24  ;;  %v18575_v24 = vmov 0  }
 0x17b   : > { %6131 = vmatprep.subr.bf16.mxu1 %v18164_v7 }
 0x17c   : > { %vm14039_vm5 = vcmp.ge.s32.totalorder %v1191_v45, 1  ;;  %v14053_v45 = vadd.s32 448, %v13911_v50 }
 0x17d   : > { %v18580_v26 = vsel %vm14039_vm5, 4294967295, %v18579_v26 }
 0x17e   : > { %6132 = vmatpush1.bf16.msra.mxu1 %v13207_v62  ;;  %v13993_v62 = vld [vmem:[%s18139_s4] ss:$0 sm:$0xff]  ;;  %18581 = vst [vmem:[#allocation68_spill] sm:$0xff] %v18580_v26 }
 0x17f   : > { %6133 = vmatprep.subr.bf16.mxu1 %v18164_v7 }
 0x182   : > { %6134 = vmatpush1.bf16.msra.mxu1 %v13208_v36  ;;  %v13209_v36 = vld [vmem:[%s18140_s5 + $0x70] sm:$0xff]  }
 0x183   : > { %6135 = vmatprep.subr.bf16.mxu1 %v18164_v7  ;;  %v14002_v7 = vadd.s32 304, %v13911_v50 }
 0x186   : > { %6136 = vmatpush1.bf16.msra.mxu1 %v13209_v36  ;;  %v13982_v36 = vadd.s32 272, %v13911_v50 }
 0x187   : > { %6137 = vmatprep.subr.bf16.mxu1 %v18575_v24 }
 0x18a   : > { %6138 = vmatpush1.bf16.msra.mxu1 %v13210_v44 }
 0x1c7   : > { %v12702_v35 = vpop.f32.mrb[32].mxu1 }
 0x1c8   : > { %v3237_v31 = vadd.f32 %v12702_v35, %v13993_v62  ;;  %v3228_v0 = vpop.f32.mrb[33].mxu1 }
 0x1c9   : > { %v3229_v8 = vadd.f32 %v13993_v62, %v3228_v0  ;;  %v12703_v4 = vpop.f32.mrb[34].mxu1 }
 0x1ca   : > { %v3485_v35 = vmax.f32 %v3237_v31, 0.0  ;;  %v3240_v14 = vadd.f32 %v12703_v4, %v13993_v62  ;;  %v3231_v34 = vpop.f32.mrb[35].mxu1 }
 0x1cb   : > { %v3483_v13 = vmax.f32 %v3229_v8, 0.0  ;;  %v3232_v1 = vadd.f32 %v13993_v62, %v3231_v34  ;;  %v14057_v34 = vadd.s32 464, %v13911_v50 }
 0x1cc   : > { %v3486_v44 = vmax.f32 %v3240_v14, 0.0  ;;  %v3647_v57 = vrot.slane %v3485_v35, 7  ;;  %v14060_v14 = vadd.s32 480, %v13911_v50 }
 0x1cd   : > { %v3644_v20 = vrot.slane %v3483_v13, 7  ;;  %v3484_v60 = vmax.f32 %v3232_v1, 0.0 }
 0x1ce   : > { %v3548_v0 = vpack.c.bf16 %v3486_v44, %v3485_v35  ;;  %v3649_v56 = vrot.slane %v3486_v44, 7  ;;  %v18582_v44 = vand.u32 15, %v13921_v43 }
 0x1cf   : > { %v3547_v52 = vpack.c.bf16 %v3484_v60, %v3483_v13  ;;  %v3645_v4 = vrot.slane %v3484_v60, 7  ;;  %v12706_v41 = vpop.f32.mrb[36].mxu1  ;;  %v14063_v31 = vsel %vm18283_vm2, 0.0, %v3644_v20  ;;  %v18583_v60 = vmov 0 }
 0x1d0   : > { %v3253_v1 = vadd.f32 %v12706_v41, %v13993_v62  ;;  %v3244_v8 = vpop.f32.mrb[37].mxu1  ;;  %v5017_v33 = vsel %vm13995_vm3, %v14063_v31, 0.0  ;;  %v14071_v35 = vsel %vm18283_vm2, %v3647_v57, %v3649_v56  ;;  %vm14075_vm7 = vcmp.ge.s32.totalorder %v18582_v44, 1 }
 0x1d1   : > { %v18584_v60 = vsel %vm14075_vm7, 4294967295, %v18583_v60  ;;  %v3245_v37 = vadd.f32 %v13993_v62, %v3244_v8  ;;  %v12707_v30 = vpop.f32.mrb[38].mxu1  ;;  %12772 = vmatprep.mubr.msk.bf16.mxu0 %vm18244_vm4, %v3547_v52  ;;  %v14083_v41 = vsel %vm18283_vm2, %v3644_v20, %v3645_v4  ;;  %v14086_v54 = vsel %vm18283_vm2, %v3645_v4, %v3647_v57 }
 0x1d2   : > { %18585 = vst [vmem:[#allocation69_spill] sm:$0xff] %v18584_v60  ;;  %v3489_v43 = vmax.f32 %v3253_v1, 0.0  ;;  %v3256_v44 = vadd.f32 %v12707_v30, %v13993_v62  ;;  %v3247_v19 = vpop.f32.mrb[39].mxu1  ;;  %12773 = vmatmul.mubr.msk.bf16.vlgmr.msra.gmra.mrb[32].mxu0 %vm18244_vm4, %v3548_v0  ;;  %v5081_v13 = vpack.c.bf16 %v14083_v41, %v5017_v33  ;;  %v5019_v57 = vsel %vm14039_vm5, %v14086_v54, 0.0 }
 0x1d3   : > { %v3487_v23 = vmax.f32 %v3245_v37, 0.0  ;;  %v3248_v52 = vadd.f32 %v13993_v62, %v3247_v19  ;;  %v18586_v4 = vand.u32 15, %v13927_v55  ;;  %v18587_v30 = vmov 0 }
 0x1d4   : > { %v3490_v0 = vmax.f32 %v3256_v44, 0.0  ;;  %5241 = vrot.lane.b32.xlu0 %v5081_v13, %s13299_s25  ;;  %v5082_v19 = vpack.c.bf16 %v14071_v35, %v5019_v57  ;;  %v4187_v37 = vrot.slane %v14063_v31, 1  ;;  %v4189_v12 = vrot.slane %v14083_v41, 1 }
 0x1d5   : > { %vm14100_vm8 = vcmp.ge.s32.totalorder %v18586_v4, 1  ;;  %v3651_v1 = vrot.slane %v3487_v23, 7  ;;  %v3488_v8 = vmax.f32 %v3248_v52, 0.0  ;;  %v4191_v55 = vrot.slane %v14086_v54, 1 }
 0x1d6   : > { %v18588_v30 = vsel %vm14100_vm8, 4294967295, %v18587_v30  ;;  %v3655_v4 = vrot.slane %v3489_v43, 7  ;;  %v3550_v20 = vpack.c.bf16 %v3490_v0, %v3489_v43  ;;  %v3657_v15 = vrot.slane %v3490_v0, 7  ;;  %5243 = vrot.lane.b32.xlu1 %v5082_v19, %s13299_s25 }
 0x1d7   : > { %18589 = vst [vmem:[#allocation70_spill] sm:$0xff] %v18588_v30  ;;  %v4193_v44 = vrot.slane %v14071_v35, 1  ;;  %v3549_v13 = vpack.c.bf16 %v3488_v8, %v3487_v23  ;;  %v3653_v61 = vrot.slane %v3488_v8, 7  ;;  %v12710_v33 = vpop.f32.mrb[40].mxu1  ;;  %v4190_v57 = vsel %vm18248_vm6, %v4187_v37, %v4189_v12 }
 0x1d8   : > { %v4192_v2 = vsel %vm18248_vm6, %v4189_v12, %v4191_v55  ;;  %v18590_v52 = vand.u32 15, %v13930_v27  ;;  %v3269_v43 = vadd.f32 %v12710_v33, %v13993_v62  ;;  %v3260_v0 = vpop.f32.mrb[41].mxu1  ;;  %5145 = vrot.lane.b32.xlu0 %v18213_v48, %s13299_s25  ;;  %v14124_v8 = vsel %vm18283_vm2, %v3649_v56, %v3651_v1 }
 0x1d9   : > { %v4442_v23 = vpack.c.bf16 %v4192_v2, %v4190_v57  ;;  %v4194_v19 = vsel %vm18248_vm6, %v4191_v55, %v4193_v44  ;;  %v3261_v12 = vadd.f32 %v13993_v62, %v3260_v0  ;;  %v12711_v27 = vpop.f32.mrb[42].mxu1  ;;  %12776 = vmatprep.mubr.msk.bf16.mxu0 %vm18244_vm4, %v3549_v13  ;;  %v14130_v37 = vsel %vm18283_vm2, %v3651_v1, %v3653_v61 }
 0x1da   : > { %vm14116_vm9 = vcmp.ge.s32.totalorder %v18590_v52, 1  ;;  %v5021_v33 = vsel %vm14075_vm7, %v14124_v8, 0.0  ;;  %v4195_v52 = vrot.slane %v14124_v8, 1  ;;  %v3493_v2 = vmax.f32 %v3269_v43, 0.0  ;;  %v3263_v55 = vpop.f32.mrb[43].mxu1  ;;  %12777 = vmatmul.mubr.msk.bf16.gmra.mrb[36].mxu0 %vm18244_vm4, %v3550_v20 }
 0x1db   : > { %v18592_v63 = vsel %vm14116_vm9, 4294967295, %v18591_v63  ;;  %v3272_v56 = vadd.f32 %v12711_v27, %v13993_v62  ;;  %5147 = vrot.lane.b32.xlu1 %v4442_v23, %s13299_s25  ;;  %v5083_v57 = vpack.c.bf16 %v14130_v37, %v5021_v33  ;;  %v14141_v13 = vsel %vm18283_vm2, %v3653_v61, %v3655_v4 }
 0x1dc   : > { %18593 = vst [vmem:[#allocation71_spill] sm:$0xff] %v18592_v63  ;;  %v3491_v1 = vmax.f32 %v3261_v12, 0.0  ;;  %v3264_v0 = vadd.f32 %v13993_v62, %v3263_v55  ;;  %v4196_v48 = vsel %vm18248_vm6, %v4193_v44, %v4195_v52  ;;  %v14146_v5 = vsel %vm18283_vm2, %v3655_v4, %v3657_v15 }
 0x1dd   : > { %v18594_v43 = vand.u32 15, %v13934_v40  ;;  %v18595_v23 = vmov 0  ;;  %v3663_v20 = vrot.slane %v3493_v2, 7  ;;  %v3494_v27 = vmax.f32 %v3272_v56, 0.0  ;;  %5245 = vrot.lane.b32.xlu0 %v5083_v57, %s13299_s25 }
 0x1de   : > { %v4443_v61 = vpack.c.bf16 %v4196_v48, %v4194_v19  ;;  %v5023_v12 = vsel %vm14100_vm8, %v14141_v13, 0.0  ;;  %v3659_v33 = vrot.slane %v3491_v1, 7  ;;  %v3492_v44 = vmax.f32 %v3264_v0, 0.0 }
 0x1df   : > { %vm14150_vm10 = vcmp.ge.s32.totalorder %v18594_v43, 1  ;;  %v5084_v4 = vpack.c.bf16 %v14146_v5, %v5023_v12  ;;  %v4197_v55 = vrot.slane %v14130_v37, 1  ;;  %v18598_v40 = vand.u32 15, %v13937_v38  ;;  %v12714_v46 = vpop.f32.mrb[44].mxu1 }
 0x1e0   : > { %v18596_v23 = vsel %vm14150_vm10, 4294967295, %v18595_v23  ;;  %v18599_v43 = vmov 0  ;;  %v3552_v56 = vpack.c.bf16 %v3494_v27, %v3493_v2  ;;  %v3665_v49 = vrot.slane %v3494_v27, 7  ;;  %5149 = vrot.lane.b32.xlu1 %v4443_v61, %s13299_s25 }
 0x1e1   : > { %18597 = vst [vmem:[#allocation72_spill] sm:$0xff] %v18596_v23  ;;  %vm14162_vm11 = vcmp.ge.s32.totalorder %v18598_v40, 1  ;;  %v4199_v48 = vrot.slane %v14141_v13, 1  ;;  %v4201_v19 = vrot.slane %v14146_v5, 1  ;;  %v3551_v57 = vpack.c.bf16 %v3492_v44, %v3491_v1  ;;  %v3276_v40 = vpop.f32.mrb[45].mxu1  ;;  %5247 = vrot.lane.b32.xlu0 %v5084_v4, %s13299_s25 }
 0x1e2   : > { %v18600_v43 = vsel %vm14162_vm11, 4294967295, %v18599_v43  ;;  %v3661_v0 = vrot.slane %v3492_v44, 7  ;;  %v4198_v12 = vsel %vm18248_vm6, %v4195_v52, %v4197_v55  ;;  %v14171_v53 = vsel %vm18283_vm2, %v3657_v15, %v3659_v33  ;;  %v12715_v44 = vpop.f32.mrb[46].mxu1 }
 0x1e3   : > { %18601 = vst [vmem:[#allocation73_spill] sm:$0xff] %v18600_v43  ;;  %v3285_v38 = vadd.f32 %v12714_v46, %v13993_v62  ;;  %v4200_v2 = vsel %vm18248_vm6, %v4197_v55, %v4199_v48  ;;  %v5025_v27 = vsel %vm14116_vm9, %v14171_v53, 0.0  ;;  %v4202_v1 = vsel %vm18248_vm6, %v4199_v48, %v4201_v19  ;;  %12780 = vmatprep.mubr.msk.bf16.mxu0 %vm18244_vm4, %v3551_v57  ;;  %v3279_v63 = vpop.f32.mrb[47].mxu1 }
 0x1e4   : > { %v3277_v61 = vadd.f32 %v13993_v62, %v3276_v40  ;;  %v4444_v52 = vpack.c.bf16 %v4200_v2, %v4198_v12  ;;  %v14182_v15 = vsel %vm18283_vm2, %v3659_v33, %v3661_v0  ;;  %v4203_v46 = vrot.slane %v14171_v53, 1  ;;  %12781 = vmatmul.mubr.msk.bf16.gmra.mrb[40].mxu0 %vm18244_vm4, %v3552_v56 }
 0x1e5   : > { %18602 = vst [vmem:[#allocation74_spill] sm:$0xff] %v14182_v15  ;;  %v18603_v4 = vand.u32 15, %v13942_v21  ;;  %v18604_v55 = vmov 0  ;;  %v3497_v24 = vmax.f32 %v3285_v38, 0.0  ;;  %v3288_v48 = vadd.f32 %v12715_v44, %v13993_v62 }
 0x1e6   : > { %v5085_v40 = vpack.c.bf16 %v14182_v15, %v5025_v27  ;;  %v14195_v12 = vsel %vm18283_vm2, %v3661_v0, %v3663_v20  ;;  %v3495_v33 = vmax.f32 %v3277_v61, 0.0  ;;  %5151 = vrot.lane.b32.xlu1 %v4444_v52, %s13299_s25  ;;  %v3280_v21 = vadd.f32 %v13993_v62, %v3279_v63 }
 0x1e7   : > { %vm14188_vm12 = vcmp.ge.s32.totalorder %v18603_v4, 1  ;;  %v4204_v57 = vsel %vm18248_vm6, %v4201_v19, %v4203_v46  ;;  %v14202_v2 = vsel %vm18283_vm2, %v3663_v20, %v3665_v49  ;;  %v3671_v38 = vrot.slane %v3497_v24, 7 }
 0x1e8   : > { %v18605_v55 = vsel %vm14188_vm12, 4294967295, %v18604_v55  ;;  %18607 = vst [vmem:[#allocation76_spill] sm:$0xff] %v14202_v2  ;;  %v3498_v44 = vmax.f32 %v3288_v48, 0.0  ;;  %5249 = vrot.lane.b32.xlu0 %v5085_v40, %s13299_s25  ;;  %v4445_v27 = vpack.c.bf16 %v4204_v57, %v4202_v1  ;;  %v5027_v0 = vsel %vm14150_vm10, %v14195_v12, 0.0 }
 0x1e9   : > { %18606 = vst [vmem:[#allocation75_spill] sm:$0xff] %v18605_v55  ;;  %v3667_v56 = vrot.slane %v3495_v33, 7  ;;  %v3496_v61 = vmax.f32 %v3280_v21, 0.0  ;;  %v5086_v52 = vpack.c.bf16 %v14202_v2, %v5027_v0  ;;  %v4205_v63 = vrot.slane %v14182_v15, 1  ;;  %v12718_v21 = vpop.f32.mrb[48].mxu1 }
 0x1ea   : > { %v18608_v19 = vand.u32 15, %v13949_v58  ;;  %v18609_v20 = vmov 0  ;;  %v3554_v4 = vpack.c.bf16 %v3498_v44, %v3497_v24  ;;  %v3673_v48 = vrot.slane %v3498_v44, 7  ;;  %5153 = vrot.lane.b32.xlu1 %v4445_v27, %s13299_s25 }
 0x1eb   : > { %v4207_v1 = vrot.slane %v14195_v12, 1  ;;  %v4209_v40 = vrot.slane %v14202_v2, 1  ;;  %v3553_v57 = vpack.c.bf16 %v3496_v61, %v3495_v33  ;;  %v3669_v23 = vrot.slane %v3496_v61, 7 }
 0x1ec   : > { %vm14212_vm13 = vcmp.ge.s32.totalorder %v18608_v19, 1  ;;  %v4206_v0 = vsel %vm18248_vm6, %v4203_v46, %v4205_v63  ;;  %v14221_v15 = vsel %vm18283_vm2, %v3665_v49, %v3667_v56  ;;  %v3301_v58 = vadd.f32 %v12718_v21, %v13993_v62  ;;  %v3292_v19 = vpop.f32.mrb[49].mxu1  ;;  %5251 = vrot.lane.b32.xlu0 %v5086_v52, %s13299_s25 }
 0x1ed   : > { %v18610_v20 = vsel %vm14212_vm13, 4294967295, %v18609_v20  ;;  %v4208_v24 = vsel %vm18248_vm6, %v4205_v63, %v4207_v1  ;;  %v5029_v33 = vsel %vm14162_vm11, %v14221_v15, 0.0  ;;  %v4210_v44 = vsel %vm18248_vm6, %v4207_v1, %v4209_v40  ;;  %v12719_v61 = vpop.f32.mrb[50].mxu1  ;;  %12784 = vmatprep.mubr.msk.bf16.mxu0 %vm18244_vm4, %v3553_v57 }
 0x1ee   : > { %18611 = vst [vmem:[#allocation77_spill] sm:$0xff] %v18610_v20  ;;  %v3293_v27 = vadd.f32 %v13993_v62, %v3292_v19  ;;  %v4446_v46 = vpack.c.bf16 %v4208_v24, %v4206_v0  ;;  %v14232_v49 = vsel %vm18283_vm2, %v3667_v56, %v3669_v23  ;;  %v4211_v21 = vrot.slane %v14221_v15, 1  ;;  %v3295_v43 = vpop.f32.mrb[51].mxu1  ;;  %12785 = vmatmul.mubr.msk.bf16.gmra.mrb[44].mxu0 %vm18244_vm4, %v3554_v4 }
 0x1ef   : > { %18612 = vst [vmem:[#allocation78_spill] sm:$0xff] %v14232_v49  ;;  %v18613_v2 = vand.u32 15, %v13952_v6  ;;  %v18614_v52 = vmov 0  ;;  %v3501_v63 = vmax.f32 %v3301_v58, 0.0  ;;  %v3304_v1 = vadd.f32 %v12719_v61, %v13993_v62 }
 0x1f0   : > { %v5087_v19 = vpack.c.bf16 %v14232_v49, %v5029_v33  ;;  %v14245_v0 = vsel %vm18283_vm2, %v3669_v23, %v3671_v38  ;;  %v3499_v56 = vmax.f32 %v3293_v27, 0.0  ;;  %5155 = vrot.lane.b32.xlu1 %v4446_v46, %s13299_s25  ;;  %v3296_v6 = vadd.f32 %v13993_v62, %v3295_v43 }
 0x1f1   : > { %vm14237_vm14 = vcmp.ge.s32.totalorder %v18613_v2, 1  ;;  %v4212_v2 = vsel %vm18248_vm6, %v4209_v40, %v4211_v21  ;;  %v14252_v57 = vsel %vm18283_vm2, %v3671_v38, %v3673_v48  ;;  %v3679_v58 = vrot.slane %v3501_v63, 7 }
 0x1f2   : > { %v18615_v52 = vsel %vm14237_vm14, 4294967295, %v18614_v52  ;;  %18617 = vst [vmem:[#allocation80_spill] sm:$0xff] %v14252_v57  ;;  %v3502_v24 = vmax.f32 %v3304_v1, 0.0  ;;  %5253 = vrot.lane.b32.xlu0 %v5087_v19, %s13299_s25  ;;  %v4447_v33 = vpack.c.bf16 %v4212_v2, %v4210_v44  ;;  %v5031_v23 = vsel %vm14188_vm12, %v14245_v0, 0.0 }
 0x1f3   : > { %18616 = vst [vmem:[#allocation79_spill] sm:$0xff] %v18615_v52  ;;  %v3675_v4 = vrot.slane %v3499_v56, 7  ;;  %v3500_v27 = vmax.f32 %v3296_v6, 0.0  ;;  %v5088_v61 = vpack.c.bf16 %v14252_v57, %v5031_v23  ;;  %v4213_v43 = vrot.slane %v14232_v49, 1  ;;  %v12722_v6 = vpop.f32.mrb[52].mxu1 }
 0x1f4   : > { %v18618_v40 = vand.u32 15, %v13955_v16  ;;  %v18619_v38 = vmov 0  ;;  %v3556_v46 = vpack.c.bf16 %v3502_v24, %v3501_v63  ;;  %v3681_v1 = vrot.slane %v3502_v24, 7  ;;  %5157 = vrot.lane.b32.xlu1 %v4447_v33, %s13299_s25 }
 0x1f5   : > { %v4215_v44 = vrot.slane %v14245_v0, 1  ;;  %v4217_v19 = vrot.slane %v14252_v57, 1  ;;  %v3555_v2 = vpack.c.bf16 %v3500_v27, %v3499_v56  ;;  %v3677_v55 = vrot.slane %v3500_v27, 7 }
 0x1f6   : > { %vm14262_vm15 = vcmp.ge.s32.totalorder %v18618_v40, 1  ;;  %v4214_v23 = vsel %vm18248_vm6, %v4211_v21, %v4213_v43  ;;  %v14271_v49 = vsel %vm18283_vm2, %v3673_v48, %v3675_v4  ;;  %v3317_v16 = vadd.f32 %v12722_v6, %v13993_v62  ;;  %v3308_v40 = vpop.f32.mrb[53].mxu1  ;;  %5255 = vrot.lane.b32.xlu0 %v5088_v61, %s13299_s25 }
 0x1f7   : > { %v18620_v38 = vsel %vm14262_vm15, 4294967295, %v18619_v38  ;;  %v4216_v63 = vsel %vm18248_vm6, %v4213_v43, %v4215_v44  ;;  %v5033_v56 = vsel %vm14212_vm13, %v14271_v49, 0.0  ;;  %v4218_v24 = vsel %vm18248_vm6, %v4215_v44, %v4217_v19  ;;  %v12723_v27 = vpop.f32.mrb[54].mxu1  ;;  %12788 = vmatprep.mubr.msk.bf16.mxu0 %vm18244_vm4, %v3555_v2 }
 0x1f8   : > { %18621 = vst [vmem:[#allocation81_spill] sm:$0xff] %v18620_v38  ;;  %v3309_v33 = vadd.f32 %v13993_v62, %v3308_v40  ;;  %v4448_v21 = vpack.c.bf16 %v4216_v63, %v4214_v23  ;;  %v14282_v48 = vsel %vm18283_vm2, %v3675_v4, %v3677_v55  ;;  %v4219_v6 = vrot.slane %v14271_v49, 1  ;;  %v3311_v20 = vpop.f32.mrb[55].mxu1  ;;  %12789 = vmatmul.mubr.msk.bf16.gmra.mrb[48].mxu0 %vm18244_vm4, %v3556_v46 }
 0x1f9   : > { %18622 = vst [vmem:[#allocation82_spill] sm:$0xff] %v14282_v48  ;;  %v18623_v57 = vand.u32 15, %v13960_v17  ;;  %v18624_v61 = vmov 0  ;;  %v3505_v43 = vmax.f32 %v3317_v16, 0.0  ;;  %v3320_v44 = vadd.f32 %v12723_v27, %v13993_v62 }
 0x1fa   : > { %v5089_v40 = vpack.c.bf16 %v14282_v48, %v5033_v56  ;;  %v14295_v23 = vsel %vm18283_vm2, %v3677_v55, %v3679_v58  ;;  %v3503_v4 = vmax.f32 %v3309_v33, 0.0  ;;  %5159 = vrot.lane.b32.xlu1 %v4448_v21, %s13299_s25  ;;  %v3312_v17 = vadd.f32 %v13993_v62, %v3311_v20 }
 0x1fb   : > { %vm14287_vm1 = vcmp.ge.s32.totalorder %v18623_v57, 1  ;;  %v4220_v57 = vsel %vm18248_vm6, %v4217_v19, %v4219_v6  ;;  %v14302_v2 = vsel %vm18283_vm2, %v3679_v58, %v3681_v1  ;;  %v3687_v16 = vrot.slane %v3505_v43, 7 }
 0x1fc   : > { %v18625_v61 = vsel %vm14287_vm1, 4294967295, %v18624_v61  ;;  %18627 = vst [vmem:[#allocation84_spill] sm:$0xff] %v14302_v2  ;;  %v3506_v63 = vmax.f32 %v3320_v44, 0.0  ;;  %5257 = vrot.lane.b32.xlu0 %v5089_v40, %s13299_s25  ;;  %v4449_v56 = vpack.c.bf16 %v4220_v57, %v4218_v24  ;;  %v5035_v55 = vsel %vm14237_vm14, %v14295_v23, 0.0 }
 0x1fd   : > { %18626 = vst [vmem:[#allocation83_spill] sm:$0xff] %v18625_v61  ;;  %v3683_v46 = vrot.slane %v3503_v4, 7  ;;  %v3504_v33 = vmax.f32 %v3312_v17, 0.0  ;;  %v5090_v27 = vpack.c.bf16 %v14302_v2, %v5035_v55  ;;  %v4221_v20 = vrot.slane %v14282_v48, 1  ;;  %v12726_v17 = vpop.f32.mrb[56].mxu1 }
 0x1fe   : > { %v18628_v19 = vand.u32 15, %v13963_v39  ;;  %v18629_v58 = vmov 0  ;;  %v3558_v21 = vpack.c.bf16 %v3506_v63, %v3505_v43  ;;  %v3689_v44 = vrot.slane %v3506_v63, 7  ;;  %5161 = vrot.lane.b32.xlu1 %v4449_v56, %s13299_s25 }
 0x1ff   : > { %v4223_v24 = vrot.slane %v14295_v23, 1  ;;  %v4225_v40 = vrot.slane %v14302_v2, 1  ;;  %v3557_v57 = vpack.c.bf16 %v3504_v33, %v3503_v4  ;;  %v3685_v52 = vrot.slane %v3504_v33, 7 }
 0x200   : > { %vm14312_vm0 = vcmp.ge.s32.totalorder %v18628_v19, 1  ;;  %v4222_v55 = vsel %vm18248_vm6, %v4219_v6, %v4221_v20  ;;  %v14321_v48 = vsel %vm18283_vm2, %v3681_v1, %v3683_v46  ;;  %v3333_v39 = vadd.f32 %v12726_v17, %v13993_v62  ;;  %v3324_v19 = vpop.f32.mrb[57].mxu1  ;;  %5259 = vrot.lane.b32.xlu0 %v5090_v27, %s13299_s25 }
 0x201   : > { %v18630_v58 = vsel %vm14312_vm0, 4294967295, %v18629_v58  ;;  %v4224_v43 = vsel %vm18248_vm6, %v4221_v20, %v4223_v24  ;;  %v5037_v4 = vsel %vm14262_vm15, %v14321_v48, 0.0  ;;  %v4226_v63 = vsel %vm18248_vm6, %v4223_v24, %v4225_v40  ;;  %v12727_v33 = vpop.f32.mrb[58].mxu1 }
 0x202   : > { %18631 = vst [vmem:[#allocation85_spill] sm:$0xff] %v18630_v58  ;;  %v3325_v56 = vadd.f32 %v13993_v62, %v3324_v19  ;;  %v4450_v6 = vpack.c.bf16 %v4224_v43, %v4222_v55  ;;  %v14332_v1 = vsel %vm18283_vm2, %v3683_v46, %v3685_v52  ;;  %v4227_v17 = vrot.slane %v14321_v48, 1  ;;  %v3327_v38 = vpop.f32.mrb[59].mxu1 }
 0x203   : > { %18632 = vst [vmem:[#allocation86_spill] sm:$0xff] %v14332_v1  ;;  %v18633_v2 = vand.u32 15, %v13968_v42  ;;  %v18634_v27 = vmov 0  ;;  %vm18637_vm3 = vcmask 523264   ;;  %v3509_v20 = vmax.f32 %v3333_v39, 0.0 }
 0x204   : > { %12792 = vmatprep.mubr.msk.bf16.mxu0 %vm18637_vm3, %v3557_v57  ;;  %v3336_v24 = vadd.f32 %v12727_v33, %v13993_v62  ;;  %v5091_v19 = vpack.c.bf16 %v14332_v1, %v5037_v4  ;;  %v14345_v55 = vsel %vm18283_vm2, %v3685_v52, %v3687_v16  ;;  %vm18639_vm6 = vmmov %vm18637_vm3  ;;  %v3507_v46 = vmax.f32 %v3325_v56, 0.0  ;;  %5163 = vrot.lane.b32.xlu1 %v4450_v6, %s13299_s25 }
 0x205   : > { %vm14337_vm4 = vcmp.ge.s32.totalorder %v18633_v2, 1  ;;  %18638 = vst [vmem:[#allocation88_spill] sm:$0xff] %v14345_v55  ;;  %12793 = vmatmul.mubr.msk.bf16.gmra.mrb[52].mxu0 %vm18639_vm6, %v3558_v21  ;;  %v3328_v42 = vadd.f32 %v13993_v62, %v3327_v38  ;;  %vm18640_vm15 = vcmask 1046528   ;;  %v14352_v57 = vsel %vm18283_vm2, %v3687_v16, %v3689_v44 }
 0x206   : > { %v18635_v27 = vsel %vm14337_vm4, 4294967295, %v18634_v27  ;;  %v4228_v2 = vsel %vm18640_vm15, %v4225_v40, %v4227_v17  ;;  %18641 = vst [vmem:[#allocation89_spill] sm:$0xff] %v14352_v57  ;;  %v3695_v39 = vrot.slane %v3509_v20, 7  ;;  %v3510_v43 = vmax.f32 %v3336_v24, 0.0  ;;  %5261 = vrot.lane.b32.xlu0 %v5091_v19, %s13299_s25  ;;  %vm18646_vm6 = vmmov %vm18640_vm15 }
 0x207   : > { %18636 = vst [vmem:[#allocation87_spill] sm:$0xff] %v18635_v27  ;;  %v4451_v4 = vpack.c.bf16 %v4228_v2, %v4226_v63  ;;  %v5039_v52 = vsel %vm14287_vm1, %v14345_v55, 0.0  ;;  %v3691_v21 = vrot.slane %v3507_v46, 7  ;;  %v3508_v56 = vmax.f32 %v3328_v42, 0.0  ;;  %v12730_v42 = vpop.f32.mrb[60].mxu1  ;;  %vm18647_vm15 = vmmov %vm18646_vm6 }
 0x208   : > { %v5092_v33 = vpack.c.bf16 %v14352_v57, %v5039_v52  ;;  %v4229_v38 = vrot.slane %v14332_v1, 1  ;;  %v18642_v40 = vand.u32 15, %v13971_v28  ;;  %v18643_v16 = vmov 0  ;;  %vm18648_vm1 = vmmov %vm18646_vm6 }
 0x209   : > { %v3560_v6 = vpack.c.bf16 %v3510_v43, %v3509_v20  ;;  %v3697_v24 = vrot.slane %v3510_v43, 7  ;;  %v4231_v63 = vrot.slane %v14345_v55, 1  ;;  %v4233_v19 = vrot.slane %v14352_v57, 1  ;;  %5165 = vrot.lane.b32.xlu1 %v4451_v4, %s13299_s25 }
 0x20a   : > { %vm14362_vm3 = vcmp.ge.s32.totalorder %v18642_v40, 1  ;;  %v3559_v2 = vpack.c.bf16 %v3508_v56, %v3507_v46  ;;  %v3693_v61 = vrot.slane %v3508_v56, 7  ;;  %v4230_v52 = vsel %vm18646_vm6, %v4227_v17, %v4229_v38  ;;  %v3340_v40 = vpop.f32.mrb[61].mxu1  ;;  %5263 = vrot.lane.b32.xlu0 %v5092_v33, %s13299_s25 }
 0x20b   : > { %v18644_v16 = vsel %vm14362_vm3, 4294967295, %v18643_v16  ;;  %v14371_v1 = vsel %vm18283_vm2, %v3689_v44, %v3691_v21  ;;  %v3349_v28 = vadd.f32 %v12730_v42, %v13993_v62  ;;  %v4232_v20 = vsel %vm18647_vm15, %v4229_v38, %v4231_v63  ;;  %v12731_v56 = vpop.f32.mrb[62].mxu1 }
 0x20c   : > { %18645 = vst [vmem:[#allocation90_spill] sm:$0xff] %v18644_v16  ;;  %v5041_v46 = vsel %vm14312_vm0, %v14371_v1, 0.0  ;;  %v4234_v43 = vsel %vm18648_vm1, %v4231_v63, %v4233_v19  ;;  %v3341_v4 = vadd.f32 %v13993_v62, %v3340_v40  ;;  %v4452_v17 = vpack.c.bf16 %v4232_v20, %v4230_v52  ;;  %v3343_v57 = vpop.f32.mrb[63].mxu1 }
 0x20d   : > { %v14382_v44 = vsel %vm18283_vm2, %v3691_v21, %v3693_v61  ;;  %v4235_v42 = vrot.slane %v14371_v1, 1  ;;  %vm18649_vm6 = vcmask 523264   ;;  %v3513_v33 = vmax.f32 %v3349_v28, 0.0 }
 0x20e   : > { %12796 = vmatprep.mubr.msk.bf16.mxu0 %vm18649_vm6, %v3559_v2  ;;  %v3352_v38 = vadd.f32 %v12731_v56, %v13993_v62  ;;  %v5093_v58 = vpack.c.bf16 %v14382_v44, %v5041_v46  ;;  %v14389_v55 = vsel %vm18283_vm2, %v3693_v61, %v3695_v39  ;;  %v18651_v63 = vand.u32 15, %v13976_v10  ;;  %vm18655_vm15 = vmmov %vm18649_vm6  ;;  %5167 = vrot.lane.b32.xlu1 %v4452_v17, %s13299_s25 }
 0x20f   : > { %18650 = vst [vmem:[#allocation91_spill] sm:$0xff] %v14389_v55  ;;  %v18652_v52 = vmov 0  ;;  %12797 = vmatmul.mubr.msk.bf16.gmra.mrb[56].mxu0 %vm18655_vm15, %v3560_v6  ;;  %v3511_v21 = vmax.f32 %v3341_v4, 0.0  ;;  %v3344_v2 = vadd.f32 %v13993_v62, %v3343_v57  ;;  %vm18656_vm6 = vcmask 1046528  }
 0x210   : > { %vm14393_vm1 = vcmp.ge.s32.totalorder %v18651_v63, 1  ;;  %v4236_v28 = vsel %vm18656_vm6, %v4233_v19, %v4235_v42  ;;  %v14402_v40 = vsel %vm18283_vm2, %v3695_v39, %v3697_v24  ;;  %v3703_v61 = vrot.slane %v3513_v33, 7  ;;  %5265 = vrot.lane.b32.xlu0 %v5093_v58, %s13299_s25  ;;  %vm18666_vm0 = vmmov %vm18656_vm6 }
 0x211   : > { %v18653_v52 = vsel %vm14393_vm1, 4294967295, %v18652_v52  ;;  %18657 = vst [vmem:[#allocation93_spill] sm:$0xff] %v14402_v40  ;;  %v3514_v20 = vmax.f32 %v3352_v38, 0.0  ;;  %v4453_v10 = vpack.c.bf16 %v4236_v28, %v4234_v43  ;;  %v5043_v46 = vsel %vm14337_vm4, %v14389_v55, 0.0 }
 0x212   : > { %18654 = vst [vmem:[#allocation92_spill] sm:$0xff] %v18653_v52  ;;  %v3699_v6 = vrot.slane %v3511_v21, 7  ;;  %v3512_v4 = vmax.f32 %v3344_v2, 0.0  ;;  %v5094_v56 = vpack.c.bf16 %v14402_v40, %v5043_v46  ;;  %v4237_v57 = vrot.slane %v14382_v44, 1  ;;  %v12734_v2 = vpop.f32.mrb[64].mxu1 }
 0x213   : > { %v18658_v19 = vand.u32 15, %v13979_v51  ;;  %v18659_v39 = vmov 0  ;;  %v3562_v17 = vpack.c.bf16 %v3514_v20, %v3513_v33  ;;  %v3705_v38 = vrot.slane %v3514_v20, 7  ;;  %5169 = vrot.lane.b32.xlu1 %v4453_v10, %s13299_s25  ;;  %v3356_v20 = vpop.f32.mrb[65].mxu1 }
 0x214   : > { %v4239_v58 = vrot.slane %v14389_v55, 1  ;;  %v4241_v43 = vrot.slane %v14402_v40, 1  ;;  %v3561_v63 = vpack.c.bf16 %v3512_v4, %v3511_v21  ;;  %v3701_v28 = vrot.slane %v3512_v4, 7  ;;  %5267 = vrot.lane.b32.xlu0 %v5094_v56, %s13299_s25 }
 0x215   : > { %vm14412_vm15 = vcmp.ge.s32.totalorder %v18658_v19, 1  ;;  %v4238_v46 = vsel %vm18656_vm6, %v4235_v42, %v4237_v57  ;;  %v14421_v27 = vsel %vm18283_vm2, %v3697_v24, %v3699_v6  ;;  %v18662_v51 = vand.u32 15, %v13982_v36  ;;  %vm18667_vm6 = vmmov %vm18666_vm0  ;;  %v12735_v36 = vpop.f32.mrb[66].mxu1 }
 0x216   : > { %v18660_v39 = vsel %vm14412_vm15, 4294967295, %v18659_v39  ;;  %v18663_v19 = vmov 0  ;;  %v3365_v33 = vadd.f32 %v12734_v2, %v13993_v62  ;;  %v4240_v21 = vsel %vm18666_vm0, %v4237_v57, %v4239_v58  ;;  %v3359_v40 = vpop.f32.mrb[67].mxu1 }
 0x217   : > { %18661 = vst [vmem:[#allocation94_spill] sm:$0xff] %v18660_v39  ;;  %vm14425_vm4 = vcmp.ge.s32.totalorder %v18662_v51, 1  ;;  %v5045_v42 = vsel %vm14362_vm3, %v14421_v27, 0.0  ;;  %v4242_v24 = vsel %vm18667_vm6, %v4239_v58, %v4241_v43  ;;  %v3357_v10 = vadd.f32 %v13993_v62, %v3356_v20 }
 0x218   : > { %v18664_v19 = vsel %vm14425_vm4, 4294967295, %v18663_v19  ;;  %v4454_v4 = vpack.c.bf16 %v4240_v21, %v4238_v46  ;;  %v14438_v51 = vsel %vm18283_vm2, %v3699_v6, %v3701_v28  ;;  %v4243_v2 = vrot.slane %v14421_v27, 1 }
 0x219   : > { %18665 = vst [vmem:[#allocation95_spill] sm:$0xff] %v18664_v19  ;;  %vm18668_vm14 = vcmask 523264   ;;  %v3517_v56 = vmax.f32 %v3365_v33, 0.0  ;;  %v3368_v57 = vadd.f32 %v12735_v36, %v13993_v62  ;;  %v5095_v16 = vpack.c.bf16 %v14438_v51, %v5045_v42 }
 0x21a   : > { %12800 = vmatprep.mubr.msk.bf16.mxu0 %vm18668_vm14, %v3561_v63  ;;  %v14445_v55 = vsel %vm18283_vm2, %v3701_v28, %v3703_v61  ;;  %vm18669_vm0 = vmmov %vm18668_vm14  ;;  %v3515_v58 = vmax.f32 %v3357_v10, 0.0  ;;  %5171 = vrot.lane.b32.xlu1 %v4454_v4, %s13299_s25  ;;  %v3360_v6 = vadd.f32 %v13993_v62, %v3359_v40  ;;  %v4244_v46 = vsel %vm18667_vm6, %v4241_v43, %v4243_v2 }
 0x21b   : > { %12801 = vmatmul.mubr.msk.bf16.gmra.mrb[60].mxu0 %vm18669_vm0, %v3562_v17  ;;  %v3706_v63 = vsel %vm18283_vm2, %v3703_v61, %v3705_v38  ;;  %v3711_v20 = vrot.slane %v3517_v56, 7  ;;  %v3518_v21 = vmax.f32 %v3368_v57, 0.0  ;;  %5269 = vrot.lane.b32.xlu0 %v5095_v16, %s13299_s25  ;;  %v4455_v42 = vpack.c.bf16 %v4244_v46, %v4242_v24  ;;  %vm18674_vm0 = vmmov %vm18667_vm6 }
 0x21c   : > { %v3707_v28 = vrot.slane %v3515_v58, 7  ;;  %v3516_v36 = vmax.f32 %v3360_v6, 0.0  ;;  %v5047_v17 = vsel %vm14393_vm1, %v14445_v55, 0.0  ;;  %v4245_v10 = vrot.slane %v14438_v51, 1  ;;  %v12738_v6 = vpop.f32.mrb[68].mxu1  ;;  %vm18676_vm6 = vmmov %vm18674_vm0 }
 0x21d   : > { %v18670_v40 = vand.u32 15, %v13988_v9  ;;  %v18671_v43 = vmov 0  ;;  %v3564_v61 = vpack.c.bf16 %v3518_v21, %v3517_v56  ;;  %v3713_v4 = vrot.slane %v3518_v21, 7 }
 0x21e   : > { %v5096_v57 = vpack.c.bf16 %v3706_v63, %v5047_v17  ;;  %v4247_v16 = vrot.slane %v14445_v55, 1  ;;  %v3563_v24 = vpack.c.bf16 %v3516_v36, %v3515_v58  ;;  %v3709_v46 = vrot.slane %v3516_v36, 7  ;;  %5173 = vrot.lane.b32.xlu1 %v4455_v42, %s13299_s25 }
 0x21f   : > { %vm14460_vm14 = vcmp.ge.s32.totalorder %v18670_v40, 1  ;;  %v4246_v33 = vsel %vm18674_vm0, %v4243_v2, %v4245_v10  ;;  %v14468_v52 = vsel %vm18283_vm2, %v3705_v38, %v3707_v28  ;;  %v3381_v9 = vadd.f32 %v12738_v6, %v13993_v62  ;;  %v3372_v40 = vpop.f32.mrb[69].mxu1 }
 0x220   : > { %v18672_v43 = vsel %vm14460_vm14, 4294967295, %v18671_v43  ;;  %18675 = vst [vmem:[#allocation97_spill] sm:$0xff] %v14468_v52  ;;  %5271 = vrot.lane.b32.xlu0 %v5096_v57, %s13299_s25  ;;  %v4248_v56 = vsel %vm18676_vm6, %v4245_v10, %v4247_v16  ;;  %v5049_v58 = vsel %vm14412_vm15, %v14468_v52, 0.0  ;;  %v14477_v63 = vsel %vm18283_vm2, %v3711_v20, %v3713_v4  ;;  %v12739_v42 = vpop.f32.mrb[70].mxu1 }
 0x221   : > { %18673 = vst [vmem:[#allocation96_spill] sm:$0xff] %v18672_v43  ;;  %18677 = vst [vmem:[#allocation98_spill] sm:$0xff] %v14477_v63  ;;  %v18678_v21 = vand.u32 15, %v14002_v7  ;;  %v18679_v2 = vmov 0  ;;  %v3373_v38 = vadd.f32 %v13993_v62, %v3372_v40  ;;  %v4456_v36 = vpack.c.bf16 %v4248_v56, %v4246_v33  ;;  %v3375_v7 = vpop.f32.mrb[71].mxu1 }
 0x222   : > { %v14487_v17 = vsel %vm18283_vm2, %v3707_v28, %v3709_v46  ;;  %v14490_v10 = vsel %vm18283_vm2, %v3709_v46, %v3711_v20  ;;  %vm18684_vm6 = vcmask 523264   ;;  %v3521_v57 = vmax.f32 %v3381_v9, 0.0 }
 0x223   : > { %vm14481_vm0 = vcmp.ge.s32.totalorder %v18678_v21, 1  ;;  %18682 = vst [vmem:[#allocation100_spill] sm:$0xff] %v14487_v17  ;;  %18683 = vst [vmem:[#allocation101_spill] sm:$0xff] %v14490_v10  ;;  %12804 = vmatprep.mubr.msk.bf16.mxu0 %vm18684_vm6, %v3563_v24  ;;  %v3384_v16 = vadd.f32 %v12739_v42, %v13993_v62  ;;  %v5097_v6 = vpack.c.bf16 %v14487_v17, %v5049_v58  ;;  %v5051_v40 = vsel %vm14425_vm4, %v14490_v10, 0.0 }
 0x224   : > { %v18680_v2 = vsel %vm14481_vm0, 4294967295, %v18679_v2  ;;  %vm18685_vm15 = vmmov %vm18684_vm6  ;;  %v3519_v33 = vmax.f32 %v3373_v38, 0.0  ;;  %5175 = vrot.lane.b32.xlu1 %v4456_v36, %s13299_s25  ;;  %v3376_v20 = vadd.f32 %v13993_v62, %v3375_v7  ;;  %v4251_v28 = vrot.slane %v14468_v52, 1 }
 0x225   : > { %18681 = vst [vmem:[#allocation99_spill] sm:$0xff] %v18680_v2  ;;  %12805 = vmatmul.mubr.msk.bf16.gmra.mrb[64].mxu0 %vm18685_vm15, %v3564_v61  ;;  %v18686_v24 = vrot.slane %v14083_v41, 2  ;;  %v18687_v46 = vrot.slane %v14063_v31, 2  ;;  %vm18688_vm6 = vcmask 1045504   ;;  %v3522_v56 = vmax.f32 %v3384_v16, 0.0  ;;  %5273 = vrot.lane.b32.xlu0 %v5097_v6, %s13299_s25 }
 0x226   : > { %v5098_v58 = vpack.c.bf16 %v14477_v63, %v5051_v40  ;;  %v4253_v61 = vrot.slane %v14487_v17, 1  ;;  %v4255_v21 = vrot.slane %v14490_v10, 1  ;;  %v3719_v38 = vrot.slane %v3521_v57, 7 }
 0x227   : > { %v14507_v9 = vsel %vm18688_vm6, %v18687_v46, %v18686_v24  ;;  %v3715_v42 = vrot.slane %v3519_v33, 7  ;;  %v3520_v36 = vmax.f32 %v3376_v20, 0.0  ;;  %v4257_v7 = vrot.slane %v14477_v63, 1  ;;  %v12742_v20 = vpop.f32.mrb[72].mxu1 }
 0x228   : > { %v18689_v39 = vand.u32 15, %v14005_v22  ;;  %v18690_v19 = vmov 0  ;;  %v3566_v16 = vpack.c.bf16 %v3522_v56, %v3521_v57  ;;  %v3721_v24 = vrot.slane %v3522_v56, 7 }
 0x229   : > { %vm18693_vm6 = vcmask 1046528   ;;  %v3565_v46 = vpack.c.bf16 %v3520_v36, %v3519_v33  ;;  %v3717_v52 = vrot.slane %v3520_v36, 7  ;;  %v18695_v10 = vmov 0.0|0.0   ;;  %5275 = vrot.lane.b32.xlu0 %v5098_v58, %s13299_s25 }
 0x22a   : > { %vm14516_vm15 = vcmp.ge.s32.totalorder %v18689_v39, 1  ;;  %v4254_v6 = vsel %vm18693_vm6, %v4251_v28, %v4253_v61  ;;  %vm18694_vm2 = vmmov %vm18693_vm6  ;;  %5177 = vrot.lane.b32.xlu1 %v18695_v10, %s13299_s25  ;;  %vm18696_vm4 = vcmask 1040384   ;;  %v3397_v22 = vadd.f32 %v12742_v20, %v13993_v62  ;;  %v3388_v39 = vpop.f32.mrb[73].mxu1 }
 0x22b   : > { %v18691_v19 = vsel %vm14516_vm15, 4294967295, %v18690_v19  ;;  %v4256_v40 = vsel %vm18694_vm2, %v4253_v61, %v4255_v21  ;;  %v14525_v63 = vsel %vm18696_vm4, %v3713_v4, %v3715_v42  ;;  %v4258_v33 = vsel %vm18694_vm2, %v4255_v21, %v4257_v7  ;;  %v12743_v36 = vpop.f32.mrb[74].mxu1  ;;  %vm18702_vm1 = vmmov %vm18696_vm4 }
 0x22c   : > { %18692 = vst [vmem:[#allocation102_spill] sm:$0xff] %v18691_v19  ;;  %v4458_v17 = vpack.c.bf16 %v4256_v40, %v4254_v6  ;;  %v5053_v57 = vsel %vm14460_vm14, %v14525_v63, 0.0  ;;  %v4259_v28 = vrot.slane %v14525_v63, 1  ;;  %v18697_v56 = vand.u32 15, %v14010_v11  ;;  %vm18704_vm14 = vmmov %vm18702_vm1 }
 0x22d   : > { %v18698_v61 = vmov 0  ;;  %v3389_v4 = vadd.f32 %v13993_v62, %v3388_v39  ;;  %v14542_v6 = vsel %vm18696_vm4, %v3715_v42, %v3717_v52  ;;  %v14545_v58 = vsel %vm18702_vm1, %v3717_v52, %v3719_v38 }
 0x22e   : > { %vm14536_vm6 = vcmp.ge.s32.totalorder %v18697_v56, 1  ;;  %18701 = vst [vmem:[#allocation104_spill] sm:$0xff] %v14542_v6  ;;  %18703 = vst [vmem:[#allocation105_spill] sm:$0xff] %v14545_v58  ;;  %v14548_v40 = vsel %vm18704_vm14, %v3719_v38, %v3721_v24  ;;  %v18706_v21 = vand.u32 15, %v13924_v29  ;;  %v18707_v11 = vmov 0  ;;  %v3391_v56 = vpop.f32.mrb[75].mxu1  ;;  %5179 = vrot.lane.b32.xlu1 %v4458_v17, %s13299_s25 }
 0x22f   : > { %v18699_v61 = vsel %vm14536_vm6, 4294967295, %v18698_v61  ;;  %18705 = vst [vmem:[#allocation106_spill] sm:$0xff] %v14548_v40  ;;  %vm18710_vm3 = vcmask 523264   ;;  %v3525_v20 = vmax.f32 %v3397_v22, 0.0  ;;  %v3400_v39 = vadd.f32 %v12743_v36, %v13993_v62 }
 0x230   : > { %18700 = vst [vmem:[#allocation103_spill] sm:$0xff] %v18699_v61  ;;  %vm14552_vm2 = vcmp.lt.s32.totalorder %v18706_v21, 15  ;;  %12808 = vmatprep.mubr.msk.bf16.mxu0 %vm18710_vm3, %v3565_v46  ;;  %v5099_v42 = vpack.c.bf16 %v14542_v6, %v5053_v57  ;;  %vm18711_vm4 = vcmask 1046528   ;;  %vm18712_vm1 = vmmov %vm18710_vm3  ;;  %v3523_v38 = vmax.f32 %v3389_v4, 0.0 }
 0x231   : > { %v18708_v11 = vsel %vm14552_vm2, 4294967295, %v18707_v11  ;;  %v4260_v52 = vsel %vm18711_vm4, %v4257_v7, %v4259_v28  ;;  %12809 = vmatmul.mubr.msk.bf16.gmra.mrb[68].mxu0 %vm18712_vm1, %v3566_v16  ;;  %v3392_v29 = vadd.f32 %v13993_v62, %v3391_v56  ;;  %v5055_v46 = vsel %vm14481_vm0, %v14545_v58, 0.0  ;;  %vm18713_vm3 = vmmov %vm18711_vm4 }
 0x232   : > { %18709 = vst [vmem:[#allocation107_spill] sm:$0xff] %v18708_v11  ;;  %v4459_v21 = vpack.c.bf16 %v4260_v52, %v4258_v33  ;;  %v3727_v22 = vrot.slane %v3525_v20, 7  ;;  %v3526_v43 = vmax.f32 %v3400_v39, 0.0  ;;  %5277 = vrot.lane.b32.xlu0 %v5099_v42, %s13299_s25  ;;  %v5100_v57 = vpack.c.bf16 %v14548_v40, %v5055_v46  ;;  %vm18721_vm1 = vmmov %vm18713_vm3 }
 0x233   : > { %v4261_v7 = vrot.slane %v14542_v6, 1  ;;  %v3723_v36 = vrot.slane %v3523_v38, 7  ;;  %v3524_v16 = vmax.f32 %v3392_v29, 0.0  ;;  %v4263_v4 = vrot.slane %v14545_v58, 1 }
 0x234   : > { %v4265_v17 = vrot.slane %v14548_v40, 1  ;;  %v3568_v56 = vpack.c.bf16 %v3526_v43, %v3525_v20  ;;  %v3729_v33 = vrot.slane %v3526_v43, 7  ;;  %v18714_v2 = vand.u32 15, %v14013_v18  ;;  %5181 = vrot.lane.b32.xlu1 %v4459_v21, %s13299_s25  ;;  %v12746_v43 = vpop.f32.mrb[76].mxu1 }
 0x235   : > { %v4262_v52 = vsel %vm18713_vm3, %v4259_v28, %v4261_v7  ;;  %v18715_v39 = vmov 0  ;;  %v18718_v42 = vrot.slane %v14086_v54, 2  ;;  %v18719_v46 = vrot.slane %v14083_v41, 2  ;;  %v3404_v20 = vpop.f32.mrb[77].mxu1 }
 0x236   : > { %vm14574_vm14 = vcmp.ge.s32.totalorder %v18714_v2, 1  ;;  %vm18720_vm4 = vcmask 1045504   ;;  %v3567_v58 = vpack.c.bf16 %v3524_v16, %v3523_v38  ;;  %v3725_v6 = vrot.slane %v3524_v16, 7  ;;  %5279 = vrot.lane.b32.xlu0 %v5100_v57, %s13299_s25  ;;  %v12747_v16 = vpop.f32.mrb[78].mxu1 }
 0x237   : > { %v18716_v39 = vsel %vm14574_vm14, 4294967295, %v18715_v39  ;;  %v14583_v29 = vsel %vm18720_vm4, %v18719_v46, %v18718_v42  ;;  %v4264_v28 = vsel %vm18721_vm1, %v4261_v7, %v4263_v4  ;;  %vm18722_vm3 = vcmask 1040384   ;;  %vm18723_vm4 = vmmov %vm18721_vm1 }
 0x238   : > { %18717 = vst [vmem:[#allocation108_spill] sm:$0xff] %v18716_v39  ;;  %v14588_v18 = vsel %vm18722_vm3, %v3721_v24, %v3723_v36  ;;  %v3413_v2 = vadd.f32 %v12746_v43, %v13993_v62  ;;  %v4460_v40 = vpack.c.bf16 %v4264_v28, %v4262_v52  ;;  %v4266_v38 = vsel %vm18723_vm4, %v4263_v4, %v4265_v17  ;;  %vm18724_vm0 = vmmov %vm18722_vm3  ;;  %v3407_v28 = vpop.f32.mrb[79].mxu1 }
 0x239   : > { %v5057_v42 = vsel %vm14516_vm15, %v14588_v18, 0.0  ;;  %v3405_v21 = vadd.f32 %v13993_v62, %v3404_v20  ;;  %v14598_v7 = vsel %vm18724_vm0, %v3723_v36, %v3725_v6  ;;  %v4267_v24 = vrot.slane %v14588_v18, 1  ;;  %vm18726_vm1 = vmmov %vm18724_vm0 }
 0x23a   : > { %18725 = vst [vmem:[#allocation109_spill] sm:$0xff] %v14598_v7  ;;  %v14602_v46 = vsel %vm18726_vm1, %v3725_v6, %v3727_v22  ;;  %v18728_v57 = vand.u32 15, %v14019_v32  ;;  %v18729_v52 = vmov 0  ;;  %vm18732_vm15 = vcmask 523264   ;;  %5183 = vrot.lane.b32.xlu1 %v4460_v40, %s13299_s25  ;;  %v14621_v32 = vld [vmem:[%s18139_s4] ss:$0 sm:$0xff] }
 0x23b   : > { %18727 = vst [vmem:[#allocation110_spill] sm:$0xff] %v14602_v46  ;;  %12812 = vmatprep.mubr.msk.bf16.mxu0 %vm18732_vm15, %v3567_v58  ;;  %v3529_v4 = vmax.f32 %v3413_v2, 0.0  ;;  %v3416_v43 = vadd.f32 %v12747_v16, %v13993_v62  ;;  %v5101_v36 = vpack.c.bf16 %v14598_v7, %v5057_v42  ;;  %v14614_v20 = vsel %vm18724_vm0, %v3727_v22, %v3729_v33  ;;  %vm18733_vm4 = vmmov %vm18732_vm15 }
 0x23c   : > { %vm14606_vm3 = vcmp.ge.s32.totalorder %v18728_v57, 1  ;;  %12813 = vmatmul.mubr.msk.bf16.gmra.mrb[72].mxu0 %vm18733_vm4, %v3568_v56  ;;  %v3527_v6 = vmax.f32 %v3405_v21, 0.0  ;;  %v3408_v58 = vadd.f32 %v14621_v32, %v3407_v28  ;;  %vm18734_vm15 = vcmask 1046528  }
 0x23d   : > { %v18730_v52 = vsel %vm14606_vm3, 4294967295, %v18729_v52  ;;  %v4268_v62 = vsel %vm18734_vm15, %v4265_v17, %v4267_v24  ;;  %v5059_v2 = vsel %vm14536_vm6, %v14602_v46, 0.0  ;;  %v3530_v22 = vmax.f32 %v3416_v43, 0.0  ;;  %5281 = vrot.lane.b32.xlu0 %v5101_v36, %s13299_s25  ;;  %vm18739_vm0 = vmmov %vm18734_vm15 }
 0x23e   : > { %18731 = vst [vmem:[#allocation111_spill] sm:$0xff] %v18730_v52  ;;  %v4461_v56 = vpack.c.bf16 %v4268_v62, %v4266_v38  ;;  %v5102_v42 = vpack.c.bf16 %v14614_v20, %v5059_v2  ;;  %v3731_v21 = vrot.slane %v3527_v6, 7  ;;  %v3528_v16 = vmax.f32 %v3408_v58, 0.0  ;;  %v12750_v58 = vpop.f32.mrb[80].mxu1  ;;  %vm18740_vm4 = vmmov %vm18739_vm0 }
 0x23f   : > { %v4269_v57 = vrot.slane %v14598_v7, 1  ;;  %v4271_v17 = vrot.slane %v14602_v46, 1  ;;  %v18735_v28 = vand.u32 15, %v14027_v25  ;;  %v18736_v61 = vmov 0  ;;  %vm18742_vm6 = vmmov %vm18739_vm0 }
 0x240   : > { %v3735_v43 = vrot.slane %v3529_v4, 7  ;;  %v3570_v38 = vpack.c.bf16 %v3530_v22, %v3529_v4  ;;  %v3737_v36 = vrot.slane %v3530_v22, 7  ;;  %v4273_v62 = vrot.slane %v14614_v20, 1  ;;  %5185 = vrot.lane.b32.xlu1 %v4461_v56, %s13299_s25 }
 0x241   : > { %vm14637_vm1 = vcmp.ge.s32.totalorder %v18735_v28, 1  ;;  %v3569_v2 = vpack.c.bf16 %v3528_v16, %v3527_v6  ;;  %v3733_v19 = vrot.slane %v3528_v16, 7  ;;  %v4270_v40 = vsel %vm18739_vm0, %v4267_v24, %v4269_v57  ;;  %v3420_v28 = vpop.f32.mrb[81].mxu1  ;;  %5283 = vrot.lane.b32.xlu0 %v5102_v42, %s13299_s25 }
 0x242   : > { %v18737_v61 = vsel %vm14637_vm1, 4294967295, %v18736_v61  ;;  %v4272_v46 = vsel %vm18740_vm4, %v4269_v57, %v4271_v17  ;;  %v3429_v25 = vadd.f32 %v14621_v32, %v12750_v58  ;;  %vm18741_vm15 = vcmask 1040384   ;;  %v12751_v16 = vpop.f32.mrb[82].mxu1 }
 0x243   : > { %18738 = vst [vmem:[#allocation112_spill] sm:$0xff] %v18737_v61  ;;  %v4462_v7 = vpack.c.bf16 %v4272_v46, %v4270_v40  ;;  %v14648_v4 = vsel %vm18741_vm15, %v3729_v33, %v3731_v21  ;;  %v4274_v22 = vsel %vm18742_vm6, %v4271_v17, %v4273_v62  ;;  %v3421_v6 = vadd.f32 %v14621_v32, %v3420_v28  ;;  %vm18743_vm13 = vmmov %vm18741_vm15  ;;  %v3423_v17 = vpop.f32.mrb[83].mxu1 }
 0x244   : > { %v14653_v56 = vsel %vm18743_vm13, %v3731_v21, %v3733_v19  ;;  %v5061_v24 = vsel %vm14574_vm14, %v14648_v4, 0.0  ;;  %v4275_v57 = vrot.slane %v14648_v4, 1  ;;  %v18745_v42 = vand.u32 15, %v14030_v59  ;;  %vm18752_vm14 = vmmov %vm18743_vm13 }
 0x245   : > { %18744 = vst [vmem:[#allocation113_spill] sm:$0xff] %v14653_v56  ;;  %v18746_v46 = vmov 0  ;;  %vm18749_vm4 = vcmask 523264   ;;  %v3533_v33 = vmax.f32 %v3429_v25, 0.0  ;;  %v3432_v40 = vadd.f32 %v14621_v32, %v12751_v16  ;;  %5187 = vrot.lane.b32.xlu1 %v4462_v7, %s13299_s25 }
 0x246   : > { %vm14661_vm0 = vcmp.ge.s32.totalorder %v18745_v42, 1  ;;  %12816 = vmatprep.mubr.msk.bf16.mxu0 %vm18749_vm4, %v3569_v2  ;;  %v5103_v21 = vpack.c.bf16 %v14653_v56, %v5061_v24  ;;  %v14669_v58 = vsel %vm18743_vm13, %v3733_v19, %v3735_v43  ;;  %vm18750_vm6 = vmmov %vm18749_vm4  ;;  %v3531_v28 = vmax.f32 %v3421_v6, 0.0 }
 0x247   : > { %v18747_v46 = vsel %vm14661_vm0, 4294967295, %v18746_v46  ;;  %12817 = vmatmul.mubr.msk.bf16.gmra.mrb[76].mxu0 %vm18750_vm6, %v3570_v38  ;;  %v3424_v59 = vadd.f32 %v14621_v32, %v3423_v17  ;;  %vm18751_vm15 = vcmask 1046528   ;;  %v14676_v2 = vsel %vm18752_vm14, %v3735_v43, %v3737_v36 }
 0x248   : > { %18748 = vst [vmem:[#allocation114_spill] sm:$0xff] %v18747_v46  ;;  %v4276_v42 = vsel %vm18751_vm15, %v4273_v62, %v4275_v57  ;;  %18753 = vst [vmem:[#allocation115_spill] sm:$0xff] %v14676_v2  ;;  %v3743_v25 = vrot.slane %v3533_v33, 7  ;;  %v3534_v16 = vmax.f32 %v3432_v40, 0.0  ;;  %5285 = vrot.lane.b32.xlu0 %v5103_v21, %s13299_s25  ;;  %v5063_v19 = vsel %vm14606_vm3, %v14669_v58, 0.0 }
 0x249   : > { %v4463_v24 = vpack.c.bf16 %v4276_v42, %v4274_v22  ;;  %v3739_v38 = vrot.slane %v3531_v28, 7  ;;  %v3532_v6 = vmax.f32 %v3424_v59, 0.0  ;;  %v5104_v7 = vpack.c.bf16 %v14676_v2, %v5063_v19  ;;  %v12754_v59 = vpop.f32.mrb[84].mxu1  ;;  %vm18758_vm14 = vmmov %vm18751_vm15 }
 0x24a   : > { %v4277_v17 = vrot.slane %v14653_v56, 1  ;;  %v18754_v62 = vand.u32 15, %v14036_v47  ;;  %v18755_v43 = vmov 0  ;;  %v3572_v40 = vpack.c.bf16 %v3534_v16, %v3533_v33  ;;  %vm18759_vm6 = vmmov %vm18758_vm14 }
 0x24b   : > { %v3745_v39 = vrot.slane %v3534_v16, 7  ;;  %v4279_v22 = vrot.slane %v14669_v58, 1  ;;  %v4281_v21 = vrot.slane %v14676_v2, 1  ;;  %v3571_v42 = vpack.c.bf16 %v3532_v6, %v3531_v28  ;;  %5189 = vrot.lane.b32.xlu1 %v4463_v24, %s13299_s25  ;;  %vm18760_vm15 = vmmov %vm18759_vm6 }
 0x24c   : > { %vm14686_vm4 = vcmp.ge.s32.totalorder %v18754_v62, 1  ;;  %v3741_v52 = vrot.slane %v3532_v6, 7  ;;  %v4278_v19 = vsel %vm18758_vm14, %v4275_v57, %v4277_v17  ;;  %v14695_v56 = vsel %vm18743_vm13, %v3737_v36, %v3739_v38  ;;  %v3436_v62 = vpop.f32.mrb[85].mxu1  ;;  %5287 = vrot.lane.b32.xlu0 %v5104_v7, %s13299_s25  ;;  %vm18761_vm14 = vmmov %vm18743_vm13 }
 0x24d   : > { %v18756_v43 = vsel %vm14686_vm4, 4294967295, %v18755_v43  ;;  %v3445_v47 = vadd.f32 %v14621_v32, %v12754_v59  ;;  %v4280_v33 = vsel %vm18759_vm6, %v4277_v17, %v4279_v22  ;;  %v5065_v28 = vsel %vm14637_vm1, %v14695_v56, 0.0  ;;  %v12755_v6 = vpop.f32.mrb[86].mxu1 }
 0x24e   : > { %18757 = vst [vmem:[#allocation116_spill] sm:$0xff] %v18756_v43  ;;  %v4282_v16 = vsel %vm18760_vm15, %v4279_v22, %v4281_v21  ;;  %v3437_v24 = vadd.f32 %v14621_v32, %v3436_v62  ;;  %v4464_v57 = vpack.c.bf16 %v4280_v33, %v4278_v19  ;;  %v14706_v36 = vsel %vm18761_vm14, %v3739_v38, %v3741_v52  ;;  %v3439_v61 = vpop.f32.mrb[87].mxu1  ;;  %vm18768_vm15 = vmmov %vm18761_vm14 }
 0x24f   : > { %18762 = vst [vmem:[#allocation117_spill] sm:$0xff] %v14706_v36  ;;  %v4283_v59 = vrot.slane %v14695_v56, 1  ;;  %v18763_v2 = vand.u32 15, %v14048_v3  ;;  %v18764_v7 = vmov 0  ;;  %vm18767_vm6 = vcmask 523264   ;;  %vm18771_vm3 = vmmov %vm18768_vm15 }
 0x250   : > { %12820 = vmatprep.mubr.msk.bf16.mxu0 %vm18767_vm6, %v3571_v42  ;;  %v3537_v17 = vmax.f32 %v3445_v47, 0.0  ;;  %v3448_v22 = vadd.f32 %v14621_v32, %v12755_v6  ;;  %v5105_v62 = vpack.c.bf16 %v14706_v36, %v5065_v28  ;;  %v14719_v19 = vsel %vm18768_vm15, %v3741_v52, %v3743_v25  ;;  %vm18769_vm14 = vmmov %vm18767_vm6  ;;  %5191 = vrot.lane.b32.xlu1 %v4464_v57, %s13299_s25 }
 0x251   : > { %vm14711_vm13 = vcmp.ge.s32.totalorder %v18763_v2, 1  ;;  %12821 = vmatmul.mubr.msk.bf16.gmra.mrb[80].mxu0 %vm18769_vm14, %v3572_v40  ;;  %v3535_v38 = vmax.f32 %v3437_v24, 0.0  ;;  %v3440_v3 = vadd.f32 %v14621_v32, %v3439_v61  ;;  %vm18770_vm1 = vcmask 1046528   ;;  %vm18778_vm6 = vmmov %vm18768_vm15 }
 0x252   : > { %v18765_v7 = vsel %vm14711_vm13, 4294967295, %v18764_v7  ;;  %v4284_v2 = vsel %vm18770_vm1, %v4281_v21, %v4283_v59  ;;  %v14726_v42 = vsel %vm18771_vm3, %v3743_v25, %v3745_v39  ;;  %v3751_v47 = vrot.slane %v3537_v17, 7  ;;  %5289 = vrot.lane.b32.xlu0 %v5105_v62, %s13299_s25 }
 0x253   : > { %18766 = vst [vmem:[#allocation118_spill] sm:$0xff] %v18765_v7  ;;  %18772 = vst [vmem:[#allocation119_spill] sm:$0xff] %v14726_v42  ;;  %v3538_v33 = vmax.f32 %v3448_v22, 0.0  ;;  %v4465_v28 = vpack.c.bf16 %v4284_v2, %v4282_v16  ;;  %v5067_v52 = vsel %vm14661_vm0, %v14719_v19, 0.0  ;;  %v3747_v40 = vrot.slane %v3535_v38, 7 }
 0x254   : > { %v3536_v24 = vmax.f32 %v3440_v3, 0.0  ;;  %v5106_v6 = vpack.c.bf16 %v14726_v42, %v5067_v52  ;;  %v4285_v61 = vrot.slane %v14706_v36, 1  ;;  %v18773_v21 = vand.u32 15, %v14053_v45  ;;  %v12758_v3 = vpop.f32.mrb[88].mxu1 }
 0x255   : > { %v18774_v25 = vmov 0  ;;  %v3574_v57 = vpack.c.bf16 %v3538_v33, %v3537_v17  ;;  %v3753_v22 = vrot.slane %v3538_v33, 7  ;;  %v4287_v16 = vrot.slane %v14719_v19, 1  ;;  %5193 = vrot.lane.b32.xlu1 %v4465_v28, %s13299_s25 }
 0x256   : > { %vm14736_vm1 = vcmp.ge.s32.totalorder %v18773_v21, 1  ;;  %v4289_v62 = vrot.slane %v14726_v42, 1  ;;  %v3573_v2 = vpack.c.bf16 %v3536_v24, %v3535_v38  ;;  %v3749_v46 = vrot.slane %v3536_v24, 7  ;;  %v3452_v21 = vpop.f32.mrb[89].mxu1  ;;  %5291 = vrot.lane.b32.xlu0 %v5106_v6, %s13299_s25 }
 0x257   : > { %v18775_v25 = vsel %vm14736_vm1, 4294967295, %v18774_v25  ;;  %vm18777_vm3 = vcmask 1046528   ;;  %v14745_v36 = vsel %vm18778_vm6, %v3745_v39, %v3747_v40  ;;  %v3461_v45 = vadd.f32 %v14621_v32, %v12758_v3  ;;  %v12759_v24 = vpop.f32.mrb[90].mxu1 }
 0x258   : > { %18776 = vst [vmem:[#allocation120_spill] sm:$0xff] %v18775_v25  ;;  %v4286_v52 = vsel %vm18777_vm3, %v4283_v59, %v4285_v61  ;;  %18779 = vst [vmem:[#allocation121_spill] sm:$0xff] %v14745_v36  ;;  %v5069_v38 = vsel %vm14686_vm4, %v14745_v36, 0.0  ;;  %v3453_v28 = vadd.f32 %v14621_v32, %v3452_v21  ;;  %v4291_v3 = vrot.slane %v14745_v36, 1  ;;  %v3455_v43 = vpop.f32.mrb[91].mxu1 }
 0x259   : > { %vm18780_vm15 = vmmov %vm18777_vm3  ;;  %v18783_v42 = vand.u32 15, %v14057_v34  ;;  %v18784_v6 = vmov 0  ;;  %v3456_v34 = vadd.f32 %v14621_v32, %v3455_v43  ;;  %vm18790_vm4 = vcmask 1046528  }
 0x25a   : > { %v4288_v17 = vsel %vm18780_vm15, %v4285_v61, %v4287_v16  ;;  %vm18781_vm14 = vmmov %vm18777_vm3  ;;  %vm18786_vm15 = vcmask 523264   ;;  %v3541_v61 = vmax.f32 %v3461_v45, 0.0 }
 0x25b   : > { %v4290_v33 = vsel %vm18781_vm14, %v4287_v16, %v4289_v62  ;;  %v4466_v59 = vpack.c.bf16 %v4288_v17, %v4286_v52  ;;  %vm18782_vm3 = vmmov %vm18778_vm6  ;;  %vm14761_vm6 = vcmp.ge.s32.totalorder %v18783_v42, 1  ;;  %12824 = vmatprep.mubr.msk.bf16.mxu0 %vm18786_vm15, %v3573_v2  ;;  %v3464_v16 = vadd.f32 %v14621_v32, %v12759_v24 }
 0x25c   : > { %v14756_v39 = vsel %vm18782_vm3, %v3747_v40, %v3749_v46  ;;  %v18785_v6 = vsel %vm14761_vm6, 4294967295, %v18784_v6  ;;  %vm18787_vm14 = vmmov %vm18782_vm3  ;;  %v3539_v40 = vmax.f32 %v3453_v28, 0.0  ;;  %v4292_v42 = vsel %vm18790_vm4, %v4289_v62, %v4291_v3 }
 0x25d   : > { %v5107_v21 = vpack.c.bf16 %v14756_v39, %v5069_v38  ;;  %v14769_v52 = vsel %vm18787_vm14, %v3749_v46, %v3751_v47  ;;  %vm18789_vm3 = vmmov %vm18786_vm15  ;;  %5195 = vrot.lane.b32.xlu1 %v4466_v59, %s13299_s25  ;;  %v3759_v45 = vrot.slane %v3541_v61, 7  ;;  %v3542_v17 = vmax.f32 %v3464_v16, 0.0 }
 0x25e   : > { %18788 = vst [vmem:[#allocation122_spill] sm:$0xff] %v14769_v52  ;;  %12825 = vmatmul.mubr.msk.bf16.gmra.mrb[84].mxu0 %vm18789_vm3, %v3574_v57  ;;  %vm18791_vm0 = vmmov %vm18787_vm14  ;;  %v4467_v38 = vpack.c.bf16 %v4292_v42, %v4290_v33  ;;  %v5071_v46 = vsel %vm14711_vm13, %v14769_v52, 0.0  ;;  %v3755_v57 = vrot.slane %v3539_v40, 7  ;;  %v3540_v28 = vmax.f32 %v3456_v34, 0.0  ;;  %v12762_v34 = vpop.f32.mrb[92].mxu1 }
 0x25f   : > { %v14776_v2 = vsel %vm18791_vm0, %v3751_v47, %v3753_v22  ;;  %5293 = vrot.lane.b32.xlu0 %v5107_v21, %s13299_s25  ;;  %v4293_v43 = vrot.slane %v14756_v39, 1  ;;  %v3576_v59 = vpack.c.bf16 %v3542_v17, %v3541_v61  ;;  %v3761_v62 = vrot.slane %v3542_v17, 7  ;;  %vm18796_vm15 = vmmov %vm18787_vm14  ;;  %v3468_v7 = vpop.f32.mrb[93].mxu1 }
 0x260   : > { %18792 = vst [vmem:[#allocation123_spill] sm:$0xff] %v14776_v2  ;;  %v5108_v24 = vpack.c.bf16 %v14776_v2, %v5071_v46  ;;  %v4295_v47 = vrot.slane %v14769_v52, 1  ;;  %v4297_v36 = vrot.slane %v14776_v2, 1  ;;  %v18793_v16 = vand.u32 15, %v14060_v14  ;;  %vm18797_vm14 = vmmov %vm18790_vm4 }
 0x261   : > { %v18794_v33 = vmov 0  ;;  %v3575_v21 = vpack.c.bf16 %v3540_v28, %v3539_v40  ;;  %v3757_v42 = vrot.slane %v3540_v28, 7  ;;  %5197 = vrot.lane.b32.xlu1 %v4467_v38, %s13299_s25  ;;  %v4294_v46 = vsel %vm18790_vm4, %v4291_v3, %v4293_v43  ;;  %vm18798_vm3 = vmmov %vm18790_vm4 }
 0x262   : > { %vm14788_vm0 = vcmp.ge.s32.totalorder %v18793_v16, 1  ;;  %v14795_v61 = vsel %vm18796_vm15, %v3753_v22, %v3755_v57  ;;  %v3477_v17 = vadd.f32 %v14621_v32, %v12762_v34  ;;  %v4296_v14 = vsel %vm18797_vm14, %v4293_v43, %v4295_v47  ;;  %v12763_v16 = vpop.f32.mrb[94].mxu1  ;;  %vm18799_vm4 = vmmov %vm18796_vm15 }
 0x263   : > { %v18795_v33 = vsel %vm14788_vm0, 4294967295, %v18794_v33  ;;  %5295 = vrot.lane.b32.xlu0 %v5108_v24, %s13299_s25  ;;  %v5073_v40 = vsel %vm14736_vm1, %v14795_v61, 0.0  ;;  %v4298_v28 = vsel %vm18798_vm3, %v4295_v47, %v4297_v36  ;;  %v3469_v38 = vadd.f32 %v14621_v32, %v3468_v7  ;;  %v3471_v2 = vpop.f32.mrb[95].mxu1  ;;  %vm18801_vm14 = vmmov %vm18799_vm4 }
 0x264   : > { %v4468_v3 = vpack.c.bf16 %v4296_v14, %v4294_v46  ;;  %v14806_v22 = vsel %vm18799_vm4, %v3755_v57, %v3757_v42  ;;  %v4299_v34 = vrot.slane %v14795_v61, 1  ;;  %vm18800_vm15 = vcmask 523264   ;;  %vm18804_vm1 = vmmov %vm18801_vm14 }
 0x265   : > { %12828 = vmatprep.mubr.msk.bf16.mxu0 %vm18800_vm15, %v3575_v21  ;;  %v3545_v24 = vmax.f32 %v3477_v17, 0.0  ;;  %v3480_v43 = vadd.f32 %v14621_v32, %v12763_v16  ;;  %v5109_v25 = vpack.c.bf16 %v14806_v22, %v5073_v40  ;;  %v14813_v52 = vsel %vm18801_vm14, %v3757_v42, %v3759_v45  ;;  %vm18802_vm3 = vmmov %vm18800_vm15  ;;  %v5242_v16 = vpop.permute.xlu0 %5241 }
 0x266   : > { %12829 = vmatmul.mubr.msk.bf16.gmra.mrb[88].mxu0 %vm18802_vm3, %v3576_v59  ;;  %v3543_v7 = vmax.f32 %v3469_v38, 0.0  ;;  %5199 = vrot.lane.b32.xlu1 %v4468_v3, %s13299_s25  ;;  %v3472_v57 = vadd.f32 %v14621_v32, %v3471_v2  ;;  %vm18803_vm4 = vcmask 1046528   ;;  %v14820_v21 = vsel %vm18804_vm1, %v3759_v45, %v3761_v62  ;;  %vm18805_vm1 = vmmov %vm18802_vm3 }
 0x267   : > { %v4300_v47 = vsel %vm18803_vm4, %v4297_v36, %v4299_v34  ;;  %v3767_v46 = vrot.slane %v3545_v24, 7  ;;  %v3546_v17 = vmax.f32 %v3480_v43, 0.0  ;;  %5297 = vrot.lane.b32.xlu0 %v5109_v25, %s13299_s25  ;;  %v5075_v42 = vsel %vm14761_vm6, %v14813_v52, 0.0  ;;  %v13211_v36 = vld [vmem:[%s18143_s8] sm:$0xff]   ;;  %vm18806_vm15 = vmmov %vm18803_vm4 }
 0x268   : > { %v4469_v14 = vpack.c.bf16 %v4300_v47, %v4298_v28  ;;  %v3763_v59 = vrot.slane %v3543_v7, 7  ;;  %v3544_v40 = vmax.f32 %v3472_v57, 0.0  ;;  %v5110_v38 = vpack.c.bf16 %v14820_v21, %v5075_v42  ;;  %12836 = vmatprep.subr.bf16.mxu0 %v13211_v36  ;;  %vm18807_vm14 = vmmov %vm18803_vm4 }
 0x269   : > { %v4301_v32 = vrot.slane %v14806_v22, 1  ;;  %v3578_v2 = vpack.c.bf16 %v3546_v17, %v3545_v24  ;;  %v3769_v45 = vrot.slane %v3546_v17, 7  ;;  %v4303_v25 = vrot.slane %v14813_v52, 1  ;;  %12837 = vmatpush3.bf16.msra.mxu0 %v13211_v36 }
 0x26a   : > { %v4305_v28 = vrot.slane %v14820_v21, 1  ;;  %v3577_v3 = vpack.c.bf16 %v3544_v40, %v3543_v7  ;;  %v3765_v43 = vrot.slane %v3544_v40, 7  ;;  %5201 = vrot.lane.b32.xlu1 %v4469_v14, %s13299_s25  ;;  %v5436_v57 = vsel %vm18805_vm1, 0.0|0.0, %v5242_v16  ;;  %v5244_v40 = vpop.permute.xlu1 %5243  ;;  %vm18811_vm1 = vmmov %vm18807_vm14 }
 0x26b   : > { %v4302_v47 = vsel %vm18806_vm15, %v4299_v34, %v4301_v32  ;;  %5299 = vrot.lane.b32.xlu0 %v5110_v38, %s13299_s25  ;;  %6139 = vmatprep.mubr.bf16.mxu1 %v5436_v57  ;;  %v4304_v24 = vsel %vm18807_vm14, %v4301_v32, %v4303_v25  ;;  %vm18808_vm3 = vcmask 1040384   ;;  %v18809_v7 = vsel %vm14552_vm2, %v14583_v29, 0.0  ;;  %v5146_v32 = vpop.permute.xlu0 %5145 }
 0x26c   : > { %v14839_v17 = vsel %vm18808_vm3, %v3761_v62, %v3763_v59  ;;  %v4858_v42 = vpack.c.bf16 %v18809_v7, %v14507_v9  ;;  %v1171_v14 = vadd.s32 496, %v13911_v50  ;;  %v4470_v16 = vpack.c.bf16 %v4304_v24, %v4302_v47  ;;  %vm18810_vm4 = vmmov %vm18808_vm3 }
 0x26d   : > { %v14848_v34 = vsel %vm18810_vm4, %v3763_v59, %v3765_v43  ;;  %v5077_v38 = vsel %vm14788_vm0, %v14839_v17, 0.0  ;;  %v4306_v62 = vsel %vm18811_vm1, %v4303_v25, %v4305_v28  ;;  %vm18812_vm15 = vcmask 523264   ;;  %vm18813_vm14 = vmmov %vm18808_vm3 }
 0x26e   : > { %12832 = vmatprep.mubr.msk.bf16.mxu0 %vm18812_vm15, %v3577_v3  ;;  %v5111_v29 = vpack.c.bf16 %v14848_v34, %v5077_v38  ;;  %v4307_v9 = vrot.slane %v14839_v17, 1  ;;  %v1611_v57 = vand.u32 15, %v1171_v14  ;;  %v14858_v47 = vsel %vm18813_vm14, %v3765_v43, %v3767_v46  ;;  %vm18814_vm3 = vmmov %vm18812_vm15  ;;  %5203 = vrot.lane.b32.xlu1 %v4470_v16, %s13299_s25 }
 0x26f   : > { %12833 = vmatmul.mubr.msk.bf16.gmra.mrb[92].mxu0 %vm18814_vm3, %v3578_v2  ;;  %vm18815_vm4 = vmmov %vm18814_vm3  ;;  %v4309_v3 = vrot.slane %v14848_v34, 1  ;;  %vm18818_vm15 = vcmask 1046528   ;;  %v18819_v43 = vmov 0  ;;  %v4311_v2 = vrot.slane %v14858_v47, 1 }
 0x270   : > { %v5308_v59 = vsel %vm18815_vm4, 0.0|0.0, %v5146_v32  ;;  %vm18816_vm2 = vmmov %vm18813_vm14  ;;  %5301 = vrot.lane.b32.xlu0 %v5111_v29, %s13299_s25  ;;  %v4308_v24 = vsel %vm18818_vm15, %v4305_v28, %v4307_v9  ;;  %vm14868_vm0 = vcmp.ge.s32.totalorder %v1611_v57, 1  ;;  %v3960_v28 = vsel %vm14039_vm5, %v14063_v31, 0.0  ;;  %v5148_v32 = vpop.permute.xlu1 %5147 }
 0x271   : > { %v3770_v25 = vsel %vm18816_vm2, %v3767_v46, %v3769_v45  ;;  %6140 = vmatmul.mubr.bf16.vlgmr.msra.gmra.mrb[96].mxu1 %v5308_v59  ;;  %vm18817_vm1 = vmmov %vm18814_vm3  ;;  %v18820_v43 = vsel %vm14868_vm0, 4294967295, %v18819_v43  ;;  %v4471_v7 = vpack.c.bf16 %v4308_v24, %v4306_v62  ;;  %v5079_v46 = vsel %vm14868_vm0, %v14858_v47, 0.0  ;;  %v5246_v24 = vpop.permute.xlu0 %5245 }
 0x272   : > { %v5440_v36 = vsel %vm18817_vm1, %v4858_v42, %v5244_v40  ;;  %vm18821_vm2 = vmmov %vm18818_vm15  ;;  %v5112_v14 = vpack.c.bf16 %v3770_v25, %v5079_v46  ;;  %v1114_v42 = vadd.s32 40, %v13911_v50  ;;  %v4609_v40 = vrot.slane %v14071_v35, 2 }
 0x273   : > { %6147 = vmatprep.mubr.bf16.mxu1 %v5440_v36  ;;  %v4310_v45 = vsel %vm18821_vm2, %v4307_v9, %v4309_v3  ;;  %vm18822_vm14 = vmmov %vm18821_vm2  ;;  %5205 = vrot.lane.b32.xlu1 %v4471_v7, %s13299_s25  ;;  %v4611_v62 = vrot.slane %v14124_v8, 2  ;;  %v1116_v9 = vadd.s32 56, %v13911_v50  ;;  %v4613_v57 = vrot.slane %v14130_v37, 2 }
 0x274   : > { %v4312_v16 = vsel %vm18822_vm14, %v4309_v3, %v4311_v2  ;;  %5303 = vrot.lane.b32.xlu0 %v5112_v14, %s13299_s25  ;;  %v1212_v29 = vand.u32 15, %v1114_v42  ;;  %v4023_v59 = vpack.c.bf16 %v14083_v41, %v3960_v28  ;;  %vm18823_vm3 = vcmask 1045504  }
 0x275   : > { %v4472_v38 = vpack.c.bf16 %v4312_v16, %v4310_v45  ;;  %v4612_v31 = vsel %vm18823_vm3, %v4609_v40, %v4611_v62  ;;  %v4615_v25 = vrot.slane %v14141_v13, 2  ;;  %v18824_v3 = vmov 0  ;;  %vm18828_vm15 = vmmov %vm18823_vm3 }
 0x276   : > { %vm14891_vm4 = vcmp.lt.s32.totalorder %v1212_v29, 15  ;;  %v1226_v36 = vand.u32 15, %v1116_v9  ;;  %v5312_v2 = vsel %vm18817_vm1, %v4023_v59, %v5148_v32  ;;  %v18827_v7 = vrot.slane %v14086_v54, 2  ;;  %vm18832_vm14 = vmmov %vm18823_vm3  ;;  %v5150_v29 = vpop.permute.xlu1 %5149 }
 0x277   : > { %v18825_v3 = vsel %vm14891_vm4, 4294967295, %v18824_v3  ;;  %5207 = vrot.lane.b32.xlu1 %v4472_v38, %s13299_s25  ;;  %v4798_v41 = vsel %vm14891_vm4, %v4612_v31, 0.0  ;;  %v18829_v14 = vmov 0  ;;  %v4616_v16 = vsel %vm18832_vm14, %v4613_v57, %v4615_v25  ;;  %vm18833_vm3 = vmmov %vm18817_vm1  ;;  %v5248_v31 = vpop.permute.xlu0 %5247 }
 0x278   : > { %18826 = vst [vmem:[#allocation124_spill] sm:$0xff] %v18825_v3  ;;  %v4610_v46 = vsel %vm18828_vm15, %v18827_v7, %v4609_v40  ;;  %vm14902_vm2 = vcmp.lt.s32.totalorder %v1226_v36, 15  ;;  %v1118_v28 = vadd.s32 72, %v13911_v50  ;;  %v3962_v38 = vsel %vm14075_vm7, %v14086_v54, 0.0  ;;  %vm18834_vm1 = vmmov %vm18832_vm14 }
 0x279   : > { %6148 = vmatmul.mubr.bf16.gmra.mrb[100].mxu1 %v5312_v2  ;;  %v4859_v45 = vpack.c.bf16 %v4798_v41, %v4610_v46  ;;  %v18830_v14 = vsel %vm14902_vm2, 4294967295, %v18829_v14  ;;  %v4614_v40 = vsel %vm18834_vm1, %v4611_v62, %v4613_v57  ;;  %v4800_v32 = vsel %vm14902_vm2, %v4616_v16, 0.0  ;;  %vm18835_vm15 = vmmov %vm18833_vm3 }
 0x27a   : > { %18831 = vst [vmem:[#allocation125_spill] sm:$0xff] %v18830_v14  ;;  %v1240_v9 = vand.u32 15, %v1118_v28  ;;  %v4619_v59 = vrot.slane %v14171_v53, 2  ;;  %v4024_v36 = vpack.c.bf16 %v14071_v35, %v3962_v38  ;;  %v4617_v2 = vrot.slane %v14146_v5, 2  ;;  %vm18836_vm14 = vmmov %vm18833_vm3  ;;  %v18840_v28 = vld [vmem:[#allocation74_spill] sm:$0xff] }
 0x27b   : > { %v5444_v42 = vsel %vm18833_vm3, %v4859_v45, %v5246_v24  ;;  %8715 = vrot.lane.b32.xlu1 %v18695_v10, %s13299_s25  ;;  %v4860_v24 = vpack.c.bf16 %v4800_v32, %v4614_v40  ;;  %v18837_v57 = vmov 0  ;;  %v1120_v46 = vadd.s32 88, %v13911_v50  ;;  %v5152_v45 = vpop.permute.xlu1 %5151  ;;  %v5250_v40 = vpop.permute.xlu0 %5249 }
 0x27c   : > { %6155 = vmatprep.mubr.bf16.mxu1 %v5444_v42  ;;  %v5316_v54 = vsel %vm18835_vm15, %v4024_v36, %v5150_v29  ;;  %vm14922_vm3 = vcmp.lt.s32.totalorder %v1240_v9, 15  ;;  %v4620_v7 = vsel %vm18834_vm1, %v4617_v2, %v4619_v59  ;;  %v3964_v35 = vsel %vm14100_vm8, %v14124_v8, 0.0  ;;  %vm18841_vm15 = vmmov %vm18834_vm1 }
 0x27d   : > { %v5448_v62 = vsel %vm18836_vm14, %v4860_v24, %v5248_v31  ;;  %v18838_v57 = vsel %vm14922_vm3, 4294967295, %v18837_v57  ;;  %v4802_v41 = vsel %vm14922_vm3, %v4620_v7, 0.0  ;;  %v1254_v16 = vand.u32 15, %v1120_v46  ;;  %vm18842_vm1 = vmmov %vm18836_vm14 }
 0x27e   : > { %18839 = vst [vmem:[#allocation126_spill] sm:$0xff] %v18838_v57  ;;  %v4621_v42 = vrot.slane %v18840_v28, 2  ;;  %v4623_v38 = vrot.slane %v14195_v12, 2  ;;  %v4025_v32 = vpack.c.bf16 %v14130_v37, %v3964_v35  ;;  %v4618_v29 = vsel %vm18841_vm15, %v4615_v25, %v4617_v2  ;;  %vm18846_vm3 = vmmov %vm18841_vm15  ;;  %v13212_v37 = vld [vmem:[%s18143_s8 + $0x8] sm:$0xff]  }
 0x27f   : > { %v4861_v9 = vpack.c.bf16 %v4802_v41, %v4618_v29  ;;  %vm14939_vm2 = vcmp.lt.s32.totalorder %v1254_v16, 15  ;;  %v18843_v36 = vmov 0  ;;  %v3966_v2 = vsel %vm14116_vm9, %v14141_v13, 0.0  ;;  %vm18848_vm15 = vmmov %vm18846_vm3  ;;  %12838 = vmatprep.subr.bf16.mxu0 %v13212_v37  ;;  %v5154_v46 = vpop.permute.xlu1 %5153  ;;  %v18849_v41 = vld [vmem:[#allocation76_spill] sm:$0xff] }
 0x280   : > { %v5320_v31 = vsel %vm18836_vm14, %v4025_v32, %v5152_v45  ;;  %v18844_v36 = vsel %vm14939_vm2, 4294967295, %v18843_v36  ;;  %v4624_v24 = vsel %vm18846_vm3, %v4621_v42, %v4623_v38  ;;  %v4625_v45 = vrot.slane %v18849_v41, 2  ;;  %12839 = vmatpush3.bf16.msra.mxu0 %v13212_v37  ;;  %vm18850_vm3 = vmmov %vm18842_vm1 }
 0x281   : > { %6156 = vmatmul.mubr.bf16.gmra.mrb[104].mxu1 %v5316_v54  ;;  %v5452_v8 = vsel %vm18842_vm1, %v4861_v9, %v5250_v40  ;;  %18845 = vst [vmem:[#allocation74_spill] sm:$0xff] %v18844_v36  ;;  %v1122_v54 = vadd.s32 104, %v13911_v50  ;;  %v4804_v7 = vsel %vm14939_vm2, %v4624_v24, 0.0  ;;  %v4627_v16 = vrot.slane %v14221_v15, 2  ;;  %v5252_v40 = vpop.permute.xlu0 %5251  ;;  %vm18851_vm14 = vmmov %vm18842_vm1 }
 0x282   : > { %6163 = vmatprep.mubr.bf16.mxu1 %v5448_v62  ;;  %v4622_v62 = vsel %vm18848_vm15, %v4619_v59, %v4621_v42  ;;  %v4026_v32 = vpack.c.bf16 %v14146_v5, %v3966_v2  ;;  %v18852_v59 = vmov 0  ;;  %v3968_v24 = vsel %vm14150_vm10, %v14171_v53, 0.0  ;;  %vm18856_vm2 = vmmov %vm18848_vm15 }
 0x283   : > { %v1268_v35 = vand.u32 15, %v1122_v54  ;;  %v4862_v29 = vpack.c.bf16 %v4804_v7, %v4622_v62  ;;  %v4628_v42 = vsel %vm18848_vm15, %v4625_v45, %v4627_v16  ;;  %v4626_v5 = vsel %vm18856_vm2, %v4623_v38, %v4625_v45  ;;  %v5156_v37 = vpop.permute.xlu1 %5155  ;;  %v18857_v62 = vld [vmem:[#allocation78_spill] sm:$0xff] }
 0x284   : > { %v5324_v9 = vsel %vm18850_vm3, %v4026_v32, %v5154_v46  ;;  %v4629_v7 = vrot.slane %v18857_v62, 2  ;;  %v4631_v46 = vrot.slane %v14245_v0, 2  ;;  %v18859_v38 = vmov 0 }
 0x285   : > { %v5456_v13 = vsel %vm18851_vm14, %v4862_v29, %v5252_v40  ;;  %vm14959_vm1 = vcmp.lt.s32.totalorder %v1268_v35, 15  ;;  %v5254_v35 = vpop.permute.xlu0 %5253  ;;  %v4027_v40 = vpack.c.bf16 %v18840_v28, %v3968_v24  ;;  %vm18858_vm14 = vmmov %vm18850_vm3  ;;  %v18940_v36 = vmov 0 }
 0x286   : > { %v18853_v59 = vsel %vm14959_vm1, 4294967295, %v18852_v59  ;;  %v4806_v54 = vsel %vm14959_vm1, %v4628_v42, 0.0  ;;  %v4632_v45 = vsel %vm18856_vm2, %v4629_v7, %v4631_v46  ;;  %v3970_v42 = vsel %vm14162_vm11, %v14195_v12, 0.0  ;;  %vm18863_vm1 = vmmov %vm18856_vm2 }
 0x287   : > { %18854 = vst [vmem:[#allocation76_spill] sm:$0xff] %v18853_v59  ;;  %v4863_v32 = vpack.c.bf16 %v4806_v54, %v4626_v5  ;;  %v5328_v29 = vsel %vm18850_vm3, %v4027_v40, %v5156_v37  ;;  %v4630_v28 = vsel %vm18863_vm1, %v4627_v16, %v4629_v7  ;;  %v5158_v24 = vpop.permute.xlu1 %5157  ;;  %v18864_v54 = vld [vmem:[#allocation80_spill] sm:$0xff]  ;;  %v4028_v40 = vpack.c.bf16 %v18849_v41, %v3970_v42 }
 0x288   : > { %v4633_v37 = vrot.slane %v18864_v54, 2  ;;  %v18866_v16 = vmov 0  ;;  %v4675_v14 = vrot.slane %v14525_v63, 2 }
 0x289   : > { %6164 = vmatmul.mubr.bf16.gmra.mrb[108].mxu1 %v5320_v31  ;;  %v1124_v31 = vadd.s32 120, %v13911_v50  ;;  %v5460_v53 = vsel %vm18858_vm14, %v4863_v32, %v5254_v35  ;;  %v5256_v35 = vpop.permute.xlu0 %5255  ;;  %vm18865_vm14 = vmmov %vm18850_vm3 }
 0x28a   : > { %6171 = vmatprep.mubr.bf16.mxu1 %v5452_v8 }
 0x28b   : > { %v1282_v2 = vand.u32 15, %v1124_v31 }
 0x28d   : > { %vm14976_vm15 = vcmp.lt.s32.totalorder %v1282_v2, 15  ;;  %v4635_v2 = vrot.slane %v14271_v49, 2 }
 0x28e   : > { %v18860_v38 = vsel %vm14976_vm15, 4294967295, %v18859_v38  ;;  %v4808_v31 = vsel %vm14976_vm15, %v4632_v45, 0.0  ;;  %vm18870_vm15 = vmmov %vm18863_vm1 }
 0x28f   : > { %18861 = vst [vmem:[#allocation78_spill] sm:$0xff] %v18860_v38  ;;  %v4864_v32 = vpack.c.bf16 %v4808_v31, %v4630_v28  ;;  %v4636_v7 = vsel %vm18863_vm1, %v4633_v37, %v4635_v2  ;;  %v4634_v41 = vsel %vm18870_vm15, %v4631_v46, %v4633_v37  ;;  %v5160_v28 = vpop.permute.xlu1 %5159  ;;  %v18873_v46 = vmov 0 }
 0x291   : > { %6172 = vmatmul.mubr.bf16.gmra.mrb[112].mxu1 %v5324_v9  ;;  %v1126_v9 = vadd.s32 136, %v13911_v50  ;;  %v5464_v12 = vsel %vm18865_vm14, %v4864_v32, %v5256_v35  ;;  %v4639_v35 = vrot.slane %v14295_v23, 2  ;;  %vm18872_vm14 = vmmov %vm18850_vm3 }
 0x292   : > { %6179 = vmatprep.mubr.bf16.mxu1 %v5456_v13  ;;  %v18952_v13 = vld [vmem:[#allocation95_spill] sm:$0xff] }
 0x293   : > { %v1296_v5 = vand.u32 15, %v1126_v9  ;;  %v3972_v9 = vsel %vm14188_vm12, %v14221_v15, 0.0 }
 0x294   : > { %v4029_v32 = vpack.c.bf16 %v18857_v62, %v3972_v9  ;;  %v18876_v62 = vld [vmem:[#allocation77_spill] sm:$0xff] }
 0x295   : > { %vm14993_vm2 = vcmp.lt.s32.totalorder %v1296_v5, 15 }
 0x296   : > { %v18867_v16 = vsel %vm14993_vm2, 4294967295, %v18866_v16  ;;  %v4810_v42 = vsel %vm14993_vm2, %v4636_v7, 0.0  ;;  %v1130_v7 = vadd.s32 168, %v13911_v50  ;;  %vm18877_vm2 = vnez %v18876_v62 }
 0x297   : > { %18868 = vst [vmem:[#allocation80_spill] sm:$0xff] %v18867_v16  ;;  %v3974_v9 = vsel %vm18877_vm2, %v14245_v0, 0.0 }
 0x299   : > { %6180 = vmatmul.mubr.bf16.gmra.mrb[116].mxu1 %v5328_v29  ;;  %v5332_v29 = vsel %vm18850_vm3, %v4028_v40, %v5158_v24  ;;  %v18871_v24 = vld [vmem:[#allocation82_spill] sm:$0xff]  ;;  %v5258_v40 = vpop.permute.xlu0 %5257 }
 0x29a   : > { %6187 = vmatprep.mubr.bf16.mxu1 %v5460_v53  ;;  %v1128_v53 = vadd.s32 152, %v13911_v50  ;;  %v4637_v5 = vrot.slane %v18871_v24, 2 }
 0x29c   : > { %v1310_v31 = vand.u32 15, %v1128_v53  ;;  %v4640_v37 = vsel %vm18870_vm15, %v4637_v5, %v4639_v35  ;;  %v13213_v53 = vld [vmem:[%s18143_s8 + $0x10] sm:$0xff]  }
 0x29d   : > { %12840 = vmatprep.subr.bf16.mxu0 %v13213_v53 }
 0x29e   : > { %vm15010_vm1 = vcmp.lt.s32.totalorder %v1310_v31, 15  ;;  %v1324_v31 = vand.u32 15, %v1130_v7  ;;  %12841 = vmatpush3.bf16.msra.mxu0 %v13213_v53  ;;  %v18885_v7 = vld [vmem:[#allocation79_spill] sm:$0xff] }
 0x29f   : > { %v18874_v46 = vsel %vm15010_vm1, 4294967295, %v18873_v46  ;;  %vm18886_vm2 = vnez %v18885_v7  ;;  %v1146_v7 = vadd.s32 296, %v13911_v50 }
 0x2a0   : > { %18875 = vst [vmem:[#allocation82_spill] sm:$0xff] %v18874_v46  ;;  %v3976_v53 = vsel %vm18886_vm2, %v14271_v49, 0.0 }
 0x2a1   : > { %6188 = vmatmul.mubr.bf16.gmra.mrb[120].mxu1 %v5332_v29  ;;  %v4865_v29 = vpack.c.bf16 %v4810_v42, %v4634_v41  ;;  %v4812_v42 = vsel %vm15010_vm1, %v4640_v37, 0.0  ;;  %vm18884_vm1 = vcmask 1045504   ;;  %v1132_v37 = vadd.s32 184, %v13911_v50 }
 0x2a2   : > { %6195 = vmatprep.mubr.bf16.mxu1 %v5464_v12  ;;  %v5336_v12 = vsel %vm18850_vm3, %v4029_v32, %v5160_v28  ;;  %vm18878_vm3 = vmmov %vm18870_vm15  ;;  %v5162_v28 = vpop.permute.xlu1 %5161 }
 0x2a3   : > { %v5468_v15 = vsel %vm18872_vm14, %v4865_v29, %v5258_v40  ;;  %v4638_v41 = vsel %vm18878_vm3, %v4635_v2, %v4637_v5  ;;  %v18879_v40 = vld [vmem:[#allocation84_spill] sm:$0xff]  ;;  %v4643_v29 = vrot.slane %v14321_v48, 2  ;;  %vm18880_vm15 = vmmov %vm18872_vm14  ;;  %vm15030_vm3 = vcmp.lt.s32.totalorder %v1324_v31, 15 }
 0x2a4   : > { %v4641_v32 = vrot.slane %v18879_v40, 2  ;;  %v4866_v10 = vpack.c.bf16 %v4812_v42, %v4638_v41  ;;  %v18881_v2 = vmov 0  ;;  %vm18887_vm4 = vmmov %vm18884_vm1  ;;  %v18888_v41 = vld [vmem:[#allocation86_spill] sm:$0xff] }
 0x2a5   : > { %v18882_v2 = vsel %vm15030_vm3, 4294967295, %v18881_v2  ;;  %v4645_v42 = vrot.slane %v18888_v41, 2  ;;  %vm18897_vm2 = vmmov %vm18887_vm4 }
 0x2a6   : > { %18883 = vst [vmem:[#allocation84_spill] sm:$0xff] %v18882_v2  ;;  %v4644_v5 = vsel %vm18884_vm1, %v4641_v32, %v4643_v29  ;;  %vm18890_vm1 = vmmov %vm18872_vm14 }
 0x2a9   : > { %6196 = vmatmul.mubr.bf16.gmra.mrb[124].mxu1 %v5336_v12  ;;  %v5260_v12 = vpop.permute.xlu0 %5259 }
 0x2aa   : > { %6203 = vmatprep.mubr.bf16.mxu1 %v5468_v15  ;;  %v4030_v15 = vpack.c.bf16 %v18864_v54, %v3974_v9  ;;  %v5472_v0 = vsel %vm18880_vm15, %v4866_v10, %v5260_v12  ;;  %v4642_v54 = vsel %vm18887_vm4, %v4639_v35, %v4641_v32  ;;  %v5164_v9 = vpop.permute.xlu1 %5163  ;;  %v1338_v10 = vand.u32 15, %v1132_v37  ;;  %v18895_v37 = vld [vmem:[#allocation81_spill] sm:$0xff] }
 0x2ab   : > { %v18892_v35 = vmov 0 }
 0x2ac   : > { %v5340_v16 = vsel %vm18872_vm14, %v4030_v15, %v5162_v28  ;;  %v18889_v28 = vld [vmem:[#allocation88_spill] sm:$0xff]  ;;  %v4031_v15 = vpack.c.bf16 %v18871_v24, %v3976_v53  ;;  %vm18891_vm14 = vmmov %vm18890_vm1  ;;  %vm15047_vm15 = vcmp.lt.s32.totalorder %v1338_v10, 15  ;;  %v4646_v24 = vsel %vm18897_vm2, %v4643_v29, %v4645_v42 }
 0x2ad   : > { %v4647_v31 = vrot.slane %v18889_v28, 2  ;;  %v5262_v12 = vpop.permute.xlu0 %5261  ;;  %v18893_v35 = vsel %vm15047_vm15, 4294967295, %v18892_v35  ;;  %v4651_v10 = vrot.slane %v14371_v1, 2  ;;  %v18900_v29 = vmov 0 }
 0x2ae   : > { %18894 = vst [vmem:[#allocation86_spill] sm:$0xff] %v18893_v35 }
 0x2af   : > { %v4648_v32 = vsel %vm18887_vm4, %v4645_v42, %v4647_v31 }
 0x2b0   : > { %v4816_v53 = vsel %vm15047_vm15, %v4648_v32, 0.0  ;;  %v1136_v32 = vadd.s32 216, %v13911_v50 }
 0x2b1   : > { %6204 = vmatmul.mubr.bf16.gmra.mrb[128].mxu1 %v5340_v16  ;;  %v4814_v16 = vsel %vm15030_vm3, %v4644_v5, 0.0  ;;  %v1134_v5 = vadd.s32 200, %v13911_v50  ;;  %vm18896_vm3 = vnez %v18895_v37 }
 0x2b2   : > { %6211 = vmatprep.mubr.bf16.mxu1 %v5472_v0  ;;  %v4867_v46 = vpack.c.bf16 %v4814_v16, %v4642_v54  ;;  %v5344_v0 = vsel %vm18890_vm1, %v4031_v15, %v5164_v9  ;;  %v3978_v2 = vsel %vm18896_vm3, %v14295_v23, 0.0  ;;  %v5166_v54 = vpop.permute.xlu1 %5165  ;;  %v18898_v16 = vld [vmem:[#allocation89_spill] sm:$0xff]  ;;  %vm18905_vm3 = vmmov %vm18897_vm2 }
 0x2b3   : > { %v4649_v9 = vrot.slane %v18898_v16, 2  ;;  %v4032_v15 = vpack.c.bf16 %v18879_v40, %v3978_v2 }
 0x2b4   : > { %v5476_v49 = vsel %vm18891_vm14, %v4867_v46, %v5262_v12  ;;  %v1352_v46 = vand.u32 15, %v1134_v5  ;;  %v5264_v12 = vpop.permute.xlu0 %5263  ;;  %vm18899_vm14 = vmmov %vm18890_vm1  ;;  %v18903_v5 = vld [vmem:[#allocation83_spill] sm:$0xff] }
 0x2b5   : > { %v4652_v42 = vsel %vm18897_vm2, %v4649_v9, %v4651_v10  ;;  %vm18904_vm15 = vnez %v18903_v5  ;;  %v4650_v40 = vsel %vm18905_vm3, %v4647_v31, %v4649_v9  ;;  %v18908_v31 = vmov 0 }
 0x2b6   : > { %vm15064_vm4 = vcmp.lt.s32.totalorder %v1352_v46, 15  ;;  %v3980_v35 = vsel %vm18904_vm15, %v14321_v48, 0.0  ;;  %v18906_v46 = vld [vmem:[#allocation91_spill] sm:$0xff] }
 0x2b7   : > { %v18901_v29 = vsel %vm15064_vm4, 4294967295, %v18900_v29  ;;  %v4818_v2 = vsel %vm15064_vm4, %v4652_v42, 0.0  ;;  %v1138_v42 = vadd.s32 232, %v13911_v50 }
 0x2b8   : > { %18902 = vst [vmem:[#allocation88_spill] sm:$0xff] %v18901_v29 }
 0x2b9   : > { %6212 = vmatmul.mubr.bf16.gmra.mrb[132].mxu1 %v5344_v0  ;;  %v4868_v0 = vpack.c.bf16 %v4816_v53, %v4646_v24  ;;  %v5168_v24 = vpop.permute.xlu1 %5167  ;;  %v1366_v53 = vand.u32 15, %v1136_v32  ;;  %v15087_v32 = vpop.f32.mrb[32].mxu0 }
 0x2ba   : > { %6219 = vmatprep.mubr.bf16.mxu1 %v5476_v49  ;;  %v5348_v49 = vsel %vm18890_vm1, %v4032_v15, %v5166_v54  ;;  %v4653_v54 = vrot.slane %v14382_v44, 2  ;;  %v5266_v15 = vpop.permute.xlu0 %5265  ;;  %v15089_v29 = vpop.f32.mrb[33].mxu0 }
 0x2bb   : > { %v5480_v23 = vsel %vm18899_vm14, %v4868_v0, %v5264_v12  ;;  %v4655_v12 = vrot.slane %v18906_v46, 2  ;;  %v4033_v0 = vpack.c.bf16 %v18888_v41, %v3980_v35  ;;  %vm18907_vm14 = vmmov %vm18890_vm1  ;;  %vm15081_vm2 = vcmp.lt.s32.totalorder %v1366_v53, 15  ;;  %v18911_v41 = vld [vmem:[#allocation85_spill] sm:$0xff] }
 0x2bc   : > { %v18909_v31 = vsel %vm15081_vm2, 4294967295, %v18908_v31  ;;  %vm18912_vm4 = vnez %v18911_v41 }
 0x2bd   : > { %18910 = vst [vmem:[#allocation89_spill] sm:$0xff] %v18909_v31  ;;  %v4656_v9 = vsel %vm18905_vm3, %v4653_v54, %v4655_v12  ;;  %v3982_v35 = vsel %vm18912_vm4, %v18889_v28, 0.0  ;;  %v5170_v53 = vpop.permute.xlu1 %5169 }
 0x2be   : > { %v5268_v5 = vpop.permute.xlu0 %5267  ;;  %v4034_v37 = vpack.c.bf16 %v18898_v16, %v3982_v35  ;;  %v18920_v16 = vld [vmem:[#allocation87_spill] sm:$0xff] }
 0x2bf   : > { %vm18921_vm4 = vnez %v18920_v16 }
 0x2c0   : > { %v5356_v28 = vsel %vm18907_vm14, %v4034_v37, %v5170_v53  ;;  %v3984_v37 = vsel %vm18921_vm4, %v14371_v1, 0.0 }
 0x2c1   : > { %6220 = vmatmul.mubr.bf16.gmra.mrb[136].mxu1 %v5348_v49  ;;  %v4869_v49 = vpack.c.bf16 %v4818_v2, %v4650_v40  ;;  %v15094_v40 = vpop.f32.mrb[34].mxu0  ;;  %v4035_v16 = vpack.c.bf16 %v14382_v44, %v3984_v37 }
 0x2c2   : > { %6227 = vmatprep.mubr.bf16.mxu1 %v5480_v23  ;;  %v5352_v23 = vsel %vm18890_vm1, %v4033_v0, %v5168_v24  ;;  %vm18913_vm1 = vmmov %vm18905_vm3  ;;  %v4820_v24 = vsel %vm15081_vm2, %v4656_v9, 0.0  ;;  %v1380_v0 = vand.u32 15, %v1138_v42  ;;  %vm18919_vm2 = vcmask 1045504   ;;  %v5270_v1 = vpop.permute.xlu0 %5269 }
 0x2c3   : > { %v5484_v48 = vsel %vm18907_vm14, %v4869_v49, %v5266_v15  ;;  %v4654_v2 = vsel %vm18913_vm1, %v4651_v10, %v4653_v54  ;;  %v15099_v15 = vpop.f32.mrb[35].mxu0  ;;  %v18914_v49 = vld [vmem:[#allocation93_spill] sm:$0xff]  ;;  %vm18915_vm3 = vmmov %vm18907_vm14  ;;  %v18916_v54 = vmov 0  ;;  %v1140_v42 = vadd.s32 248, %v13911_v50 }
 0x2c4   : > { %v4870_v41 = vpack.c.bf16 %v4820_v24, %v4654_v2  ;;  %vm15106_vm1 = vcmp.lt.s32.totalorder %v1380_v0, 15  ;;  %v15112_v31 = vpop.f32.mrb[36].mxu0  ;;  %vm18922_vm14 = vmmov %vm18919_vm2  ;;  %v4663_v2 = vrot.slane %v14445_v55, 2  ;;  %v5172_v24 = vpop.permute.xlu1 %5171 }
 0x2c5   : > { %v18917_v54 = vsel %vm15106_vm1, 4294967295, %v18916_v54  ;;  %v15114_v38 = vpop.f32.mrb[37].mxu0  ;;  %v1394_v0 = vand.u32 15, %v1140_v42 }
 0x2c6   : > { %v5488_v10 = vsel %vm18915_vm3, %v4870_v41, %v5268_v5  ;;  %18918 = vst [vmem:[#allocation91_spill] sm:$0xff] %v18917_v54  ;;  %v15119_v35 = vpop.f32.mrb[38].mxu0  ;;  %v18929_v54 = vld [vmem:[#allocation90_spill] sm:$0xff] }
 0x2c7   : > { %v15125_v53 = vpop.f32.mrb[39].mxu0  ;;  %vm18930_vm4 = vnez %v18929_v54  ;;  %v18938_v54 = vld [vmem:[#allocation97_spill] sm:$0xff] }
 0x2c8   : > { %v15139_v42 = vpop.f32.mrb[40].mxu0  ;;  %v3986_v44 = vsel %vm18930_vm4, %v18906_v46, 0.0 }
 0x2c9   : > { %6228 = vmatmul.mubr.bf16.gmra.mrb[140].mxu1 %v5352_v23  ;;  %v4657_v23 = vrot.slane %v18914_v49, 2  ;;  %v15144_v37 = vpop.f32.mrb[41].mxu0 }
 0x2ca   : > { %6235 = vmatprep.mubr.bf16.mxu1 %v5484_v48  ;;  %v4659_v48 = vrot.slane %v14421_v27, 2 }
 0x2cb   : > { %v4658_v5 = vsel %vm18922_vm14, %v4655_v12, %v4657_v23  ;;  %vm15134_vm14 = vcmp.lt.s32.totalorder %v1394_v0, 15  ;;  %v4036_v0 = vpack.c.bf16 %v18914_v49, %v3986_v44 }
 0x2cc   : > { %v4660_v9 = vsel %vm18919_vm2, %v4657_v23, %v4659_v48  ;;  %vm18923_vm2 = vmmov %vm18915_vm3  ;;  %v18925_v23 = vmov 0 }
 0x2cd   : > { %v4822_v41 = vsel %vm15106_vm1, %v4660_v9, 0.0  ;;  %v5360_v12 = vsel %vm18923_vm2, %v4035_v16, %v5172_v24  ;;  %vm18924_vm3 = vmmov %vm18923_vm2  ;;  %v18926_v23 = vsel %vm15134_vm14, 4294967295, %v18925_v23  ;;  %vm18928_vm1 = vcmask 1045504  }
 0x2ce   : > { %v4871_v59 = vpack.c.bf16 %v4822_v41, %v4658_v5  ;;  %18927 = vst [vmem:[#allocation93_spill] sm:$0xff] %v18926_v23  ;;  %vm18931_vm2 = vmmov %vm18928_vm1  ;;  %v15149_v5 = vpop.f32.mrb[42].mxu0  ;;  %v5174_v41 = vpop.permute.xlu1 %5173 }
 0x2cf   : > { %v15151_v24 = vpop.f32.mrb[43].mxu0 }
 0x2d0   : > { %v5492_v55 = vsel %vm18924_vm3, %v4871_v59, %v5270_v1 }
 0x2d1   : > { %6236 = vmatmul.mubr.bf16.gmra.mrb[144].mxu1 %v5356_v28  ;;  %v4661_v28 = vrot.slane %v14438_v51, 2 }
 0x2d2   : > { %6243 = vmatprep.mubr.bf16.mxu1 %v5488_v10  ;;  %v13214_v10 = vld [vmem:[%s18143_s8 + $0x18] sm:$0xff]   ;;  %v5176_v49 = vpop.permute.xlu1 %5175 }
 0x2d3   : > { %12842 = vmatprep.subr.bf16.mxu0 %v13214_v10  ;;  %v4664_v9 = vsel %vm18928_vm1, %v4661_v28, %v4663_v2  ;;  %v4662_v16 = vsel %vm18931_vm2, %v4659_v48, %v4661_v28  ;;  %v5272_v2 = vpop.permute.xlu0 %5271  ;;  %vm18932_vm1 = vmmov %vm18924_vm3  ;;  %v15157_v48 = vpop.f32.mrb[44].mxu0  ;;  %v18934_v28 = vld [vmem:[#allocation92_spill] sm:$0xff] }
 0x2d4   : > { %12843 = vmatpush3.bf16.msra.mxu0 %v13214_v10  ;;  %v4824_v59 = vsel %vm15134_vm14, %v4664_v9, 0.0  ;;  %v5364_v1 = vsel %vm18932_vm1, %v4036_v0, %v5174_v41  ;;  %vm18933_vm3 = vmmov %vm18932_vm1  ;;  %vm18935_vm2 = vnez %v18934_v28  ;;  %v15162_v9 = vpop.f32.mrb[45].mxu0  ;;  %v18937_v41 = vld [vmem:[#allocation101_spill] sm:$0xff]  ;;  %v4667_v28 = vrot.slane %v18938_v54, 2 }
 0x2d5   : > { %v4872_v10 = vpack.c.bf16 %v4824_v59, %v4662_v16  ;;  %v15164_v23 = vpop.f32.mrb[46].mxu0  ;;  %v18936_v16 = vld [vmem:[#allocation100_spill] sm:$0xff]  ;;  %v4671_v0 = vrot.slane %v18937_v41, 2 }
 0x2d6   : > { %v4669_v59 = vrot.slane %v18936_v16, 2 }
 0x2d7   : > { %v5496_v46 = vsel %vm18933_vm3, %v4872_v10, %v5272_v2  ;;  %v15168_v2 = vpop.f32.mrb[47].mxu0  ;;  %vm18939_vm3 = vmmov %vm18932_vm1 }
 0x2d8   : > { %v15180_v62 = vpop.f32.mrb[48].mxu0 }
 0x2d9   : > { %6244 = vmatmul.mubr.bf16.gmra.mrb[148].mxu1 %v5360_v12  ;;  %v1144_v12 = vadd.s32 280, %v13911_v50 }
 0x2da   : > { %6251 = vmatprep.mubr.bf16.mxu1 %v5492_v55  ;;  %v3988_v55 = vsel %vm18935_vm2, %v14421_v27, 0.0  ;;  %vm18943_vm2 = vcmask 1045504  }
 0x2db   : > { %v1422_v44 = vand.u32 15, %v1144_v12  ;;  %v4037_v10 = vpack.c.bf16 %v14438_v51, %v3988_v55  ;;  %v4672_v12 = vsel %vm18943_vm2, %v4669_v59, %v4671_v0  ;;  %v15182_v51 = vpop.f32.mrb[49].mxu0  ;;  %vm18944_vm4 = vmmov %vm18943_vm2 }
 0x2dc   : > { %v4670_v55 = vsel %vm18944_vm4, %v4667_v28, %v4669_v59  ;;  %vm18946_vm2 = vmmov %vm18932_vm1  ;;  %v18947_v59 = vmov 0 }
 0x2dd   : > { %vm15174_vm14 = vcmp.lt.s32.totalorder %v1422_v44, 15  ;;  %v5178_v44 = vpop.permute.xlu1 %5177 }
 0x2de   : > { %v18941_v36 = vsel %vm15174_vm14, 4294967295, %v18940_v36 }
 0x2df   : > { %18942 = vst [vmem:[#allocation100_spill] sm:$0xff] %v18941_v36 }
 0x2e1   : > { %6252 = vmatmul.mubr.bf16.gmra.mrb[152].mxu1 %v5364_v1  ;;  %v5274_v1 = vpop.permute.xlu0 %5273 }
 0x2e2   : > { %6259 = vmatprep.mubr.bf16.mxu1 %v5496_v46  ;;  %v5368_v46 = vsel %vm18932_vm1, %v4037_v10, %v5176_v49  ;;  %v5500_v27 = vsel %vm18939_vm3, 0.0|0.0, %v5274_v1  ;;  %v4828_v49 = vsel %vm15174_vm14, %v4672_v12, 0.0  ;;  %v15187_v10 = vpop.f32.mrb[50].mxu0  ;;  %v1436_v1 = vand.u32 15, %v1146_v7 }
 0x2e3   : > { %v15191_v3 = vpop.f32.mrb[51].mxu0  ;;  %v4874_v45 = vpack.c.bf16 %v4828_v49, %v4670_v55  ;;  %vm18950_vm3 = vcmask 1045504   ;;  %v1148_v7 = vadd.s32 312, %v13911_v50  ;;  %vm18953_vm14 = vnez %v18952_v13  ;;  %v5180_v49 = vpop.permute.xlu1 %5179 }
 0x2e4   : > { %vm15195_vm4 = vcmp.lt.s32.totalorder %v1436_v1, 15  ;;  %v15201_v36 = vpop.f32.mrb[52].mxu0 }
 0x2e5   : > { %v5276_v11 = vpop.permute.xlu0 %5275  ;;  %v18948_v59 = vsel %vm15195_vm4, 4294967295, %v18947_v59  ;;  %18951 = vst [vmem:[#allocation97_spill] sm:$0xff] %v15201_v36  ;;  %v15206_v8 = vpop.f32.mrb[53].mxu0  ;;  %v1450_v1 = vand.u32 15, %v1148_v7  ;;  %v1150_v7 = vadd.s32 328, %v13911_v50 }
 0x2e6   : > { %v5504_v28 = vsel %vm18932_vm1, %v4874_v45, %v5276_v11  ;;  %18949 = vst [vmem:[#allocation101_spill] sm:$0xff] %v18948_v59  ;;  %v15211_v45 = vpop.f32.mrb[54].mxu0 }
 0x2e7   : > { %v15215_v60 = vpop.f32.mrb[55].mxu0 }
 0x2e8   : > { %v15226_v59 = vpop.f32.mrb[56].mxu0 }
 0x2e9   : > { %6260 = vmatmul.mubr.bf16.gmra.mrb[156].mxu1 %v5368_v46  ;;  %v18945_v46 = vld [vmem:[#allocation98_spill] sm:$0xff]  ;;  %v5278_v26 = vpop.permute.xlu0 %5277 }
 0x2ea   : > { %6267 = vmatprep.mubr.bf16.mxu1 %v5500_v27  ;;  %v4673_v57 = vrot.slane %v18945_v46, 2  ;;  %v5372_v27 = vsel %vm18946_vm2, 0.0|0.0, %v5178_v44  ;;  %v3992_v44 = vsel %vm18953_vm14, %v18938_v54, 0.0  ;;  %vm18954_vm2 = vmmov %vm18950_vm3  ;;  %18955 = vst [vmem:[#allocation98_spill] sm:$0xff] %v15211_v45  ;;  %v18964_v45 = vld [vmem:[#allocation96_spill] sm:$0xff] }
 0x2eb   : > { %v4039_v54 = vpack.c.bf16 %v18936_v16, %v3992_v44  ;;  %vm18965_vm14 = vnez %v18964_v45  ;;  %v15231_v44 = vpop.f32.mrb[57].mxu0 }
 0x2ec   : > { %v4676_v12 = vsel %vm18950_vm3, %v4673_v57, %v4675_v14  ;;  %v4674_v55 = vsel %vm18954_vm2, %v4671_v0, %v4673_v57  ;;  %vm18958_vm3 = vmmov %vm18932_vm1  ;;  %vm15220_vm2 = vcmp.lt.s32.totalorder %v1450_v1, 15  ;;  %v18959_v0 = vmov 0  ;;  %18966 = vst [vmem:[#allocation127_spill] sm:$0xff] %v15231_v44 }
 0x2ed   : > { %v4830_v11 = vsel %vm15195_vm4, %v4676_v12, 0.0  ;;  %v5376_v36 = vsel %vm18932_vm1, %v4039_v54, %v5180_v49  ;;  %v18960_v0 = vsel %vm15220_vm2, 4294967295, %v18959_v0  ;;  %vm18962_vm4 = vcmask 1045504   ;;  %v18969_v49 = vld [vmem:[#allocation106_spill] sm:$0xff] }
 0x2ee   : > { %v4875_v13 = vpack.c.bf16 %v4830_v11, %v4674_v55  ;;  %v3994_v16 = vsel %vm18965_vm14, %v18937_v41, 0.0  ;;  %vm18967_vm1 = vmmov %vm18962_vm4  ;;  %v5182_v55 = vpop.permute.xlu1 %5181  ;;  %v1464_v11 = vand.u32 15, %v1150_v7  ;;  %v4681_v1 = vrot.slane %v18969_v49, 2 }
 0x2ef   : > { %v4683_v54 = vrot.slane %v14588_v18, 2  ;;  %v4040_v41 = vpack.c.bf16 %v18945_v46, %v3994_v16  ;;  %v1152_v7 = vadd.s32 344, %v13911_v50 }
 0x2f0   : > { %v5508_v57 = vsel %vm18958_vm3, %v4875_v13, %v5278_v26  ;;  %v15236_v13 = vpop.f32.mrb[58].mxu0 }
 0x2f1   : > { %6268 = vmatmul.mubr.bf16.gmra.mrb[160].mxu1 %v5372_v27  ;;  %v18956_v27 = vld [vmem:[#allocation104_spill] sm:$0xff]  ;;  %18968 = vst [vmem:[#allocation128_spill] sm:$0xff] %v15236_v13  ;;  %v18977_v13 = vld [vmem:[#allocation99_spill] sm:$0xff] }
 0x2f2   : > { %6275 = vmatprep.mubr.bf16.mxu1 %v5504_v28  ;;  %v4677_v25 = vrot.slane %v18956_v27, 2  ;;  %v18957_v28 = vld [vmem:[#allocation105_spill] sm:$0xff]  ;;  %18961 = vst [vmem:[#allocation104_spill] sm:$0xff] %v18960_v0  ;;  %vm18978_vm14 = vnez %v18977_v13 }
 0x2f3   : > { %v4679_v30 = vrot.slane %v18957_v28, 2  ;;  %18963 = vst [vmem:[#allocation105_spill] sm:$0xff] %v15226_v59  ;;  %v5280_v59 = vpop.permute.xlu0 %5279  ;;  %v3996_v46 = vsel %vm18978_vm14, %v14525_v63, 0.0 }
 0x2f4   : > { %v4041_v63 = vpack.c.bf16 %v18956_v27, %v3996_v46 }
 0x2f5   : > { %v4680_v12 = vsel %vm18962_vm4, %v4677_v25, %v4679_v30  ;;  %vm18971_vm4 = vmmov %vm18958_vm3 }
 0x2f6   : > { %v4832_v26 = vsel %vm15220_vm2, %v4680_v12, 0.0  ;;  %v5380_v44 = vsel %vm18971_vm4, %v4040_v41, %v5182_v55  ;;  %vm18975_vm2 = vcmask 1045504   ;;  %v18982_v55 = vld [vmem:[#allocation109_spill] sm:$0xff]  ;;  %v18983_v41 = vld [vmem:[#allocation110_spill] sm:$0xff] }
 0x2f7   : > { %v4684_v12 = vsel %vm18975_vm2, %v4681_v1, %v4683_v54  ;;  %vm18980_vm4 = vmmov %vm18975_vm2 }
 0x2f8   : > { %vm18984_vm2 = vmmov %vm18958_vm3 }
 0x2f9   : > { %6276 = vmatmul.mubr.bf16.gmra.mrb[164].mxu1 %v5376_v36  ;;  %v4678_v36 = vsel %vm18967_vm1, %v4675_v14, %v4677_v25  ;;  %vm15245_vm1 = vcmp.lt.s32.totalorder %v1464_v11, 15  ;;  %v18972_v25 = vmov 0  ;;  %v4685_v11 = vrot.slane %v18982_v55, 2 }
 0x2fa   : > { %6283 = vmatprep.mubr.bf16.mxu1 %v5508_v57  ;;  %v15240_v57 = vpop.f32.mrb[59].mxu0  ;;  %v4876_v45 = vpack.c.bf16 %v4832_v26, %v4678_v36  ;;  %v18973_v25 = vsel %vm15245_vm1, 4294967295, %v18972_v25  ;;  %v5184_v36 = vpop.permute.xlu1 %5183  ;;  %v1478_v26 = vand.u32 15, %v1152_v7  ;;  %v1154_v7 = vadd.s32 360, %v13911_v50 }
 0x2fb   : > { %18970 = vst [vmem:[#allocation106_spill] sm:$0xff] %v15240_v57  ;;  %18974 = vst [vmem:[#allocation129_spill] sm:$0xff] %v18973_v25  ;;  %v15251_v0 = vpop.f32.mrb[60].mxu0  ;;  %v5282_v57 = vpop.permute.xlu0 %5281 }
 0x2fc   : > { %v5512_v14 = vsel %vm18958_vm3, %v4876_v45, %v5280_v59  ;;  %18976 = vst [vmem:[#allocation130_spill] sm:$0xff] %v15251_v0  ;;  %v15256_v16 = vpop.f32.mrb[61].mxu0  ;;  %v4834_v59 = vsel %vm15245_vm1, %v4684_v12, 0.0  ;;  %vm18985_vm3 = vmmov %vm18984_vm2  ;;  %vm18989_vm1 = vcmask 1045504  }
 0x2fd   : > { %18979 = vst [vmem:[#allocation131_spill] sm:$0xff] %v15256_v16  ;;  %v15261_v45 = vpop.f32.mrb[62].mxu0  ;;  %v5384_v16 = vsel %vm18984_vm2, %v4041_v63, %v5184_v36  ;;  %vm18993_vm2 = vmmov %vm18989_vm1  ;;  %v4689_v36 = vrot.slane %v14614_v20, 2 }
 0x2fe   : > { %18981 = vst [vmem:[#allocation132_spill] sm:$0xff] %v15261_v45  ;;  %v15265_v0 = vpop.f32.mrb[63].mxu0  ;;  %v18991_v45 = vld [vmem:[#allocation102_spill] sm:$0xff] }
 0x2ff   : > { %v15276_v25 = vpop.f32.mrb[64].mxu0  ;;  %vm18992_vm14 = vnez %v18991_v45 }
 0x300   : > { %18990 = vst [vmem:[#allocation110_spill] sm:$0xff] %v15276_v25  ;;  %v3998_v27 = vsel %vm18992_vm14, %v18957_v28, 0.0  ;;  %v15281_v46 = vpop.f32.mrb[65].mxu0 }
 0x301   : > { %6284 = vmatmul.mubr.bf16.gmra.mrb[168].mxu1 %v5380_v44  ;;  %v4682_v44 = vsel %vm18980_vm4, %v4679_v30, %v4681_v1  ;;  %vm15270_vm4 = vcmp.lt.s32.totalorder %v1478_v26, 15  ;;  %v18986_v1 = vmov 0  ;;  %v4691_v26 = vrot.slane %v14648_v4, 2 }
 0x302   : > { %6291 = vmatprep.mubr.bf16.mxu1 %v5512_v14  ;;  %v4687_v14 = vrot.slane %v18983_v41, 2  ;;  %v4877_v13 = vpack.c.bf16 %v4834_v59, %v4682_v44  ;;  %v18987_v1 = vsel %vm15270_vm4, 4294967295, %v18986_v1  ;;  %v5186_v44 = vpop.permute.xlu1 %5185  ;;  %v1492_v59 = vand.u32 15, %v1154_v7 }
 0x303   : > { %18988 = vst [vmem:[#allocation109_spill] sm:$0xff] %v18987_v1  ;;  %v4042_v28 = vpack.c.bf16 %v18969_v49, %v3998_v27  ;;  %v1156_v7 = vadd.s32 376, %v13911_v50 }
 0x304   : > { %v5516_v30 = vsel %vm18985_vm3, %v4877_v13, %v5282_v57  ;;  %v4688_v12 = vsel %vm18989_vm1, %v4685_v11, %v4687_v14  ;;  %v15286_v57 = vpop.f32.mrb[66].mxu0  ;;  %vm18995_vm1 = vmmov %vm18985_vm3 }
 0x305   : > { %v4836_v13 = vsel %vm15270_vm4, %v4688_v12, 0.0  ;;  %18994 = vst [vmem:[#allocation133_spill] sm:$0xff] %v15286_v57  ;;  %v15290_v63 = vpop.f32.mrb[67].mxu0  ;;  %v5388_v25 = vsel %vm18995_vm1, %v4042_v28, %v5186_v44  ;;  %vm18996_vm3 = vmmov %vm18995_vm1  ;;  %vm19000_vm4 = vcmask 1045504   ;;  %v19002_v57 = vld [vmem:[#allocation103_spill] sm:$0xff]  ;;  %v1506_v44 = vand.u32 15, %v1156_v7 }
 0x306   : > { %v4692_v12 = vsel %vm19000_vm4, %v4689_v36, %v4691_v26  ;;  %v15301_v1 = vpop.f32.mrb[68].mxu0  ;;  %vm19003_vm14 = vnez %v19002_v57  ;;  %vm19005_vm1 = vmmov %vm19000_vm4  ;;  %v4695_v28 = vrot.slane %v14669_v58, 2  ;;  %v1158_v7 = vadd.s32 392, %v13911_v50 }
 0x307   : > { %19001 = vst [vmem:[#allocation135_spill] sm:$0xff] %v15301_v1  ;;  %v4000_v49 = vsel %vm19003_vm14, %v14588_v18, 0.0  ;;  %v15306_v27 = vpop.f32.mrb[69].mxu0  ;;  %vm19008_vm4 = vmmov %vm18996_vm3 }
 0x308   : > { %19004 = vst [vmem:[#allocation136_spill] sm:$0xff] %v15306_v27  ;;  %v4043_v18 = vpack.c.bf16 %v18982_v55, %v4000_v49 }
 0x309   : > { %6292 = vmatmul.mubr.bf16.gmra.mrb[172].mxu1 %v5384_v16  ;;  %v4686_v16 = vsel %vm18993_vm2, %v4683_v54, %v4685_v11  ;;  %vm15295_vm2 = vcmp.lt.s32.totalorder %v1492_v59, 15  ;;  %v18997_v11 = vmov 0  ;;  %v19007_v59 = vld [vmem:[#allocation113_spill] sm:$0xff] }
 0x30a   : > { %6299 = vmatprep.mubr.bf16.mxu1 %v5516_v30  ;;  %v5284_v30 = vpop.permute.xlu0 %5283  ;;  %v4878_v45 = vpack.c.bf16 %v4836_v13, %v4686_v16  ;;  %v18998_v11 = vsel %vm15295_vm2, 4294967295, %v18997_v11  ;;  %v15311_v16 = vpop.f32.mrb[70].mxu0 }
 0x30b   : > { %18999 = vst [vmem:[#allocation134_spill] sm:$0xff] %v18998_v11  ;;  %19006 = vst [vmem:[#allocation137_spill] sm:$0xff] %v15311_v16  ;;  %v5188_v13 = vpop.permute.xlu1 %5187  ;;  %v19014_v16 = vld [vmem:[#allocation108_spill] sm:$0xff] }
 0x30c   : > { %v5520_v54 = vsel %vm18996_vm3, %v4878_v45, %v5284_v30  ;;  %v4838_v45 = vsel %vm15295_vm2, %v4692_v12, 0.0  ;;  %v4693_v30 = vrot.slane %v19007_v59, 2  ;;  %v5392_v27 = vsel %vm19008_vm4, %v4043_v18, %v5188_v13  ;;  %v19019_v13 = vld [vmem:[#allocation115_spill] sm:$0xff] }
 0x30d   : > { %vm19012_vm2 = vcmask 1045504   ;;  %vm19015_vm14 = vnez %v19014_v16  ;;  %v4699_v18 = vrot.slane %v14695_v56, 2 }
 0x30e   : > { %v5286_v1 = vpop.permute.xlu0 %5285  ;;  %v4696_v12 = vsel %vm19012_vm2, %v4693_v30, %v4695_v28  ;;  %v4002_v55 = vsel %vm19015_vm14, %v18983_v41, 0.0  ;;  %vm19017_vm4 = vmmov %vm19012_vm2 }
 0x30f   : > { %v4044_v41 = vpack.c.bf16 %v14614_v20, %v4002_v55  ;;  %vm19020_vm2 = vmmov %vm18996_vm3 }
 0x311   : > { %6300 = vmatmul.mubr.bf16.gmra.mrb[176].mxu1 %v5388_v25  ;;  %v4690_v25 = vsel %vm19005_vm1, %v4687_v14, %v4689_v36  ;;  %vm15320_vm1 = vcmp.lt.s32.totalorder %v1506_v44, 15  ;;  %v19009_v36 = vmov 0  ;;  %v4697_v44 = vrot.slane %v19019_v13, 2 }
 0x312   : > { %6307 = vmatprep.mubr.bf16.mxu1 %v5520_v54  ;;  %v15315_v54 = vpop.f32.mrb[71].mxu0  ;;  %v4879_v57 = vpack.c.bf16 %v4838_v45, %v4690_v25  ;;  %v19010_v36 = vsel %vm15320_vm1, 4294967295, %v19009_v36  ;;  %v5190_v25 = vpop.permute.xlu1 %5189  ;;  %v1520_v45 = vand.u32 15, %v1158_v7  ;;  %v1160_v7 = vadd.s32 408, %v13911_v50 }
 0x313   : > { %19011 = vst [vmem:[#allocation113_spill] sm:$0xff] %v19010_v36  ;;  %v15326_v11 = vpop.f32.mrb[72].mxu0 }
 0x314   : > { %v5524_v14 = vsel %vm18996_vm3, %v4879_v57, %v5286_v1  ;;  %19013 = vst [vmem:[#allocation138_spill] sm:$0xff] %v15326_v11  ;;  %v15331_v49 = vpop.f32.mrb[73].mxu0  ;;  %v4840_v1 = vsel %vm15320_vm1, %v4696_v12, 0.0  ;;  %v5288_v11 = vpop.permute.xlu0 %5287  ;;  %vm19021_vm3 = vmmov %vm19020_vm2  ;;  %vm19025_vm1 = vcmask 1045504  }
 0x315   : > { %19016 = vst [vmem:[#allocation139_spill] sm:$0xff] %v15331_v49  ;;  %v15336_v57 = vpop.f32.mrb[74].mxu0  ;;  %v5396_v49 = vsel %vm19020_vm2, %v4044_v41, %v5190_v25  ;;  %v4700_v12 = vsel %vm19025_vm1, %v4697_v44, %v4699_v18  ;;  %vm19030_vm2 = vmmov %vm19025_vm1  ;;  %v19032_v25 = vld [vmem:[#allocation117_spill] sm:$0xff]  ;;  %v4703_v41 = vrot.slane %v14719_v19, 2 }
 0x316   : > { %19018 = vst [vmem:[#allocation140_spill] sm:$0xff] %v15336_v57  ;;  %v19027_v57 = vld [vmem:[#allocation111_spill] sm:$0xff]  ;;  %vm19034_vm1 = vmmov %vm19021_vm3 }
 0x317   : > { %vm19028_vm14 = vnez %v19027_v57 }
 0x318   : > { %v4004_v20 = vsel %vm19028_vm14, %v14648_v4, 0.0 }
 0x319   : > { %6308 = vmatmul.mubr.bf16.gmra.mrb[180].mxu1 %v5392_v27  ;;  %v4694_v27 = vsel %vm19017_vm4, %v4691_v26, %v4693_v30  ;;  %vm15345_vm4 = vcmp.lt.s32.totalorder %v1520_v45, 15  ;;  %v19022_v30 = vmov 0  ;;  %v4701_v45 = vrot.slane %v19032_v25, 2 }
 0x31a   : > { %6315 = vmatprep.mubr.bf16.mxu1 %v5524_v14  ;;  %v15340_v14 = vpop.f32.mrb[75].mxu0  ;;  %v4880_v16 = vpack.c.bf16 %v4840_v1, %v4694_v27  ;;  %v19023_v30 = vsel %vm15345_vm4, 4294967295, %v19022_v30  ;;  %v5192_v27 = vpop.permute.xlu1 %5191  ;;  %v1534_v1 = vand.u32 15, %v1160_v7  ;;  %v4045_v4 = vpack.c.bf16 %v19007_v59, %v4004_v20 }
 0x31b   : > { %19024 = vst [vmem:[#allocation115_spill] sm:$0xff] %v19023_v30  ;;  %v15351_v36 = vpop.f32.mrb[76].mxu0  ;;  %v1162_v7 = vadd.s32 424, %v13911_v50 }
 0x31c   : > { %v5528_v26 = vsel %vm19021_vm3, %v4880_v16, %v5288_v11  ;;  %19026 = vst [vmem:[#allocation141_spill] sm:$0xff] %v15351_v36  ;;  %v15356_v55 = vpop.f32.mrb[77].mxu0  ;;  %v4842_v11 = vsel %vm15345_vm4, %v4700_v12, 0.0  ;;  %v5290_v36 = vpop.permute.xlu0 %5289  ;;  %vm19035_vm3 = vmmov %vm19034_vm1  ;;  %vm19039_vm4 = vcmask 1045504  }
 0x31d   : > { %19029 = vst [vmem:[#allocation142_spill] sm:$0xff] %v15356_v55  ;;  %v15361_v16 = vpop.f32.mrb[78].mxu0  ;;  %v5400_v55 = vsel %vm19034_vm1, %v4045_v4, %v5192_v27  ;;  %v4704_v12 = vsel %vm19039_vm4, %v4701_v45, %v4703_v41  ;;  %vm19044_vm1 = vmmov %vm19039_vm4  ;;  %v19046_v27 = vld [vmem:[#allocation119_spill] sm:$0xff]  ;;  %v19047_v4 = vld [vmem:[#allocation121_spill] sm:$0xff] }
 0x31e   : > { %19031 = vst [vmem:[#allocation143_spill] sm:$0xff] %v15361_v16  ;;  %v19041_v16 = vld [vmem:[#allocation112_spill] sm:$0xff]  ;;  %vm19048_vm4 = vmmov %vm19035_vm3 }
 0x31f   : > { %vm19042_vm14 = vnez %v19041_v16 }
 0x320   : > { %v4006_v59 = vsel %vm19042_vm14, %v14669_v58, 0.0 }
 0x321   : > { %6316 = vmatmul.mubr.bf16.gmra.mrb[184].mxu1 %v5396_v49  ;;  %v4698_v49 = vsel %vm19030_vm2, %v4695_v28, %v4697_v44  ;;  %vm15370_vm2 = vcmp.lt.s32.totalorder %v1534_v1, 15  ;;  %v19036_v44 = vmov 0  ;;  %v4705_v1 = vrot.slane %v19046_v27, 2 }
 0x322   : > { %6323 = vmatprep.mubr.bf16.mxu1 %v5528_v26  ;;  %v15365_v26 = vpop.f32.mrb[79].mxu0  ;;  %v4881_v57 = vpack.c.bf16 %v4842_v11, %v4698_v49  ;;  %v19037_v44 = vsel %vm15370_vm2, 4294967295, %v19036_v44  ;;  %v5194_v49 = vpop.permute.xlu1 %5193  ;;  %v1548_v11 = vand.u32 15, %v1162_v7  ;;  %v4046_v58 = vpack.c.bf16 %v19019_v13, %v4006_v59 }
 0x323   : > { %19033 = vst [vmem:[#allocation117_spill] sm:$0xff] %v15365_v26  ;;  %19038 = vst [vmem:[#allocation144_spill] sm:$0xff] %v19037_v44  ;;  %v5292_v26 = vpop.permute.xlu0 %5291  ;;  %v1164_v7 = vadd.s32 440, %v13911_v50 }
 0x324   : > { %v5532_v28 = vsel %vm19035_vm3, %v4881_v57, %v5290_v36  ;;  %v15376_v30 = vpop.f32.mrb[80].mxu0  ;;  %v4844_v36 = vsel %vm15370_vm2, %v4704_v12, 0.0  ;;  %vm19052_vm2 = vcmask 1045504  }
 0x325   : > { %19040 = vst [vmem:[#allocation145_spill] sm:$0xff] %v15376_v30  ;;  %v15381_v20 = vpop.f32.mrb[81].mxu0 }
 0x326   : > { %19043 = vst [vmem:[#allocation146_spill] sm:$0xff] %v15381_v20  ;;  %v15386_v57 = vpop.f32.mrb[82].mxu0  ;;  %v5404_v20 = vsel %vm19048_vm4, %v4046_v58, %v5194_v49  ;;  %vm19057_vm4 = vmmov %vm19052_vm2  ;;  %v4709_v49 = vrot.slane %v14756_v39, 2 }
 0x327   : > { %19045 = vst [vmem:[#allocation147_spill] sm:$0xff] %v15386_v57  ;;  %v15390_v30 = vpop.f32.mrb[83].mxu0  ;;  %v19054_v57 = vld [vmem:[#allocation114_spill] sm:$0xff] }
 0x328   : > { %vm19055_vm14 = vnez %v19054_v57 }
 0x329   : > { %6324 = vmatmul.mubr.bf16.gmra.mrb[188].mxu1 %v5400_v55  ;;  %v4702_v55 = vsel %vm19044_vm1, %v4699_v18, %v4701_v45  ;;  %vm15395_vm1 = vcmp.lt.s32.totalorder %v1548_v11, 15  ;;  %v19049_v45 = vmov 0  ;;  %v4008_v13 = vsel %vm19055_vm14, %v14695_v56, 0.0  ;;  %v19059_v11 = vld [vmem:[#allocation122_spill] sm:$0xff] }
 0x32a   : > { %6331 = vmatprep.mubr.bf16.mxu1 %v5532_v28  ;;  %v4707_v28 = vrot.slane %v19047_v4, 2  ;;  %v4882_v16 = vpack.c.bf16 %v4844_v36, %v4702_v55  ;;  %v19050_v45 = vsel %vm15395_vm1, 4294967295, %v19049_v45  ;;  %v5196_v55 = vpop.permute.xlu1 %5195  ;;  %v1562_v36 = vand.u32 15, %v1164_v7 }
 0x32b   : > { %19051 = vst [vmem:[#allocation119_spill] sm:$0xff] %v19050_v45  ;;  %v4711_v58 = vrot.slane %v19059_v11, 2  ;;  %v4047_v56 = vpack.c.bf16 %v19032_v25, %v4008_v13  ;;  %v1166_v7 = vadd.s32 456, %v13911_v50 }
 0x32c   : > { %v5536_v18 = vsel %vm19035_vm3, %v4882_v16, %v5292_v26  ;;  %v4708_v12 = vsel %vm19052_vm2, %v4705_v1, %v4707_v28  ;;  %vm19061_vm2 = vmmov %vm19035_vm3 }
 0x32d   : > { %v4846_v16 = vsel %vm15395_vm1, %v4708_v12, 0.0  ;;  %vm19062_vm3 = vmmov %vm19061_vm2  ;;  %vm19066_vm1 = vcmask 1045504  }
 0x32e   : > { %v4712_v12 = vsel %vm19066_vm1, %v4709_v49, %v4711_v58 }
 0x331   : > { %6332 = vmatmul.mubr.bf16.gmra.mrb[192].mxu1 %v5404_v20  ;;  %v15401_v44 = vpop.f32.mrb[84].mxu0  ;;  %v4706_v20 = vsel %vm19057_vm4, %v4703_v41, %v4705_v1  ;;  %vm15420_vm4 = vcmp.lt.s32.totalorder %v1562_v36, 15  ;;  %v19063_v1 = vmov 0 }
 0x332   : > { %6339 = vmatprep.mubr.bf16.mxu1 %v5536_v18  ;;  %19053 = vst [vmem:[#allocation121_spill] sm:$0xff] %v15401_v44  ;;  %v15406_v59 = vpop.f32.mrb[85].mxu0  ;;  %v5294_v44 = vpop.permute.xlu0 %5293  ;;  %v4883_v57 = vpack.c.bf16 %v4846_v16, %v4706_v20  ;;  %v19064_v1 = vsel %vm15420_vm4, 4294967295, %v19063_v1  ;;  %v1576_v16 = vand.u32 15, %v1166_v7  ;;  %v1168_v7 = vadd.s32 472, %v13911_v50 }
 0x333   : > { %19056 = vst [vmem:[#allocation148_spill] sm:$0xff] %v15406_v59  ;;  %v15411_v26 = vpop.f32.mrb[86].mxu0  ;;  %v5408_v59 = vsel %vm19061_vm2, %v4047_v56, %v5196_v55  ;;  %19065 = vst [vmem:[#allocation150_spill] sm:$0xff] %v19064_v1  ;;  %v5198_v20 = vpop.permute.xlu1 %5197  ;;  %v19073_v55 = vld [vmem:[#allocation123_spill] sm:$0xff]  ;;  %v4715_v56 = vrot.slane %v14795_v61, 2 }
 0x334   : > { %19058 = vst [vmem:[#allocation149_spill] sm:$0xff] %v15411_v26  ;;  %v15415_v18 = vpop.f32.mrb[87].mxu0  ;;  %v5540_v41 = vsel %vm19062_vm3, %v4883_v57, %v5294_v44  ;;  %v19068_v26 = vld [vmem:[#allocation116_spill] sm:$0xff]  ;;  %vm19071_vm2 = vmmov %vm19066_vm1  ;;  %v4848_v44 = vsel %vm15420_vm4, %v4712_v12, 0.0  ;;  %v4713_v36 = vrot.slane %v19073_v55, 2  ;;  %vm19080_vm4 = vcmask 1045504  }
 0x335   : > { %19060 = vst [vmem:[#allocation122_spill] sm:$0xff] %v15415_v18  ;;  %vm19069_vm14 = vnez %v19068_v26  ;;  %vm19075_vm1 = vmmov %vm19062_vm3 }
 0x336   : > { %v4010_v25 = vsel %vm19069_vm14, %v14719_v19, 0.0  ;;  %vm19076_vm3 = vmmov %vm19075_vm1  ;;  %v4716_v12 = vsel %vm19080_vm4, %v4713_v36, %v4715_v56 }
 0x337   : > { %v4048_v19 = vpack.c.bf16 %v19046_v27, %v4010_v25  ;;  %v4012_v25 = vsel %vm14711_vm13, %v19047_v4, 0.0  ;;  %v4717_v4 = vrot.slane %v14806_v22, 2  ;;  %v4719_v27 = vrot.slane %v14813_v52, 2 }
 0x338   : > { %v4049_v18 = vpack.c.bf16 %v14756_v39, %v4012_v25 }
 0x339   : > { %6340 = vmatmul.mubr.bf16.gmra.mrb[196].mxu1 %v5408_v59  ;;  %v15426_v45 = vpop.f32.mrb[88].mxu0  ;;  %v4710_v59 = vsel %vm19071_vm2, %v4707_v28, %v4709_v49  ;;  %vm15445_vm2 = vcmp.lt.s32.totalorder %v1576_v16, 15  ;;  %v19077_v49 = vmov 0 }
 0x33a   : > { %6347 = vmatprep.mubr.bf16.mxu1 %v5540_v41  ;;  %19067 = vst [vmem:[#allocation151_spill] sm:$0xff] %v15426_v45  ;;  %v15431_v13 = vpop.f32.mrb[89].mxu0  ;;  %v5296_v45 = vpop.permute.xlu0 %5295  ;;  %v4884_v26 = vpack.c.bf16 %v4848_v44, %v4710_v59  ;;  %v19078_v49 = vsel %vm15445_vm2, 4294967295, %v19077_v49  ;;  %v4850_v44 = vsel %vm15445_vm2, %v4716_v12, 0.0  ;;  %vm19089_vm2 = vcmask 1045504  }
 0x33b   : > { %19070 = vst [vmem:[#allocation152_spill] sm:$0xff] %v15431_v13  ;;  %v15436_v57 = vpop.f32.mrb[90].mxu0  ;;  %v5412_v13 = vsel %vm19075_vm1, %v4048_v19, %v5198_v20  ;;  %19079 = vst [vmem:[#allocation154_spill] sm:$0xff] %v19078_v49  ;;  %v4720_v39 = vsel %vm19089_vm2, %v4717_v4, %v4719_v27 }
 0x33c   : > { %19072 = vst [vmem:[#allocation153_spill] sm:$0xff] %v15436_v57  ;;  %v15440_v41 = vpop.f32.mrb[91].mxu0  ;;  %v5544_v28 = vsel %vm19076_vm3, %v4884_v26, %v5296_v45  ;;  %v5200_v57 = vpop.permute.xlu1 %5199  ;;  %v15461_v45 = vld [vmem:[%s18142_s7] ss:$0 sm:$0xff]  ;;  %vm19084_vm1 = vmmov %vm19080_vm4 }
 0x33d   : > { %19074 = vst [vmem:[#allocation123_spill] sm:$0xff] %v15440_v41  ;;  %v4714_v26 = vsel %vm19084_vm1, %v4711_v58, %v4713_v36  ;;  %vm19086_vm4 = vmmov %vm19076_vm3 }
 0x33e   : > { %v4885_v49 = vpack.c.bf16 %v4850_v44, %v4714_v26 }
 0x341   : > { %6348 = vmatmul.mubr.bf16.gmra.mrb[200].mxu1 %v5412_v13 }
 0x342   : > { %6355 = vmatprep.mubr.bf16.mxu1 %v5544_v28  ;;  %v15451_v1 = vpop.f32.mrb[92].mxu0  ;;  %v1590_v28 = vand.u32 15, %v1168_v7  ;;  %v1170_v7 = vadd.s32 488, %v13911_v50 }
 0x343   : > { %19081 = vst [vmem:[#allocation155_spill] sm:$0xff] %v15451_v1  ;;  %v15456_v59 = vpop.f32.mrb[93].mxu0 }
 0x344   : > { %19083 = vst [vmem:[#allocation156_spill] sm:$0xff] %v15456_v59  ;;  %v6141_v13 = vpop.f32.mrb[96].mxu1  ;;  %v15466_v20 = vpop.f32.mrb[94].mxu0  ;;  %vm15480_vm1 = vcmp.lt.s32.totalorder %v1590_v28, 15 }
 0x345   : > { %19085 = vst [vmem:[#allocation157_spill] sm:$0xff] %v15466_v20  ;;  %v6142_v16 = vadd.f32 %v6141_v13, %v15089_v29  ;;  %v6143_v19 = vpop.f32.mrb[97].mxu1  ;;  %v15471_v1 = vpop.f32.mrb[95].mxu0  ;;  %v5416_v29 = vsel %vm19086_vm4, %v4049_v18, %v5200_v57  ;;  %v19087_v20 = vmov 0  ;;  %vm19092_vm4 = vmmov %vm19089_vm2  ;;  %v4852_v44 = vsel %vm15480_vm1, %v4720_v39, 0.0 }
 0x346   : > { %v5298_v59 = vpop.permute.xlu0 %5297  ;;  %v6144_v41 = vpop.f32.mrb[98].mxu1  ;;  %v19088_v20 = vsel %vm15480_vm1, 4294967295, %v19087_v20  ;;  %v4718_v26 = vsel %vm19092_vm4, %v4715_v56, %v4717_v4  ;;  %vm19093_vm2 = vmmov %vm19076_vm3  ;;  %v1172_v39 = vadd.s32 504, %v13911_v50 }
 0x347   : > { %v6403_v58 = vadd.f32 %v15461_v45, %v6142_v16  ;;  %v6145_v36 = vadd.f32 %v6144_v41, %v15099_v15  ;;  %v6146_v12 = vpop.f32.mrb[99].mxu1  ;;  %v5548_v19 = vsel %vm19076_vm3, %v4885_v49, %v5298_v59  ;;  %v19090_v41 = vld [vmem:[#allocation120_spill] sm:$0xff]  ;;  %v1604_v49 = vand.u32 15, %v1170_v7  ;;  %v5202_v59 = vpop.permute.xlu1 %5201  ;;  %vm19094_vm3 = vmmov %vm19093_vm2 }
 0x348   : > { %vm19091_vm13 = vnez %v19090_v41  ;;  %v4721_v12 = vrot.slane %v14820_v21, 2  ;;  %v4886_v7 = vpack.c.bf16 %v4852_v44, %v4718_v26  ;;  %vm19095_vm4 = vmmov %vm19093_vm2  ;;  %v4016_v26 = vsel %vm14761_vm6, %v14795_v61, 0.0  ;;  %v13215_v44 = vld [vmem:[%s18138_s3 + $0x40] sm:$0xff]  }
 0x349   : > { %v6404_v13 = vadd.f32 %v15461_v45, %v6145_v36  ;;  %6356 = vmatmul.mubr.bf16.gmra.mrb[204].mxu1 %v5416_v29  ;;  %v6467_v25 = vmax.f32 %v6403_v58, 0.0  ;;  %v4014_v18 = vsel %vm19091_vm13, %v19059_v11, 0.0  ;;  %v4723_v58 = vrot.slane %v14839_v17, 2  ;;  %12908 = vmatprep.subr.bf16.mxu0 %v13215_v44 }
 0x34a   : > { %6363 = vmatprep.mubr.bf16.mxu1 %v5548_v19  ;;  %v5300_v29 = vpop.permute.xlu0 %5299  ;;  %v4050_v11 = vpack.c.bf16 %v19073_v55, %v4014_v18  ;;  %vm15502_vm1 = vcmp.lt.s32.totalorder %v1604_v49, 15  ;;  %vm19098_vm13 = vcmask 1045504   ;;  %v4725_v61 = vrot.slane %v14848_v34, 2 }
 0x34b   : > { %v6468_v15 = vmax.f32 %v6404_v13, 0.0  ;;  %v4724_v55 = vsel %vm19098_vm13, %v4721_v12, %v4723_v58  ;;  %vm19335_vm6 = vcmask 523264  }
 0x34c   : > { %v6149_v57 = vpop.f32.mrb[100].mxu1 }
 0x34d   : > { %v6150_v16 = vadd.f32 %v15087_v32, %v6149_v57  ;;  %v6151_v28 = vpop.f32.mrb[101].mxu1  ;;  %v6531_v36 = vpack.c.bf16 %v6468_v15, %v6467_v25  ;;  %v5420_v32 = vsel %vm19094_vm3, %v4050_v11, %v5202_v59  ;;  %v5552_v15 = vsel %vm19095_vm4, %v4886_v7, %v5300_v29  ;;  %vm19101_vm4 = vmmov %vm19094_vm3 }
 0x34e   : > { %v6152_v13 = vpop.f32.mrb[102].mxu1  ;;  %v19096_v57 = vmov 0  ;;  %v4727_v59 = vrot.slane %v14858_v47, 2  ;;  %v4854_v28 = vsel %vm15502_vm1, %v4724_v55, 0.0  ;;  %v4051_v7 = vpack.c.bf16 %v14806_v22, %v4016_v26 }
 0x34f   : > { %v6405_v19 = vadd.f32 %v15461_v45, %v6150_v16  ;;  %v6153_v56 = vadd.f32 %v15094_v40, %v6152_v13  ;;  %v6154_v4 = vpop.f32.mrb[103].mxu1  ;;  %12844 = vmatprep.mubr.msk.bf16.mxu0 %vm19093_vm2, %v6531_v36  ;;  %v19097_v57 = vsel %vm15502_vm1, 4294967295, %v19096_v57  ;;  %vm19099_vm2 = vmmov %vm19098_vm13  ;;  %v5204_v36 = vpop.permute.xlu1 %5203  ;;  %vm19104_vm1 = vcmask 1045504  }
 0x350   : > { %v4722_v49 = vsel %vm19099_vm2, %v4719_v27, %v4721_v12  ;;  %vm19100_vm13 = vmmov %vm19094_vm3  ;;  %v4728_v22 = vsel %vm19104_vm1, %v4725_v61, %v4727_v59 }
 0x351   : > { %v6406_v25 = vadd.f32 %v15461_v45, %v6153_v56  ;;  %6364 = vmatmul.mubr.bf16.gmra.mrb[208].mxu1 %v5420_v32  ;;  %v6469_v40 = vmax.f32 %v6405_v19, 0.0  ;;  %v1618_v19 = vand.u32 15, %v1172_v39  ;;  %v5302_v56 = vpop.permute.xlu0 %5301  ;;  %v4887_v32 = vpack.c.bf16 %v4854_v28, %v4722_v49 }
 0x352   : > { %6371 = vmatprep.mubr.bf16.mxu1 %v5552_v15  ;;  %v19102_v15 = vmov 0 }
 0x353   : > { %v6470_v18 = vmax.f32 %v6406_v25, 0.0  ;;  %v5424_v25 = vsel %vm19094_vm3, %v4051_v7, %v5204_v36  ;;  %v5556_v39 = vsel %vm19101_vm4, %v4887_v32, %v5302_v56  ;;  %vm15526_vm2 = vcmp.lt.s32.totalorder %v1618_v19, 15  ;;  %vm19106_vm3 = vmmov %vm19104_vm1 }
 0x354   : > { %v6157_v16 = vpop.f32.mrb[104].mxu1  ;;  %v19103_v15 = vsel %vm15526_vm2, 4294967295, %v19102_v15  ;;  %v4726_v26 = vsel %vm19106_vm3, %v4723_v58, %v4725_v61  ;;  %vm19107_vm1 = vmmov %vm19101_vm4 }
 0x355   : > { %v6532_v29 = vpack.c.bf16 %v6470_v18, %v6469_v40  ;;  %v6158_v13 = vadd.f32 %v6157_v16, %v15114_v38  ;;  %v6159_v11 = vpop.f32.mrb[105].mxu1  ;;  %v5206_v16 = vpop.permute.xlu1 %5205  ;;  %vm19108_vm4 = vmmov %vm19107_vm1 }
 0x356   : > { %v6160_v4 = vpop.f32.mrb[106].mxu1  ;;  %vm19109_vm3 = vmmov %vm19107_vm1 }
 0x357   : > { %v6407_v47 = vadd.f32 %v15461_v45, %v6158_v13  ;;  %v6161_v27 = vadd.f32 %v6160_v4, %v15125_v53  ;;  %v6162_v12 = vpop.f32.mrb[107].mxu1  ;;  %12845 = vmatmul.mubr.msk.bf16.vlgmr.msra.gmra.mrb[96].mxu0 %vm19100_vm13, %v6532_v29  ;;  %vm19105_vm13 = vnez %v18795_v33  ;;  %v5304_v29 = vpop.permute.xlu0 %5303 }
 0x358   : > { %12909 = vmatpush3.bf16.msra.mxu0 %v13215_v44  ;;  %v4018_v40 = vsel %vm19105_vm13, %v14813_v52, 0.0  ;;  %v4856_v44 = vsel %vm15526_vm2, %v4728_v22, 0.0 }
 0x359   : > { %v6408_v38 = vadd.f32 %v15461_v45, %v6161_v27  ;;  %6372 = vmatmul.mubr.bf16.gmra.mrb[212].mxu1 %v5424_v25  ;;  %v6471_v53 = vmax.f32 %v6407_v47, 0.0  ;;  %v4052_v13 = vpack.c.bf16 %v14820_v21, %v4018_v40  ;;  %v4888_v58 = vpack.c.bf16 %v4856_v44, %v4726_v26  ;;  %v5208_v27 = vpop.permute.xlu1 %5207 }
 0x35a   : > { %6379 = vmatprep.mubr.bf16.mxu1 %v5556_v39  ;;  %v4020_v21 = vsel %vm14868_vm0, %v14839_v17, 0.0 }
 0x35b   : > { %v6472_v55 = vmax.f32 %v6408_v38, 0.0  ;;  %v5428_v61 = vsel %vm19108_vm4, %v4052_v13, %v5206_v16  ;;  %v4053_v39 = vpack.c.bf16 %v14848_v34, %v4020_v21  ;;  %vm19110_vm4 = vmmov %vm19107_vm1 }
 0x35c   : > { %v6165_v18 = vpop.f32.mrb[108].mxu1 }
 0x35d   : > { %v6166_v49 = vadd.f32 %v15112_v31, %v6165_v18  ;;  %v6167_v28 = vpop.f32.mrb[109].mxu1  ;;  %v6533_v36 = vpack.c.bf16 %v6472_v55, %v6471_v53  ;;  %v5560_v31 = vsel %vm19109_vm3, %v4888_v58, %v5304_v29  ;;  %v5432_v55 = vsel %vm19110_vm4, %v4053_v39, %v5208_v27  ;;  %vm19111_vm3 = vmmov %vm19107_vm1 }
 0x35e   : > { %v6168_v59 = vpop.f32.mrb[110].mxu1  ;;  %vm19112_vm4 = vmmov %vm19107_vm1 }
 0x35f   : > { %v6409_v11 = vadd.f32 %v15461_v45, %v6166_v49  ;;  %v6169_v19 = vadd.f32 %v15119_v35, %v6168_v59  ;;  %v6170_v52 = vpop.f32.mrb[111].mxu1  ;;  %12848 = vmatprep.mubr.msk.bf16.mxu0 %vm19107_vm1, %v6533_v36  ;;  %v13216_v35 = vld [vmem:[%s18138_s3 + $0x48] sm:$0xff]  }
 0x360   : > { %12910 = vmatprep.subr.bf16.mxu0 %v13216_v35 }
 0x361   : > { %v6410_v56 = vadd.f32 %v15461_v45, %v6169_v19  ;;  %6380 = vmatmul.mubr.bf16.gmra.mrb[216].mxu1 %v5428_v61  ;;  %v6473_v4 = vmax.f32 %v6409_v11, 0.0  ;;  %12911 = vmatpush3.bf16.msra.mxu0 %v13216_v35  ;;  %v13217_v11 = vld [vmem:[%s18138_s3 + $0x50] sm:$0xff]  }
 0x362   : > { %6387 = vmatprep.mubr.bf16.mxu1 %v5560_v31  ;;  %12912 = vmatprep.subr.bf16.mxu0 %v13217_v11 }
 0x363   : > { %v6474_v7 = vmax.f32 %v6410_v56, 0.0 }
 0x364   : > { %v6173_v47 = vpop.f32.mrb[112].mxu1 }
 0x365   : > { %v6174_v12 = vadd.f32 %v6173_v47, %v15144_v37  ;;  %v6175_v32 = vpop.f32.mrb[113].mxu1  ;;  %v6534_v25 = vpack.c.bf16 %v6474_v7, %v6473_v4  ;;  %12913 = vmatpush3.bf16.msra.mxu0 %v13217_v11 }
 0x366   : > { %v6176_v38 = vpop.f32.mrb[114].mxu1 }
 0x367   : > { %v6411_v22 = vadd.f32 %v15461_v45, %v6174_v12  ;;  %v6177_v53 = vadd.f32 %v6176_v38, %v15151_v24  ;;  %v6178_v17 = vpop.f32.mrb[115].mxu1  ;;  %12849 = vmatmul.mubr.msk.bf16.gmra.mrb[100].mxu0 %vm19107_vm1, %v6534_v25 }
 0x369   : > { %v6412_v40 = vadd.f32 %v15461_v45, %v6177_v53  ;;  %6388 = vmatmul.mubr.bf16.gmra.mrb[220].mxu1 %v5432_v55  ;;  %v6475_v37 = vmax.f32 %v6411_v22, 0.0  ;;  %v13218_v53 = vld [vmem:[%s18138_s3 + $0x58] sm:$0xff]  }
 0x36a   : > { %12914 = vmatprep.subr.bf16.mxu0 %v13218_v53 }
 0x36b   : > { %v6476_v18 = vmax.f32 %v6412_v40, 0.0  ;;  %12915 = vmatpush3.bf16.msra.mxu0 %v13218_v53  ;;  %v13220_v53 = vld [vmem:[%s18138_s3 + $0x68] sm:$0xff]  }
 0x36c   : > { %v6181_v26 = vpop.f32.mrb[116].mxu1 }
 0x36d   : > { %v6182_v44 = vadd.f32 %v15139_v42, %v6181_v26  ;;  %v6183_v16 = vpop.f32.mrb[117].mxu1  ;;  %v6535_v34 = vpack.c.bf16 %v6476_v18, %v6475_v37 }
 0x36e   : > { %v6184_v49 = vpop.f32.mrb[118].mxu1 }
 0x36f   : > { %v6413_v28 = vadd.f32 %v15461_v45, %v6182_v44  ;;  %v6185_v24 = vadd.f32 %v15149_v5, %v6184_v49  ;;  %v6186_v36 = vpop.f32.mrb[119].mxu1  ;;  %12852 = vmatprep.mubr.msk.bf16.mxu0 %vm19111_vm3, %v6535_v34  ;;  %vm19113_vm3 = vmmov %vm19107_vm1 }
 0x371   : > { %v6414_v29 = vadd.f32 %v15461_v45, %v6185_v24  ;;  %v6477_v59 = vmax.f32 %v6413_v28, 0.0 }
 0x373   : > { %v6478_v13 = vmax.f32 %v6414_v29, 0.0 }
 0x374   : > { %v6189_v19 = vpop.f32.mrb[120].mxu1 }
 0x375   : > { %v6190_v42 = vadd.f32 %v6189_v19, %v15162_v9  ;;  %v6191_v52 = vpop.f32.mrb[121].mxu1  ;;  %v6536_v58 = vpack.c.bf16 %v6478_v13, %v6477_v59 }
 0x376   : > { %v6192_v61 = vpop.f32.mrb[122].mxu1 }
 0x377   : > { %v6415_v5 = vadd.f32 %v15461_v45, %v6190_v42  ;;  %v6193_v56 = vadd.f32 %v6192_v61, %v15168_v2  ;;  %v6194_v31 = vpop.f32.mrb[123].mxu1  ;;  %12853 = vmatmul.mubr.msk.bf16.gmra.mrb[104].mxu0 %vm19107_vm1, %v6536_v58  ;;  %v13219_v42 = vld [vmem:[%s18138_s3 + $0x60] sm:$0xff]  }
 0x378   : > { %12916 = vmatprep.subr.bf16.mxu0 %v13219_v42 }
 0x379   : > { %v6416_v4 = vadd.f32 %v15461_v45, %v6193_v56  ;;  %v6479_v7 = vmax.f32 %v6415_v5, 0.0  ;;  %12917 = vmatpush3.bf16.msra.mxu0 %v13219_v42 }
 0x37a   : > { %12918 = vmatprep.subr.bf16.mxu0 %v13220_v53 }
 0x37b   : > { %v6480_v21 = vmax.f32 %v6416_v4, 0.0 }
 0x37c   : > { %v6197_v35 = vpop.f32.mrb[124].mxu1 }
 0x37d   : > { %v6198_v47 = vadd.f32 %v15157_v48, %v6197_v35  ;;  %v6199_v9 = vpop.f32.mrb[125].mxu1  ;;  %v6537_v27 = vpack.c.bf16 %v6480_v21, %v6479_v7  ;;  %12919 = vmatpush3.bf16.msra.mxu0 %v13220_v53 }
 0x37e   : > { %v6200_v12 = vpop.f32.mrb[126].mxu1 }
 0x37f   : > { %v6417_v32 = vadd.f32 %v15461_v45, %v6198_v47  ;;  %v6201_v25 = vadd.f32 %v15164_v23, %v6200_v12  ;;  %v6202_v38 = vpop.f32.mrb[127].mxu1  ;;  %12856 = vmatprep.mubr.msk.bf16.mxu0 %vm19112_vm4, %v6537_v27  ;;  %vm19114_vm4 = vmmov %vm19107_vm1  ;;  %v19115_v47 = vld [vmem:[#allocation97_spill] sm:$0xff] }
 0x381   : > { %v6418_v2 = vadd.f32 %v15461_v45, %v6201_v25  ;;  %v6481_v39 = vmax.f32 %v6417_v32, 0.0  ;;  %v19116_v25 = vld [vmem:[#allocation98_spill] sm:$0xff] }
 0x383   : > { %v6482_v22 = vmax.f32 %v6418_v2, 0.0 }
 0x384   : > { %v6205_v17 = vpop.f32.mrb[128].mxu1 }
 0x385   : > { %v6206_v48 = vadd.f32 %v6205_v17, %v15182_v51  ;;  %v6207_v55 = vpop.f32.mrb[129].mxu1  ;;  %v6538_v40 = vpack.c.bf16 %v6482_v22, %v6481_v39 }
 0x386   : > { %v6208_v37 = vpop.f32.mrb[130].mxu1 }
 0x387   : > { %v6419_v23 = vadd.f32 %v15461_v45, %v6206_v48  ;;  %v6209_v18 = vadd.f32 %v6208_v37, %v15191_v3  ;;  %v6210_v26 = vpop.f32.mrb[131].mxu1  ;;  %12857 = vmatmul.mubr.msk.bf16.gmra.mrb[108].mxu0 %vm19113_vm3, %v6538_v40  ;;  %vm19117_vm3 = vmmov %vm19107_vm1  ;;  %v19118_v48 = vld [vmem:[#allocation127_spill] sm:$0xff] }
 0x388   : > { %v19119_v26 = vld [vmem:[#allocation106_spill] sm:$0xff] }
 0x389   : > { %v6420_v44 = vadd.f32 %v15461_v45, %v6209_v18  ;;  %v6483_v16 = vmax.f32 %v6419_v23, 0.0 }
 0x38b   : > { %v6484_v34 = vmax.f32 %v6420_v44, 0.0 }
 0x38c   : > { %v6213_v49 = vpop.f32.mrb[132].mxu1 }
 0x38d   : > { %v6214_v28 = vadd.f32 %v15180_v62, %v6213_v49  ;;  %v6215_v51 = vpop.f32.mrb[133].mxu1  ;;  %v6539_v24 = vpack.c.bf16 %v6484_v34, %v6483_v16 }
 0x38e   : > { %v6216_v36 = vpop.f32.mrb[134].mxu1 }
 0x38f   : > { %v6421_v29 = vadd.f32 %v15461_v45, %v6214_v28  ;;  %v6217_v59 = vadd.f32 %v15187_v10, %v6216_v36  ;;  %v6218_v13 = vpop.f32.mrb[135].mxu1  ;;  %12860 = vmatprep.mubr.msk.bf16.mxu0 %vm19107_vm1, %v6539_v24  ;;  %v19120_v24 = vld [vmem:[#allocation105_spill] sm:$0xff] }
 0x391   : > { %v6422_v3 = vadd.f32 %v15461_v45, %v6217_v59  ;;  %v6485_v11 = vmax.f32 %v6421_v29, 0.0 }
 0x393   : > { %v6486_v19 = vmax.f32 %v6422_v3, 0.0 }
 0x394   : > { %v6221_v52 = vpop.f32.mrb[136].mxu1 }
 0x395   : > { %v6222_v62 = vadd.f32 %v6221_v52, %v15206_v8  ;;  %v6223_v58 = vpop.f32.mrb[137].mxu1  ;;  %v6540_v61 = vpack.c.bf16 %v6486_v19, %v6485_v11  ;;  %v19121_v11 = vld [vmem:[#allocation128_spill] sm:$0xff] }
 0x396   : > { %v6224_v5 = vpop.f32.mrb[138].mxu1 }
 0x397   : > { %v6423_v10 = vadd.f32 %v15461_v45, %v6222_v62  ;;  %v6225_v56 = vadd.f32 %v6224_v5, %v15215_v60  ;;  %v6226_v31 = vpop.f32.mrb[139].mxu1  ;;  %12861 = vmatmul.mubr.msk.bf16.gmra.mrb[112].mxu0 %vm19114_vm4, %v6540_v61  ;;  %vm19122_vm4 = vmmov %vm19107_vm1  ;;  %v13221_v61 = vld [vmem:[%s18138_s3 + $0x70] sm:$0xff]  }
 0x398   : > { %12920 = vmatprep.subr.bf16.mxu0 %v13221_v61 }
 0x399   : > { %v6424_v4 = vadd.f32 %v15461_v45, %v6225_v56  ;;  %v6487_v7 = vmax.f32 %v6423_v10, 0.0  ;;  %v19123_v10 = vld [vmem:[#allocation131_spill] sm:$0xff]  ;;  %12921 = vmatpush3.bf16.msra.mxu0 %v13221_v61 }
 0x39b   : > { %v6488_v21 = vmax.f32 %v6424_v4, 0.0 }
 0x39c   : > { %v6229_v35 = vpop.f32.mrb[140].mxu1 }
 0x39d   : > { %v6230_v9 = vadd.f32 %v19115_v47, %v6229_v35  ;;  %v6231_v8 = vpop.f32.mrb[141].mxu1  ;;  %v6541_v27 = vpack.c.bf16 %v6488_v21, %v6487_v7 }
 0x39e   : > { %v6232_v12 = vpop.f32.mrb[142].mxu1 }
 0x39f   : > { %v6425_v32 = vadd.f32 %v15461_v45, %v6230_v9  ;;  %v6233_v38 = vadd.f32 %v19116_v25, %v6232_v12  ;;  %v6234_v2 = vpop.f32.mrb[143].mxu1  ;;  %12864 = vmatprep.mubr.msk.bf16.mxu0 %vm19117_vm3, %v6541_v27  ;;  %vm19124_vm3 = vmmov %vm19107_vm1 }
 0x3a1   : > { %v6426_v60 = vadd.f32 %v15461_v45, %v6233_v38  ;;  %v6489_v39 = vmax.f32 %v6425_v32, 0.0  ;;  %v19125_v32 = vld [vmem:[#allocation130_spill] sm:$0xff] }
 0x3a3   : > { %v6490_v22 = vmax.f32 %v6426_v60, 0.0 }
 0x3a4   : > { %v6237_v17 = vpop.f32.mrb[144].mxu1 }
 0x3a5   : > { %v6238_v55 = vadd.f32 %v6237_v17, %v19118_v48  ;;  %v6239_v40 = vpop.f32.mrb[145].mxu1  ;;  %v6542_v37 = vpack.c.bf16 %v6490_v22, %v6489_v39  ;;  %v19126_v22 = vld [vmem:[#allocation132_spill] sm:$0xff] }
 0x3a6   : > { %v6240_v23 = vpop.f32.mrb[146].mxu1  ;;  %v13222_v40 = vld [vmem:[%s18138_s3 + $0x78] sm:$0xff]  }
 0x3a7   : > { %v6427_v18 = vadd.f32 %v15461_v45, %v6238_v55  ;;  %v6241_v44 = vadd.f32 %v6240_v23, %v19119_v26  ;;  %v6242_v16 = vpop.f32.mrb[147].mxu1  ;;  %12865 = vmatmul.mubr.msk.bf16.gmra.mrb[116].mxu0 %vm19107_vm1, %v6542_v37  ;;  %12922 = vmatprep.subr.bf16.mxu0 %v13222_v40 }
 0x3a8   : > { %12923 = vmatpush3.bf16.msra.mxu0 %v13222_v40  ;;  %v19136_v40 = vld [vmem:[#allocation139_spill] sm:$0xff] }
 0x3a9   : > { %v6428_v34 = vadd.f32 %v15461_v45, %v6241_v44  ;;  %v6491_v49 = vmax.f32 %v6427_v18, 0.0 }
 0x3ab   : > { %v6492_v28 = vmax.f32 %v6428_v34, 0.0 }
 0x3ac   : > { %v6245_v51 = vpop.f32.mrb[148].mxu1 }
 0x3ad   : > { %v6246_v36 = vadd.f32 %v19120_v24, %v6245_v51  ;;  %v6247_v29 = vpop.f32.mrb[149].mxu1  ;;  %v6543_v59 = vpack.c.bf16 %v6492_v28, %v6491_v49  ;;  %v19128_v28 = vmov 0  }
 0x3ae   : > { %v6248_v13 = vpop.f32.mrb[150].mxu1  ;;  %9677 = vmatprep.subr.bf16.mxu0 %v19128_v28 }
 0x3af   : > { %v6429_v3 = vadd.f32 %v15461_v45, %v6246_v36  ;;  %v6249_v19 = vadd.f32 %v19121_v11, %v6248_v13  ;;  %v6250_v42 = vpop.f32.mrb[151].mxu1  ;;  %12868 = vmatprep.mubr.msk.bf16.mxu0 %vm19122_vm4, %v6543_v59  ;;  %vm19127_vm4 = vmmov %vm19107_vm1 }
 0x3b0   : > { %v19130_v42 = vld [vmem:[#allocation133_spill] sm:$0xff] }
 0x3b1   : > { %v6430_v52 = vadd.f32 %v15461_v45, %v6249_v19  ;;  %v6493_v62 = vmax.f32 %v6429_v3, 0.0 }
 0x3b3   : > { %v6494_v58 = vmax.f32 %v6430_v52, 0.0 }
 0x3b4   : > { %v6253_v5 = vpop.f32.mrb[152].mxu1 }
 0x3b5   : > { %v6254_v56 = vadd.f32 %v6253_v5, %v19123_v10  ;;  %v6255_v31 = vpop.f32.mrb[153].mxu1  ;;  %v6544_v4 = vpack.c.bf16 %v6494_v58, %v6493_v62  ;;  %v19132_v10 = vld [vmem:[#allocation136_spill] sm:$0xff] }
 0x3b6   : > { %v6256_v7 = vpop.f32.mrb[154].mxu1 }
 0x3b7   : > { %v6431_v21 = vadd.f32 %v15461_v45, %v6254_v56  ;;  %v6257_v35 = vadd.f32 %v6256_v7, %v15265_v0  ;;  %v6258_v47 = vpop.f32.mrb[155].mxu1  ;;  %12869 = vmatmul.mubr.msk.bf16.gmra.mrb[120].mxu0 %vm19124_vm3, %v6544_v4  ;;  %vm19131_vm3 = vmmov %vm19107_vm1 }
 0x3b9   : > { %v6432_v9 = vadd.f32 %v15461_v45, %v6257_v35  ;;  %v6495_v8 = vmax.f32 %v6431_v21, 0.0 }
 0x3bb   : > { %v6496_v27 = vmax.f32 %v6432_v9, 0.0 }
 0x3bc   : > { %v6261_v12 = vpop.f32.mrb[156].mxu1 }
 0x3bd   : > { %v6262_v25 = vadd.f32 %v19125_v32, %v6261_v12  ;;  %v6263_v38 = vpop.f32.mrb[157].mxu1  ;;  %v6545_v2 = vpack.c.bf16 %v6496_v27, %v6495_v8  ;;  %v19133_v32 = vld [vmem:[#allocation135_spill] sm:$0xff] }
 0x3be   : > { %v6264_v60 = vpop.f32.mrb[158].mxu1 }
 0x3bf   : > { %v6433_v39 = vadd.f32 %v15461_v45, %v6262_v25  ;;  %v6265_v53 = vadd.f32 %v19126_v22, %v6264_v60  ;;  %v6266_v17 = vpop.f32.mrb[159].mxu1  ;;  %12872 = vmatprep.mubr.msk.bf16.mxu0 %vm19107_vm1, %v6545_v2  ;;  %v19134_v22 = vld [vmem:[#allocation137_spill] sm:$0xff] }
 0x3c1   : > { %v6434_v0 = vadd.f32 %v15461_v45, %v6265_v53  ;;  %v6497_v48 = vmax.f32 %v6433_v39, 0.0 }
 0x3c3   : > { %v6498_v55 = vmax.f32 %v6434_v0, 0.0 }
 0x3c4   : > { %v6269_v37 = vpop.f32.mrb[160].mxu1 }
 0x3c5   : > { %v6270_v23 = vadd.f32 %v6269_v37, %v15281_v46  ;;  %v6271_v18 = vpop.f32.mrb[161].mxu1  ;;  %v6546_v26 = vpack.c.bf16 %v6498_v55, %v6497_v48  ;;  %v19129_v46 = vld [vmem:[#allocation110_spill] sm:$0xff] }
 0x3c6   : > { %v6272_v44 = vpop.f32.mrb[162].mxu1 }
 0x3c7   : > { %v6435_v16 = vadd.f32 %v15461_v45, %v6270_v23  ;;  %v6273_v34 = vadd.f32 %v6272_v44, %v15290_v63  ;;  %v6274_v49 = vpop.f32.mrb[163].mxu1  ;;  %12873 = vmatmul.mubr.msk.bf16.gmra.mrb[124].mxu0 %vm19127_vm4, %v6546_v26  ;;  %vm19135_vm4 = vmmov %vm19107_vm1 }
 0x3c9   : > { %v6436_v51 = vadd.f32 %v15461_v45, %v6273_v34  ;;  %v6499_v24 = vmax.f32 %v6435_v16, 0.0 }
 0x3cb   : > { %v6500_v36 = vmax.f32 %v6436_v51, 0.0 }
 0x3cc   : > { %v6277_v29 = vpop.f32.mrb[164].mxu1 }
 0x3cd   : > { %v6278_v59 = vadd.f32 %v19129_v46, %v6277_v29  ;;  %v6279_v13 = vpop.f32.mrb[165].mxu1  ;;  %v6547_v3 = vpack.c.bf16 %v6500_v36, %v6499_v24  ;;  %v19138_v29 = vld [vmem:[#allocation138_spill] sm:$0xff] }
 0x3ce   : > { %v6280_v11 = vpop.f32.mrb[166].mxu1 }
 0x3cf   : > { %v6437_v19 = vadd.f32 %v15461_v45, %v6278_v59  ;;  %v6281_v52 = vadd.f32 %v19130_v42, %v6280_v11  ;;  %v6282_v63 = vpop.f32.mrb[167].mxu1  ;;  %12876 = vmatprep.mubr.msk.bf16.mxu0 %vm19131_vm3, %v6547_v3  ;;  %vm19137_vm3 = vmmov %vm19107_vm1 }
 0x3d1   : > { %v6438_v62 = vadd.f32 %v15461_v45, %v6281_v52  ;;  %v6501_v58 = vmax.f32 %v6437_v19, 0.0  ;;  %v19139_v19 = vld [vmem:[#allocation140_spill] sm:$0xff] }
 0x3d3   : > { %v6502_v61 = vmax.f32 %v6438_v62, 0.0 }
 0x3d4   : > { %v6285_v5 = vpop.f32.mrb[168].mxu1 }
 0x3d5   : > { %v6286_v56 = vadd.f32 %v6285_v5, %v19132_v10  ;;  %v6287_v31 = vpop.f32.mrb[169].mxu1  ;;  %v6548_v4 = vpack.c.bf16 %v6502_v61, %v6501_v58  ;;  %v19140_v61 = vld [vmem:[#allocation142_spill] sm:$0xff] }
 0x3d6   : > { %v6288_v7 = vpop.f32.mrb[170].mxu1 }
 0x3d7   : > { %v6439_v21 = vadd.f32 %v15461_v45, %v6286_v56  ;;  %v6289_v35 = vadd.f32 %v6288_v7, %v15315_v54  ;;  %v6290_v47 = vpop.f32.mrb[171].mxu1  ;;  %12877 = vmatmul.mubr.msk.bf16.gmra.mrb[128].mxu0 %vm19107_vm1, %v6548_v4  ;;  %v19141_v7 = vld [vmem:[#allocation117_spill] sm:$0xff] }
 0x3d9   : > { %v6440_v9 = vadd.f32 %v15461_v45, %v6289_v35  ;;  %v6503_v8 = vmax.f32 %v6439_v21, 0.0 }
 0x3db   : > { %v6504_v27 = vmax.f32 %v6440_v9, 0.0 }
 0x3dc   : > { %v6293_v12 = vpop.f32.mrb[172].mxu1 }
 0x3dd   : > { %v6294_v25 = vadd.f32 %v19133_v32, %v6293_v12  ;;  %v6295_v38 = vpop.f32.mrb[173].mxu1  ;;  %v6549_v2 = vpack.c.bf16 %v6504_v27, %v6503_v8  ;;  %v19143_v12 = vld [vmem:[#allocation141_spill] sm:$0xff] }
 0x3de   : > { %v6296_v60 = vpop.f32.mrb[174].mxu1 }
 0x3df   : > { %v6441_v39 = vadd.f32 %v15461_v45, %v6294_v25  ;;  %v6297_v53 = vadd.f32 %v19134_v22, %v6296_v60  ;;  %v6298_v17 = vpop.f32.mrb[175].mxu1  ;;  %12880 = vmatprep.mubr.msk.bf16.mxu0 %vm19135_vm4, %v6549_v2  ;;  %vm19142_vm4 = vmmov %vm19107_vm1 }
 0x3e1   : > { %v6442_v54 = vadd.f32 %v15461_v45, %v6297_v53  ;;  %v6505_v0 = vmax.f32 %v6441_v39, 0.0  ;;  %v19144_v39 = vld [vmem:[#allocation143_spill] sm:$0xff] }
 0x3e3   : > { %v6506_v48 = vmax.f32 %v6442_v54, 0.0 }
 0x3e4   : > { %v6301_v55 = vpop.f32.mrb[176].mxu1 }
 0x3e5   : > { %v6302_v37 = vadd.f32 %v6301_v55, %v19136_v40  ;;  %v6303_v23 = vpop.f32.mrb[177].mxu1  ;;  %v6550_v18 = vpack.c.bf16 %v6506_v48, %v6505_v0  ;;  %v19146_v55 = vld [vmem:[#allocation146_spill] sm:$0xff] }
 0x3e6   : > { %v6304_v26 = vpop.f32.mrb[178].mxu1 }
 0x3e7   : > { %v6443_v44 = vadd.f32 %v15461_v45, %v6302_v37  ;;  %v6305_v16 = vadd.f32 %v6304_v26, %v15340_v14  ;;  %v6306_v34 = vpop.f32.mrb[179].mxu1  ;;  %12881 = vmatmul.mubr.msk.bf16.gmra.mrb[132].mxu0 %vm19137_vm3, %v6550_v18  ;;  %vm19145_vm3 = vmmov %vm19107_vm1 }
 0x3e9   : > { %v6444_v49 = vadd.f32 %v15461_v45, %v6305_v16  ;;  %v6507_v51 = vmax.f32 %v6443_v44, 0.0 }
 0x3eb   : > { %v6508_v24 = vmax.f32 %v6444_v49, 0.0 }
 0x3ec   : > { %v6309_v36 = vpop.f32.mrb[180].mxu1 }
 0x3ed   : > { %v6310_v46 = vadd.f32 %v19138_v29, %v6309_v36  ;;  %v6311_v59 = vpop.f32.mrb[181].mxu1  ;;  %v6551_v13 = vpack.c.bf16 %v6508_v24, %v6507_v51  ;;  %v19147_v36 = vld [vmem:[#allocation145_spill] sm:$0xff] }
 0x3ee   : > { %v6312_v3 = vpop.f32.mrb[182].mxu1 }
 0x3ef   : > { %v6445_v11 = vadd.f32 %v15461_v45, %v6310_v46  ;;  %v6313_v42 = vadd.f32 %v19139_v19, %v6312_v3  ;;  %v6314_v52 = vpop.f32.mrb[183].mxu1  ;;  %12884 = vmatprep.mubr.msk.bf16.mxu0 %vm19107_vm1, %v6551_v13 }
 0x3f1   : > { %v6446_v14 = vadd.f32 %v15461_v45, %v6313_v42  ;;  %v6509_v63 = vmax.f32 %v6445_v11, 0.0  ;;  %v19148_v11 = vld [vmem:[#allocation147_spill] sm:$0xff] }
 0x3f3   : > { %v6510_v62 = vmax.f32 %v6446_v14, 0.0 }
 0x3f4   : > { %v6317_v58 = vpop.f32.mrb[184].mxu1 }
 0x3f5   : > { %v6318_v5 = vadd.f32 %v6317_v58, %v19140_v61  ;;  %v6319_v10 = vpop.f32.mrb[185].mxu1  ;;  %v6552_v56 = vpack.c.bf16 %v6510_v62, %v6509_v63  ;;  %v19150_v62 = vld [vmem:[#allocation148_spill] sm:$0xff] }
 0x3f6   : > { %v6320_v31 = vpop.f32.mrb[186].mxu1 }
 0x3f7   : > { %v6447_v4 = vadd.f32 %v15461_v45, %v6318_v5  ;;  %v6321_v21 = vadd.f32 %v6320_v31, %v19141_v7  ;;  %v6322_v35 = vpop.f32.mrb[187].mxu1  ;;  %12885 = vmatmul.mubr.msk.bf16.gmra.mrb[136].mxu0 %vm19142_vm4, %v6552_v56  ;;  %vm19149_vm4 = vmmov %vm19107_vm1  ;;  %v19151_v31 = vld [vmem:[#allocation122_spill] sm:$0xff] }
 0x3f9   : > { %v6448_v47 = vadd.f32 %v15461_v45, %v6321_v21  ;;  %v6511_v9 = vmax.f32 %v6447_v4, 0.0 }
 0x3fb   : > { %v6512_v8 = vmax.f32 %v6448_v47, 0.0 }
 0x3fc   : > { %v6325_v27 = vpop.f32.mrb[188].mxu1 }
 0x3fd   : > { %v6326_v32 = vadd.f32 %v19143_v12, %v6325_v27  ;;  %v6327_v25 = vpop.f32.mrb[189].mxu1  ;;  %v6553_v38 = vpack.c.bf16 %v6512_v8, %v6511_v9  ;;  %v19153_v8 = vld [vmem:[#allocation121_spill] sm:$0xff] }
 0x3fe   : > { %v6328_v2 = vpop.f32.mrb[190].mxu1 }
 0x3ff   : > { %v6449_v60 = vadd.f32 %v15461_v45, %v6326_v32  ;;  %v6329_v22 = vadd.f32 %v19144_v39, %v6328_v2  ;;  %v6330_v53 = vpop.f32.mrb[191].mxu1  ;;  %12888 = vmatprep.mubr.msk.bf16.mxu0 %vm19145_vm3, %v6553_v38  ;;  %vm19152_vm3 = vmmov %vm19107_vm1  ;;  %v19154_v2 = vld [vmem:[#allocation149_spill] sm:$0xff] }
 0x401   : > { %v6450_v17 = vadd.f32 %v15461_v45, %v6329_v22  ;;  %v6513_v54 = vmax.f32 %v6449_v60, 0.0 }
 0x403   : > { %v6514_v0 = vmax.f32 %v6450_v17, 0.0 }
 0x404   : > { %v6333_v48 = vpop.f32.mrb[192].mxu1 }
 0x405   : > { %v6334_v40 = vadd.f32 %v6333_v48, %v19146_v55  ;;  %v6335_v37 = vpop.f32.mrb[193].mxu1  ;;  %v6554_v23 = vpack.c.bf16 %v6514_v0, %v6513_v54  ;;  %v19155_v0 = vld [vmem:[#allocation152_spill] sm:$0xff] }
 0x406   : > { %v6336_v18 = vpop.f32.mrb[194].mxu1 }
 0x407   : > { %v6451_v26 = vadd.f32 %v15461_v45, %v6334_v40  ;;  %v6337_v44 = vadd.f32 %v6336_v18, %v15390_v30  ;;  %v6338_v16 = vpop.f32.mrb[195].mxu1  ;;  %12889 = vmatmul.mubr.msk.bf16.gmra.mrb[140].mxu0 %vm19107_vm1, %v6554_v23  ;;  %v19156_v18 = vld [vmem:[#allocation123_spill] sm:$0xff] }
 0x409   : > { %v6452_v34 = vadd.f32 %v15461_v45, %v6337_v44  ;;  %v6515_v49 = vmax.f32 %v6451_v26, 0.0 }
 0x40b   : > { %v6516_v51 = vmax.f32 %v6452_v34, 0.0 }
 0x40c   : > { %v6341_v24 = vpop.f32.mrb[196].mxu1 }
 0x40d   : > { %v6342_v29 = vadd.f32 %v19147_v36, %v6341_v24  ;;  %v6343_v46 = vpop.f32.mrb[197].mxu1  ;;  %v6555_v59 = vpack.c.bf16 %v6516_v51, %v6515_v49 }
 0x40e   : > { %v6344_v13 = vpop.f32.mrb[198].mxu1  ;;  %v19158_v46 = vld [vmem:[#allocation151_spill] sm:$0xff] }
 0x40f   : > { %v6453_v3 = vadd.f32 %v15461_v45, %v6342_v29  ;;  %v6345_v19 = vadd.f32 %v19148_v11, %v6344_v13  ;;  %v6346_v42 = vpop.f32.mrb[199].mxu1  ;;  %12892 = vmatprep.mubr.msk.bf16.mxu0 %vm19149_vm4, %v6555_v59  ;;  %vm19157_vm4 = vmmov %vm19107_vm1 }
 0x411   : > { %v6454_v30 = vadd.f32 %v15461_v45, %v6345_v19  ;;  %v6517_v52 = vmax.f32 %v6453_v3, 0.0 }
 0x413   : > { %v6518_v14 = vmax.f32 %v6454_v30, 0.0  ;;  %v19159_v30 = vld [vmem:[#allocation153_spill] sm:$0xff] }
 0x414   : > { %v6349_v63 = vpop.f32.mrb[200].mxu1 }
 0x415   : > { %v6350_v58 = vadd.f32 %v6349_v63, %v19150_v62  ;;  %v6351_v61 = vpop.f32.mrb[201].mxu1  ;;  %v6556_v5 = vpack.c.bf16 %v6518_v14, %v6517_v52 }
 0x416   : > { %v6352_v10 = vpop.f32.mrb[202].mxu1 }
 0x417   : > { %v6455_v56 = vadd.f32 %v15461_v45, %v6350_v58  ;;  %v6353_v4 = vadd.f32 %v6352_v10, %v19151_v31  ;;  %v6354_v7 = vpop.f32.mrb[203].mxu1  ;;  %12893 = vmatmul.mubr.msk.bf16.gmra.mrb[144].mxu0 %vm19152_vm3, %v6556_v5  ;;  %vm19160_vm3 = vmmov %vm19107_vm1  ;;  %v19161_v5 = vld [vmem:[#allocation156_spill] sm:$0xff] }
 0x419   : > { %v6456_v21 = vadd.f32 %v15461_v45, %v6353_v4  ;;  %v6519_v35 = vmax.f32 %v6455_v56, 0.0 }
 0x41b   : > { %v6520_v47 = vmax.f32 %v6456_v21, 0.0 }
 0x41c   : > { %v6357_v9 = vpop.f32.mrb[204].mxu1 }
 0x41d   : > { %v6358_v27 = vadd.f32 %v19153_v8, %v6357_v9  ;;  %v6359_v12 = vpop.f32.mrb[205].mxu1  ;;  %v6557_v32 = vpack.c.bf16 %v6520_v47, %v6519_v35  ;;  %v19162_v9 = vld [vmem:[#allocation5_spill] sm:$0xff] }
 0x41e   : > { %v6360_v25 = vpop.f32.mrb[206].mxu1 }
 0x41f   : > { %v6457_v38 = vadd.f32 %v15461_v45, %v6358_v27  ;;  %v6361_v60 = vadd.f32 %v19154_v2, %v6360_v25  ;;  %v6362_v39 = vpop.f32.mrb[207].mxu1  ;;  %12896 = vmatprep.mubr.msk.bf16.mxu0 %vm19107_vm1, %v6557_v32 }
 0x421   : > { %v6458_v22 = vadd.f32 %v15461_v45, %v6361_v60  ;;  %v6521_v53 = vmax.f32 %v6457_v38, 0.0  ;;  %v19163_v38 = vld [vmem:[#allocation2_spill] sm:$0xff] }
 0x423   : > { %v6522_v17 = vmax.f32 %v6458_v22, 0.0  ;;  %v15712_v22 = vld [vmem:[%s18144_s9] ss:$0 sm:$0xff] }
 0x424   : > { %v6365_v54 = vpop.f32.mrb[208].mxu1 }
 0x425   : > { %v6366_v48 = vadd.f32 %v6365_v54, %v19155_v0  ;;  %v6367_v55 = vpop.f32.mrb[209].mxu1  ;;  %v6558_v40 = vpack.c.bf16 %v6522_v17, %v6521_v53 }
 0x426   : > { %v6368_v37 = vpop.f32.mrb[210].mxu1 }
 0x427   : > { %v6459_v23 = vadd.f32 %v15461_v45, %v6366_v48  ;;  %v6369_v26 = vadd.f32 %v6368_v37, %v19156_v18  ;;  %v6370_v44 = vpop.f32.mrb[211].mxu1  ;;  %12897 = vmatmul.mubr.msk.bf16.gmra.mrb[148].mxu0 %vm19157_vm4, %v6558_v40  ;;  %v19166_v37 = vld [vmem:[#allocation157_spill] sm:$0xff]  ;;  %vm19167_vm4 = vmmov %vm19107_vm1 }
 0x428   : > { %v13223_v44 = vld [vmem:[%s18141_s6 + $0x20] sm:$0xff]  }
 0x429   : > { %v6460_v16 = vadd.f32 %v15461_v45, %v6369_v26  ;;  %v6523_v49 = vmax.f32 %v6459_v23, 0.0  ;;  %12988 = vmatprep.subr.bf16.mxu1 %v13223_v44 }
 0x42a   : > { %v12846_v34 = vpop.f32.mrb[96].mxu0  ;;  %12989 = vmatpush3.bf16.msra.mxu1 %v13223_v44 }
 0x42b   : > { %v6524_v51 = vmax.f32 %v6460_v16, 0.0  ;;  %v6725_v24 = vpop.f32.mrb[97].mxu0  ;;  %v19169_v16 = vld [vmem:[#allocation4_spill] sm:$0xff] }
 0x42c   : > { %v6373_v36 = vpop.f32.mrb[212].mxu1  ;;  %v12847_v29 = vpop.f32.mrb[98].mxu0  ;;  %v6980_v2 = vadd.f32 %v6725_v24, %v19163_v38  ;;  %v19170_v24 = vld [vmem:[#allocation9_spill] sm:$0xff] }
 0x42d   : > { %v6374_v59 = vadd.f32 %v19158_v46, %v6373_v36  ;;  %v6375_v13 = vpop.f32.mrb[213].mxu1  ;;  %v6728_v3 = vpop.f32.mrb[99].mxu0  ;;  %v6559_v11 = vpack.c.bf16 %v6524_v51, %v6523_v49  ;;  %v6983_v49 = vadd.f32 %v12847_v29, %v19169_v16 }
 0x42e   : > { %v6376_v19 = vpop.f32.mrb[214].mxu1  ;;  %v6981_v8 = vadd.f32 %v6728_v3, %v19162_v9  ;;  %v15722_v26 = vadd.f32 %v15712_v22, %v6980_v2 }
 0x42f   : > { %v6461_v42 = vadd.f32 %v15461_v45, %v6374_v59  ;;  %v6377_v52 = vadd.f32 %v19159_v30, %v6376_v19  ;;  %v6378_v14 = vpop.f32.mrb[215].mxu1  ;;  %12900 = vmatprep.mubr.msk.bf16.mxu0 %vm19160_vm3, %v6559_v11  ;;  %v19171_v59 = vld [vmem:[#allocation3_spill] sm:$0xff]  ;;  %vm19176_vm3 = vmmov %vm19107_vm1 }
 0x430   : > { %v15716_v48 = vadd.f32 %v15712_v22, %v6981_v8  ;;  %19168 = vst [vmem:[#allocation97_spill] sm:$0xff] %v15722_v26  ;;  %v6982_v13 = vadd.f32 %v12846_v34, %v19171_v59  ;;  %v19172_v19 = vld [vmem:[#allocation7_spill] sm:$0xff]  ;;  %v7115_v30 = vmax.f32 %v15722_v26, 0.0 }
 0x431   : > { %v6462_v63 = vadd.f32 %v15461_v45, %v6377_v52  ;;  %v6525_v62 = vmax.f32 %v6461_v42, 0.0  ;;  %v15735_v52 = vadd.f32 %v15712_v22, %v6983_v49 }
 0x432   : > { %19165 = vst [vmem:[#allocation120_spill] sm:$0xff] %v15716_v48  ;;  %v7116_v46 = vmax.f32 %v15716_v48, 0.0 }
 0x433   : > { %v6526_v58 = vmax.f32 %v6462_v63, 0.0  ;;  %19173 = vst [vmem:[#allocation98_spill] sm:$0xff] %v15735_v52  ;;  %v15741_v63 = vadd.f32 %v15712_v22, %v6982_v13  ;;  %v19191_v13 = vld [vmem:[#allocation15_spill] sm:$0xff] }
 0x434   : > { %v6381_v61 = vpop.f32.mrb[216].mxu1  ;;  %v7179_v14 = vpack.c.bf16 %v7116_v46, %v7115_v30 }
 0x435   : > { %v6382_v10 = vadd.f32 %v6381_v61, %v19161_v5  ;;  %v6383_v56 = vpop.f32.mrb[217].mxu1  ;;  %v6560_v31 = vpack.c.bf16 %v6526_v58, %v6525_v62  ;;  %19175 = vst [vmem:[#allocation106_spill] sm:$0xff] %v15741_v63  ;;  %v7118_v62 = vmax.f32 %v15735_v52, 0.0  ;;  %v19178_v58 = vld [vmem:[#allocation8_spill] sm:$0xff] }
 0x436   : > { %v6384_v4 = vpop.f32.mrb[218].mxu1  ;;  %v7117_v56 = vmax.f32 %v15741_v63, 0.0 }
 0x437   : > { %v6463_v7 = vadd.f32 %v15461_v45, %v6382_v10  ;;  %v6385_v21 = vadd.f32 %v6384_v4, %v15471_v1  ;;  %v6386_v35 = vpop.f32.mrb[219].mxu1  ;;  %12901 = vmatmul.mubr.msk.bf16.gmra.mrb[152].mxu0 %vm19107_vm1, %v6560_v31  ;;  %v19164_v1 = vld [vmem:[#allocation155_spill] sm:$0xff]  ;;  %v19179_v31 = vld [vmem:[#allocation6_spill] sm:$0xff]  ;;  %vm19294_vm1 = vcmask 1040384  }
 0x438   : > { %v7180_v8 = vpack.c.bf16 %v7118_v62, %v7117_v56  ;;  %v19194_v62 = vld [vmem:[#allocation17_spill] sm:$0xff]  ;;  %vm19298_vm2 = vmmov %vm19294_vm1 }
 0x439   : > { %v6464_v47 = vadd.f32 %v15461_v45, %v6385_v21  ;;  %v6527_v12 = vmax.f32 %v6463_v7, 0.0  ;;  %v19180_v21 = vld [vmem:[#allocation11_spill] sm:$0xff]  ;;  %vm19300_vm0 = vmmov %vm19298_vm2 }
 0x43a   : > { %v12850_v27 = vpop.f32.mrb[100].mxu0 }
 0x43b   : > { %v6528_v32 = vmax.f32 %v6464_v47, 0.0  ;;  %v6741_v25 = vpop.f32.mrb[101].mxu0  ;;  %v6986_v4 = vadd.f32 %v12850_v27, %v19179_v31 }
 0x43c   : > { %v6389_v60 = vpop.f32.mrb[220].mxu1  ;;  %v12851_v39 = vpop.f32.mrb[102].mxu0  ;;  %v6984_v42 = vadd.f32 %v6741_v25, %v19172_v19  ;;  %v19182_v25 = vld [vmem:[#allocation13_spill] sm:$0xff]  ;;  %v19192_v19 = vld [vmem:[#allocation16_spill] sm:$0xff] }
 0x43d   : > { %v6390_v53 = vadd.f32 %v19164_v1, %v6389_v60  ;;  %v6391_v17 = vpop.f32.mrb[221].mxu1  ;;  %v6744_v54 = vpop.f32.mrb[103].mxu0  ;;  %v6561_v0 = vpack.c.bf16 %v6528_v32, %v6527_v12  ;;  %v6987_v61 = vadd.f32 %v12851_v39, %v19178_v58  ;;  %v15759_v60 = vadd.f32 %v15712_v22, %v6986_v4  ;;  %v19186_v1 = vld [vmem:[#allocation12_spill] sm:$0xff] }
 0x43e   : > { %v6392_v55 = vpop.f32.mrb[222].mxu1  ;;  %v6985_v36 = vadd.f32 %v6744_v54, %v19170_v24  ;;  %v15745_v34 = vadd.f32 %v15712_v22, %v6984_v42  ;;  %v19190_v24 = vld [vmem:[#allocation14_spill] sm:$0xff] }
 0x43f   : > { %v6465_v40 = vadd.f32 %v15461_v45, %v6390_v53  ;;  %v6393_v23 = vadd.f32 %v19166_v37, %v6392_v55  ;;  %v6394_v18 = vpop.f32.mrb[223].mxu1  ;;  %12904 = vmatprep.mubr.msk.bf16.mxu0 %vm19167_vm4, %v6561_v0  ;;  %v15755_v12 = vadd.f32 %v15712_v22, %v6987_v61  ;;  %19183 = vst [vmem:[#allocation131_spill] sm:$0xff] %v15759_v60  ;;  %v19187_v0 = vld [vmem:[#allocation10_spill] sm:$0xff] }
 0x440   : > { %19177 = vst [vmem:[#allocation105_spill] sm:$0xff] %v15745_v34  ;;  %v7119_v9 = vmax.f32 %v15745_v34, 0.0 }
 0x441   : > { %v6466_v51 = vadd.f32 %v15461_v45, %v6393_v23  ;;  %v6529_v3 = vmax.f32 %v6465_v40, 0.0  ;;  %v15738_v45 = vadd.f32 %v15712_v22, %v6985_v36  ;;  %19181 = vst [vmem:[#allocation128_spill] sm:$0xff] %v15755_v12  ;;  %v7122_v17 = vmax.f32 %v15755_v12, 0.0 }
 0x442   : > { %v7121_v40 = vmax.f32 %v15759_v60, 0.0 }
 0x443   : > { %v6530_v11 = vmax.f32 %v6466_v51, 0.0  ;;  %19174 = vst [vmem:[#allocation127_spill] sm:$0xff] %v15738_v45  ;;  %v7120_v10 = vmax.f32 %v15738_v45, 0.0 }
 0x444   : > { %v7182_v18 = vpack.c.bf16 %v7122_v17, %v7121_v40 }
 0x445   : > { %v6562_v29 = vpack.c.bf16 %v6530_v11, %v6529_v3  ;;  %v7181_v2 = vpack.c.bf16 %v7120_v10, %v7119_v9  ;;  %v19198_v9 = vld [vmem:[#allocation18_spill] sm:$0xff] }
 0x447   : > { %12905 = vmatmul.mubr.msk.bf16.gmra.mrb[156].mxu0 %vm19176_vm3, %v6562_v29  ;;  %vm19297_vm3 = vmmov %vm19294_vm1 }
 0x448   : > { %12924 = vmatprep.mubr.bf16.mxu0 %v7179_v14 }
 0x44a   : > { %v12854_v5 = vpop.f32.mrb[104].mxu0 }
 0x44b   : > { %v6757_v7 = vpop.f32.mrb[105].mxu0  ;;  %v6990_v55 = vadd.f32 %v12854_v5, %v19187_v0  ;;  %v19202_v0 = vld [vmem:[#allocation21_spill] sm:$0xff] }
 0x44c   : > { %v6988_v35 = vadd.f32 %v6757_v7, %v19180_v21  ;;  %v12855_v47 = vpop.f32.mrb[106].mxu0 }
 0x44d   : > { %v6760_v32 = vpop.f32.mrb[107].mxu0  ;;  %v6991_v53 = vadd.f32 %v12855_v47, %v19186_v1  ;;  %v15777_v16 = vadd.f32 %v15712_v22, %v6990_v55  ;;  %v19200_v1 = vld [vmem:[#allocation20_spill] sm:$0xff] }
 0x44e   : > { %v6989_v38 = vadd.f32 %v6760_v32, %v19182_v25  ;;  %v15762_v27 = vadd.f32 %v15712_v22, %v6988_v35  ;;  %v19199_v25 = vld [vmem:[#allocation19_spill] sm:$0xff] }
 0x44f   : > { %12925 = vmatmul.mubr.bf16.vlgmr.msra.gmra.mrb[160].mxu0 %v7180_v8  ;;  %v15774_v23 = vadd.f32 %v15712_v22, %v6991_v53  ;;  %19189 = vst [vmem:[#allocation133_spill] sm:$0xff] %v15777_v16  ;;  %v7125_v59 = vmax.f32 %v15777_v16, 0.0 }
 0x450   : > { %19184 = vst [vmem:[#allocation130_spill] sm:$0xff] %v15762_v27  ;;  %v15765_v39 = vadd.f32 %v15712_v22, %v6989_v38  ;;  %12928 = vmatprep.mubr.bf16.mxu0 %v7181_v2  ;;  %v7123_v37 = vmax.f32 %v15762_v27, 0.0 }
 0x451   : > { %19188 = vst [vmem:[#allocation110_spill] sm:$0xff] %v15774_v23  ;;  %v7126_v49 = vmax.f32 %v15774_v23, 0.0 }
 0x452   : > { %19185 = vst [vmem:[#allocation132_spill] sm:$0xff] %v15765_v39  ;;  %v7124_v54 = vmax.f32 %v15765_v39, 0.0 }
 0x453   : > { %v7184_v29 = vpack.c.bf16 %v7126_v49, %v7125_v59 }
 0x454   : > { %v7183_v44 = vpack.c.bf16 %v7124_v54, %v7123_v37 }
 0x457   : > { %12929 = vmatmul.mubr.bf16.gmra.mrb[164].mxu0 %v7182_v18 }
 0x458   : > { %12932 = vmatprep.mubr.bf16.mxu0 %v7183_v44 }
 0x45a   : > { %v12858_v51 = vpop.f32.mrb[108].mxu0 }
 0x45b   : > { %v6994_v36 = vadd.f32 %v12858_v51, %v19190_v24  ;;  %v6773_v46 = vpop.f32.mrb[109].mxu0 }
 0x45c   : > { %v6992_v3 = vadd.f32 %v6773_v46, %v19191_v13  ;;  %v12859_v11 = vpop.f32.mrb[110].mxu0  ;;  %v19206_v13 = vld [vmem:[#allocation22_spill] sm:$0xff] }
 0x45d   : > { %v6995_v42 = vadd.f32 %v12859_v11, %v19192_v19  ;;  %v6776_v30 = vpop.f32.mrb[111].mxu0  ;;  %v15789_v61 = vadd.f32 %v15712_v22, %v6994_v36  ;;  %v19207_v19 = vld [vmem:[#allocation23_spill] sm:$0xff] }
 0x45e   : > { %v15785_v14 = vadd.f32 %v15712_v22, %v6992_v3  ;;  %v6993_v58 = vadd.f32 %v6776_v30, %v19194_v62 }
 0x45f   : > { %19195 = vst [vmem:[#allocation135_spill] sm:$0xff] %v15789_v61  ;;  %v15792_v5 = vadd.f32 %v15712_v22, %v6995_v42  ;;  %12933 = vmatmul.mubr.bf16.gmra.mrb[168].mxu0 %v7184_v29  ;;  %v7129_v7 = vmax.f32 %v15789_v61, 0.0  ;;  %v19208_v29 = vld [vmem:[#allocation24_spill] sm:$0xff] }
 0x460   : > { %19193 = vst [vmem:[#allocation136_spill] sm:$0xff] %v15785_v14  ;;  %v15795_v10 = vadd.f32 %v15712_v22, %v6993_v58  ;;  %v7127_v31 = vmax.f32 %v15785_v14, 0.0 }
 0x461   : > { %19196 = vst [vmem:[#allocation137_spill] sm:$0xff] %v15792_v5  ;;  %v7130_v56 = vmax.f32 %v15792_v5, 0.0 }
 0x462   : > { %19197 = vst [vmem:[#allocation139_spill] sm:$0xff] %v15795_v10  ;;  %v7128_v4 = vmax.f32 %v15795_v10, 0.0 }
 0x463   : > { %v7186_v35 = vpack.c.bf16 %v7130_v56, %v7129_v7 }
 0x464   : > { %v7185_v21 = vpack.c.bf16 %v7128_v4, %v7127_v31  ;;  %v19210_v31 = vld [vmem:[#allocation25_spill] sm:$0xff] }
 0x466   : > { %12936 = vmatprep.mubr.bf16.mxu0 %v7185_v21 }
 0x467   : > { %12937 = vmatmul.mubr.bf16.gmra.mrb[172].mxu0 %v7186_v35 }
 0x46a   : > { %v12862_v47 = vpop.f32.mrb[112].mxu0 }
 0x46b   : > { %v6998_v8 = vadd.f32 %v12862_v47, %v19198_v9  ;;  %v6789_v32 = vpop.f32.mrb[113].mxu0  ;;  %v13224_v47 = vld [vmem:[%s18141_s6 + $0x28] sm:$0xff]  }
 0x46c   : > { %v6996_v38 = vadd.f32 %v6789_v32, %v19199_v25  ;;  %v12863_v2 = vpop.f32.mrb[114].mxu0  ;;  %12990 = vmatprep.subr.bf16.mxu1 %v13224_v47 }
 0x46d   : > { %v6999_v53 = vadd.f32 %v12863_v2, %v19200_v1  ;;  %v6792_v17 = vpop.f32.mrb[115].mxu0  ;;  %v15809_v40 = vadd.f32 %v15712_v22, %v6998_v8  ;;  %12991 = vmatpush3.bf16.msra.mxu1 %v13224_v47  ;;  %v19222_v47 = vld [vmem:[#allocation32_spill] sm:$0xff] }
 0x46e   : > { %v15805_v54 = vadd.f32 %v15712_v22, %v6996_v38  ;;  %v6997_v55 = vadd.f32 %v6792_v17, %v19202_v0 }
 0x46f   : > { %19203 = vst [vmem:[#allocation140_spill] sm:$0xff] %v15809_v40  ;;  %v15812_v37 = vadd.f32 %v15712_v22, %v6999_v53  ;;  %v7133_v24 = vmax.f32 %v15809_v40, 0.0  ;;  %v19214_v53 = vld [vmem:[#allocation26_spill] sm:$0xff] }
 0x470   : > { %19201 = vst [vmem:[#allocation138_spill] sm:$0xff] %v15805_v54  ;;  %v15815_v18 = vadd.f32 %v15712_v22, %v6997_v55  ;;  %v7131_v49 = vmax.f32 %v15805_v54, 0.0  ;;  %v19215_v55 = vld [vmem:[#allocation27_spill] sm:$0xff] }
 0x471   : > { %19204 = vst [vmem:[#allocation142_spill] sm:$0xff] %v15812_v37  ;;  %v7134_v44 = vmax.f32 %v15812_v37, 0.0 }
 0x472   : > { %19205 = vst [vmem:[#allocation117_spill] sm:$0xff] %v15815_v18  ;;  %v7132_v51 = vmax.f32 %v15815_v18, 0.0 }
 0x473   : > { %v7188_v46 = vpack.c.bf16 %v7134_v44, %v7133_v24 }
 0x474   : > { %v7187_v36 = vpack.c.bf16 %v7132_v51, %v7131_v49  ;;  %v19216_v51 = vld [vmem:[#allocation28_spill] sm:$0xff] }
 0x476   : > { %12940 = vmatprep.mubr.bf16.mxu0 %v7187_v36 }
 0x477   : > { %12941 = vmatmul.mubr.bf16.gmra.mrb[176].mxu0 %v7188_v46 }
 0x47a   : > { %v12866_v59 = vpop.f32.mrb[116].mxu0 }
 0x47b   : > { %v7002_v3 = vadd.f32 %v12866_v59, %v19206_v13  ;;  %v6805_v11 = vpop.f32.mrb[117].mxu0  ;;  %v19218_v59 = vld [vmem:[#allocation29_spill] sm:$0xff] }
 0x47c   : > { %v7000_v42 = vadd.f32 %v6805_v11, %v19207_v19  ;;  %v12867_v30 = vpop.f32.mrb[118].mxu0 }
 0x47d   : > { %v7003_v62 = vadd.f32 %v12867_v30, %v19208_v29  ;;  %v6808_v58 = vpop.f32.mrb[119].mxu0  ;;  %v15829_v7 = vadd.f32 %v15712_v22, %v7002_v3 }
 0x47e   : > { %v15825_v56 = vadd.f32 %v15712_v22, %v7000_v42  ;;  %v7001_v4 = vadd.f32 %v6808_v58, %v19210_v31 }
 0x47f   : > { %19211 = vst [vmem:[#allocation143_spill] sm:$0xff] %v15829_v7  ;;  %v15832_v21 = vadd.f32 %v15712_v22, %v7003_v62  ;;  %v7137_v25 = vmax.f32 %v15829_v7, 0.0 }
 0x480   : > { %19209 = vst [vmem:[#allocation141_spill] sm:$0xff] %v15825_v56  ;;  %v15835_v35 = vadd.f32 %v15712_v22, %v7001_v4  ;;  %v7135_v8 = vmax.f32 %v15825_v56, 0.0 }
 0x481   : > { %19212 = vst [vmem:[#allocation146_spill] sm:$0xff] %v15832_v21  ;;  %v7138_v9 = vmax.f32 %v15832_v21, 0.0 }
 0x482   : > { %19213 = vst [vmem:[#allocation145_spill] sm:$0xff] %v15835_v35  ;;  %v7136_v32 = vmax.f32 %v15835_v35, 0.0 }
 0x483   : > { %v7190_v2 = vpack.c.bf16 %v7138_v9, %v7137_v25 }
 0x484   : > { %v7189_v38 = vpack.c.bf16 %v7136_v32, %v7135_v8  ;;  %v19223_v32 = vld [vmem:[#allocation33_spill] sm:$0xff] }
 0x486   : > { %12944 = vmatprep.mubr.bf16.mxu0 %v7189_v38 }
 0x487   : > { %12945 = vmatmul.mubr.bf16.gmra.mrb[180].mxu0 %v7190_v2  ;;  %v19224_v2 = vld [vmem:[#allocation34_spill] sm:$0xff] }
 0x48a   : > { %v12870_v1 = vpop.f32.mrb[120].mxu0 }
 0x48b   : > { %v7006_v17 = vadd.f32 %v12870_v1, %v19214_v53  ;;  %v6821_v0 = vpop.f32.mrb[121].mxu0 }
 0x48c   : > { %v7004_v44 = vadd.f32 %v6821_v0, %v19215_v55  ;;  %v12871_v49 = vpop.f32.mrb[122].mxu0  ;;  %v19226_v0 = vld [vmem:[#allocation35_spill] sm:$0xff] }
 0x48d   : > { %v7007_v24 = vadd.f32 %v12871_v49, %v19216_v51  ;;  %v6824_v36 = vpop.f32.mrb[123].mxu0  ;;  %v15852_v3 = vadd.f32 %v15712_v22, %v7006_v17 }
 0x48e   : > { %v15848_v46 = vadd.f32 %v15712_v22, %v7004_v44  ;;  %v7005_v13 = vadd.f32 %v6824_v36, %v19218_v59 }
 0x48f   : > { %19219 = vst [vmem:[#allocation148_spill] sm:$0xff] %v15852_v3  ;;  %v15855_v11 = vadd.f32 %v15712_v22, %v7007_v24  ;;  %v7141_v62 = vmax.f32 %v15852_v3, 0.0 }
 0x490   : > { %19217 = vst [vmem:[#allocation147_spill] sm:$0xff] %v15848_v46  ;;  %v15858_v19 = vadd.f32 %v15712_v22, %v7005_v13  ;;  %v7139_v30 = vmax.f32 %v15848_v46, 0.0 }
 0x491   : > { %19220 = vst [vmem:[#allocation122_spill] sm:$0xff] %v15855_v11  ;;  %v7142_v42 = vmax.f32 %v15855_v11, 0.0 }
 0x492   : > { %19221 = vst [vmem:[#allocation121_spill] sm:$0xff] %v15858_v19  ;;  %v7140_v29 = vmax.f32 %v15858_v19, 0.0 }
 0x493   : > { %v7192_v31 = vpack.c.bf16 %v7142_v42, %v7141_v62  ;;  %v13225_v62 = vld [vmem:[%s18140_s5 + $0x80] sm:$0xff]  }
 0x494   : > { %v7191_v58 = vpack.c.bf16 %v7140_v29, %v7139_v30  ;;  %9678 = vmatpush1.bf16.msra.mxu0 %v13225_v62 }
 0x495   : > { %9679 = vmatprep.subr.bf16.mxu0 %v19128_v28 }
 0x496   : > { %12948 = vmatprep.mubr.bf16.mxu0 %v7191_v58  ;;  %v19230_v58 = vld [vmem:[#allocation36_spill] sm:$0xff] }
 0x497   : > { %12949 = vmatmul.mubr.bf16.gmra.mrb[184].mxu0 %v7192_v31 }
 0x49a   : > { %v12874_v4 = vpop.f32.mrb[124].mxu0 }
 0x49b   : > { %v7010_v9 = vadd.f32 %v12874_v4, %v19222_v47  ;;  %v6837_v8 = vpop.f32.mrb[125].mxu0  ;;  %v19231_v47 = vld [vmem:[#allocation30_spill] sm:$0xff] }
 0x49c   : > { %v7008_v25 = vadd.f32 %v6837_v8, %v19223_v32  ;;  %v12875_v38 = vpop.f32.mrb[126].mxu0  ;;  %v13226_v32 = vld [vmem:[%s18141_s6 + $0x30] sm:$0xff]  }
 0x49d   : > { %v7011_v1 = vadd.f32 %v12875_v38, %v19224_v2  ;;  %v6840_v53 = vpop.f32.mrb[127].mxu0  ;;  %v15872_v44 = vadd.f32 %v15712_v22, %v7010_v9  ;;  %v19232_v38 = vld [vmem:[#allocation37_spill] sm:$0xff]  ;;  %12992 = vmatprep.subr.bf16.mxu1 %v13226_v32 }
 0x49e   : > { %v15868_v17 = vadd.f32 %v15712_v22, %v7008_v25  ;;  %v7009_v55 = vadd.f32 %v6840_v53, %v19226_v0  ;;  %v13227_v25 = vld [vmem:[%s18141_s6 + $0x38] sm:$0xff]   ;;  %v19234_v0 = vld [vmem:[#allocation31_spill] sm:$0xff]  ;;  %12993 = vmatpush3.bf16.msra.mxu1 %v13226_v32 }
 0x49f   : > { %19227 = vst [vmem:[#allocation152_spill] sm:$0xff] %v15872_v44  ;;  %v15875_v49 = vadd.f32 %v15712_v22, %v7011_v1  ;;  %v7145_v13 = vmax.f32 %v15872_v44, 0.0  ;;  %12994 = vmatprep.subr.bf16.mxu1 %v13227_v25 }
 0x4a0   : > { %19225 = vst [vmem:[#allocation149_spill] sm:$0xff] %v15868_v17  ;;  %v15878_v51 = vadd.f32 %v15712_v22, %v7009_v55  ;;  %v7143_v36 = vmax.f32 %v15868_v17, 0.0 }
 0x4a1   : > { %19228 = vst [vmem:[#allocation123_spill] sm:$0xff] %v15875_v49  ;;  %v7146_v24 = vmax.f32 %v15875_v49, 0.0 }
 0x4a2   : > { %19229 = vst [vmem:[#allocation151_spill] sm:$0xff] %v15878_v51  ;;  %v7144_v59 = vmax.f32 %v15878_v51, 0.0  ;;  %12995 = vmatpush3.bf16.msra.mxu1 %v13227_v25  ;;  %v19240_v25 = vld [vmem:[#allocation41_spill] sm:$0xff] }
 0x4a3   : > { %v7194_v30 = vpack.c.bf16 %v7146_v24, %v7145_v13 }
 0x4a4   : > { %v7193_v42 = vpack.c.bf16 %v7144_v59, %v7143_v36 }
 0x4a6   : > { %12952 = vmatprep.mubr.bf16.mxu0 %v7193_v42  ;;  %v13228_v42 = vld [vmem:[%s18140_s5 + $0x88] sm:$0xff]  }
 0x4a7   : > { %12953 = vmatmul.mubr.bf16.gmra.mrb[188].mxu0 %v7194_v30 }
 0x4a8   : > { %9680 = vmatpush1.bf16.msra.mxu0 %v13228_v42  ;;  %v19242_v42 = vld [vmem:[#allocation39_spill] sm:$0xff] }
 0x4a9   : > { %9681 = vmatprep.subr.bf16.mxu0 %v19128_v28 }
 0x4aa   : > { %v12878_v29 = vpop.f32.mrb[128].mxu0 }
 0x4ab   : > { %v7014_v31 = vadd.f32 %v12878_v29, %v19230_v58  ;;  %v6853_v4 = vpop.f32.mrb[129].mxu0 }
 0x4ac   : > { %v7012_v9 = vadd.f32 %v6853_v4, %v19231_v47  ;;  %v12879_v8 = vpop.f32.mrb[130].mxu0  ;;  %v13229_v4 = vld [vmem:[%s18140_s5 + $0x90] sm:$0xff]  }
 0x4ad   : > { %v7015_v2 = vadd.f32 %v12879_v8, %v19232_v38  ;;  %v6856_v1 = vpop.f32.mrb[131].mxu0  ;;  %v15902_v24 = vadd.f32 %v15712_v22, %v7014_v31  ;;  %9682 = vmatpush1.bf16.msra.mxu0 %v13229_v4  ;;  %v19239_v38 = vld [vmem:[#allocation38_spill] sm:$0xff]  ;;  %v13230_v4 = vld [vmem:[%s18140_s5 + $0x98] sm:$0xff]  }
 0x4ae   : > { %v15898_v53 = vadd.f32 %v15712_v22, %v7012_v9  ;;  %v7013_v55 = vadd.f32 %v6856_v1, %v19234_v0  ;;  %v19238_v9 = vld [vmem:[#allocation40_spill] sm:$0xff]  ;;  %9683 = vmatprep.subr.bf16.mxu0 %v19128_v28 }
 0x4af   : > { %19235 = vst [vmem:[#allocation156_spill] sm:$0xff] %v15902_v24  ;;  %v15905_v36 = vadd.f32 %v15712_v22, %v7015_v2  ;;  %v7149_v62 = vmax.f32 %v15902_v24, 0.0 }
 0x4b0   : > { %19233 = vst [vmem:[#allocation153_spill] sm:$0xff] %v15898_v53  ;;  %v15908_v59 = vadd.f32 %v15712_v22, %v7013_v55  ;;  %v7147_v30 = vmax.f32 %v15898_v53, 0.0 }
 0x4b1   : > { %19236 = vst [vmem:[#allocation5_spill] sm:$0xff] %v15905_v36  ;;  %v7150_v13 = vmax.f32 %v15905_v36, 0.0  ;;  %9684 = vmatpush1.bf16.msra.mxu0 %v13230_v4 }
 0x4b2   : > { %19237 = vst [vmem:[#allocation2_spill] sm:$0xff] %v15908_v59  ;;  %v7148_v29 = vmax.f32 %v15908_v59, 0.0  ;;  %9685 = vmatprep.subr.bf16.mxu0 %v19128_v28 }
 0x4b3   : > { %v7196_v31 = vpack.c.bf16 %v7150_v13, %v7149_v62 }
 0x4b4   : > { %v7195_v58 = vpack.c.bf16 %v7148_v29, %v7147_v30 }
 0x4b6   : > { %12956 = vmatprep.mubr.bf16.mxu0 %v7195_v58 }
 0x4b7   : > { %12957 = vmatmul.mubr.bf16.gmra.mrb[192].mxu0 %v7196_v31 }
 0x4ba   : > { %v12882_v47 = vpop.f32.mrb[132].mxu0 }
 0x4bb   : > { %v7018_v8 = vadd.f32 %v12882_v47, %v19238_v9  ;;  %v6869_v32 = vpop.f32.mrb[133].mxu0 }
 0x4bc   : > { %v7016_v2 = vadd.f32 %v6869_v32, %v19239_v38  ;;  %v12883_v1 = vpop.f32.mrb[134].mxu0  ;;  %v13231_v38 = vld [vmem:[%s18140_s5 + $0xa0] sm:$0xff]  }
 0x4bd   : > { %v7019_v0 = vadd.f32 %v12883_v1, %v19240_v25  ;;  %v6872_v55 = vpop.f32.mrb[135].mxu0  ;;  %v15930_v29 = vadd.f32 %v15712_v22, %v7018_v8  ;;  %9686 = vmatpush1.bf16.msra.mxu0 %v13231_v38  ;;  %v19246_v25 = vld [vmem:[#allocation44_spill] sm:$0xff] }
 0x4be   : > { %v15926_v13 = vadd.f32 %v15712_v22, %v7016_v2  ;;  %v7017_v30 = vadd.f32 %v6872_v55, %v19242_v42  ;;  %9687 = vmatprep.subr.bf16.mxu0 %v19128_v28  ;;  %v19247_v42 = vld [vmem:[#allocation42_spill] sm:$0xff] }
 0x4bf   : > { %19243 = vst [vmem:[#allocation157_spill] sm:$0xff] %v15930_v29  ;;  %v15933_v62 = vadd.f32 %v15712_v22, %v7019_v0  ;;  %v7153_v32 = vmax.f32 %v15930_v29, 0.0 }
 0x4c0   : > { %19241 = vst [vmem:[#allocation155_spill] sm:$0xff] %v15926_v13  ;;  %v15936_v58 = vadd.f32 %v15712_v22, %v7017_v30  ;;  %v7151_v47 = vmax.f32 %v15926_v13, 0.0 }
 0x4c1   : > { %19244 = vst [vmem:[#allocation4_spill] sm:$0xff] %v15933_v62  ;;  %v7154_v31 = vmax.f32 %v15933_v62, 0.0  ;;  %v19250_v62 = vld [vmem:[#allocation43_spill] sm:$0xff] }
 0x4c2   : > { %19245 = vst [vmem:[#allocation9_spill] sm:$0xff] %v15936_v58  ;;  %v7152_v9 = vmax.f32 %v15936_v58, 0.0 }
 0x4c3   : > { %v7198_v2 = vpack.c.bf16 %v7154_v31, %v7153_v32 }
 0x4c4   : > { %v7197_v8 = vpack.c.bf16 %v7152_v9, %v7151_v47  ;;  %v19248_v47 = vld [vmem:[#allocation45_spill] sm:$0xff] }
 0x4c6   : > { %12960 = vmatprep.mubr.bf16.mxu0 %v7197_v8 }
 0x4c7   : > { %12961 = vmatmul.mubr.bf16.gmra.mrb[196].mxu0 %v7198_v2 }
 0x4ca   : > { %v12886_v1 = vpop.f32.mrb[136].mxu0 }
 0x4cb   : > { %v7022_v0 = vadd.f32 %v12886_v1, %v19246_v25  ;;  %v6885_v55 = vpop.f32.mrb[137].mxu0  ;;  %v13232_v1 = vld [vmem:[%s18140_s5 + $0xa8] sm:$0xff]  }
 0x4cc   : > { %v7020_v30 = vadd.f32 %v6885_v55, %v19247_v42  ;;  %v12887_v4 = vpop.f32.mrb[138].mxu0  ;;  %9688 = vmatpush1.bf16.msra.mxu0 %v13232_v1 }
 0x4cd   : > { %v7023_v9 = vadd.f32 %v12887_v4, %v19248_v47  ;;  %v6888_v50 = vpop.f32.mrb[139].mxu0  ;;  %v15958_v32 = vadd.f32 %v15712_v22, %v7022_v0  ;;  %9689 = vmatprep.subr.bf16.mxu0 %v19128_v28  ;;  %v13233_v0 = vld [vmem:[%s18140_s5 + $0xb0] sm:$0xff]  }
 0x4ce   : > { %v15954_v58 = vadd.f32 %v15712_v22, %v7020_v30  ;;  %v7021_v31 = vadd.f32 %v6888_v50, %v19250_v62  ;;  %v19254_v4 = vld [vmem:[#allocation48_spill] sm:$0xff] }
 0x4cf   : > { %19251 = vst [vmem:[#allocation7_spill] sm:$0xff] %v15958_v32  ;;  %v15961_v8 = vadd.f32 %v15712_v22, %v7023_v9  ;;  %v7157_v50 = vmax.f32 %v15958_v32, 0.0  ;;  %v19258_v32 = vld [vmem:[#allocation47_spill] sm:$0xff] }
 0x4d0   : > { %19249 = vst [vmem:[#allocation3_spill] sm:$0xff] %v15954_v58  ;;  %v15964_v38 = vadd.f32 %v15712_v22, %v7021_v31  ;;  %v7155_v25 = vmax.f32 %v15954_v58, 0.0  ;;  %9690 = vmatpush1.bf16.msra.mxu0 %v13233_v0  ;;  %v19255_v31 = vld [vmem:[#allocation46_spill] sm:$0xff] }
 0x4d1   : > { %19252 = vst [vmem:[#allocation8_spill] sm:$0xff] %v15961_v8  ;;  %v7158_v2 = vmax.f32 %v15961_v8, 0.0  ;;  %9691 = vmatprep.subr.bf16.mxu0 %v19128_v28 }
 0x4d2   : > { %19253 = vst [vmem:[#allocation6_spill] sm:$0xff] %v15964_v38  ;;  %v7156_v55 = vmax.f32 %v15964_v38, 0.0 }
 0x4d3   : > { %v7200_v42 = vpack.c.bf16 %v7158_v2, %v7157_v50 }
 0x4d4   : > { %v7199_v62 = vpack.c.bf16 %v7156_v55, %v7155_v25  ;;  %v19256_v25 = vld [vmem:[#allocation49_spill] sm:$0xff] }
 0x4d6   : > { %12964 = vmatprep.mubr.bf16.mxu0 %v7199_v62 }
 0x4d7   : > { %12965 = vmatmul.mubr.bf16.gmra.mrb[200].mxu0 %v7200_v42 }
 0x4da   : > { %v12890_v30 = vpop.f32.mrb[140].mxu0 }
 0x4db   : > { %v7026_v47 = vadd.f32 %v12890_v30, %v19254_v4  ;;  %v6901_v9 = vpop.f32.mrb[141].mxu0  ;;  %v13234_v30 = vld [vmem:[%s18140_s5 + $0xb8] sm:$0xff]  }
 0x4dc   : > { %v7024_v38 = vadd.f32 %v6901_v9, %v19255_v31  ;;  %v12891_v1 = vpop.f32.mrb[142].mxu0  ;;  %9692 = vmatpush1.bf16.msra.mxu0 %v13234_v30 }
 0x4dd   : > { %v7027_v55 = vadd.f32 %v12891_v1, %v19256_v25  ;;  %v6904_v8 = vpop.f32.mrb[143].mxu0  ;;  %v15986_v50 = vadd.f32 %v15712_v22, %v7026_v47  ;;  %9693 = vmatprep.subr.bf16.mxu0 %v19128_v28  ;;  %v13235_v47 = vld [vmem:[%s18140_s5 + $0xc0] sm:$0xff]   ;;  %v19262_v1 = vld [vmem:[#allocation52_spill] sm:$0xff] }
 0x4de   : > { %v15982_v58 = vadd.f32 %v15712_v22, %v7024_v38  ;;  %v7025_v2 = vadd.f32 %v6904_v8, %v19258_v32 }
 0x4df   : > { %19259 = vst [vmem:[#allocation13_spill] sm:$0xff] %v15986_v50  ;;  %v15989_v62 = vadd.f32 %v15712_v22, %v7027_v55  ;;  %v7161_v32 = vmax.f32 %v15986_v50, 0.0  ;;  %v19266_v50 = vld [vmem:[#allocation51_spill] sm:$0xff] }
 0x4e0   : > { %19257 = vst [vmem:[#allocation11_spill] sm:$0xff] %v15982_v58  ;;  %v15992_v0 = vadd.f32 %v15712_v22, %v7025_v2  ;;  %v7159_v38 = vmax.f32 %v15982_v58, 0.0  ;;  %9694 = vmatpush1.bf16.msra.mxu0 %v13235_v47  ;;  %v19263_v2 = vld [vmem:[#allocation50_spill] sm:$0xff] }
 0x4e1   : > { %19260 = vst [vmem:[#allocation12_spill] sm:$0xff] %v15989_v62  ;;  %v7162_v42 = vmax.f32 %v15989_v62, 0.0  ;;  %9695 = vmatprep.subr.bf16.mxu0 %v19128_v28 }
 0x4e2   : > { %19261 = vst [vmem:[#allocation10_spill] sm:$0xff] %v15992_v0  ;;  %v7160_v4 = vmax.f32 %v15992_v0, 0.0 }
 0x4e3   : > { %v7202_v9 = vpack.c.bf16 %v7162_v42, %v7161_v32 }
 0x4e4   : > { %v7201_v8 = vpack.c.bf16 %v7160_v4, %v7159_v38  ;;  %v19264_v38 = vld [vmem:[#allocation53_spill] sm:$0xff] }
 0x4e6   : > { %12968 = vmatprep.mubr.bf16.mxu0 %v7201_v8 }
 0x4e7   : > { %12969 = vmatmul.mubr.bf16.gmra.mrb[204].mxu0 %v7202_v9 }
 0x4ea   : > { %v12894_v31 = vpop.f32.mrb[144].mxu0 }
 0x4eb   : > { %v7030_v25 = vadd.f32 %v12894_v31, %v19262_v1  ;;  %v6917_v55 = vpop.f32.mrb[145].mxu0  ;;  %v13236_v31 = vld [vmem:[%s18140_s5 + $0xc8] sm:$0xff]  }
 0x4ec   : > { %v7028_v0 = vadd.f32 %v6917_v55, %v19263_v2  ;;  %v12895_v30 = vpop.f32.mrb[146].mxu0  ;;  %9696 = vmatpush1.bf16.msra.mxu0 %v13236_v31 }
 0x4ed   : > { %v7031_v4 = vadd.f32 %v12895_v30, %v19264_v38  ;;  %v6920_v62 = vpop.f32.mrb[147].mxu0  ;;  %v16014_v32 = vadd.f32 %v15712_v22, %v7030_v25  ;;  %9697 = vmatprep.subr.bf16.mxu0 %v19128_v28  ;;  %v13237_v25 = vld [vmem:[%s18140_s5 + $0xd0] sm:$0xff]  }
 0x4ee   : > { %v16010_v58 = vadd.f32 %v15712_v22, %v7028_v0  ;;  %v7029_v42 = vadd.f32 %v6920_v62, %v19266_v50  ;;  %v19270_v30 = vld [vmem:[#allocation56_spill] sm:$0xff] }
 0x4ef   : > { %19267 = vst [vmem:[#allocation15_spill] sm:$0xff] %v16014_v32  ;;  %v16017_v8 = vadd.f32 %v15712_v22, %v7031_v4  ;;  %v7165_v50 = vmax.f32 %v16014_v32, 0.0  ;;  %v19274_v32 = vld [vmem:[#allocation55_spill] sm:$0xff] }
 0x4f0   : > { %19265 = vst [vmem:[#allocation14_spill] sm:$0xff] %v16010_v58  ;;  %v16020_v47 = vadd.f32 %v15712_v22, %v7029_v42  ;;  %v7163_v0 = vmax.f32 %v16010_v58, 0.0  ;;  %9698 = vmatpush1.bf16.msra.mxu0 %v13237_v25  ;;  %v19271_v42 = vld [vmem:[#allocation54_spill] sm:$0xff] }
 0x4f1   : > { %19268 = vst [vmem:[#allocation16_spill] sm:$0xff] %v16017_v8  ;;  %v7166_v9 = vmax.f32 %v16017_v8, 0.0  ;;  %9699 = vmatprep.subr.bf16.mxu0 %v19128_v28 }
 0x4f2   : > { %19269 = vst [vmem:[#allocation17_spill] sm:$0xff] %v16020_v47  ;;  %v7164_v1 = vmax.f32 %v16020_v47, 0.0 }
 0x4f3   : > { %v7204_v55 = vpack.c.bf16 %v7166_v9, %v7165_v50 }
 0x4f4   : > { %v7203_v62 = vpack.c.bf16 %v7164_v1, %v7163_v0  ;;  %v19272_v0 = vld [vmem:[#allocation57_spill] sm:$0xff] }
 0x4f6   : > { %12972 = vmatprep.mubr.bf16.mxu0 %v7203_v62 }
 0x4f7   : > { %12973 = vmatmul.mubr.bf16.gmra.mrb[208].mxu0 %v7204_v55 }
 0x4fa   : > { %v12898_v2 = vpop.f32.mrb[148].mxu0 }
 0x4fb   : > { %v7034_v38 = vadd.f32 %v12898_v2, %v19270_v30  ;;  %v6933_v4 = vpop.f32.mrb[149].mxu0  ;;  %v13238_v2 = vld [vmem:[%s18140_s5 + $0xd8] sm:$0xff]  }
 0x4fc   : > { %v7032_v47 = vadd.f32 %v6933_v4, %v19271_v42  ;;  %v12899_v31 = vpop.f32.mrb[150].mxu0  ;;  %9700 = vmatpush1.bf16.msra.mxu0 %v13238_v2 }
 0x4fd   : > { %v7035_v1 = vadd.f32 %v12899_v31, %v19272_v0  ;;  %v6936_v8 = vpop.f32.mrb[151].mxu0  ;;  %v16042_v50 = vadd.f32 %v15712_v22, %v7034_v38  ;;  %9701 = vmatprep.subr.bf16.mxu0 %v19128_v28  ;;  %v13239_v38 = vld [vmem:[%s18140_s5 + $0xe0] sm:$0xff]   ;;  %v19278_v31 = vld [vmem:[#allocation60_spill] sm:$0xff] }
 0x4fe   : > { %v16038_v58 = vadd.f32 %v15712_v22, %v7032_v47  ;;  %v7033_v9 = vadd.f32 %v6936_v8, %v19274_v32 }
 0x4ff   : > { %19275 = vst [vmem:[#allocation19_spill] sm:$0xff] %v16042_v50  ;;  %v16045_v62 = vadd.f32 %v15712_v22, %v7035_v1  ;;  %v7169_v32 = vmax.f32 %v16042_v50, 0.0  ;;  %v19282_v50 = vld [vmem:[#allocation59_spill] sm:$0xff] }
 0x500   : > { %19273 = vst [vmem:[#allocation18_spill] sm:$0xff] %v16038_v58  ;;  %v16048_v25 = vadd.f32 %v15712_v22, %v7033_v9  ;;  %v7167_v47 = vmax.f32 %v16038_v58, 0.0  ;;  %9702 = vmatpush1.bf16.msra.mxu0 %v13239_v38  ;;  %v19279_v9 = vld [vmem:[#allocation58_spill] sm:$0xff] }
 0x501   : > { %19276 = vst [vmem:[#allocation20_spill] sm:$0xff] %v16045_v62  ;;  %v7170_v55 = vmax.f32 %v16045_v62, 0.0  ;;  %9703 = vmatprep.subr.bf16.mxu0 %v19128_v28 }
 0x502   : > { %19277 = vst [vmem:[#allocation21_spill] sm:$0xff] %v16048_v25  ;;  %v7168_v30 = vmax.f32 %v16048_v25, 0.0 }
 0x503   : > { %v7206_v4 = vpack.c.bf16 %v7170_v55, %v7169_v32 }
 0x504   : > { %v7205_v8 = vpack.c.bf16 %v7168_v30, %v7167_v47  ;;  %v19280_v47 = vld [vmem:[#allocation61_spill] sm:$0xff] }
 0x506   : > { %12976 = vmatprep.mubr.bf16.mxu0 %v7205_v8 }
 0x507   : > { %12977 = vmatmul.mubr.bf16.gmra.mrb[212].mxu0 %v7206_v4 }
 0x50a   : > { %v12902_v42 = vpop.f32.mrb[152].mxu0 }
 0x50b   : > { %v7038_v0 = vadd.f32 %v12902_v42, %v19278_v31  ;;  %v6949_v1 = vpop.f32.mrb[153].mxu0 }
 0x50c   : > { %v7036_v25 = vadd.f32 %v6949_v1, %v19279_v9  ;;  %v12903_v2 = vpop.f32.mrb[154].mxu0  ;;  %v13241_v1 = vld [vmem:[%s18140_s5 + $0xf0] sm:$0xff]  }
 0x50d   : > { %v7039_v30 = vadd.f32 %v12903_v2, %v19280_v47  ;;  %v6952_v62 = vpop.f32.mrb[155].mxu0  ;;  %v16070_v32 = vadd.f32 %v15712_v22, %v7038_v0  ;;  %v19286_v2 = vld [vmem:[#allocation64_spill] sm:$0xff] }
 0x50e   : > { %v16066_v58 = vadd.f32 %v15712_v22, %v7036_v25  ;;  %v7037_v55 = vadd.f32 %v6952_v62, %v19282_v50  ;;  %v13240_v50 = vld [vmem:[%s18140_s5 + $0xe8] sm:$0xff]  }
 0x50f   : > { %19283 = vst [vmem:[#allocation23_spill] sm:$0xff] %v16070_v32  ;;  %v16073_v8 = vadd.f32 %v15712_v22, %v7039_v30  ;;  %v7173_v25 = vmax.f32 %v16070_v32, 0.0  ;;  %9704 = vmatpush1.bf16.msra.mxu0 %v13240_v50 }
 0x510   : > { %19281 = vst [vmem:[#allocation22_spill] sm:$0xff] %v16066_v58  ;;  %v16076_v38 = vadd.f32 %v15712_v22, %v7037_v55  ;;  %v7171_v42 = vmax.f32 %v16066_v58, 0.0  ;;  %9705 = vmatprep.subr.bf16.mxu0 %v19128_v28  ;;  %v19287_v55 = vld [vmem:[#allocation62_spill] sm:$0xff] }
 0x511   : > { %19284 = vst [vmem:[#allocation24_spill] sm:$0xff] %v16073_v8  ;;  %v7174_v4 = vmax.f32 %v16073_v8, 0.0 }
 0x512   : > { %19285 = vst [vmem:[#allocation25_spill] sm:$0xff] %v16076_v38  ;;  %v7172_v31 = vmax.f32 %v16076_v38, 0.0 }
 0x513   : > { %v7208_v0 = vpack.c.bf16 %v7174_v4, %v7173_v25  ;;  %9706 = vmatpush1.bf16.msra.mxu0 %v13241_v1  ;;  %v19288_v4 = vld [vmem:[#allocation65_spill] sm:$0xff] }
 0x514   : > { %v7207_v62 = vpack.c.bf16 %v7172_v31, %v7171_v42  ;;  %9707 = vmatprep.subr.bf16.mxu0 %v19128_v28 }
 0x516   : > { %12980 = vmatprep.mubr.bf16.mxu0 %v7207_v62  ;;  %v19290_v62 = vld [vmem:[#allocation63_spill] sm:$0xff] }
 0x517   : > { %12981 = vmatmul.mubr.bf16.gmra.mrb[216].mxu0 %v7208_v0 }
 0x51a   : > { %v12906_v9 = vpop.f32.mrb[156].mxu0 }
 0x51b   : > { %v7042_v47 = vadd.f32 %v12906_v9, %v19286_v2  ;;  %v6965_v30 = vpop.f32.mrb[157].mxu0  ;;  %v16109_v2 = vld [vmem:[%s18139_s4 + $0x1] ss:$0 sm:$0xff] }
 0x51c   : > { %v7040_v38 = vadd.f32 %v6965_v30, %v19287_v55  ;;  %v12907_v42 = vpop.f32.mrb[158].mxu0 }
 0x51d   : > { %v7043_v31 = vadd.f32 %v12907_v42, %v19288_v4  ;;  %v6968_v25 = vpop.f32.mrb[159].mxu0  ;;  %v16098_v0 = vadd.f32 %v15712_v22, %v7042_v47 }
 0x51e   : > { %v16094_v50 = vadd.f32 %v15712_v22, %v7040_v38  ;;  %v7041_v8 = vadd.f32 %v6968_v25, %v19290_v62 }
 0x51f   : > { %19291 = vst [vmem:[#allocation27_spill] sm:$0xff] %v16098_v0  ;;  %v16101_v1 = vadd.f32 %v15712_v22, %v7043_v31  ;;  %v7177_v31 = vmax.f32 %v16098_v0, 0.0 }
 0x520   : > { %19289 = vst [vmem:[#allocation26_spill] sm:$0xff] %v16094_v50  ;;  %v16104_v9 = vadd.f32 %v15712_v22, %v7041_v8  ;;  %v7175_v55 = vmax.f32 %v16094_v50, 0.0  ;;  %v13242_v22 = vld [vmem:[%s18140_s5 + $0xf8] sm:$0xff]  }
 0x521   : > { %19292 = vst [vmem:[#allocation28_spill] sm:$0xff] %v16101_v1  ;;  %v7178_v30 = vmax.f32 %v16101_v1, 0.0  ;;  %9708 = vmatpush1.bf16.msra.mxu0 %v13242_v22 }
 0x522   : > { %19293 = vst [vmem:[#allocation29_spill] sm:$0xff] %v16104_v9  ;;  %v12926_v38 = vpop.f32.mrb[160].mxu0  ;;  %v7176_v42 = vmax.f32 %v16104_v9, 0.0  ;;  %11572 = vmatprep.subr.bf16.mxu0 %v19128_v28 }
 0x523   : > { %v7327_v47 = vadd.f32 %v12926_v38, %v16109_v2  ;;  %v7318_v4 = vpop.f32.mrb[161].mxu0  ;;  %v7210_v50 = vpack.c.bf16 %v7178_v30, %v7177_v31 }
 0x524   : > { %v7319_v8 = vadd.f32 %v16109_v2, %v7318_v4  ;;  %v12927_v25 = vpop.f32.mrb[162].mxu0  ;;  %v7209_v62 = vpack.c.bf16 %v7176_v42, %v7175_v55 }
 0x525   : > { %v7575_v58 = vmax.f32 %v7327_v47, 0.0  ;;  %v7330_v1 = vadd.f32 %v12927_v25, %v16109_v2  ;;  %v7321_v32 = vpop.f32.mrb[163].mxu0 }
 0x526   : > { %v7573_v9 = vmax.f32 %v7319_v8, 0.0  ;;  %v7322_v38 = vadd.f32 %v16109_v2, %v7321_v32  ;;  %12984 = vmatprep.mubr.bf16.mxu0 %v7209_v62  ;;  %v19295_v32 = vld [vmem:[#allocation67_spill] sm:$0xff] }
 0x527   : > { %v7576_v0 = vmax.f32 %v7330_v1, 0.0  ;;  %12985 = vmatmul.mubr.bf16.gmra.mrb[220].mxu0 %v7210_v50  ;;  %v7736_v59 = vrot.slane %v7575_v58, 7  ;;  %vm19296_vm4 = vnez %v19295_v32 }
 0x528   : > { %v7733_v13 = vrot.slane %v7573_v9, 7  ;;  %v7574_v29 = vmax.f32 %v7322_v38, 0.0 }
 0x529   : > { %v7638_v4 = vpack.c.bf16 %v7576_v0, %v7575_v58  ;;  %v7738_v36 = vrot.slane %v7576_v0, 7 }
 0x52a   : > { %v16124_v55 = vsel %vm19294_vm1, 0.0, %v7733_v13  ;;  %v7637_v42 = vpack.c.bf16 %v7574_v29, %v7573_v9  ;;  %v7734_v47 = vrot.slane %v7574_v29, 7  ;;  %v12930_v30 = vpop.f32.mrb[164].mxu0  ;;  %vm19299_vm1 = vcmask 523264  }
 0x52b   : > { %v7343_v31 = vadd.f32 %v12930_v30, %v16109_v2  ;;  %v7334_v22 = vpop.f32.mrb[165].mxu0  ;;  %v8587_v8 = vsel %vm19296_vm4, %v16124_v55, 0.0  ;;  %v8019_v50 = vrot.slane %v16124_v55, 1  ;;  %v16132_v1 = vsel %vm19297_vm3, %v7736_v59, %v7738_v36  ;;  %vm19301_vm4 = vmmov %vm19299_vm1 }
 0x52c   : > { %v16135_v58 = vsel %vm19298_vm2, %v7734_v47, %v7736_v59  ;;  %v7335_v0 = vadd.f32 %v16109_v2, %v7334_v22  ;;  %v12931_v9 = vpop.f32.mrb[166].mxu0  ;;  %12996 = vmatprep.mubr.msk.bf16.mxu1 %vm19299_vm1, %v7637_v42  ;;  %v16140_v29 = vsel %vm19300_vm0, %v7733_v13, %v7734_v47  ;;  %v8025_v25 = vrot.slane %v16132_v1, 1 }
 0x52d   : > { %v7579_v62 = vmax.f32 %v7343_v31, 0.0  ;;  %v7346_v38 = vadd.f32 %v12931_v9, %v16109_v2  ;;  %v7337_v30 = vpop.f32.mrb[167].mxu0  ;;  %12997 = vmatmul.mubr.msk.bf16.vlgmr.msra.gmra.mrb[224].mxu1 %vm19301_vm4, %v7638_v4  ;;  %v8651_v32 = vpack.c.bf16 %v16140_v29, %v8587_v8  ;;  %v8021_v59 = vrot.slane %v16140_v29, 1 }
 0x52e   : > { %v7577_v53 = vmax.f32 %v7335_v0, 0.0  ;;  %v7338_v22 = vadd.f32 %v16109_v2, %v7337_v30  ;;  %v8023_v42 = vrot.slane %v16135_v58, 1  ;;  %v8589_v47 = vsel %vm14039_vm5, %v16135_v58, 0.0 }
 0x52f   : > { %v7744_v24 = vrot.slane %v7579_v62, 7  ;;  %v7580_v31 = vmax.f32 %v7346_v38, 0.0  ;;  %8811 = vrot.lane.b32.xlu0 %v8651_v32, %s13299_s25  ;;  %vm19303_vm0 = vcmask 1046528   ;;  %v8652_v4 = vpack.c.bf16 %v16132_v1, %v8589_v47 }
 0x530   : > { %v8022_v9 = vsel %vm19303_vm0, %v8019_v50, %v8021_v59  ;;  %v7740_v8 = vrot.slane %v7577_v53, 7  ;;  %v7578_v51 = vmax.f32 %v7338_v22, 0.0  ;;  %vm19304_vm2 = vmmov %vm19303_vm0  ;;  %v8303_v19 = vrot.slane %v16124_v55, 2 }
 0x531   : > { %v8024_v0 = vsel %vm19304_vm2, %v8021_v59, %v8023_v42  ;;  %vm19305_vm3 = vmmov %vm19303_vm0  ;;  %v7640_v49 = vpack.c.bf16 %v7580_v31, %v7579_v62  ;;  %v7746_v17 = vrot.slane %v7580_v31, 7  ;;  %vm19306_vm1 = vcmask 1040384  }
 0x532   : > { %v8026_v30 = vsel %vm19305_vm3, %v8023_v42, %v8025_v25  ;;  %v8272_v44 = vpack.c.bf16 %v8024_v0, %v8022_v9  ;;  %v7639_v11 = vpack.c.bf16 %v7578_v51, %v7577_v53  ;;  %v7742_v46 = vrot.slane %v7578_v51, 7  ;;  %v12934_v38 = vpop.f32.mrb[168].mxu0  ;;  %vm19308_vm4 = vmmov %vm19306_vm1 }
 0x533   : > { %v16159_v32 = vsel %vm19306_vm1, %v7738_v36, %v7740_v8  ;;  %v7359_v47 = vadd.f32 %v12934_v38, %v16109_v2  ;;  %v7350_v59 = vpop.f32.mrb[169].mxu0  ;;  %8813 = vrot.lane.b32.xlu0 %v8652_v4, %s13299_s25  ;;  %v16170_v51 = vsel %vm19308_vm4, %v7744_v24, %v7746_v17  ;;  %vm19309_vm0 = vcmask 523264   ;;  %vm19310_vm2 = vmmov %vm19306_vm1 }
 0x534   : > { %8717 = vrot.lane.b32.xlu1 %v8272_v44, %s13299_s25  ;;  %v8591_v22 = vsel %vm14075_vm7, %v16159_v32, 0.0  ;;  %v8027_v53 = vrot.slane %v16159_v32, 1  ;;  %v7351_v36 = vadd.f32 %v16109_v2, %v7350_v59  ;;  %v12935_v42 = vpop.f32.mrb[170].mxu0  ;;  %13000 = vmatprep.mubr.msk.bf16.mxu1 %vm19309_vm0, %v7639_v11  ;;  %v16175_v31 = vsel %vm19310_vm2, %v7740_v8, %v7742_v46  ;;  %vm19311_vm3 = vmmov %vm19306_vm1 }
 0x535   : > { %v16178_v44 = vsel %vm19311_vm3, %v7742_v46, %v7744_v24  ;;  %v8033_v9 = vrot.slane %v16170_v51, 1  ;;  %v7583_v4 = vmax.f32 %v7359_v47, 0.0  ;;  %v7362_v0 = vadd.f32 %v12935_v42, %v16109_v2  ;;  %v7353_v38 = vpop.f32.mrb[171].mxu0  ;;  %vm19312_vm1 = vmmov %vm19309_vm0 }
 0x536   : > { %13001 = vmatmul.mubr.msk.bf16.gmra.mrb[228].mxu1 %vm19312_vm1, %v7640_v49  ;;  %v8653_v50 = vpack.c.bf16 %v16175_v31, %v8591_v22  ;;  %vm19313_vm4 = vcmask 1046528   ;;  %v7581_v3 = vmax.f32 %v7351_v36, 0.0  ;;  %v7354_v11 = vadd.f32 %v16109_v2, %v7353_v38 }
 0x537   : > { %v8028_v59 = vsel %vm19313_vm4, %v8025_v25, %v8027_v53  ;;  %v8593_v46 = vsel %vm14100_vm8, %v16178_v44, 0.0  ;;  %v7752_v24 = vrot.slane %v7583_v4, 7  ;;  %v7584_v21 = vmax.f32 %v7362_v0, 0.0  ;;  %vm19317_vm2 = vmmov %vm19313_vm4 }
 0x538   : > { %v8273_v8 = vpack.c.bf16 %v8028_v59, %v8026_v30  ;;  %8815 = vrot.lane.b32.xlu0 %v8653_v50, %s13299_s25  ;;  %v8654_v47 = vpack.c.bf16 %v16170_v51, %v8593_v46  ;;  %v8029_v49 = vrot.slane %v16175_v31, 1  ;;  %v7748_v42 = vrot.slane %v7581_v3, 7  ;;  %vm19318_vm3 = vmmov %vm19317_vm2 }
 0x539   : > { %v7582_v22 = vmax.f32 %v7354_v11, 0.0  ;;  %v8031_v25 = vrot.slane %v16178_v44, 1  ;;  %v19315_v30 = vrot.slane %v16140_v29, 2  ;;  %vm19316_vm0 = vcmask 1045504   ;;  %vm19321_vm4 = vmmov %vm19317_vm2 }
 0x53a   : > { %8719 = vrot.lane.b32.xlu1 %v8273_v8, %s13299_s25  ;;  %v7642_v38 = vpack.c.bf16 %v7584_v21, %v7583_v4  ;;  %v7754_v59 = vrot.slane %v7584_v21, 7  ;;  %v8030_v0 = vsel %vm19317_vm2, %v8027_v53, %v8029_v49  ;;  %v12938_v7 = vpop.f32.mrb[172].mxu0  ;;  %vm19319_vm1 = vcmask 1040384  }
 0x53b   : > { %v16197_v36 = vsel %vm19316_vm0, %v8303_v19, %v19315_v30  ;;  %v7641_v46 = vpack.c.bf16 %v7582_v22, %v7581_v3  ;;  %v7750_v56 = vrot.slane %v7582_v22, 7  ;;  %v8032_v11 = vsel %vm19318_vm3, %v8029_v49, %v8031_v25  ;;  %v7366_v37 = vpop.f32.mrb[173].mxu0  ;;  %vm19323_vm2 = vmmov %vm19319_vm1 }
 0x53c   : > { %v16203_v8 = vsel %vm19319_vm1, %v7746_v17, %v7748_v42  ;;  %v7375_v18 = vadd.f32 %v12938_v7, %v16109_v2  ;;  %8817 = vrot.lane.b32.xlu0 %v8654_v47, %s13299_s25  ;;  %v8274_v19 = vpack.c.bf16 %v8032_v11, %v8030_v0  ;;  %v8034_v4 = vsel %vm19321_vm4, %v8031_v25, %v8033_v9  ;;  %v12939_v22 = vpop.f32.mrb[174].mxu0  ;;  %vm19324_vm3 = vmmov %vm19319_vm1 }
 0x53d   : > { %v8595_v53 = vsel %vm14116_vm9, %v16203_v8, 0.0  ;;  %v7367_v3 = vadd.f32 %v16109_v2, %v7366_v37  ;;  %vm19322_vm0 = vcmask 523264   ;;  %v16214_v17 = vsel %vm19323_vm2, %v7748_v42, %v7750_v56  ;;  %v7369_v0 = vpop.f32.mrb[175].mxu0  ;;  %vm19326_vm4 = vmmov %vm19323_vm2 }
 0x53e   : > { %13004 = vmatprep.mubr.msk.bf16.mxu1 %vm19322_vm0, %v7641_v46  ;;  %v8035_v7 = vrot.slane %v16203_v8, 1  ;;  %v16218_v49 = vsel %vm19324_vm3, %v7750_v56, %v7752_v24  ;;  %v7587_v47 = vmax.f32 %v7375_v18, 0.0  ;;  %v7378_v30 = vadd.f32 %v12939_v22, %v16109_v2  ;;  %8721 = vrot.lane.b32.xlu1 %v8274_v19, %s13299_s25  ;;  %vm19325_vm1 = vmmov %vm19322_vm0 }
 0x53f   : > { %13005 = vmatmul.mubr.msk.bf16.gmra.mrb[232].mxu1 %vm19325_vm1, %v7642_v38  ;;  %v8655_v37 = vpack.c.bf16 %v16214_v17, %v8595_v53  ;;  %v16225_v25 = vsel %vm19326_vm4, %v7752_v24, %v7754_v59  ;;  %v7585_v42 = vmax.f32 %v7367_v3, 0.0  ;;  %v7370_v46 = vadd.f32 %v16109_v2, %v7369_v0  ;;  %vm19334_vm13 = vmmov %vm19326_vm4 }
 0x540   : > { %vm19327_vm0 = vcmask 1046528   ;;  %v8597_v18 = vsel %vm14150_vm10, %v16218_v49, 0.0  ;;  %v7760_v22 = vrot.slane %v7587_v47, 7  ;;  %v7588_v50 = vmax.f32 %v7378_v30, 0.0 }
 0x541   : > { %v8036_v11 = vsel %vm19327_vm0, %v8033_v9, %v8035_v7  ;;  %8819 = vrot.lane.b32.xlu0 %v8655_v37, %s13299_s25  ;;  %v8656_v38 = vpack.c.bf16 %v16225_v25, %v8597_v18  ;;  %v7756_v53 = vrot.slane %v7585_v42, 7  ;;  %v7586_v54 = vmax.f32 %v7370_v46, 0.0  ;;  %vm19332_vm3 = vmmov %vm19327_vm0 }
 0x542   : > { %v8275_v19 = vpack.c.bf16 %v8036_v11, %v8034_v4  ;;  %v8037_v24 = vrot.slane %v16214_v17, 1  ;;  %v8039_v3 = vrot.slane %v16218_v49, 1  ;;  %v7644_v0 = vpack.c.bf16 %v7588_v50, %v7587_v47  ;;  %vm19333_vm1 = vmmov %vm19327_vm0 }
 0x543   : > { %v16236_v40 = vrot.slane %v7588_v50, 7  ;;  %v8041_v9 = vrot.slane %v16225_v25, 1  ;;  %v19329_v30 = vrot.slane %v16135_v58, 2  ;;  %v19330_v37 = vrot.slane %v16140_v29, 2 }
 0x544   : > { %8723 = vrot.lane.b32.xlu1 %v8275_v19, %s13299_s25  ;;  %vm19331_vm2 = vcmask 1045504   ;;  %v7643_v11 = vpack.c.bf16 %v7586_v54, %v7585_v42  ;;  %v7758_v18 = vrot.slane %v7586_v54, 7  ;;  %v8038_v46 = vsel %vm19332_vm3, %v8035_v7, %v8037_v24 }
 0x545   : > { %v8308_v4 = vsel %vm19331_vm2, %v19330_v37, %v19329_v30  ;;  %v8040_v10 = vsel %vm19333_vm1, %v8037_v24, %v8039_v3  ;;  %8821 = vrot.lane.b32.xlu0 %v8656_v38, %s13299_s25  ;;  %v16249_v47 = vsel %vm19326_vm4, %v7754_v59, %v7756_v53  ;;  %v8042_v19 = vsel %vm19327_vm0, %v8039_v3, %v8041_v9  ;;  %vm19336_vm2 = vmmov %vm19326_vm4 }
 0x546   : > { %v8276_v50 = vpack.c.bf16 %v8040_v10, %v8038_v46  ;;  %v16254_v5 = vsel %vm19334_vm13, %v7760_v22, %v16236_v40  ;;  %13008 = vmatprep.mubr.msk.bf16.mxu1 %vm19335_vm6, %v7643_v11  ;;  %v16258_v54 = vsel %vm19336_vm2, %v7756_v53, %v7758_v18  ;;  %v8599_v42 = vsel %vm14162_vm11, %v16249_v47, 0.0  ;;  %vm19338_vm3 = vmmov %vm19336_vm2 }
 0x547   : > { %v8043_v10 = vrot.slane %v16249_v47, 1  ;;  %v16265_v59 = vsel %vm19338_vm3, %v7758_v18, %v7760_v22  ;;  %vm19339_vm1 = vmmov %vm19335_vm6  ;;  %v8657_v38 = vpack.c.bf16 %v16258_v54, %v8599_v42  ;;  %v8045_v3 = vrot.slane %v16258_v54, 1  ;;  %v19342_v18 = vld [vmem:[#allocation107_spill] sm:$0xff] }
 0x548   : > { %8725 = vrot.lane.b32.xlu1 %v8276_v50, %s13299_s25  ;;  %13009 = vmatmul.mubr.msk.bf16.gmra.mrb[236].mxu1 %vm19339_vm1, %v7644_v0  ;;  %v8601_v53 = vsel %vm14188_vm12, %v16265_v59, 0.0  ;;  %v8047_v30 = vrot.slane %v16265_v59, 1  ;;  %vm19341_vm6 = vmmov %vm19327_vm0  ;;  %v8049_v22 = vrot.slane %v16254_v5, 1  ;;  %vm19343_vm13 = vnez %v19342_v18 }
 0x549   : > { %v8044_v37 = vsel %vm19341_vm6, %v8041_v9, %v8043_v10  ;;  %v8658_v11 = vpack.c.bf16 %v16254_v5, %v8601_v53  ;;  %v8494_v46 = vsel %vm19343_vm13, %v8308_v4, 0.0  ;;  %8823 = vrot.lane.b32.xlu0 %v8657_v38, %s13299_s25  ;;  %vm19344_vm4 = vmmov %vm19327_vm0  ;;  %v7925_v4 = vsel %vm14039_vm5, %v16124_v55, 0.0 }
 0x54a   : > { %v8277_v0 = vpack.c.bf16 %v8044_v37, %v8042_v19  ;;  %v8046_v50 = vsel %vm19344_vm4, %v8043_v10, %v8045_v3  ;;  %v8048_v42 = vsel %vm19327_vm0, %v8045_v3, %v8047_v30  ;;  %v16284_v14 = vpack.c.bf16 %v8494_v46, %v16197_v36  ;;  %vm19345_vm2 = vmmov %vm19327_vm0  ;;  %v12942_v3 = vpop.f32.mrb[176].mxu0 }
 0x54b   : > { %v8278_v61 = vpack.c.bf16 %v8048_v42, %v8046_v50  ;;  %v16289_v9 = vsel %vm19345_vm2, %v8047_v30, %v8049_v22  ;;  %v8309_v38 = vrot.slane %v16132_v1, 2  ;;  %v16297_v19 = vpack.c.bf16 %v16140_v29, %v7925_v4  ;;  %v7382_v62 = vpop.f32.mrb[177].mxu0  ;;  %v19350_v42 = vld [vmem:[#allocation124_spill] sm:$0xff] }
 0x54c   : > { %8727 = vrot.lane.b32.xlu1 %v8277_v0, %s13299_s25  ;;  %v8311_v36 = vrot.slane %v16159_v32, 2  ;;  %v7927_v10 = vsel %vm14075_vm7, %v16135_v58, 0.0  ;;  %v8313_v53 = vrot.slane %v16175_v31, 2  ;;  %v19346_v30 = vrot.slane %v16135_v58, 2  ;;  %v12943_v50 = vpop.f32.mrb[178].mxu0 }
 0x54d   : > { %vm19347_vm3 = vcmask 1045504   ;;  %v16308_v13 = vpack.c.bf16 %v16132_v1, %v7927_v10  ;;  %v8315_v37 = vrot.slane %v16178_v44, 2  ;;  %v7929_v29 = vsel %vm14100_vm8, %v16159_v32, 0.0  ;;  %8825 = vrot.lane.b32.xlu0 %v8658_v11, %s13299_s25 }
 0x54e   : > { %v8310_v55 = vsel %vm19347_vm3, %v19346_v30, %v8309_v38  ;;  %v7391_v18 = vadd.f32 %v12942_v3, %v16109_v2  ;;  %vm19348_vm5 = vmmov %vm19347_vm3  ;;  %v16319_v0 = vpack.c.bf16 %v16175_v31, %v7929_v29  ;;  %v7383_v1 = vadd.f32 %v16109_v2, %v7382_v62  ;;  %v19353_v31 = vld [vmem:[#allocation125_spill] sm:$0xff] }
 0x54f   : > { %v8312_v46 = vsel %vm19348_vm5, %v8309_v38, %v8311_v36  ;;  %vm19349_vm7 = vmmov %vm19347_vm3  ;;  %vm19351_vm1 = vnez %v19350_v42  ;;  %v8317_v32 = vrot.slane %v16170_v51, 2  ;;  %v7394_v11 = vadd.f32 %v12943_v50, %v16109_v2  ;;  %v7385_v38 = vpop.f32.mrb[179].mxu0 }
 0x550   : > { %v8314_v58 = vsel %vm19349_vm7, %v8311_v36, %v8313_v53  ;;  %v8496_v4 = vsel %vm19351_vm1, %v8312_v46, 0.0  ;;  %vm19352_vm6 = vmmov %vm19347_vm3  ;;  %v7591_v10 = vmax.f32 %v7391_v18, 0.0  ;;  %8729 = vrot.lane.b32.xlu1 %v8278_v61, %s13299_s25  ;;  %vm19354_vm8 = vnez %v19353_v31 }
 0x551   : > { %v8316_v35 = vsel %vm19352_vm6, %v8313_v53, %v8315_v37  ;;  %v16328_v36 = vpack.c.bf16 %v8496_v4, %v8310_v55  ;;  %v7589_v30 = vmax.f32 %v7383_v1, 0.0  ;;  %v7386_v29 = vadd.f32 %v16109_v2, %v7385_v38  ;;  %vm19355_vm13 = vmmov %vm19347_vm3 }
 0x552   : > { %v8498_v3 = vsel %vm19354_vm8, %v8316_v35, 0.0  ;;  %v8318_v53 = vsel %vm19355_vm13, %v8315_v37, %v8317_v32  ;;  %v7768_v46 = vrot.slane %v7591_v10, 7  ;;  %v7592_v42 = vmax.f32 %v7394_v11, 0.0  ;;  %vm19356_vm4 = vmmov %vm19347_vm3 }
 0x553   : > { %v16333_v62 = vpack.c.bf16 %v8498_v3, %v8314_v58  ;;  %v8319_v18 = vrot.slane %v16203_v8, 2  ;;  %v7931_v61 = vsel %vm14116_vm9, %v16178_v44, 0.0  ;;  %v7764_v55 = vrot.slane %v7589_v30, 7  ;;  %v19358_v44 = vld [vmem:[#allocation126_spill] sm:$0xff]  ;;  %vm19366_vm6 = vmmov %vm19356_vm4 }
 0x554   : > { %v7590_v50 = vmax.f32 %v7386_v29, 0.0  ;;  %v16341_v4 = vpack.c.bf16 %v16170_v51, %v7931_v61  ;;  %v8321_v1 = vrot.slane %v16214_v17, 2  ;;  %v7646_v35 = vpack.c.bf16 %v7592_v42, %v7591_v10  ;;  %v19360_v51 = vld [vmem:[#allocation77_spill] sm:$0xff] }
 0x555   : > { %v16344_v58 = vrot.slane %v7592_v42, 7  ;;  %v8320_v37 = vsel %vm19356_vm4, %v8317_v32, %v8319_v18  ;;  %v8323_v11 = vrot.slane %v16218_v49, 2  ;;  %vm19357_vm0 = vcmask 1040384  }
 0x556   : > { %v7645_v38 = vpack.c.bf16 %v7590_v50, %v7589_v30  ;;  %v7766_v31 = vrot.slane %v7590_v50, 7  ;;  %v16350_v21 = vsel %vm19357_vm0, %v16236_v40, %v7764_v55  ;;  %vm19359_vm9 = vnez %v19358_v44  ;;  %vm19362_vm3 = vmmov %vm19357_vm0 }
 0x557   : > { %v8500_v3 = vsel %vm19359_vm9, %v8320_v37, 0.0  ;;  %vm19361_vm2 = vnez %v19360_v51  ;;  %v8051_v10 = vrot.slane %v16350_v21, 1  ;;  %v16360_v32 = vsel %vm19362_vm3, %v7768_v46, %v16344_v58  ;;  %vm19364_vm7 = vmmov %vm19357_vm0 }
 0x558   : > { %v8603_v29 = vsel %vm19361_vm2, %v16350_v21, 0.0  ;;  %v16362_v42 = vpack.c.bf16 %v8500_v3, %v8318_v53  ;;  %vm19363_vm5 = vcmask 523264   ;;  %v16366_v40 = vsel %vm19364_vm7, %v7764_v55, %v7766_v31  ;;  %vm19365_vm1 = vmmov %vm19357_vm0 }
 0x559   : > { %13012 = vmatprep.mubr.msk.bf16.mxu1 %vm19363_vm5, %v7645_v38  ;;  %v16369_v30 = vsel %vm19365_vm1, %v7766_v31, %v7768_v46  ;;  %v8322_v50 = vsel %vm19366_vm6, %v8319_v18, %v8321_v1  ;;  %vm19367_vm8 = vmmov %vm19363_vm5  ;;  %v8659_v37 = vpack.c.bf16 %v16366_v40, %v8603_v29  ;;  %vm19368_vm13 = vcmask 1046528   ;;  %v19369_v38 = vld [vmem:[#allocation79_spill] sm:$0xff]  ;;  %v19373_v29 = vld [vmem:[#allocation74_spill] sm:$0xff] }
 0x55a   : > { %13013 = vmatmul.mubr.msk.bf16.gmra.mrb[240].mxu1 %vm19367_vm8, %v7646_v35  ;;  %v8052_v53 = vsel %vm19368_vm13, %v8049_v22, %v8051_v10  ;;  %vm19370_vm4 = vnez %v19369_v38  ;;  %v8053_v44 = vrot.slane %v16366_v40, 1  ;;  %v8055_v18 = vrot.slane %v16369_v30, 1  ;;  %vm19371_vm0 = vmmov %vm19366_vm6 }
 0x55b   : > { %v8605_v55 = vsel %vm19370_vm4, %v16369_v30, 0.0  ;;  %v8279_v46 = vpack.c.bf16 %v8052_v53, %v16289_v9  ;;  %v8324_v35 = vsel %vm19371_vm0, %v8321_v1, %v8323_v11  ;;  %8827 = vrot.lane.b32.xlu0 %v8659_v37, %s13299_s25  ;;  %vm19372_vm9 = vmmov %vm19368_vm13  ;;  %vm19374_vm3 = vnez %v19373_v29 }
 0x55c   : > { %v8660_v31 = vpack.c.bf16 %v16360_v32, %v8605_v55  ;;  %v8054_v3 = vsel %vm19372_vm9, %v8051_v10, %v8053_v44  ;;  %v8502_v22 = vsel %vm19374_vm3, %v8324_v35, 0.0  ;;  %v7939_v61 = vsel %vm19361_vm2, %v16265_v59, 0.0  ;;  %vm19375_vm5 = vmmov %vm19372_vm9 }
 0x55d   : > { %v7933_v9 = vsel %vm14150_vm10, %v16203_v8, 0.0  ;;  %8731 = vrot.lane.b32.xlu1 %v8279_v46, %s13299_s25  ;;  %v8056_v53 = vsel %vm19375_vm5, %v8053_v44, %v8055_v18  ;;  %v19376_v1 = vrot.slane %v16360_v32, 1  ;;  %vm19377_vm7 = vmmov %vm19375_vm5  ;;  %v16403_v10 = vpack.c.bf16 %v8502_v22, %v8322_v50  ;;  %v12946_v46 = vpop.f32.mrb[180].mxu0 }
 0x55e   : > { %v16406_v55 = vpack.c.bf16 %v16254_v5, %v7939_v61  ;;  %v8280_v51 = vpack.c.bf16 %v8056_v53, %v8054_v3  ;;  %v16409_v35 = vpack.c.bf16 %v16214_v17, %v7933_v9  ;;  %v8325_v8 = vrot.slane %v16225_v25, 2  ;;  %v7398_v3 = vpop.f32.mrb[181].mxu0  ;;  %vm19378_vm10 = vmmov %vm19371_vm0 }
 0x55f   : > { %v16401_v37 = vsel %vm19377_vm7, %v8055_v18, %v19376_v1  ;;  %v8327_v56 = vrot.slane %v16249_v47, 2  ;;  %v7941_v44 = vsel %vm19370_vm4, %v16350_v21, 0.0  ;;  %v7935_v50 = vsel %vm14162_vm11, %v16218_v49, 0.0  ;;  %8829 = vrot.lane.b32.xlu0 %v8660_v31, %s13299_s25  ;;  %vm19379_vm2 = vmmov %vm19371_vm0  ;;  %v12947_v7 = vpop.f32.mrb[182].mxu0  ;;  %v19380_v49 = vld [vmem:[#allocation76_spill] sm:$0xff] }
 0x560   : > { %v8329_v61 = vrot.slane %v16258_v54, 2  ;;  %v8331_v18 = vrot.slane %v16265_v59, 2  ;;  %v7407_v17 = vadd.f32 %v12946_v46, %v16109_v2  ;;  %v8326_v29 = vsel %vm19378_vm10, %v8323_v11, %v8325_v8  ;;  %vm19382_vm1 = vmmov %vm19371_vm0 }
 0x561   : > { %v8328_v22 = vsel %vm19379_vm2, %v8325_v8, %v8327_v56  ;;  %v16426_v38 = vpack.c.bf16 %v16366_v40, %v7941_v44  ;;  %v7399_v9 = vadd.f32 %v16109_v2, %v7398_v3  ;;  %8733 = vrot.lane.b32.xlu1 %v8280_v51, %s13299_s25  ;;  %vm19381_vm11 = vnez %v19380_v49  ;;  %v7401_v8 = vpop.f32.mrb[183].mxu0  ;;  %vm19383_vm6 = vmmov %vm19371_vm0  ;;  %v19384_v51 = vld [vmem:[#allocation78_spill] sm:$0xff] }
 0x562   : > { %v8504_v59 = vsel %vm19381_vm11, %v8328_v22, 0.0  ;;  %v16433_v53 = vpack.c.bf16 %v16225_v25, %v7935_v50  ;;  %v8330_v31 = vsel %vm19382_vm1, %v8327_v56, %v8329_v61  ;;  %v7595_v1 = vmax.f32 %v7407_v17, 0.0  ;;  %v19386_v22 = vld [vmem:[#allocation81_spill] sm:$0xff]  ;;  %vm19390_vm9 = vmmov %vm19371_vm0 }
 0x563   : > { %v7410_v11 = vadd.f32 %v12947_v7, %v16109_v2  ;;  %v16437_v46 = vpack.c.bf16 %v8504_v59, %v8326_v29  ;;  %v8332_v44 = vsel %vm19383_vm6, %v8329_v61, %v8331_v18  ;;  %v7593_v3 = vmax.f32 %v7399_v9, 0.0 }
 0x564   : > { %v7402_v39 = vadd.f32 %v16109_v2, %v7401_v8  ;;  %vm19385_vm8 = vnez %v19384_v51  ;;  %vm19387_vm13 = vnez %v19386_v22  ;;  %v7776_v50 = vrot.slane %v7595_v1, 7 }
 0x565   : > { %v8506_v49 = vsel %vm19385_vm8, %v8332_v44, 0.0  ;;  %v7943_v25 = vsel %vm19387_vm13, %v16369_v30, 0.0  ;;  %v7596_v56 = vmax.f32 %v7410_v11, 0.0  ;;  %v7772_v29 = vrot.slane %v7593_v3, 7 }
 0x566   : > { %v16446_v17 = vpack.c.bf16 %v8506_v49, %v8330_v31  ;;  %v16449_v7 = vpack.c.bf16 %v16360_v32, %v7943_v25  ;;  %v7594_v59 = vmax.f32 %v7402_v39, 0.0  ;;  %v7937_v61 = vsel %vm14188_vm12, %v16249_v47, 0.0 }
 0x567   : > { %v8333_v9 = vrot.slane %v16254_v5, 2  ;;  %v7648_v8 = vpack.c.bf16 %v7596_v56, %v7595_v1  ;;  %v16455_v44 = vrot.slane %v7596_v56, 7  ;;  %v16458_v51 = vpack.c.bf16 %v16258_v54, %v7937_v61 }
 0x568   : > { %v8335_v31 = vrot.slane %v16350_v21, 2  ;;  %v7647_v11 = vpack.c.bf16 %v7594_v59, %v7593_v3  ;;  %v7774_v49 = vrot.slane %v7594_v59, 7  ;;  %vm19388_vm4 = vcmask 1040384   ;;  %v19394_v3 = vld [vmem:[#allocation80_spill] sm:$0xff] }
 0x569   : > { %v7773_v25 = vsel %vm19388_vm4, %v16344_v58, %v7772_v29  ;;  %v8334_v39 = vsel %vm19371_vm0, %v8331_v18, %v8333_v9  ;;  %vm19389_vm12 = vmmov %vm19388_vm4  ;;  %vm19391_vm3 = vcmask 523264   ;;  %vm19395_vm10 = vnez %v19394_v3 }
 0x56a   : > { %v8607_v47 = vsel %vm19387_vm13, %v7773_v25, 0.0  ;;  %v8059_v24 = vrot.slane %v7773_v25, 1  ;;  %v16468_v5 = vsel %vm19389_vm12, %v7776_v50, %v16455_v44  ;;  %v8336_v54 = vsel %vm19390_vm9, %v8333_v9, %v8335_v31  ;;  %13016 = vmatprep.mubr.msk.bf16.mxu1 %vm19391_vm3, %v7647_v11  ;;  %vm19392_vm5 = vmmov %vm19388_vm4 }
 0x56b   : > { %v7775_v21 = vsel %vm19392_vm5, %v7772_v29, %v7774_v49  ;;  %vm19393_vm7 = vmmov %vm19388_vm4  ;;  %v8508_v18 = vsel %vm19395_vm10, %v8336_v54, 0.0  ;;  %v19397_v56 = vrot.slane %v16360_v32, 1  ;;  %vm19398_vm11 = vcmask 1046528  }
 0x56c   : > { %v7777_v1 = vsel %vm19393_vm7, %v7774_v49, %v7776_v50  ;;  %vm19396_vm2 = vmmov %vm19391_vm3  ;;  %v8661_v22 = vpack.c.bf16 %v7775_v21, %v8607_v47  ;;  %v8061_v11 = vrot.slane %v7775_v21, 1  ;;  %v16485_v58 = vpack.c.bf16 %v8508_v18, %v8334_v39 }
 0x56d   : > { %13017 = vmatmul.mubr.msk.bf16.gmra.mrb[244].mxu1 %vm19396_vm2, %v7648_v8  ;;  %v8060_v59 = vsel %vm19398_vm11, %v19397_v56, %v8059_v24  ;;  %v8609_v9 = vsel %vm18904_vm15, %v7777_v1, 0.0  ;;  %v8063_v49 = vrot.slane %v7777_v1, 1  ;;  %vm19400_vm1 = vmmov %vm19398_vm11  ;;  %v7945_v47 = vsel %vm18904_vm15, %v7773_v25, 0.0 }
 0x56e   : > { %v8281_v29 = vpack.c.bf16 %v8060_v59, %v16401_v37  ;;  %v8662_v50 = vpack.c.bf16 %v16468_v5, %v8609_v9  ;;  %8831 = vrot.lane.b32.xlu0 %v8661_v22, %s13299_s25  ;;  %v8062_v8 = vsel %vm19400_vm1, %v8059_v24, %v8061_v11  ;;  %v8337_v54 = vrot.slane %v16366_v40, 2  ;;  %vm19401_vm6 = vmmov %vm19400_vm1  ;;  %v19404_v22 = vld [vmem:[#allocation85_spill] sm:$0xff]  ;;  %v12950_v9 = vpop.f32.mrb[184].mxu0 }
 0x56f   : > { %v8339_v3 = vrot.slane %v16369_v30, 2  ;;  %v8064_v37 = vsel %vm19401_vm6, %v8061_v11, %v8063_v49  ;;  %v19402_v56 = vrot.slane %v16468_v5, 1  ;;  %vm19403_vm8 = vmmov %vm19400_vm1  ;;  %v16500_v18 = vpack.c.bf16 %v7775_v21, %v7945_v47  ;;  %v19408_v11 = vld [vmem:[#allocation82_spill] sm:$0xff]  ;;  %v7414_v27 = vpop.f32.mrb[185].mxu0 }
 0x570   : > { %8735 = vrot.lane.b32.xlu1 %v8281_v29, %s13299_s25  ;;  %vm19405_vm13 = vnez %v19404_v22  ;;  %v8282_v59 = vpack.c.bf16 %v8064_v37, %v8062_v8  ;;  %vm19406_vm15 = vmmov %vm19371_vm0  ;;  %v8345_v47 = vrot.slane %v7775_v21, 2  ;;  %v7423_v23 = vadd.f32 %v12950_v9, %v16109_v2 }
 0x571   : > { %v16498_v39 = vsel %vm19403_vm8, %v8063_v49, %v19402_v56  ;;  %v7947_v24 = vsel %vm19405_vm13, %v7777_v1, 0.0  ;;  %v8338_v61 = vsel %vm19406_vm15, %v8335_v31, %v8337_v54  ;;  %vm19407_vm4 = vmmov %vm19371_vm0  ;;  %vm19409_vm0 = vnez %v19408_v11 }
 0x572   : > { %v8340_v40 = vsel %vm19407_vm4, %v8337_v54, %v8339_v3  ;;  %v16507_v30 = vpack.c.bf16 %v16468_v5, %v7947_v24  ;;  %v8341_v49 = vrot.slane %v16360_v32, 2  ;;  %v8343_v56 = vrot.slane %v7773_v25, 2  ;;  %8833 = vrot.lane.b32.xlu0 %v8662_v50, %s13299_s25  ;;  %v12951_v24 = vpop.f32.mrb[186].mxu0  ;;  %vm19410_vm12 = vmmov %vm19407_vm4 }
 0x573   : > { %v8510_v29 = vsel %vm19409_vm0, %v8340_v40, 0.0  ;;  %v8347_v31 = vrot.slane %v7777_v1, 2  ;;  %v8349_v54 = vrot.slane %v16468_v5, 2  ;;  %v7415_v37 = vadd.f32 %v16109_v2, %v7414_v27  ;;  %vm19411_vm9 = vmmov %vm19407_vm4  ;;  %v7417_v50 = vpop.f32.mrb[187].mxu0 }
 0x574   : > { %v16514_v8 = vpack.c.bf16 %v8510_v29, %v8338_v61  ;;  %8737 = vrot.lane.b32.xlu1 %v8282_v59, %s13299_s25  ;;  %v8342_v40 = vsel %vm19410_vm12, %v8339_v3, %v8341_v49  ;;  %v8344_v32 = vsel %vm19411_vm9, %v8341_v49, %v8343_v56  ;;  %vm19412_vm3 = vmmov %vm19407_vm4  ;;  %v7599_v21 = vmax.f32 %v7423_v23, 0.0  ;;  %v19413_v61 = vld [vmem:[#allocation84_spill] sm:$0xff]  ;;  %v19416_v59 = vld [vmem:[#allocation86_spill] sm:$0xff] }
 0x575   : > { %v8346_v25 = vsel %vm19412_vm3, %v8343_v56, %v8345_v47  ;;  %v7426_v9 = vadd.f32 %v12951_v24, %v16109_v2  ;;  %vm19414_vm5 = vnez %v19413_v61  ;;  %vm19415_vm7 = vmmov %vm19412_vm3  ;;  %v7597_v29 = vmax.f32 %v7415_v37, 0.0 }
 0x576   : > { %v8512_v1 = vsel %vm19414_vm5, %v8344_v32, 0.0  ;;  %v8348_v11 = vsel %vm19415_vm7, %v8345_v47, %v8347_v31  ;;  %v7418_v27 = vadd.f32 %v16109_v2, %v7417_v50  ;;  %vm19417_vm10 = vnez %v19416_v59  ;;  %vm19418_vm2 = vmmov %vm19412_vm3 }
 0x577   : > { %v16527_v16 = vpack.c.bf16 %v8512_v1, %v8342_v40  ;;  %v8514_v3 = vsel %vm19417_vm10, %v8348_v11, 0.0  ;;  %v7600_v49 = vmax.f32 %v7426_v9, 0.0  ;;  %v8350_v23 = vsel %vm19418_vm2, %v8347_v31, %v8349_v54  ;;  %vm19432_vm3 = vmmov %vm19418_vm2 }
 0x578   : > { %v16531_v45 = vpack.c.bf16 %v8514_v3, %v8346_v25  ;;  %v7780_v56 = vrot.slane %v7597_v29, 7  ;;  %v7598_v24 = vmax.f32 %v7418_v27, 0.0  ;;  %v7784_v12 = vrot.slane %v7599_v21, 7  ;;  %v19421_v25 = vld [vmem:[#allocation87_spill] sm:$0xff] }
 0x579   : > { %v7650_v61 = vpack.c.bf16 %v7600_v49, %v7599_v21  ;;  %v7786_v32 = vrot.slane %v7600_v49, 7  ;;  %vm19419_vm11 = vcmask 1040384   ;;  %vm19422_vm6 = vnez %v19421_v25 }
 0x57a   : > { %v7649_v34 = vpack.c.bf16 %v7598_v24, %v7597_v29  ;;  %v7782_v47 = vrot.slane %v7598_v24, 7  ;;  %v7781_v37 = vsel %vm19419_vm11, %v16455_v44, %v7780_v56  ;;  %vm19420_vm1 = vmmov %vm19419_vm11  ;;  %vm19423_vm8 = vcmask 523264  }
 0x57b   : > { %v8611_v40 = vsel %vm19405_vm13, %v7781_v37, 0.0  ;;  %v8067_v50 = vrot.slane %v7781_v37, 1  ;;  %v16539_v9 = vsel %vm19420_vm1, %v7784_v12, %v7786_v32  ;;  %v7949_v31 = vsel %vm19422_vm6, %v7781_v37, 0.0  ;;  %vm19424_vm15 = vmmov %vm19420_vm1 }
 0x57c   : > { %13020 = vmatprep.mubr.msk.bf16.mxu1 %vm19423_vm8, %v7649_v34  ;;  %v7783_v21 = vsel %vm19424_vm15, %v7780_v56, %v7782_v47  ;;  %vm19425_vm4 = vmmov %vm19420_vm1  ;;  %v8073_v11 = vrot.slane %v16539_v9, 1  ;;  %v8351_v29 = vrot.slane %v7781_v37, 2  ;;  %v19427_v22 = vrot.slane %v16468_v5, 1 }
 0x57d   : > { %v7785_v1 = vsel %vm19425_vm4, %v7782_v47, %v7784_v12  ;;  %vm19426_vm0 = vmmov %vm19423_vm8  ;;  %v8663_v44 = vpack.c.bf16 %v7783_v21, %v8611_v40  ;;  %vm19428_vm13 = vcmask 1046528   ;;  %v8069_v3 = vrot.slane %v7783_v21, 1 }
 0x57e   : > { %13021 = vmatmul.mubr.msk.bf16.gmra.mrb[248].mxu1 %vm19426_vm0, %v7650_v61  ;;  %v8068_v27 = vsel %vm19428_vm13, %v19427_v22, %v8067_v50  ;;  %v8613_v59 = vsel %vm19422_vm6, %v7785_v1, 0.0  ;;  %v8071_v56 = vrot.slane %v7785_v1, 1  ;;  %v16555_v12 = vpack.c.bf16 %v7783_v21, %v7949_v31  ;;  %vm19429_vm12 = vmmov %vm19428_vm13  ;;  %v19430_v61 = vld [vmem:[#allocation90_spill] sm:$0xff]  ;;  %v19435_v31 = vld [vmem:[#allocation88_spill] sm:$0xff] }
 0x57f   : > { %v8283_v34 = vpack.c.bf16 %v8068_v27, %v16498_v39  ;;  %v8664_v49 = vpack.c.bf16 %v16539_v9, %v8613_v59  ;;  %8835 = vrot.lane.b32.xlu0 %v8663_v44, %s13299_s25  ;;  %v8070_v24 = vsel %vm19429_vm12, %v8067_v50, %v8069_v3  ;;  %vm19431_vm9 = vnez %v19430_v61  ;;  %vm19433_vm5 = vmmov %vm19429_vm12 }
 0x580   : > { %v7951_v5 = vsel %vm19431_vm9, %v7785_v1, 0.0  ;;  %v8352_v47 = vsel %vm19432_vm3, %v8349_v54, %v8351_v29  ;;  %v8353_v37 = vrot.slane %v7783_v21, 2  ;;  %v8072_v40 = vsel %vm19433_vm5, %v8069_v3, %v8071_v56  ;;  %vm19434_vm7 = vmmov %vm19433_vm5  ;;  %v12954_v54 = vpop.f32.mrb[188].mxu0 }
 0x581   : > { %8739 = vrot.lane.b32.xlu1 %v8283_v34, %s13299_s25  ;;  %v8074_v39 = vsel %vm19434_vm7, %v8071_v56, %v8073_v11  ;;  %v16566_v25 = vpack.c.bf16 %v16539_v9, %v7951_v5  ;;  %vm19436_vm10 = vnez %v19435_v31  ;;  %v8284_v22 = vpack.c.bf16 %v8072_v40, %v8070_v24  ;;  %v7430_v3 = vpop.f32.mrb[189].mxu0  ;;  %vm19437_vm11 = vmmov %vm19418_vm2 }
 0x582   : > { %v8516_v44 = vsel %vm19436_vm10, %v8352_v47, 0.0  ;;  %v8354_v27 = vsel %vm19418_vm2, %v8351_v29, %v8353_v37  ;;  %v8355_v59 = vrot.slane %v7785_v1, 2  ;;  %v8357_v21 = vrot.slane %v16539_v9, 2  ;;  %v12955_v31 = vpop.f32.mrb[190].mxu0  ;;  %vm19440_vm6 = vmmov %vm19418_vm2 }
 0x583   : > { %v16570_v50 = vpack.c.bf16 %v8516_v44, %v8350_v23  ;;  %v7439_v34 = vadd.f32 %v12954_v54, %v16109_v2  ;;  %8837 = vrot.lane.b32.xlu0 %v8664_v49, %s13299_s25  ;;  %v7431_v5 = vadd.f32 %v16109_v2, %v7430_v3  ;;  %v19438_v23 = vld [vmem:[#allocation89_spill] sm:$0xff]  ;;  %v7442_v9 = vadd.f32 %v12955_v31, %v16109_v2  ;;  %v7433_v47 = vpop.f32.mrb[191].mxu0  ;;  %vm19441_vm8 = vmmov %vm19425_vm4 }
 0x584   : > { %v8356_v56 = vsel %vm19437_vm11, %v8353_v37, %v8355_v59  ;;  %vm19439_vm1 = vnez %v19438_v23  ;;  %v8358_v1 = vsel %vm19440_vm6, %v8355_v59, %v8357_v21  ;;  %v7434_v49 = vadd.f32 %v16109_v2, %v7433_v47  ;;  %vm19442_vm15 = vmmov %vm19425_vm4 }
 0x585   : > { %8741 = vrot.lane.b32.xlu1 %v8284_v22, %s13299_s25  ;;  %v8518_v24 = vsel %vm19439_vm1, %v8356_v56, 0.0  ;;  %v7603_v29 = vmax.f32 %v7439_v34, 0.0  ;;  %v7601_v44 = vmax.f32 %v7431_v5, 0.0  ;;  %v7604_v37 = vmax.f32 %v7442_v9, 0.0  ;;  %vm19443_vm4 = vmmov %vm19426_vm0 }
 0x586   : > { %v16583_v40 = vpack.c.bf16 %v8518_v24, %v8354_v27  ;;  %v7602_v3 = vmax.f32 %v7434_v49, 0.0  ;;  %vm19444_vm0 = vmmov %vm19441_vm8  ;;  %v19446_v24 = vld [vmem:[#allocation92_spill] sm:$0xff] }
 0x587   : > { %v7788_v54 = vrot.slane %v7601_v44, 7  ;;  %v7792_v60 = vrot.slane %v7603_v29, 7  ;;  %v7652_v48 = vpack.c.bf16 %v7604_v37, %v7603_v29  ;;  %v7794_v22 = vrot.slane %v7604_v37, 7  ;;  %vm19445_vm13 = vmmov %vm19444_vm0 }
 0x588   : > { %v7651_v52 = vpack.c.bf16 %v7602_v3, %v7601_v44  ;;  %v7790_v23 = vrot.slane %v7602_v3, 7  ;;  %vm19447_vm12 = vnez %v19446_v24  ;;  %vm19448_vm3 = vmmov %vm19443_vm4 }
 0x589   : > { %v7789_v56 = vsel %vm19441_vm8, %v7786_v32, %v7788_v54  ;;  %v7795_v27 = vsel %vm19442_vm15, %v7792_v60, %v7794_v22  ;;  %vm19450_vm7 = vmmov %vm19433_vm5 }
 0x58a   : > { %v8615_v59 = vsel %vm19431_vm9, %v7789_v56, 0.0  ;;  %v8075_v34 = vrot.slane %v7789_v56, 1  ;;  %13024 = vmatprep.mubr.msk.bf16.mxu1 %vm19443_vm4, %v7651_v52  ;;  %v7791_v5 = vsel %vm19444_vm0, %v7788_v54, %v7790_v23  ;;  %v7793_v31 = vsel %vm19445_vm13, %v7790_v23, %v7792_v60  ;;  %vm19449_vm9 = vmmov %vm19418_vm2 }
 0x58b   : > { %v7953_v29 = vsel %vm19447_vm12, %v7789_v56, 0.0  ;;  %v8359_v9 = vrot.slane %v7789_v56, 2  ;;  %13025 = vmatmul.mubr.msk.bf16.gmra.mrb[252].mxu1 %vm19448_vm3, %v7652_v48  ;;  %v8665_v47 = vpack.c.bf16 %v7791_v5, %v8615_v59  ;;  %v8363_v61 = vrot.slane %v7793_v31, 2  ;;  %vm19451_vm10 = vmmov %vm19433_vm5  ;;  %v19452_v56 = vld [vmem:[#allocation91_spill] sm:$0xff] }
 0x58c   : > { %v8076_v32 = vsel %vm19433_vm5, %v8073_v11, %v8075_v34  ;;  %v8617_v44 = vsel %vm19447_vm12, %v7793_v31, 0.0  ;;  %v8077_v52 = vrot.slane %v7791_v5, 1  ;;  %v8079_v3 = vrot.slane %v7793_v31, 1  ;;  %vm19454_vm11 = vmmov %vm19440_vm6 }
 0x58d   : > { %v8285_v49 = vpack.c.bf16 %v8076_v32, %v8074_v39  ;;  %v8666_v37 = vpack.c.bf16 %v7795_v27, %v8617_v44  ;;  %8839 = vrot.lane.b32.xlu0 %v8665_v47, %s13299_s25  ;;  %v16600_v60 = vpack.c.bf16 %v7791_v5, %v7953_v29  ;;  %v8360_v54 = vsel %vm19449_vm9, %v8357_v21, %v8359_v9  ;;  %vm19455_vm1 = vmmov %vm19440_vm6  ;;  %v12958_v29 = vpop.f32.mrb[192].mxu0  ;;  %v19456_v47 = vld [vmem:[#allocation93_spill] sm:$0xff] }
 0x58e   : > { %v8361_v23 = vrot.slane %v7791_v5, 2  ;;  %v8078_v48 = vsel %vm19450_vm7, %v8075_v34, %v8077_v52  ;;  %v8080_v11 = vsel %vm19451_vm10, %v8077_v52, %v8079_v3  ;;  %vm19453_vm2 = vnez %v19452_v56  ;;  %v7446_v32 = vpop.f32.mrb[193].mxu0  ;;  %vm19459_vm8 = vmmov %vm19444_vm0 }
 0x58f   : > { %8743 = vrot.lane.b32.xlu1 %v8285_v49, %s13299_s25  ;;  %v8520_v59 = vsel %vm19453_vm2, %v8360_v54, 0.0  ;;  %v8286_v39 = vpack.c.bf16 %v8080_v11, %v8078_v48  ;;  %vm19457_vm6 = vnez %v19456_v47  ;;  %v7455_v5 = vadd.f32 %v12958_v29, %v16109_v2  ;;  %v12959_v49 = vpop.f32.mrb[194].mxu0  ;;  %vm19460_vm15 = vmmov %vm19444_vm0  ;;  %v19461_v47 = vld [vmem:[#allocation94_spill] sm:$0xff] }
 0x590   : > { %v16608_v27 = vpack.c.bf16 %v8520_v59, %v8358_v1  ;;  %v8362_v31 = vsel %vm19454_vm11, %v8359_v9, %v8361_v23  ;;  %v8364_v24 = vsel %vm19455_vm1, %v8361_v23, %v8363_v61  ;;  %v7447_v44 = vadd.f32 %v16109_v2, %v7446_v32  ;;  %v7449_v61 = vpop.f32.mrb[195].mxu0  ;;  %vm19465_vm13 = vmmov %vm19459_vm8 }
 0x591   : > { %v8522_v21 = vsel %vm19457_vm6, %v8364_v24, 0.0  ;;  %8841 = vrot.lane.b32.xlu0 %v8666_v37, %s13299_s25  ;;  %v7607_v1 = vmax.f32 %v7455_v5, 0.0  ;;  %v7458_v9 = vadd.f32 %v12959_v49, %v16109_v2  ;;  %v7450_v3 = vadd.f32 %v16109_v2, %v7449_v61  ;;  %v19463_v5 = vld [vmem:[#allocation95_spill] sm:$0xff]  ;;  %vm19466_vm12 = vmmov %vm19448_vm3 }
 0x592   : > { %v16616_v34 = vpack.c.bf16 %v8522_v21, %v8362_v31  ;;  %v7605_v52 = vmax.f32 %v7447_v44, 0.0  ;;  %v19458_v11 = vmov 0.0|0.0   ;;  %vm19462_vm4 = vnez %v19461_v47  ;;  %vm19467_vm3 = vmmov %vm19459_vm8 }
 0x593   : > { %8745 = vrot.lane.b32.xlu1 %v8286_v39, %s13299_s25  ;;  %v7608_v54 = vmax.f32 %v7458_v9, 0.0  ;;  %v7606_v48 = vmax.f32 %v7450_v3, 0.0  ;;  %v7800_v37 = vrot.slane %v7607_v1, 7  ;;  %vm19464_vm0 = vnez %v19463_v5  ;;  %vm19468_vm5 = vmmov %vm19466_vm12 }
 0x594   : > { %v7796_v23 = vrot.slane %v7605_v52, 7  ;;  %vm19472_vm10 = vmmov %vm19450_vm7 }
 0x595   : > { %v7654_v56 = vpack.c.bf16 %v7608_v54, %v7607_v1  ;;  %v7802_v59 = vrot.slane %v7608_v54, 7  ;;  %v7653_v31 = vpack.c.bf16 %v7606_v48, %v7605_v52  ;;  %v7798_v24 = vrot.slane %v7606_v48, 7  ;;  %vm19473_vm2 = vmmov %vm19450_vm7 }
 0x596   : > { %v7797_v39 = vsel %vm19459_vm8, %v7794_v22, %v7796_v23  ;;  %vm19475_vm11 = vmmov %vm19455_vm1 }
 0x597   : > { %8747 = vrot.lane.b32.xlu1 %v19458_v11, %s13299_s25  ;;  %v16626_v29 = vsel %vm19460_vm15, %v7800_v37, %v7802_v59  ;;  %v8619_v21 = vsel %vm19462_vm4, %v7797_v39, 0.0  ;;  %v8083_v2 = vrot.slane %v7797_v39, 1  ;;  %v7957_v32 = vsel %vm19464_vm0, %v7797_v39, 0.0  ;;  %13028 = vmatprep.mubr.msk.bf16.mxu1 %vm19466_vm12, %v7653_v31  ;;  %v19470_v11 = vld [vmem:[#allocation96_spill] sm:$0xff]  ;;  %vm19476_vm6 = vmmov %vm19455_vm1 }
 0x598   : > { %v7801_v44 = vsel %vm19465_vm13, %v7798_v24, %v7800_v37  ;;  %v7799_v49 = vsel %vm19467_vm3, %v7796_v23, %v7798_v24  ;;  %v18503_v1 = vrot.slane %v16626_v29, 1  ;;  %v8367_v9 = vrot.slane %v7797_v39, 2  ;;  %13029 = vmatmul.mubr.msk.bf16.gmra.mrb[0].mxu1 %vm19468_vm5, %v7654_v56  ;;  %vm19480_vm15 = vmmov %vm19468_vm5 }
 0x599   : > { %v8085_v22 = vrot.slane %v7799_v49, 1  ;;  %v8667_v61 = vpack.c.bf16 %v7799_v49, %v8619_v21  ;;  %v8087_v52 = vrot.slane %v7801_v44, 1  ;;  %v8621_v3 = vsel %vm19464_vm0, %v7801_v44, 0.0  ;;  %vm19481_vm4 = vmmov %vm19467_vm3 }
 0x59a   : > { %v8668_v54 = vpack.c.bf16 %v16626_v29, %v8621_v3  ;;  %v16640_v48 = vpack.c.bf16 %v7799_v49, %v7957_v32  ;;  %vm19471_vm9 = vnez %v19470_v11  ;;  %v8369_v31 = vrot.slane %v7799_v49, 2  ;;  %v12962_v49 = vpop.f32.mrb[196].mxu0  ;;  %vm19482_vm0 = vmmov %vm19468_vm5 }
 0x59b   : > { %v7959_v37 = vsel %vm19471_vm9, %v7801_v44, 0.0  ;;  %8843 = vrot.lane.b32.xlu0 %v8667_v61, %s13299_s25  ;;  %v8086_v23 = vsel %vm19450_vm7, %v8083_v2, %v8085_v22  ;;  %v8088_v56 = vsel %vm19472_vm10, %v8085_v22, %v8087_v52  ;;  %v16650_v24 = vsel %vm19473_vm2, %v8087_v52, %v18503_v1  ;;  %v16667_v61 = vld [vmem:[%s18139_s4 + $0x1] ss:$0 sm:$0xff]  ;;  %v19477_v52 = vld [vmem:[#allocation100_spill] sm:$0xff]  ;;  %vm19483_vm13 = vmmov %vm19467_vm3 }
 0x59c   : > { %19469 = vst [vmem:[#allocation32_spill] sm:$0xff] %v16640_v48  ;;  %v16653_v39 = vpack.c.bf16 %v16626_v29, %v7959_v37  ;;  %v8288_v47 = vpack.c.bf16 %v8088_v56, %v8086_v23  ;;  %v8370_v21 = vsel %vm19475_vm11, %v8367_v9, %v8369_v31  ;;  %v8371_v5 = vrot.slane %v7801_v44, 2  ;;  %v7462_v44 = vpop.f32.mrb[197].mxu0  ;;  %vm19486_vm5 = vmmov %vm19467_vm3 }
 0x59d   : > { %v18502_v32 = vrot.slane %v16626_v29, 2  ;;  %v7471_v9 = vadd.f32 %v16667_v61, %v12962_v49  ;;  %vm19478_vm8 = vnez %v19477_v52  ;;  %v7463_v37 = vadd.f32 %v16667_v61, %v7462_v44  ;;  %vm19487_vm7 = vmmov %vm19482_vm0 }
 0x59e   : > { %19474 = vst [vmem:[#allocation33_spill] sm:$0xff] %v16653_v39  ;;  %8749 = vrot.lane.b32.xlu1 %v8288_v47, %s13299_s25  ;;  %v8372_v2 = vsel %vm19455_vm1, %v8369_v31, %v8371_v5  ;;  %v12963_v31 = vpop.f32.mrb[198].mxu0  ;;  %vm19488_vm10 = vmmov %vm19482_vm0  ;;  %v19489_v11 = vrot.slane %v16626_v29, 1 }
 0x59f   : > { %v16662_v22 = vsel %vm19476_vm6, %v8371_v5, %v18502_v32  ;;  %8845 = vrot.lane.b32.xlu0 %v8668_v54, %s13299_s25  ;;  %v8526_v3 = vsel %vm19478_vm8, %v8372_v2, 0.0  ;;  %v7611_v56 = vmax.f32 %v7471_v9, 0.0  ;;  %v7474_v47 = vadd.f32 %v16667_v61, %v12963_v31  ;;  %v7465_v5 = vpop.f32.mrb[199].mxu0  ;;  %v13243_v54 = vld [vmem:[%s18143_s8 + $0x20] sm:$0xff]   ;;  %v8716_v2 = vpop.permute.xlu1 %8715 }
 0x5a0   : > { %v16674_v23 = vpack.c.bf16 %v8526_v3, %v8370_v21  ;;  %v7609_v32 = vmax.f32 %v7463_v37, 0.0  ;;  %v7466_v1 = vadd.f32 %v16667_v61, %v7465_v5  ;;  %v8876_v21 = vsel %vm19480_vm15, 0.0|0.0, %v8716_v2  ;;  %13060 = vmatprep.subr.bf16.mxu1 %v13243_v54 }
 0x5a1   : > { %v7612_v26 = vmax.f32 %v7474_v47, 0.0  ;;  %v7808_v63 = vrot.slane %v7611_v56, 7  ;;  %v8812_v9 = vpop.permute.xlu0 %8811  ;;  %13061 = vmatpush3.bf16.msra.mxu1 %v13243_v54  ;;  %vm19499_vm15 = vcmask 1045504  }
 0x5a2   : > { %19479 = vst [vmem:[#allocation34_spill] sm:$0xff] %v16674_v23  ;;  %v7804_v49 = vrot.slane %v7609_v32, 7  ;;  %v7610_v52 = vmax.f32 %v7466_v1, 0.0  ;;  %v9004_v47 = vsel %vm19482_vm0, 0.0|0.0, %v8812_v9 }
 0x5a3   : > { %v7656_v44 = vpack.c.bf16 %v7612_v26, %v7611_v56  ;;  %v16681_v28 = vrot.slane %v7612_v26, 7  ;;  %9709 = vmatprep.mubr.bf16.mxu0 %v9004_v47  ;;  %v19484_v56 = vld [vmem:[#allocation99_spill] sm:$0xff] }
 0x5a4   : > { %v7805_v3 = vsel %vm19481_vm4, %v7802_v59, %v7804_v49  ;;  %v7655_v37 = vpack.c.bf16 %v7610_v52, %v7609_v32  ;;  %v7806_v31 = vrot.slane %v7610_v52, 7  ;;  %vm19485_vm12 = vnez %v19484_v56  ;;  %9710 = vmatmul.mubr.bf16.vlgmr.msra.gmra.mrb[224].mxu0 %v8876_v21 }
 0x5a5   : > { %v16688_v5 = vsel %vm19483_vm13, %v7808_v63, %v16681_v28  ;;  %v8623_v26 = vsel %vm19471_vm9, %v7805_v3, 0.0  ;;  %v8091_v1 = vrot.slane %v7805_v3, 1  ;;  %v7961_v2 = vsel %vm19485_vm12, %v7805_v3, 0.0  ;;  %v8814_v52 = vpop.permute.xlu0 %8813  ;;  %vm19490_vm9 = vmmov %vm19473_vm2 }
 0x5a6   : > { %v7807_v39 = vsel %vm19467_vm3, %v7804_v49, %v7806_v31  ;;  %v7809_v59 = vsel %vm19486_vm5, %v7806_v31, %v7808_v63  ;;  %13032 = vmatprep.mubr.msk.bf16.mxu1 %vm19487_vm7, %v7655_v37  ;;  %v18507_v32 = vrot.slane %v16688_v5, 1  ;;  %v8375_v54 = vrot.slane %v7805_v3, 2  ;;  %vm19491_vm2 = vmmov %vm19482_vm0 }
 0x5a7   : > { %13033 = vmatmul.mubr.msk.bf16.gmra.mrb[4].mxu1 %vm19488_vm10, %v7656_v44  ;;  %v8669_v9 = vpack.c.bf16 %v7807_v39, %v8623_v26  ;;  %v8092_v47 = vsel %vm19490_vm9, %v19489_v11, %v8091_v1  ;;  %v8625_v48 = vsel %vm19485_vm12, %v7809_v59, 0.0  ;;  %v8093_v49 = vrot.slane %v7807_v39, 1  ;;  %vm19492_vm11 = vmmov %vm19490_vm9  ;;  %v19494_v26 = vld [vmem:[#allocation102_spill] sm:$0xff]  ;;  %v8718_v11 = vpop.permute.xlu1 %8717 }
 0x5a8   : > { %v9008_v63 = vsel %vm19491_vm2, %v16284_v14, %v8814_v52  ;;  %v8289_v21 = vpack.c.bf16 %v8092_v47, %v16650_v24  ;;  %v8670_v37 = vpack.c.bf16 %v16688_v5, %v8625_v48  ;;  %v8095_v3 = vrot.slane %v7809_v59, 1  ;;  %vm19496_vm6 = vmmov %vm19490_vm9  ;;  %v19500_v47 = vld [vmem:[#allocation101_spill] sm:$0xff] }
 0x5a9   : > { %8847 = vrot.lane.b32.xlu0 %v8669_v9, %s13299_s25  ;;  %9717 = vmatprep.mubr.bf16.mxu0 %v9008_v63  ;;  %v8094_v44 = vsel %vm19492_vm11, %v8091_v1, %v8093_v49  ;;  %v16710_v31 = vpack.c.bf16 %v7807_v39, %v7961_v2  ;;  %vm19495_vm1 = vnez %v19494_v26  ;;  %vm19497_vm8 = vmmov %vm19496_vm6  ;;  %v19498_v1 = vrot.slane %v16626_v29, 2 }
 0x5aa   : > { %v7963_v56 = vsel %vm19495_vm1, %v7809_v59, 0.0  ;;  %8751 = vrot.lane.b32.xlu1 %v8289_v21, %s13299_s25  ;;  %v8096_v14 = vsel %vm19496_vm6, %v8093_v49, %v8095_v3  ;;  %v16719_v48 = vsel %vm19497_vm8, %v8095_v3, %v18507_v32  ;;  %v8816_v52 = vpop.permute.xlu0 %8815  ;;  %vm19501_vm4 = vnez %v19500_v47  ;;  %v12966_v49 = vpop.f32.mrb[200].mxu0  ;;  %vm19502_vm13 = vmmov %vm19499_vm15 }
 0x5ab   : > { %19493 = vst [vmem:[#allocation35_spill] sm:$0xff] %v16710_v31  ;;  %v16722_v24 = vpack.c.bf16 %v16688_v5, %v7963_v56  ;;  %v8376_v2 = vsel %vm19499_vm15, %v19498_v1, %v8375_v54  ;;  %v8290_v9 = vpack.c.bf16 %v8096_v14, %v8094_v44  ;;  %v8377_v21 = vrot.slane %v7807_v39, 2  ;;  %v7478_v32 = vpop.f32.mrb[201].mxu0  ;;  %vm19503_vm12 = vmmov %vm19502_vm13  ;;  %v19505_v1 = vld [vmem:[#allocation104_spill] sm:$0xff] }
 0x5ac   : > { %v8528_v63 = vsel %vm19501_vm4, %v8376_v2, 0.0  ;;  %v8379_v31 = vrot.slane %v7809_v59, 2  ;;  %v8381_v3 = vrot.slane %v16688_v5, 2  ;;  %v7487_v56 = vadd.f32 %v16667_v61, %v12966_v49  ;;  %v12967_v59 = vpop.f32.mrb[202].mxu0  ;;  %vm19504_vm3 = vmmov %vm19482_vm0 }
 0x5ad   : > { %v16730_v23 = vpack.c.bf16 %v8528_v63, %v16662_v22  ;;  %8849 = vrot.lane.b32.xlu0 %v8670_v37, %s13299_s25  ;;  %v8880_v29 = vsel %vm19482_vm0, %v16297_v19, %v8718_v11  ;;  %v8378_v44 = vsel %vm19502_vm13, %v8375_v54, %v8377_v21  ;;  %v7479_v39 = vadd.f32 %v16667_v61, %v7478_v32  ;;  %vm19507_vm7 = vmmov %vm19503_vm12  ;;  %v7481_v11 = vpop.f32.mrb[203].mxu0  ;;  %v8720_v63 = vpop.permute.xlu1 %8719 }
 0x5ae   : > { %v8380_v14 = vsel %vm19503_vm12, %v8377_v21, %v8379_v31  ;;  %8753 = vrot.lane.b32.xlu1 %v8290_v9, %s13299_s25  ;;  %9718 = vmatmul.mubr.bf16.gmra.mrb[228].mxu0 %v8880_v29  ;;  %v9012_v22 = vsel %vm19504_vm3, %v16328_v36, %v8816_v52  ;;  %vm19506_vm5 = vnez %v19505_v1  ;;  %v8382_v19 = vsel %vm19507_vm7, %v8379_v31, %v8381_v3  ;;  %v8818_v49 = vpop.permute.xlu0 %8817  ;;  %vm19509_vm9 = vmmov %vm19482_vm0 }
 0x5af   : > { %v8530_v2 = vsel %vm19506_vm5, %v8380_v14, 0.0  ;;  %v7615_v37 = vmax.f32 %v7487_v56, 0.0  ;;  %v7490_v54 = vadd.f32 %v16667_v61, %v12967_v59  ;;  %9725 = vmatprep.mubr.bf16.mxu0 %v9012_v22  ;;  %v7613_v47 = vmax.f32 %v7479_v39, 0.0  ;;  %vm19511_vm11 = vmmov %vm19482_vm0 }
 0x5b0   : > { %v16749_v32 = vpack.c.bf16 %v8530_v2, %v8378_v44  ;;  %v7482_v9 = vadd.f32 %v16667_v61, %v7481_v11  ;;  %vm19508_vm10 = vcmask 1040384   ;;  %v8884_v44 = vsel %vm19509_vm9, %v16308_v13, %v8720_v63  ;;  %vm19514_vm15 = vmmov %vm19482_vm0  ;;  %v19515_v11 = vld [vmem:[#allocation103_spill] sm:$0xff] }
 0x5b1   : > { %v7616_v21 = vmax.f32 %v7490_v54, 0.0  ;;  %v7812_v36 = vrot.slane %v7613_v47, 7  ;;  %v7816_v29 = vrot.slane %v7615_v37, 7  ;;  %vm19510_vm2 = vmmov %vm19508_vm10  ;;  %v9016_v22 = vsel %vm19511_vm11, %v16333_v62, %v8818_v49 }
 0x5b2   : > { %v7614_v52 = vmax.f32 %v7482_v9, 0.0  ;;  %vm19512_vm6 = vmmov %vm19510_vm2  ;;  %vm19516_vm4 = vnez %v19515_v11  ;;  %v19517_v26 = vrot.slane %v16688_v5, 1 }
 0x5b3   : > { %v7658_v14 = vpack.c.bf16 %v7616_v21, %v7615_v37  ;;  %v16752_v1 = vrot.slane %v7616_v21, 7  ;;  %v7813_v31 = vsel %vm19508_vm10, %v16681_v28, %v7812_v36  ;;  %vm19513_vm8 = vmmov %vm19510_vm2 }
 0x5b4   : > { %v7657_v56 = vpack.c.bf16 %v7614_v52, %v7613_v47  ;;  %v7814_v59 = vrot.slane %v7614_v52, 7  ;;  %v8627_v2 = vsel %vm19495_vm1, %v7813_v31, 0.0  ;;  %v8099_v37 = vrot.slane %v7813_v31, 1  ;;  %vm19524_vm10 = vmmov %vm19482_vm0 }
 0x5b5   : > { %v16760_v39 = vsel %vm19510_vm2, %v7816_v29, %v16752_v1  ;;  %v7965_v47 = vsel %vm19516_vm4, %v7813_v31, 0.0  ;;  %vm19518_vm1 = vcmask 1046528   ;;  %vm19527_vm2 = vmmov %vm19507_vm7 }
 0x5b6   : > { %v7815_v54 = vsel %vm19512_vm6, %v7812_v36, %v7814_v59  ;;  %v7817_v28 = vsel %vm19513_vm8, %v7814_v59, %v7816_v29  ;;  %13036 = vmatprep.mubr.msk.bf16.mxu1 %vm19514_vm15, %v7657_v56  ;;  %9726 = vmatmul.mubr.bf16.gmra.mrb[232].mxu0 %v8884_v44  ;;  %v18508_v13 = vrot.slane %v16760_v39, 1  ;;  %v8100_v9 = vsel %vm19518_vm1, %v19517_v26, %v8099_v37  ;;  %v8722_v29 = vpop.permute.xlu1 %8721  ;;  %vm19519_vm13 = vmmov %vm19518_vm1  ;;  %v19520_v59 = vld [vmem:[#allocation108_spill] sm:$0xff] }
 0x5b7   : > { %13037 = vmatmul.mubr.msk.bf16.gmra.mrb[8].mxu1 %vm19482_vm0, %v7658_v14  ;;  %9733 = vmatprep.mubr.bf16.mxu0 %v9016_v22  ;;  %v8671_v62 = vpack.c.bf16 %v7815_v54, %v8627_v2  ;;  %v8629_v63 = vsel %vm19516_vm4, %v7817_v28, 0.0  ;;  %v8101_v21 = vrot.slane %v7815_v54, 1  ;;  %v8291_v36 = vpack.c.bf16 %v8100_v9, %v16719_v48  ;;  %vm19522_vm3 = vmmov %vm19518_vm1 }
 0x5b8   : > { %v8672_v52 = vpack.c.bf16 %v16760_v39, %v8629_v63  ;;  %v8103_v49 = vrot.slane %v7817_v28, 1  ;;  %v16782_v56 = vpack.c.bf16 %v7815_v54, %v7965_v47  ;;  %vm19521_vm12 = vnez %v19520_v59  ;;  %vm19523_vm5 = vmmov %vm19518_vm1 }
 0x5b9   : > { %8851 = vrot.lane.b32.xlu0 %v8671_v62, %s13299_s25  ;;  %v8102_v14 = vsel %vm19519_vm13, %v8099_v37, %v8101_v21  ;;  %v7967_v44 = vsel %vm19521_vm12, %v7817_v28, 0.0  ;;  %v8383_v22 = vrot.slane %v7813_v31, 2  ;;  %8755 = vrot.lane.b32.xlu1 %v8291_v36, %s13299_s25  ;;  %v8820_v62 = vpop.permute.xlu0 %8819  ;;  %v8385_v26 = vrot.slane %v7815_v54, 2  ;;  %vm19528_vm11 = vmmov %vm19527_vm2 }
 0x5ba   : > { %v8104_v2 = vsel %vm19522_vm3, %v8101_v21, %v8103_v49  ;;  %v16791_v48 = vsel %vm19523_vm5, %v8103_v49, %v18508_v13  ;;  %v16794_v11 = vpack.c.bf16 %v16760_v39, %v7967_v44  ;;  %v8387_v31 = vrot.slane %v7817_v28, 2  ;;  %v12970_v9 = vpop.f32.mrb[204].mxu0  ;;  %v19525_v21 = vld [vmem:[#allocation129_spill] sm:$0xff]  ;;  %vm19529_vm6 = vmmov %vm19482_vm0 }
 0x5bb   : > { %v8292_v37 = vpack.c.bf16 %v8104_v2, %v8102_v14  ;;  %v8384_v47 = vsel %vm19507_vm7, %v8381_v3, %v8383_v22  ;;  %v8888_v63 = vsel %vm19524_vm10, %v16319_v0, %v8722_v29  ;;  %vm19526_vm9 = vnez %v19525_v21  ;;  %v7494_v13 = vpop.f32.mrb[205].mxu0  ;;  %v19530_v29 = vld [vmem:[#allocation109_spill] sm:$0xff]  ;;  %vm19532_vm15 = vmmov %vm19527_vm2 }
 0x5bc   : > { %v8532_v36 = vsel %vm19526_vm9, %v8384_v47, 0.0  ;;  %v8389_v49 = vrot.slane %v16760_v39, 2  ;;  %v7503_v44 = vadd.f32 %v16667_v61, %v12970_v9  ;;  %v8386_v5 = vsel %vm19527_vm2, %v8383_v22, %v8385_v26  ;;  %v12971_v28 = vpop.f32.mrb[206].mxu0  ;;  %vm19533_vm4 = vmmov %vm19482_vm0 }
 0x5bd   : > { %8853 = vrot.lane.b32.xlu0 %v8672_v52, %s13299_s25  ;;  %v16806_v14 = vpack.c.bf16 %v8532_v36, %v8382_v19  ;;  %v8388_v3 = vsel %vm19528_vm11, %v8385_v26, %v8387_v31  ;;  %v7495_v54 = vadd.f32 %v16667_v61, %v7494_v13  ;;  %8757 = vrot.lane.b32.xlu1 %v8292_v37, %s13299_s25  ;;  %v7497_v22 = vpop.f32.mrb[207].mxu0  ;;  %v8724_v13 = vpop.permute.xlu1 %8723  ;;  %vm19534_vm0 = vcmask 1040384   ;;  %vm19535_vm1 = vmmov %vm19533_vm4 }
 0x5be   : > { %9734 = vmatmul.mubr.bf16.gmra.mrb[236].mxu0 %v8888_v63  ;;  %v9020_v0 = vsel %vm19529_vm6, %v16362_v42, %v8820_v62  ;;  %vm19531_vm8 = vnez %v19530_v29  ;;  %v8390_v52 = vsel %vm19532_vm15, %v8387_v31, %v8389_v49  ;;  %v7619_v19 = vmax.f32 %v7503_v44, 0.0  ;;  %v8822_v63 = vpop.permute.xlu0 %8821  ;;  %v13244_v42 = vld [vmem:[%s18143_s8 + $0x28] sm:$0xff]   ;;  %vm19536_vm13 = vmmov %vm19534_vm0 }
 0x5bf   : > { %v8534_v2 = vsel %vm19531_vm8, %v8388_v3, 0.0  ;;  %v7506_v47 = vadd.f32 %v16667_v61, %v12971_v28  ;;  %9741 = vmatprep.mubr.bf16.mxu0 %v9020_v0  ;;  %v7617_v9 = vmax.f32 %v7495_v54, 0.0  ;;  %v7498_v37 = vadd.f32 %v16667_v61, %v7497_v22  ;;  %13062 = vmatprep.subr.bf16.mxu1 %v13244_v42  ;;  %v19537_v22 = vld [vmem:[#allocation111_spill] sm:$0xff]  ;;  %vm19539_vm5 = vmmov %vm19534_vm0 }
 0x5c0   : > { %v16818_v26 = vpack.c.bf16 %v8534_v2, %v8386_v5  ;;  %v7824_v31 = vrot.slane %v7619_v19, 7  ;;  %v8892_v5 = vsel %vm19533_vm4, %v16341_v4, %v8724_v13  ;;  %v9024_v29 = vsel %vm19535_vm1, %v16403_v10, %v8822_v63  ;;  %13063 = vmatpush3.bf16.msra.mxu1 %v13244_v42  ;;  %vm19540_vm7 = vmmov %vm19534_vm0 }
 0x5c1   : > { %v7620_v21 = vmax.f32 %v7506_v47, 0.0  ;;  %v7820_v62 = vrot.slane %v7617_v9, 7  ;;  %v7618_v36 = vmax.f32 %v7498_v37, 0.0  ;;  %vm19538_vm3 = vnez %v19537_v22  ;;  %vm19541_vm10 = vmmov %vm19535_vm1 }
 0x5c2   : > { %vm19542_vm9 = vmmov %vm19535_vm1  ;;  %v19543_v59 = vrot.slane %v16760_v39, 1 }
 0x5c3   : > { %v7660_v44 = vpack.c.bf16 %v7620_v21, %v7619_v19  ;;  %v16824_v3 = vrot.slane %v7620_v21, 7  ;;  %v7821_v54 = vsel %vm19534_vm0, %v16752_v1, %v7820_v62  ;;  %v7659_v28 = vpack.c.bf16 %v7618_v36, %v7617_v9  ;;  %vm19548_vm6 = vmmov %vm19532_vm15 }
 0x5c4   : > { %v7822_v0 = vrot.slane %v7618_v36, 7  ;;  %v8631_v19 = vsel %vm19521_vm12, %v7821_v54, 0.0  ;;  %v8107_v47 = vrot.slane %v7821_v54, 1  ;;  %v7969_v4 = vsel %vm19538_vm3, %v7821_v54, 0.0  ;;  %vm19553_vm0 = vmmov %vm19548_vm6 }
 0x5c5   : > { %v16834_v2 = vsel %vm19536_vm13, %v7824_v31, %v16824_v3  ;;  %13040 = vmatprep.mubr.msk.bf16.mxu1 %vm19541_vm10, %v7659_v28  ;;  %v8391_v9 = vrot.slane %v7821_v54, 2  ;;  %vm19544_vm12 = vcmask 1046528   ;;  %v19546_v54 = vld [vmem:[#allocation112_spill] sm:$0xff]  ;;  %vm19554_vm13 = vmmov %vm19553_vm0 }
 0x5c6   : > { %v7823_v13 = vsel %vm19539_vm5, %v7820_v62, %v7822_v0  ;;  %v7825_v1 = vsel %vm19540_vm7, %v7822_v0, %v7824_v31  ;;  %9742 = vmatmul.mubr.bf16.gmra.mrb[240].mxu0 %v8892_v5  ;;  %v18509_v10 = vrot.slane %v16834_v2, 1  ;;  %13041 = vmatmul.mubr.msk.bf16.gmra.mrb[12].mxu1 %vm19542_vm9, %v7660_v44  ;;  %v8108_v63 = vsel %vm19544_vm12, %v19543_v59, %v8107_v47  ;;  %vm19545_vm2 = vmmov %vm19544_vm12 }
 0x5c7   : > { %9749 = vmatprep.mubr.bf16.mxu0 %v9024_v29  ;;  %v8673_v37 = vpack.c.bf16 %v7823_v13, %v8631_v19  ;;  %v8633_v21 = vsel %vm19538_vm3, %v7825_v1, 0.0  ;;  %v8109_v42 = vrot.slane %v7823_v13, 1  ;;  %v8293_v62 = vpack.c.bf16 %v8108_v63, %v16791_v48  ;;  %v8726_v29 = vpop.permute.xlu1 %8725  ;;  %vm19549_vm8 = vmmov %vm19545_vm2 }
 0x5c8   : > { %v8674_v36 = vpack.c.bf16 %v16834_v2, %v8633_v21  ;;  %v8111_v31 = vrot.slane %v7825_v1, 1  ;;  %v16852_v5 = vpack.c.bf16 %v7823_v13, %v7969_v4  ;;  %vm19547_vm11 = vnez %v19546_v54  ;;  %vm19550_vm15 = vmmov %vm19545_vm2 }
 0x5c9   : > { %8855 = vrot.lane.b32.xlu0 %v8673_v37, %s13299_s25  ;;  %v8110_v44 = vsel %vm19545_vm2, %v8107_v47, %v8109_v42  ;;  %v7971_v39 = vsel %vm19547_vm11, %v7825_v1, 0.0  ;;  %v8392_v28 = vsel %vm19548_vm6, %v8389_v49, %v8391_v9  ;;  %v8393_v0 = vrot.slane %v7823_v13, 2  ;;  %8759 = vrot.lane.b32.xlu1 %v8293_v62, %s13299_s25  ;;  %v19551_v47 = vld [vmem:[#allocation134_spill] sm:$0xff]  ;;  %v8824_v37 = vpop.permute.xlu0 %8823  ;;  %vm19555_vm3 = vmmov %vm19535_vm1 }
 0x5ca   : > { %v8112_v48 = vsel %vm19549_vm8, %v8109_v42, %v8111_v31  ;;  %v16864_v19 = vsel %vm19550_vm15, %v8111_v31, %v18509_v10  ;;  %v16867_v22 = vpack.c.bf16 %v16834_v2, %v7971_v39  ;;  %vm19552_vm4 = vnez %v19551_v47  ;;  %v12974_v21 = vpop.f32.mrb[208].mxu0  ;;  %vm19558_vm7 = vmmov %vm19553_vm0 }
 0x5cb   : > { %v8536_v4 = vsel %vm19552_vm4, %v8392_v28, 0.0  ;;  %v8294_v59 = vpack.c.bf16 %v8112_v48, %v8110_v44  ;;  %v8394_v13 = vsel %vm19553_vm0, %v8391_v9, %v8393_v0  ;;  %v8395_v63 = vrot.slane %v7825_v1, 2  ;;  %v7510_v31 = vpop.f32.mrb[209].mxu0  ;;  %v19556_v9 = vld [vmem:[#allocation113_spill] sm:$0xff]  ;;  %vm19559_vm10 = vmmov %vm19535_vm1 }
 0x5cc   : > { %v16871_v49 = vpack.c.bf16 %v8536_v4, %v8390_v52  ;;  %v8397_v42 = vrot.slane %v16834_v2, 2  ;;  %v7519_v62 = vadd.f32 %v16667_v61, %v12974_v21  ;;  %v8896_v39 = vsel %vm19535_vm1, %v16409_v35, %v8726_v29  ;;  %v12975_v52 = vpop.f32.mrb[210].mxu0  ;;  %v8728_v29 = vpop.permute.xlu1 %8727  ;;  %vm19561_vm12 = vmmov %vm19535_vm1 }
 0x5cd   : > { %8857 = vrot.lane.b32.xlu0 %v8674_v36, %s13299_s25  ;;  %v8396_v28 = vsel %vm19554_vm13, %v8393_v0, %v8395_v63  ;;  %v7511_v44 = vadd.f32 %v16667_v61, %v7510_v31  ;;  %8761 = vrot.lane.b32.xlu1 %v8294_v59, %s13299_s25  ;;  %v9028_v1 = vsel %vm19555_vm3, %v16437_v46, %v8824_v37  ;;  %v7513_v35 = vpop.f32.mrb[211].mxu0  ;;  %v8826_v31 = vpop.permute.xlu0 %8825  ;;  %vm19560_vm9 = vcmask 1040384   ;;  %vm19567_vm4 = vmmov %vm19535_vm1 }
 0x5ce   : > { %9750 = vmatmul.mubr.bf16.gmra.mrb[244].mxu0 %v8896_v39  ;;  %vm19557_vm5 = vnez %v19556_v9  ;;  %v8398_v47 = vsel %vm19558_vm7, %v8395_v63, %v8397_v42  ;;  %v7623_v36 = vmax.f32 %v7519_v62, 0.0  ;;  %v7522_v4 = vadd.f32 %v16667_v61, %v12975_v52  ;;  %vm19562_vm2 = vmmov %vm19560_vm9 }
 0x5cf   : > { %v8538_v48 = vsel %vm19557_vm5, %v8396_v28, 0.0  ;;  %9757 = vmatprep.mubr.bf16.mxu0 %v9028_v1  ;;  %v7621_v21 = vmax.f32 %v7511_v44, 0.0  ;;  %v7514_v59 = vadd.f32 %v16667_v61, %v7513_v35  ;;  %v8900_v63 = vsel %vm19559_vm10, %v16433_v53, %v8728_v29  ;;  %vm19565_vm8 = vmmov %vm19562_vm2 }
 0x5d0   : > { %v16888_v0 = vpack.c.bf16 %v8538_v48, %v8394_v13  ;;  %v7624_v39 = vmax.f32 %v7522_v4, 0.0  ;;  %v7832_v37 = vrot.slane %v7623_v36, 7  ;;  %v9032_v44 = vsel %vm19561_vm12, %v16446_v17, %v8826_v31  ;;  %v19563_v4 = vld [vmem:[#allocation114_spill] sm:$0xff]  ;;  %vm19566_vm15 = vmmov %vm19562_vm2 }
 0x5d1   : > { %v7828_v10 = vrot.slane %v7621_v21, 7  ;;  %v7622_v46 = vmax.f32 %v7514_v59, 0.0  ;;  %vm19564_vm6 = vnez %v19563_v4  ;;  %vm19568_vm0 = vmmov %vm19535_vm1  ;;  %v19569_v54 = vrot.slane %v16834_v2, 1 }
 0x5d2   : > { %v7662_v9 = vpack.c.bf16 %v7624_v39, %v7623_v36  ;;  %v16891_v28 = vrot.slane %v7624_v39, 7  ;;  %vm19573_vm13 = vmmov %vm19558_vm7 }
 0x5d3   : > { %v7829_v62 = vsel %vm19560_vm9, %v16824_v3, %v7828_v10  ;;  %v7661_v13 = vpack.c.bf16 %v7622_v46, %v7621_v21  ;;  %v7830_v52 = vrot.slane %v7622_v46, 7  ;;  %vm19578_vm10 = vmmov %vm19573_vm13 }
 0x5d4   : > { %v16901_v1 = vsel %vm19562_vm2, %v7832_v37, %v16891_v28  ;;  %v8635_v48 = vsel %vm19547_vm11, %v7829_v62, 0.0  ;;  %v8115_v36 = vrot.slane %v7829_v62, 1  ;;  %v7973_v35 = vsel %vm19564_vm6, %v7829_v62, 0.0  ;;  %vm19579_vm9 = vmmov %vm19568_vm0 }
 0x5d5   : > { %v7831_v53 = vsel %vm19565_vm8, %v7828_v10, %v7830_v52  ;;  %v7833_v3 = vsel %vm19566_vm15, %v7830_v52, %v7832_v37  ;;  %13044 = vmatprep.mubr.msk.bf16.mxu1 %vm19567_vm4, %v7661_v13  ;;  %v8121_v17 = vrot.slane %v16901_v1, 1  ;;  %v8399_v29 = vrot.slane %v7829_v62, 2  ;;  %vm19580_vm12 = vmmov %vm19578_vm10 }
 0x5d6   : > { %9758 = vmatmul.mubr.bf16.gmra.mrb[248].mxu0 %v8900_v63  ;;  %13045 = vmatmul.mubr.msk.bf16.gmra.mrb[16].mxu1 %vm19568_vm0, %v7662_v9  ;;  %v8675_v21 = vpack.c.bf16 %v7831_v53, %v8635_v48  ;;  %vm19570_vm11 = vcmask 1046528   ;;  %v8637_v31 = vsel %vm19564_vm6, %v7833_v3, 0.0  ;;  %v8117_v10 = vrot.slane %v7831_v53, 1  ;;  %vm19581_vm2 = vmmov %vm19568_vm0 }
 0x5d7   : > { %9765 = vmatprep.mubr.bf16.mxu0 %v9032_v44  ;;  %v8116_v59 = vsel %vm19570_vm11, %v19569_v54, %v8115_v36  ;;  %v8676_v46 = vpack.c.bf16 %v16901_v1, %v8637_v31  ;;  %v8119_v37 = vrot.slane %v7833_v3, 1  ;;  %v16919_v63 = vpack.c.bf16 %v7831_v53, %v7973_v35  ;;  %vm19571_vm1 = vmmov %vm19570_vm11  ;;  %v8730_v44 = vpop.permute.xlu1 %8729 }
 0x5d8   : > { %v8295_v39 = vpack.c.bf16 %v8116_v59, %v16864_v19  ;;  %8859 = vrot.lane.b32.xlu0 %v8675_v21, %s13299_s25  ;;  %v8118_v9 = vsel %vm19571_vm1, %v8115_v36, %v8117_v10  ;;  %v7975_v2 = vsel %vm19069_vm14, %v7833_v3, 0.0  ;;  %v8400_v13 = vsel %vm19573_vm13, %v8397_v42, %v8399_v29  ;;  %vm19574_vm3 = vmmov %vm19571_vm1  ;;  %v19576_v36 = vld [vmem:[#allocation115_spill] sm:$0xff]  ;;  %v8828_v21 = vpop.permute.xlu0 %8827 }
 0x5d9   : > { %v8401_v52 = vrot.slane %v7831_v53, 2  ;;  %v8120_v19 = vsel %vm19574_vm3, %v8117_v10, %v8119_v37  ;;  %vm19575_vm5 = vmmov %vm19571_vm1  ;;  %v16934_v4 = vpack.c.bf16 %v16901_v1, %v7975_v2  ;;  %vm19577_vm7 = vnez %v19576_v36 }
 0x5da   : > { %8763 = vrot.lane.b32.xlu1 %v8295_v39, %s13299_s25  ;;  %v16931_v48 = vsel %vm19575_vm5, %v8119_v37, %v8121_v17  ;;  %v8540_v35 = vsel %vm19577_vm7, %v8400_v13, 0.0  ;;  %v8296_v54 = vpack.c.bf16 %v8120_v19, %v8118_v9  ;;  %v8403_v59 = vrot.slane %v7833_v3, 2  ;;  %v12978_v31 = vpop.f32.mrb[212].mxu0  ;;  %vm19584_vm8 = vmmov %vm19578_vm10 }
 0x5db   : > { %v16938_v42 = vpack.c.bf16 %v8540_v35, %v8398_v47  ;;  %v8402_v53 = vsel %vm19578_vm10, %v8399_v29, %v8401_v52  ;;  %v8405_v10 = vrot.slane %v16901_v1, 2  ;;  %v7535_v39 = vadd.f32 %v16667_v61, %v12978_v31  ;;  %v7526_v37 = vpop.f32.mrb[213].mxu0  ;;  %v19582_v29 = vld [vmem:[#allocation144_spill] sm:$0xff]  ;;  %vm19585_vm15 = vmmov %vm19568_vm0 }
 0x5dc   : > { %8861 = vrot.lane.b32.xlu0 %v8676_v46, %s13299_s25  ;;  %v8904_v2 = vsel %vm19579_vm9, %v16458_v51, %v8730_v44  ;;  %v8404_v13 = vsel %vm19580_vm12, %v8401_v52, %v8403_v59  ;;  %v7527_v9 = vadd.f32 %v16667_v61, %v7526_v37  ;;  %v12979_v47 = vpop.f32.mrb[214].mxu0  ;;  %v9036_v3 = vsel %vm19581_vm2, %v16485_v58, %v8828_v21  ;;  %v8732_v44 = vpop.permute.xlu1 %8731  ;;  %v13245_v58 = vld [vmem:[%s18143_s8 + $0x30] sm:$0xff]   ;;  %vm19592_vm5 = vmmov %vm19568_vm0 }
 0x5dd   : > { %vm19583_vm6 = vnez %v19582_v29  ;;  %v8406_v36 = vsel %vm19584_vm8, %v8403_v59, %v8405_v10  ;;  %v7627_v46 = vmax.f32 %v7535_v39, 0.0  ;;  %v7538_v35 = vadd.f32 %v16667_v61, %v12979_v47  ;;  %v7529_v51 = vpop.f32.mrb[215].mxu0  ;;  %v8830_v37 = vpop.permute.xlu0 %8829  ;;  %13064 = vmatprep.subr.bf16.mxu1 %v13245_v58  ;;  %vm19593_vm7 = vmmov %vm19568_vm0 }
 0x5de   : > { %8765 = vrot.lane.b32.xlu1 %v8296_v54, %s13299_s25  ;;  %9766 = vmatmul.mubr.bf16.gmra.mrb[252].mxu0 %v8904_v2  ;;  %v8542_v19 = vsel %vm19583_vm6, %v8404_v13, 0.0  ;;  %v7625_v31 = vmax.f32 %v7527_v9, 0.0  ;;  %v7530_v54 = vadd.f32 %v16667_v61, %v7529_v51  ;;  %v8908_v59 = vsel %vm19585_vm15, %v16406_v55, %v8732_v44  ;;  %v19588_v51 = vld [vmem:[#allocation118_spill] sm:$0xff]  ;;  %vm19597_vm12 = vmmov %vm19584_vm8 }
 0x5df   : > { %9773 = vmatprep.mubr.bf16.mxu0 %v9036_v3  ;;  %v16955_v52 = vpack.c.bf16 %v8542_v19, %v8402_v53  ;;  %v7628_v2 = vmax.f32 %v7538_v35, 0.0  ;;  %v7840_v39 = vrot.slane %v7627_v46, 7  ;;  %vm19586_vm4 = vcmask 1040384   ;;  %13065 = vmatpush3.bf16.msra.mxu1 %v13245_v58  ;;  %vm19602_vm15 = vmmov %vm19597_vm12 }
 0x5e0   : > { %v7836_v21 = vrot.slane %v7625_v31, 7  ;;  %v7626_v13 = vmax.f32 %v7530_v54, 0.0  ;;  %v9040_v19 = vsel %vm19568_vm0, %v16514_v8, %v8830_v37  ;;  %vm19587_vm11 = vmmov %vm19586_vm4  ;;  %vm19589_vm1 = vnez %v19588_v51 }
 0x5e1   : > { %v7664_v47 = vpack.c.bf16 %v7628_v2, %v7627_v46  ;;  %v16963_v3 = vrot.slane %v7628_v2, 7  ;;  %vm19590_vm13 = vmmov %vm19586_vm4  ;;  %vm19596_vm9 = vnez %v19090_v41  ;;  %v8832_v51 = vpop.permute.xlu0 %8831 }
 0x5e2   : > { %v7837_v53 = vsel %vm19586_vm4, %v16891_v28, %v7836_v21  ;;  %v7663_v9 = vpack.c.bf16 %v7626_v13, %v7625_v31  ;;  %v7838_v29 = vrot.slane %v7626_v13, 7  ;;  %vm19591_vm3 = vmmov %vm19586_vm4 }
 0x5e3   : > { %v16971_v35 = vsel %vm19587_vm11, %v7840_v39, %v16963_v3  ;;  %v8639_v55 = vsel %vm19069_vm14, %v7837_v53, 0.0  ;;  %v8123_v46 = vrot.slane %v7837_v53, 1  ;;  %v7977_v44 = vsel %vm19589_vm1, %v7837_v53, 0.0  ;;  %vm19603_vm4 = vmmov %vm19568_vm0 }
 0x5e4   : > { %v7839_v54 = vsel %vm19590_vm13, %v7836_v21, %v7838_v29  ;;  %v7841_v28 = vsel %vm19591_vm3, %v7838_v29, %v7840_v39  ;;  %13048 = vmatprep.mubr.msk.bf16.mxu1 %vm19592_vm5, %v7663_v9  ;;  %v8129_v8 = vrot.slane %v16971_v35, 1  ;;  %v8407_v31 = vrot.slane %v7837_v53, 2  ;;  %v8734_v9 = vpop.permute.xlu1 %8733  ;;  %vm19604_vm0 = vmmov %vm19597_vm12 }
 0x5e5   : > { %13049 = vmatmul.mubr.msk.bf16.gmra.mrb[20].mxu1 %vm19593_vm7, %v7664_v47  ;;  %v8677_v37 = vpack.c.bf16 %v7839_v54, %v8639_v55  ;;  %vm19594_vm14 = vcmask 1046528   ;;  %v8641_v2 = vsel %vm19589_vm1, %v7841_v28, 0.0  ;;  %v8125_v58 = vrot.slane %v7839_v54, 1  ;;  %v19600_v55 = vld [vmem:[#allocation119_spill] sm:$0xff]  ;;  %vm19605_vm11 = vmmov %vm19603_vm4 }
 0x5e6   : > { %9774 = vmatmul.mubr.bf16.gmra.mrb[0].mxu0 %v8908_v59  ;;  %v8124_v62 = vsel %vm19594_vm14, %v8121_v17, %v8123_v46  ;;  %v8678_v13 = vpack.c.bf16 %v16971_v35, %v8641_v2  ;;  %v8127_v59 = vrot.slane %v7841_v28, 1  ;;  %v16989_v39 = vpack.c.bf16 %v7839_v54, %v7977_v44  ;;  %vm19595_vm10 = vmmov %vm19594_vm14 }
 0x5e7   : > { %9781 = vmatprep.mubr.bf16.mxu0 %v9040_v19  ;;  %v8297_v21 = vpack.c.bf16 %v8124_v62, %v16931_v48  ;;  %8863 = vrot.lane.b32.xlu0 %v8677_v37, %s13299_s25  ;;  %v8126_v47 = vsel %vm19595_vm10, %v8123_v46, %v8125_v58  ;;  %v7979_v1 = vsel %vm19596_vm9, %v7841_v28, 0.0  ;;  %v8408_v17 = vsel %vm19597_vm12, %v8405_v10, %v8407_v31  ;;  %vm19598_vm2 = vmmov %vm19595_vm10 }
 0x5e8   : > { %v8409_v53 = vrot.slane %v7839_v54, 2  ;;  %v8128_v48 = vsel %vm19598_vm2, %v8125_v58, %v8127_v59  ;;  %vm19599_vm6 = vmmov %vm19598_vm2  ;;  %v17004_v19 = vpack.c.bf16 %v16971_v35, %v7979_v1  ;;  %vm19601_vm8 = vnez %v19600_v55  ;;  %v8736_v55 = vpop.permute.xlu1 %8735 }
 0x5e9   : > { %8767 = vrot.lane.b32.xlu1 %v8297_v21, %s13299_s25  ;;  %v17001_v29 = vsel %vm19599_vm6, %v8127_v59, %v8129_v8  ;;  %v8544_v46 = vsel %vm19601_vm8, %v8408_v17, 0.0  ;;  %v8298_v44 = vpack.c.bf16 %v8128_v48, %v8126_v47  ;;  %v8411_v37 = vrot.slane %v7841_v28, 2  ;;  %vm19608_vm13 = vmmov %vm19604_vm0 }
 0x5ea   : > { %v17008_v10 = vpack.c.bf16 %v8544_v46, %v8406_v36  ;;  %v8410_v54 = vsel %vm19602_vm15, %v8407_v31, %v8409_v53  ;;  %v12982_v62 = vpop.f32.mrb[216].mxu0  ;;  %v8413_v2 = vrot.slane %v16971_v35, 2  ;;  %v8912_v58 = vsel %vm19603_vm4, %v16426_v38, %v8734_v9  ;;  %v19606_v31 = vld [vmem:[#allocation150_spill] sm:$0xff]  ;;  %vm19609_vm3 = vmmov %vm19603_vm4 }
 0x5eb   : > { %v7551_v21 = vadd.f32 %v16667_v61, %v12982_v62  ;;  %v7542_v59 = vpop.f32.mrb[217].mxu0  ;;  %8865 = vrot.lane.b32.xlu0 %v8678_v13, %s13299_s25  ;;  %v8412_v1 = vsel %vm19604_vm0, %v8409_v53, %v8411_v37  ;;  %v9044_v28 = vsel %vm19605_vm11, %v16527_v16, %v8832_v51  ;;  %vm19607_vm1 = vnez %v19606_v31  ;;  %v8834_v62 = vpop.permute.xlu0 %8833  ;;  %vm19611_vm7 = vmmov %vm19609_vm3 }
 0x5ec   : > { %v7543_v47 = vadd.f32 %v16667_v61, %v7542_v59  ;;  %v12983_v36 = vpop.f32.mrb[218].mxu0  ;;  %v8546_v17 = vsel %vm19607_vm1, %v8412_v1, 0.0  ;;  %v8414_v38 = vsel %vm19608_vm13, %v8411_v37, %v8413_v2  ;;  %v8916_v51 = vsel %vm19609_vm3, %v16449_v7, %v8736_v55  ;;  %vm19616_vm6 = vmmov %vm19609_vm3 }
 0x5ed   : > { %8769 = vrot.lane.b32.xlu1 %v8298_v44, %s13299_s25  ;;  %v7631_v9 = vmax.f32 %v7551_v21, 0.0  ;;  %v7554_v48 = vadd.f32 %v16667_v61, %v12983_v36  ;;  %v7545_v13 = vpop.f32.mrb[219].mxu0  ;;  %v17025_v53 = vpack.c.bf16 %v8546_v17, %v8410_v54  ;;  %vm19610_vm5 = vcmask 1040384   ;;  %vm19617_vm8 = vmmov %vm19609_vm3 }
 0x5ee   : > { %9782 = vmatmul.mubr.bf16.gmra.mrb[4].mxu0 %v8912_v58  ;;  %v7629_v46 = vmax.f32 %v7543_v47, 0.0  ;;  %v7546_v44 = vadd.f32 %v16667_v61, %v7545_v13  ;;  %v9048_v47 = vsel %vm19611_vm7, %v16531_v45, %v8834_v62  ;;  %vm19612_vm14 = vmmov %vm19610_vm5  ;;  %vm19613_vm10 = vnez %v18785_v6  ;;  %v8738_v6 = vpop.permute.xlu1 %8737 }
 0x5ef   : > { %9789 = vmatprep.mubr.bf16.mxu0 %v9044_v28  ;;  %v7632_v58 = vmax.f32 %v7554_v48, 0.0  ;;  %v7848_v1 = vrot.slane %v7631_v9, 7  ;;  %vm19614_vm12 = vmmov %vm19610_vm5  ;;  %vm19620_vm4 = vnez %v18795_v33 }
 0x5f0   : > { %v7844_v59 = vrot.slane %v7629_v46, 7  ;;  %v7630_v16 = vmax.f32 %v7546_v44, 0.0  ;;  %vm19615_vm2 = vmmov %vm19610_vm5 }
 0x5f1   : > { %v7666_v37 = vpack.c.bf16 %v7632_v58, %v7631_v9  ;;  %v17030_v21 = vrot.slane %v7632_v58, 7  ;;  %vm19625_vm3 = vmmov %vm19604_vm0 }
 0x5f2   : > { %v7845_v36 = vsel %vm19610_vm5, %v16963_v3, %v7844_v59  ;;  %v7665_v54 = vpack.c.bf16 %v7630_v16, %v7629_v46  ;;  %v7846_v28 = vrot.slane %v7630_v16, 7  ;;  %vm19626_vm5 = vmmov %vm19616_vm6 }
 0x5f3   : > { %v17038_v31 = vsel %vm19612_vm14, %v7848_v1, %v17030_v21  ;;  %v8643_v17 = vsel %vm19596_vm9, %v7845_v36, 0.0  ;;  %v8131_v7 = vrot.slane %v7845_v36, 1  ;;  %v7981_v9 = vsel %vm19613_vm10, %v7845_v36, 0.0  ;;  %vm19627_vm7 = vmmov %vm19604_vm0 }
 0x5f4   : > { %v7847_v48 = vsel %vm19614_vm12, %v7844_v59, %v7846_v28  ;;  %v7849_v3 = vsel %vm19615_vm2, %v7846_v28, %v7848_v1  ;;  %13052 = vmatprep.mubr.msk.bf16.mxu1 %vm19616_vm6, %v7665_v54  ;;  %v8137_v45 = vrot.slane %v17038_v31, 1  ;;  %v8415_v13 = vrot.slane %v7845_v36, 2  ;;  %v19623_v54 = vld [vmem:[#allocation154_spill] sm:$0xff]  ;;  %vm19628_vm14 = vmmov %vm19626_vm5 }
 0x5f5   : > { %13053 = vmatmul.mubr.msk.bf16.gmra.mrb[24].mxu1 %vm19617_vm8, %v7666_v37  ;;  %v8679_v55 = vpack.c.bf16 %v7847_v48, %v8643_v17  ;;  %vm19618_vm9 = vcmask 1046528   ;;  %v8645_v46 = vsel %vm19613_vm10, %v7849_v3, 0.0  ;;  %v8133_v44 = vrot.slane %v7847_v48, 1  ;;  %vm19630_vm12 = vmmov %vm19604_vm0 }
 0x5f6   : > { %9790 = vmatmul.mubr.bf16.gmra.mrb[8].mxu0 %v8916_v51  ;;  %v8132_v41 = vsel %vm19618_vm9, %v8129_v8, %v8131_v7  ;;  %v8680_v58 = vpack.c.bf16 %v17038_v31, %v8645_v46  ;;  %v8135_v59 = vrot.slane %v7849_v3, 1  ;;  %v17056_v16 = vpack.c.bf16 %v7847_v48, %v7981_v9  ;;  %vm19619_vm15 = vmmov %vm19618_vm9 }
 0x5f7   : > { %9797 = vmatprep.mubr.bf16.mxu0 %v9048_v47  ;;  %v8299_v62 = vpack.c.bf16 %v8132_v41, %v17001_v29  ;;  %8867 = vrot.lane.b32.xlu0 %v8679_v55, %s13299_s25  ;;  %v8134_v51 = vsel %vm19619_vm15, %v8131_v7, %v8133_v44  ;;  %v7983_v35 = vsel %vm19620_vm4, %v7849_v3, 0.0  ;;  %v8416_v8 = vsel %vm19604_vm0, %v8413_v2, %v8415_v13  ;;  %vm19621_vm11 = vmmov %vm19618_vm9  ;;  %v8836_v47 = vpop.permute.xlu0 %8835 }
 0x5f8   : > { %v8417_v1 = vrot.slane %v7847_v48, 2  ;;  %v8136_v29 = vsel %vm19621_vm11, %v8133_v44, %v8135_v59  ;;  %vm19622_vm1 = vmmov %vm19618_vm9  ;;  %v17071_v36 = vpack.c.bf16 %v17038_v31, %v7983_v35  ;;  %vm19624_vm13 = vnez %v19623_v54 }
 0x5f9   : > { %8771 = vrot.lane.b32.xlu1 %v8299_v62, %s13299_s25  ;;  %v17068_v37 = vsel %vm19622_vm1, %v8135_v59, %v8137_v45  ;;  %v8548_v28 = vsel %vm19624_vm13, %v8416_v8, 0.0  ;;  %v8300_v17 = vpack.c.bf16 %v8136_v29, %v8134_v51  ;;  %v8419_v9 = vrot.slane %v7849_v3, 2  ;;  %v8740_v29 = vpop.permute.xlu1 %8739  ;;  %vm19631_vm2 = vmmov %vm19626_vm5 }
 0x5fa   : > { %v17075_v2 = vpack.c.bf16 %v8548_v28, %v8414_v38  ;;  %v8418_v7 = vsel %vm19625_vm3, %v8415_v13, %v8417_v1  ;;  %v12986_v48 = vpop.f32.mrb[220].mxu0  ;;  %v8421_v55 = vrot.slane %v17038_v31, 2  ;;  %v8920_v41 = vsel %vm19626_vm5, %v16500_v18, %v8738_v6  ;;  %vm19633_vm8 = vmmov %vm19631_vm2 }
 0x5fb   : > { %v7567_v46 = vadd.f32 %v16667_v61, %v12986_v48  ;;  %8869 = vrot.lane.b32.xlu0 %v8680_v58, %s13299_s25  ;;  %v7558_v44 = vpop.f32.mrb[221].mxu0  ;;  %v8420_v62 = vsel %vm19627_vm7, %v8417_v1, %v8419_v9  ;;  %v9052_v3 = vsel %vm19628_vm14, %v16570_v50, %v8836_v47  ;;  %vm19629_vm10 = vnez %v19088_v20  ;;  %v8838_v28 = vpop.permute.xlu0 %8837  ;;  %vm19637_vm11 = vmmov %vm19631_vm2 }
 0x5fc   : > { %v7559_v59 = vadd.f32 %v16667_v61, %v7558_v44  ;;  %v12987_v38 = vpop.f32.mrb[222].mxu0  ;;  %v8550_v13 = vsel %vm19629_vm10, %v8420_v62, 0.0  ;;  %v8422_v18 = vsel %vm19630_vm12, %v8419_v9, %v8421_v55  ;;  %vm19632_vm6 = vcmask 1040384   ;;  %vm19639_vm13 = vmmov %vm19631_vm2 }
 0x5fd   : > { %8773 = vrot.lane.b32.xlu1 %v8300_v17, %s13299_s25  ;;  %v7635_v51 = vmax.f32 %v7567_v46, 0.0  ;;  %v7570_v58 = vadd.f32 %v16667_v61, %v12987_v38  ;;  %v7561_v35 = vpop.f32.mrb[223].mxu0  ;;  %v17092_v8 = vpack.c.bf16 %v8550_v13, %v8418_v7  ;;  %v8924_v46 = vsel %vm19631_vm2, %v16507_v30, %v8740_v29  ;;  %vm19634_vm9 = vmmov %vm19632_vm6 }
 0x5fe   : > { %9798 = vmatmul.mubr.bf16.gmra.mrb[12].mxu0 %v8920_v41  ;;  %v7633_v1 = vmax.f32 %v7559_v59, 0.0  ;;  %v7562_v6 = vadd.f32 %v16667_v61, %v7561_v35  ;;  %v9056_v38 = vsel %vm19633_vm8, %v16583_v40, %v8838_v28  ;;  %vm19635_vm15 = vmmov %vm19632_vm6  ;;  %vm19638_vm1 = vnez %v18820_v43 }
 0x5ff   : > { %9805 = vmatprep.mubr.bf16.mxu0 %v9052_v3  ;;  %v7636_v54 = vmax.f32 %v7570_v58, 0.0  ;;  %v7856_v20 = vrot.slane %v7635_v51, 7  ;;  %vm19636_vm0 = vmmov %vm19632_vm6  ;;  %vm19643_vm14 = vnez %v19097_v57  ;;  %vm19646_vm2 = vnez %v19103_v15 }
 0x600   : > { %v7852_v17 = vrot.slane %v7633_v1, 7  ;;  %v7634_v50 = vmax.f32 %v7562_v6, 0.0  ;;  %v17095_v47 = vpop.f32.mrb[224].mxu1  ;;  %vm19644_vm10 = vmmov %vm19625_vm3 }
 0x601   : > { %v7668_v48 = vpack.c.bf16 %v7636_v54, %v7635_v51  ;;  %v7858_v9 = vrot.slane %v7636_v54, 7  ;;  %v17097_v41 = vpop.f32.mrb[225].mxu1  ;;  %vm19645_vm12 = vmmov %vm19625_vm3 }
 0x602   : > { %v7853_v7 = vsel %vm19632_vm6, %v17030_v21, %v7852_v17  ;;  %v7667_v44 = vpack.c.bf16 %v7634_v50, %v7633_v1  ;;  %v7854_v61 = vrot.slane %v7634_v50, 7  ;;  %v17103_v62 = vpop.f32.mrb[226].mxu1  ;;  %vm19647_vm6 = vmmov %vm19633_vm8 }
 0x603   : > { %v17105_v59 = vpop.f32.mrb[227].mxu1  ;;  %v8647_v3 = vsel %vm19620_vm4, %v7853_v7, 0.0  ;;  %v8139_v13 = vrot.slane %v7853_v7, 1  ;;  %v7859_v51 = vsel %vm19634_vm9, %v7856_v20, %v7858_v9  ;;  %v7985_v21 = vsel %vm19638_vm1, %v7853_v7, 0.0  ;;  %v8742_v9 = vpop.permute.xlu1 %8741  ;;  %vm19648_vm8 = vmmov %vm19647_vm6 }
 0x604   : > { %v7855_v30 = vsel %vm19635_vm15, %v7852_v17, %v7854_v61  ;;  %v7857_v58 = vsel %vm19636_vm0, %v7854_v61, %v7856_v20  ;;  %13056 = vmatprep.mubr.msk.bf16.mxu1 %vm19637_vm11, %v7667_v44  ;;  %v8423_v35 = vrot.slane %v7853_v7, 2  ;;  %vm19640_vm4 = vcmask 1046528   ;;  %v8840_v7 = vpop.permute.xlu0 %8839  ;;  %vm19649_vm9 = vmmov %vm19647_vm6 }
 0x605   : > { %v8143_v1 = vrot.slane %v7857_v58, 1  ;;  %13057 = vmatmul.mubr.msk.bf16.gmra.mrb[28].mxu1 %vm19639_vm13, %v7668_v48  ;;  %v8681_v33 = vpack.c.bf16 %v7855_v30, %v8647_v3  ;;  %v8140_v40 = vsel %vm19640_vm4, %v8137_v45, %v8139_v13  ;;  %v8649_v6 = vsel %vm19638_vm1, %v7857_v58, 0.0  ;;  %vm19641_vm5 = vmmov %vm19640_vm4  ;;  %v13246_v45 = vld [vmem:[%s18143_s8 + $0x38] sm:$0xff]  }
 0x606   : > { %9806 = vmatmul.mubr.bf16.gmra.mrb[16].mxu0 %v8924_v46  ;;  %v8301_v29 = vpack.c.bf16 %v8140_v40, %v17068_v37  ;;  %v8682_v54 = vpack.c.bf16 %v7859_v51, %v8649_v6  ;;  %v8141_v28 = vrot.slane %v7855_v30, 1  ;;  %v17124_v17 = vpack.c.bf16 %v7855_v30, %v7985_v21  ;;  %vm19642_vm7 = vmmov %vm19640_vm4  ;;  %13066 = vmatprep.subr.bf16.mxu1 %v13246_v45 }
 0x607   : > { %9813 = vmatprep.mubr.bf16.mxu0 %v9056_v38  ;;  %8871 = vrot.lane.b32.xlu0 %v8681_v33, %s13299_s25  ;;  %v8424_v50 = vsel %vm19625_vm3, %v8421_v55, %v8423_v35  ;;  %v8425_v20 = vrot.slane %v7855_v30, 2  ;;  %v8427_v48 = vrot.slane %v7857_v58, 2  ;;  %v8928_v57 = vsel %vm19647_vm6, %v16555_v12, %v8742_v9  ;;  %v8744_v21 = vpop.permute.xlu1 %8743  ;;  %vm19650_vm15 = vmmov %vm19647_vm6 }
 0x608   : > { %8775 = vrot.lane.b32.xlu1 %v8301_v29, %s13299_s25  ;;  %v8142_v43 = vsel %vm19641_vm5, %v8139_v13, %v8141_v28  ;;  %v8144_v31 = vsel %vm19642_vm7, %v8141_v28, %v8143_v1  ;;  %v8552_v37 = vsel %vm19643_vm14, %v8424_v50, 0.0  ;;  %13067 = vmatpush3.bf16.msra.mxu1 %v13246_v45  ;;  %v9060_v58 = vsel %vm19648_vm8, %v16608_v27, %v8840_v7  ;;  %vm19651_vm0 = vmmov %vm19647_vm6 }
 0x609   : > { %v17128_v46 = vpop.f32.mrb[228].mxu1  ;;  %v8302_v44 = vpack.c.bf16 %v8144_v31, %v8142_v43  ;;  %v17140_v61 = vpack.c.bf16 %v8552_v37, %v8422_v18  ;;  %v8426_v38 = vsel %vm19644_vm10, %v8423_v35, %v8425_v20  ;;  %v8428_v3 = vsel %vm19645_vm12, %v8425_v20, %v8427_v48  ;;  %v8842_v35 = vpop.permute.xlu0 %8841  ;;  %vm19652_vm11 = vmmov %vm19651_vm0  ;;  %v19654_v31 = vld [vmem:[#allocation34_spill] sm:$0xff] }
 0x60a   : > { %v17138_v55 = vpop.f32.mrb[229].mxu1  ;;  %v8554_v51 = vsel %vm19646_vm2, %v8428_v3, 0.0  ;;  %v8932_v33 = vsel %vm19649_vm9, %v16566_v25, %v8744_v21  ;;  %v9064_v6 = vsel %vm19650_vm15, %v16616_v34, %v8842_v35  ;;  %vm19653_vm1 = vmmov %vm19651_vm0  ;;  %v19656_v3 = vld [vmem:[#allocation32_spill] sm:$0xff] }
 0x60b   : > { %v17144_v13 = vpop.f32.mrb[230].mxu1  ;;  %8873 = vrot.lane.b32.xlu0 %v8682_v54, %s13299_s25  ;;  %v17153_v18 = vpack.c.bf16 %v8554_v51, %v8426_v38  ;;  %v8746_v27 = vpop.permute.xlu1 %8745  ;;  %vm19655_vm13 = vmmov %vm19651_vm0 }
 0x60c   : > { %v17150_v30 = vpop.f32.mrb[231].mxu1  ;;  %8777 = vrot.lane.b32.xlu1 %v8302_v44, %s13299_s25  ;;  %v8936_v20 = vsel %vm19651_vm0, %v16600_v60, %v8746_v27  ;;  %vm19657_vm4 = vmmov %vm19651_vm0 }
 0x60d   : > { %v8844_v54 = vpop.permute.xlu0 %8843  ;;  %vm19658_vm3 = vmmov %vm19651_vm0 }
 0x60e   : > { %9814 = vmatmul.mubr.bf16.gmra.mrb[20].mxu0 %v8928_v57  ;;  %v9068_v25 = vsel %vm19652_vm11, 0.0|0.0, %v8844_v54  ;;  %vm19660_vm5 = vmmov %vm19651_vm0 }
 0x60f   : > { %9821 = vmatprep.mubr.bf16.mxu0 %v9060_v58  ;;  %v8748_v9 = vpop.permute.xlu1 %8747  ;;  %vm19661_vm7 = vmmov %vm19651_vm0 }
 0x610   : > { %v8940_v34 = vsel %vm19653_vm1, 0.0|0.0, %v8748_v9  ;;  %vm19663_vm14 = vmmov %vm19651_vm0 }
 0x611   : > { %v8846_v43 = vpop.permute.xlu0 %8845  ;;  %vm19664_vm10 = vmmov %vm19651_vm0 }
 0x612   : > { %v17158_v15 = vpop.f32.mrb[232].mxu1  ;;  %v9072_v45 = vsel %vm19655_vm13, %v19654_v31, %v8846_v43  ;;  %vm19665_vm12 = vmmov %vm19651_vm0 }
 0x613   : > { %v17160_v1 = vpop.f32.mrb[233].mxu1  ;;  %v8750_v37 = vpop.permute.xlu1 %8749  ;;  %vm19666_vm2 = vmmov %vm19651_vm0 }
 0x614   : > { %v17162_v12 = vpop.f32.mrb[234].mxu1  ;;  %v8944_v51 = vsel %vm19657_vm4, %v19656_v3, %v8750_v37  ;;  %vm19667_vm6 = vmmov %vm19651_vm0 }
 0x615   : > { %v17166_v40 = vpop.f32.mrb[235].mxu1  ;;  %vm19668_vm8 = vmmov %vm19651_vm0 }
 0x616   : > { %9822 = vmatmul.mubr.bf16.gmra.mrb[24].mxu0 %v8932_v33  ;;  %v19659_v33 = vld [vmem:[#allocation33_spill] sm:$0xff]  ;;  %vm19669_vm9 = vmmov %vm19651_vm0 }
 0x617   : > { %9829 = vmatprep.mubr.bf16.mxu0 %v9064_v6  ;;  %vm19670_vm15 = vmmov %vm19651_vm0 }
 0x618   : > { %vm19671_vm11 = vmmov %vm19651_vm0 }
 0x619   : > { %vm19672_vm1 = vmmov %vm19651_vm0 }
 0x61a   : > { %vm19673_vm13 = vmmov %vm19651_vm0 }
 0x61b   : > { %v17170_v29 = vpop.f32.mrb[236].mxu1  ;;  %v8848_v44 = vpop.permute.xlu0 %8847  ;;  %vm19674_vm4 = vmmov %vm19651_vm0 }
 0x61c   : > { %v17172_v28 = vpop.f32.mrb[237].mxu1  ;;  %v9076_v58 = vsel %vm19658_vm3, %v16730_v23, %v8848_v44  ;;  %v8752_v21 = vpop.permute.xlu1 %8751  ;;  %v19662_v23 = vld [vmem:[#allocation35_spill] sm:$0xff]  ;;  %vm19675_vm3 = vmmov %vm19651_vm0 }
 0x61d   : > { %v17174_v50 = vpop.f32.mrb[238].mxu1  ;;  %v8948_v6 = vsel %vm19660_vm5, %v19659_v33, %v8752_v21  ;;  %vm19676_vm5 = vmmov %vm19651_vm0 }
 0x61e   : > { %v17178_v48 = vpop.f32.mrb[239].mxu1  ;;  %9830 = vmatmul.mubr.bf16.gmra.mrb[28].mxu0 %v8936_v20 }
 0x61f   : > { %9837 = vmatprep.mubr.bf16.mxu0 %v9068_v25  ;;  %v8850_v35 = vpop.permute.xlu0 %8849 }
 0x620   : > { %v9080_v27 = vsel %vm19661_vm7, %v16749_v32, %v8850_v35  ;;  %v8754_v54 = vpop.permute.xlu1 %8753  ;;  %vm19677_vm7 = vmmov %vm19651_vm0 }
 0x621   : > { %v8952_v43 = vsel %vm19663_vm14, %v19662_v23, %v8754_v54  ;;  %vm19678_vm14 = vmmov %vm19651_vm0 }
 0x626   : > { %9838 = vmatmul.mubr.bf16.gmra.mrb[32].mxu0 %v8940_v34 }
 0x627   : > { %9845 = vmatprep.mubr.bf16.mxu0 %v9072_v45 }
 0x62b   : > { %v8852_v25 = vpop.permute.xlu0 %8851  ;;  %v8756_v32 = vpop.permute.xlu1 %8755 }
 0x62c   : > { %v9084_v45 = vsel %vm19664_vm10, %v16806_v14, %v8852_v25  ;;  %v8956_v44 = vsel %vm19665_vm12, %v16722_v24, %v8756_v32  ;;  %vm19679_vm10 = vmmov %vm19651_vm0 }
 0x62d   : > { %v17184_v7 = vpop.f32.mrb[240].mxu1  ;;  %vm19680_vm12 = vmmov %vm19651_vm0 }
 0x62e   : > { %v17186_v60 = vpop.f32.mrb[241].mxu1  ;;  %9846 = vmatmul.mubr.bf16.gmra.mrb[36].mxu0 %v8944_v51 }
 0x62f   : > { %v17188_v38 = vpop.f32.mrb[242].mxu1  ;;  %9853 = vmatprep.mubr.bf16.mxu0 %v9076_v58  ;;  %v8854_v37 = vpop.permute.xlu0 %8853 }
 0x630   : > { %v17192_v57 = vpop.f32.mrb[243].mxu1  ;;  %v9088_v3 = vsel %vm19666_vm2, %v16818_v26, %v8854_v37  ;;  %v8758_v51 = vpop.permute.xlu1 %8757  ;;  %vm19681_vm2 = vmmov %vm19651_vm0 }
 0x631   : > { %v8960_v14 = vsel %vm19667_vm6, %v16782_v56, %v8758_v51  ;;  %vm19682_vm6 = vmmov %vm19651_vm0 }
 0x636   : > { %9854 = vmatmul.mubr.bf16.gmra.mrb[40].mxu0 %v8948_v6 }
 0x637   : > { %9861 = vmatprep.mubr.bf16.mxu0 %v9080_v27 }
 0x63b   : > { %v8856_v21 = vpop.permute.xlu0 %8855  ;;  %v8760_v26 = vpop.permute.xlu1 %8759 }
 0x63c   : > { %v9092_v24 = vsel %vm19668_vm8, %v16871_v49, %v8856_v21  ;;  %v8964_v54 = vsel %vm19669_vm9, %v16794_v11, %v8760_v26  ;;  %vm19683_vm8 = vmmov %vm19651_vm0 }
 0x63d   : > { %vm19684_vm9 = vmmov %vm19651_vm0 }
 0x63e   : > { %9862 = vmatmul.mubr.bf16.gmra.mrb[44].mxu0 %v8952_v43 }
 0x63f   : > { %9869 = vmatprep.mubr.bf16.mxu0 %v9084_v45  ;;  %v8858_v27 = vpop.permute.xlu0 %8857  ;;  %v8762_v23 = vpop.permute.xlu1 %8761 }
 0x640   : > { %v17200_v20 = vpop.f32.mrb[244].mxu1  ;;  %v9096_v25 = vsel %vm19670_vm15, %v16888_v0, %v8858_v27  ;;  %v8968_v49 = vsel %vm19651_vm0, %v16852_v5, %v8762_v23  ;;  %vm19685_vm15 = vmmov %vm19651_vm0 }
 0x641   : > { %v17202_v9 = vpop.f32.mrb[245].mxu1 }
 0x642   : > { %v17204_v34 = vpop.f32.mrb[246].mxu1 }
 0x643   : > { %v17208_v31 = vpop.f32.mrb[247].mxu1 }
 0x646   : > { %9870 = vmatmul.mubr.bf16.gmra.mrb[48].mxu0 %v8956_v44 }
 0x647   : > { %9877 = vmatprep.mubr.bf16.mxu0 %v9088_v3 }
 0x64a   : > { %v8860_v56 = vpop.permute.xlu0 %8859 }
 0x64b   : > { %v9100_v11 = vsel %vm19671_vm11, %v16938_v42, %v8860_v56  ;;  %vm19686_vm11 = vmmov %vm19651_vm0 }
 0x64c   : > { %v8764_v0 = vpop.permute.xlu1 %8763 }
 0x64d   : > { %v8972_v3 = vsel %vm19672_vm1, %v16867_v22, %v8764_v0  ;;  %vm19687_vm1 = vmmov %vm19651_vm0 }
 0x64e   : > { %9878 = vmatmul.mubr.bf16.gmra.mrb[52].mxu0 %v8960_v14  ;;  %v8862_v44 = vpop.permute.xlu0 %8861 }
 0x64f   : > { %9885 = vmatprep.mubr.bf16.mxu0 %v9092_v24  ;;  %v9104_v51 = vsel %vm19673_vm13, %v16955_v52, %v8862_v44  ;;  %vm19688_vm13 = vmmov %vm19651_vm0 }
 0x650   : > { %v8766_v21 = vpop.permute.xlu1 %8765 }
 0x651   : > { %v17216_v58 = vpop.f32.mrb[248].mxu1  ;;  %v8976_v42 = vsel %vm19674_vm4, %v16919_v63, %v8766_v21  ;;  %vm19689_vm4 = vmmov %vm19651_vm0 }
 0x652   : > { %v17218_v35 = vpop.f32.mrb[249].mxu1 }
 0x653   : > { %v17220_v33 = vpop.f32.mrb[250].mxu1 }
 0x654   : > { %v17224_v6 = vpop.f32.mrb[251].mxu1 }
 0x656   : > { %9886 = vmatmul.mubr.bf16.gmra.mrb[56].mxu0 %v8964_v54 }
 0x657   : > { %9893 = vmatprep.mubr.bf16.mxu0 %v9096_v25 }
 0x659   : > { %v8864_v5 = vpop.permute.xlu0 %8863 }
 0x65a   : > { %v9108_v22 = vsel %vm19675_vm3, %v17008_v10, %v8864_v5  ;;  %vm19690_vm3 = vmmov %vm19651_vm0 }
 0x65b   : > { %v8768_v52 = vpop.permute.xlu1 %8767 }
 0x65c   : > { %v8980_v25 = vsel %vm19676_vm5, %v16934_v4, %v8768_v52  ;;  %vm19691_vm5 = vmmov %vm19651_vm0 }
 0x65d   : > { %v8866_v54 = vpop.permute.xlu0 %8865 }
 0x65e   : > { %v17232_v43 = vpop.f32.mrb[252].mxu1  ;;  %9894 = vmatmul.mubr.bf16.gmra.mrb[60].mxu0 %v8968_v49  ;;  %v9112_v23 = vsel %vm19677_vm7, %v17025_v53, %v8866_v54  ;;  %vm19692_vm7 = vmmov %vm19651_vm0 }
 0x65f   : > { %v17234_v45 = vpop.f32.mrb[253].mxu1  ;;  %9901 = vmatprep.mubr.bf16.mxu0 %v9100_v11  ;;  %v8770_v56 = vpop.permute.xlu1 %8769  ;;  %v17267_v11 = vld [vmem:[%s18142_s7 + $0x1] ss:$0 sm:$0xff] }
 0x660   : > { %v17236_v32 = vpop.f32.mrb[254].mxu1  ;;  %v8984_v5 = vsel %vm19678_vm14, %v16989_v39, %v8770_v56  ;;  %vm19693_vm14 = vmmov %vm19651_vm0 }
 0x661   : > { %v17240_v37 = vpop.f32.mrb[255].mxu1 }
 0x666   : > { %9902 = vmatmul.mubr.bf16.gmra.mrb[64].mxu0 %v8972_v3 }
 0x667   : > { %9909 = vmatprep.mubr.bf16.mxu0 %v9104_v51 }
 0x669   : > { %v8868_v49 = vpop.permute.xlu0 %8867 }
 0x66b   : > { %v17248_v14 = vpop.f32.mrb[0].mxu1 }
 0x66c   : > { %v17250_v24 = vpop.f32.mrb[1].mxu1 }
 0x66d   : > { %v17252_v26 = vpop.f32.mrb[2].mxu1 }
 0x66e   : > { %v17256_v27 = vpop.f32.mrb[3].mxu1  ;;  %9910 = vmatmul.mubr.bf16.gmra.mrb[68].mxu0 %v8976_v42 }
 0x66f   : > { %9917 = vmatprep.mubr.bf16.mxu0 %v9108_v22 }
 0x676   : > { %9918 = vmatmul.mubr.bf16.gmra.mrb[72].mxu0 %v8980_v25 }
 0x677   : > { %9925 = vmatprep.mubr.bf16.mxu0 %v9112_v23  ;;  %v9711_v63 = vpop.f32.mrb[224].mxu0 }
 0x678   : > { %v9712_v10 = vadd.f32 %v9711_v63, %v17097_v41  ;;  %v9713_v44 = vpop.f32.mrb[225].mxu0  ;;  %v9116_v41 = vsel %vm19679_vm10, %v17075_v2, %v8868_v49  ;;  %v8772_v63 = vpop.permute.xlu1 %8771  ;;  %vm19694_vm10 = vmmov %vm19651_vm0 }
 0x679   : > { %v9714_v4 = vpop.f32.mrb[226].mxu0  ;;  %v8988_v2 = vsel %vm19681_vm2, %v17004_v19, %v8772_v63  ;;  %v13247_v19 = vld [vmem:[%s18145_s10] ss:$8 sps:$4 sm:$0xff]   ;;  %vm19696_vm2 = vmmov %vm19651_vm0 }
 0x67a   : > { %v17270_v0 = vpop.f32.mrb[4].mxu1  ;;  %v9974_v51 = vadd.f32 %v17267_v11, %v9712_v10  ;;  %v9715_v53 = vadd.f32 %v9714_v4, %v17105_v59  ;;  %v9716_v42 = vpop.f32.mrb[227].mxu0 }
 0x67b   : > { %v17272_v3 = vpop.f32.mrb[5].mxu1  ;;  %v8870_v4 = vpop.permute.xlu0 %8869 }
 0x67c   : > { %v17276_v21 = vpop.f32.mrb[6].mxu1  ;;  %v9975_v22 = vadd.f32 %v17267_v11, %v9715_v53  ;;  %v10038_v54 = vmax.f32 %v9974_v51, 0.0  ;;  %v9120_v51 = vsel %vm19682_vm6, %v17092_v8, %v8870_v4  ;;  %v13249_v8 = vld [vmem:[%s18145_s10 + $0x4] ss:$8 sps:$4 sm:$0xff]   ;;  %vm19697_vm6 = vmmov %vm19651_vm0 }
 0x67d   : > { %v17281_v52 = vpop.f32.mrb[7].mxu1  ;;  %10892 = vmatprep.subr.bf16.mxu1 %v13249_v8 }
 0x67e   : > { %9926 = vmatmul.mubr.bf16.gmra.mrb[76].mxu0 %v8984_v5  ;;  %v10039_v25 = vmax.f32 %v9975_v22, 0.0 }
 0x67f   : > { %9933 = vmatprep.mubr.bf16.mxu0 %v9116_v41  ;;  %v8872_v41 = vpop.permute.xlu0 %8871 }
 0x680   : > { %v10102_v59 = vpack.c.bf16 %v10039_v25, %v10038_v54 }
 0x681   : > { %v9719_v23 = vpop.f32.mrb[228].mxu0 }
 0x682   : > { %v9720_v10 = vadd.f32 %v17095_v47, %v9719_v23  ;;  %v9721_v44 = vpop.f32.mrb[229].mxu0  ;;  %13068 = vmatprep.mubr.msk.bf16.mxu1 %vm19680_vm12, %v10102_v59  ;;  %v8774_v47 = vpop.permute.xlu1 %8773  ;;  %vm19695_vm12 = vmmov %vm19651_vm0 }
 0x683   : > { %v9722_v39 = vpop.f32.mrb[230].mxu0 }
 0x684   : > { %v9976_v56 = vadd.f32 %v17267_v11, %v9720_v10  ;;  %v9723_v53 = vadd.f32 %v17103_v62, %v9722_v39  ;;  %v9724_v42 = vpop.f32.mrb[231].mxu0 }
 0x686   : > { %v9977_v49 = vadd.f32 %v17267_v11, %v9723_v53  ;;  %9934 = vmatmul.mubr.bf16.gmra.mrb[80].mxu0 %v8988_v2  ;;  %v10040_v5 = vmax.f32 %v9976_v56, 0.0  ;;  %v8992_v56 = vsel %vm19684_vm9, %v17056_v16, %v8774_v47  ;;  %v9124_v2 = vsel %vm19685_vm15, %v17140_v61, %v8872_v41  ;;  %vm19699_vm9 = vmmov %vm19651_vm0 }
 0x687   : > { %9941 = vmatprep.mubr.bf16.mxu0 %v9120_v51  ;;  %vm19701_vm15 = vmmov %vm19651_vm0 }
 0x688   : > { %v10041_v22 = vmax.f32 %v9977_v49, 0.0 }
 0x689   : > { %v9727_v54 = vpop.f32.mrb[232].mxu0 }
 0x68a   : > { %v10103_v25 = vpack.c.bf16 %v10041_v22, %v10040_v5  ;;  %v9728_v62 = vadd.f32 %v9727_v54, %v17138_v55  ;;  %v17295_v23 = vpop.f32.mrb[8].mxu1  ;;  %v9729_v59 = vpop.f32.mrb[233].mxu0 }
 0x68b   : > { %v17303_v63 = vpop.f32.mrb[9].mxu1  ;;  %v9730_v10 = vpop.f32.mrb[234].mxu0 }
 0x68c   : > { %v9978_v44 = vadd.f32 %v17267_v11, %v9728_v62  ;;  %v9731_v4 = vadd.f32 %v9730_v10, %v17150_v30  ;;  %v17307_v39 = vpop.f32.mrb[10].mxu1  ;;  %v9732_v55 = vpop.f32.mrb[235].mxu0  ;;  %13069 = vmatmul.mubr.msk.bf16.vlgmr.msra.gmra.mrb[32].mxu1 %vm19683_vm8, %v10103_v25  ;;  %vm19698_vm8 = vmmov %vm19651_vm0 }
 0x68d   : > { %v17312_v53 = vpop.f32.mrb[11].mxu1  ;;  %10893 = vmatpush1.bf16.msra.mxu1 %v13247_v19  ;;  %v8776_v5 = vpop.permute.xlu1 %8775 }
 0x68e   : > { %v9979_v42 = vadd.f32 %v17267_v11, %v9731_v4  ;;  %9942 = vmatmul.mubr.bf16.gmra.mrb[84].mxu0 %v8992_v56  ;;  %v10042_v30 = vmax.f32 %v9978_v44, 0.0  ;;  %v8874_v62 = vpop.permute.xlu0 %8873  ;;  %v8996_v61 = vsel %vm19686_vm11, %v17071_v36, %v8776_v5  ;;  %v13250_v36 = vld [vmem:[%s18145_s10 + $0x10] ss:$8 sps:$4 sm:$0xff]   ;;  %vm19702_vm11 = vmmov %vm19651_vm0 }
 0x68f   : > { %9949 = vmatprep.mubr.bf16.mxu0 %v9124_v2  ;;  %v9128_v8 = vsel %vm19687_vm1, %v17153_v18, %v8874_v62  ;;  %v13252_v2 = vld [vmem:[%s18145_s10 + $0x14] ss:$8 sps:$4 sm:$0xff]   ;;  %vm19703_vm1 = vmmov %vm19651_vm0 }
 0x690   : > { %v10043_v49 = vmax.f32 %v9979_v42, 0.0  ;;  %10894 = vmatprep.subr.bf16.mxu1 %v13252_v2 }
 0x691   : > { %v9735_v51 = vpop.f32.mrb[236].mxu0  ;;  %v8778_v44 = vpop.permute.xlu1 %8777  ;;  %10895 = vmatpush1.bf16.msra.mxu1 %v13250_v36  ;;  %v13253_v36 = vld [vmem:[%s18145_s10 + $0x20] ss:$8 sps:$4 sm:$0xff]  }
 0x692   : > { %v10104_v22 = vpack.c.bf16 %v10043_v49, %v10042_v30  ;;  %v9736_v54 = vadd.f32 %v17128_v46, %v9735_v51  ;;  %v9737_v25 = vpop.f32.mrb[237].mxu0 }
 0x693   : > { %v9738_v16 = vpop.f32.mrb[238].mxu0 }
 0x694   : > { %v9980_v47 = vadd.f32 %v17267_v11, %v9736_v54  ;;  %v9739_v59 = vadd.f32 %v17144_v13, %v9738_v16  ;;  %v9740_v19 = vpop.f32.mrb[239].mxu0  ;;  %13072 = vmatprep.mubr.msk.bf16.mxu1 %vm19651_vm0, %v10104_v22  ;;  %v9000_v22 = vsel %vm19689_vm4, %v17124_v17, %v8778_v44  ;;  %vm19705_vm4 = vmmov %vm19651_vm0 }
 0x696   : > { %v9981_v41 = vadd.f32 %v17267_v11, %v9739_v59  ;;  %9950 = vmatmul.mubr.bf16.gmra.mrb[88].mxu0 %v8996_v61  ;;  %v10044_v46 = vmax.f32 %v9980_v47, 0.0 }
 0x697   : > { %9957 = vmatprep.mubr.bf16.mxu0 %v9128_v8 }
 0x698   : > { %v10045_v10 = vmax.f32 %v9981_v41, 0.0 }
 0x699   : > { %v9743_v4 = vpop.f32.mrb[240].mxu0  ;;  %v17327_v56 = vpop.f32.mrb[12].mxu1 }
 0x69a   : > { %v10105_v55 = vpack.c.bf16 %v10045_v10, %v10044_v46  ;;  %v9744_v13 = vadd.f32 %v9743_v4, %v17160_v1  ;;  %v9745_v42 = vpop.f32.mrb[241].mxu0  ;;  %v17335_v18 = vpop.f32.mrb[13].mxu1 }
 0x69b   : > { %v9746_v30 = vpop.f32.mrb[242].mxu0  ;;  %v17339_v5 = vpop.f32.mrb[14].mxu1 }
 0x69c   : > { %v9982_v49 = vadd.f32 %v17267_v11, %v9744_v13  ;;  %v9747_v51 = vadd.f32 %v9746_v30, %v17166_v40  ;;  %v9748_v1 = vpop.f32.mrb[243].mxu0  ;;  %13073 = vmatmul.mubr.msk.bf16.gmra.mrb[36].mxu1 %vm19688_vm13, %v10105_v55  ;;  %v17344_v54 = vpop.f32.mrb[15].mxu1  ;;  %vm19704_vm13 = vmmov %vm19651_vm0 }
 0x69e   : > { %v9983_v25 = vadd.f32 %v17267_v11, %v9747_v51  ;;  %9958 = vmatmul.mubr.bf16.gmra.mrb[92].mxu0 %v9000_v22  ;;  %v10046_v62 = vmax.f32 %v9982_v49, 0.0 }
 0x6a0   : > { %v10047_v16 = vmax.f32 %v9983_v25, 0.0 }
 0x6a1   : > { %v9751_v47 = vpop.f32.mrb[244].mxu0 }
 0x6a2   : > { %v10106_v59 = vpack.c.bf16 %v10047_v16, %v10046_v62  ;;  %v9752_v40 = vadd.f32 %v17158_v15, %v9751_v47  ;;  %v9753_v19 = vpop.f32.mrb[245].mxu0 }
 0x6a3   : > { %v9754_v61 = vpop.f32.mrb[246].mxu0 }
 0x6a4   : > { %v9984_v41 = vadd.f32 %v17267_v11, %v9752_v40  ;;  %v9755_v8 = vadd.f32 %v17162_v12, %v9754_v61  ;;  %v9756_v46 = vpop.f32.mrb[247].mxu0  ;;  %13076 = vmatprep.mubr.msk.bf16.mxu1 %vm19690_vm3, %v10106_v59  ;;  %v13255_v12 = vld [vmem:[%s18145_s10 + $0x24] ss:$8 sps:$4 sm:$0xff]   ;;  %vm19706_vm3 = vmmov %vm19651_vm0 }
 0x6a5   : > { %10896 = vmatprep.subr.bf16.mxu1 %v13255_v12 }
 0x6a6   : > { %v9985_v17 = vadd.f32 %v17267_v11, %v9755_v8  ;;  %v10048_v10 = vmax.f32 %v9984_v41, 0.0  ;;  %10897 = vmatpush1.bf16.msra.mxu1 %v13253_v36 }
 0x6a8   : > { %v10049_v44 = vmax.f32 %v9985_v17, 0.0 }
 0x6a9   : > { %v9759_v4 = vpop.f32.mrb[248].mxu0  ;;  %v17353_v42 = vpop.f32.mrb[16].mxu1 }
 0x6aa   : > { %v10107_v55 = vpack.c.bf16 %v10049_v44, %v10048_v10  ;;  %v9760_v13 = vadd.f32 %v9759_v4, %v17172_v28  ;;  %v9761_v15 = vpop.f32.mrb[249].mxu0  ;;  %v17361_v2 = vpop.f32.mrb[17].mxu1 }
 0x6ab   : > { %v9762_v30 = vpop.f32.mrb[250].mxu0  ;;  %v17365_v1 = vpop.f32.mrb[18].mxu1  ;;  %v13256_v15 = vld [vmem:[%s18145_s10 + $0x30] ss:$8 sps:$4 sm:$0xff]  }
 0x6ac   : > { %v9986_v49 = vadd.f32 %v17267_v11, %v9760_v13  ;;  %v9763_v51 = vadd.f32 %v9762_v30, %v17178_v48  ;;  %v9764_v28 = vpop.f32.mrb[251].mxu0  ;;  %13077 = vmatmul.mubr.msk.bf16.gmra.mrb[40].mxu1 %vm19691_vm5, %v10107_v55  ;;  %v17368_v22 = vpop.f32.mrb[19].mxu1  ;;  %vm19707_vm5 = vmmov %vm19651_vm0 }
 0x6ae   : > { %v9987_v25 = vadd.f32 %v17267_v11, %v9763_v51  ;;  %v10050_v62 = vmax.f32 %v9986_v49, 0.0 }
 0x6b0   : > { %v10051_v16 = vmax.f32 %v9987_v25, 0.0 }
 0x6b1   : > { %v9767_v47 = vpop.f32.mrb[252].mxu0 }
 0x6b2   : > { %v10108_v59 = vpack.c.bf16 %v10051_v16, %v10050_v62  ;;  %v9768_v40 = vadd.f32 %v17170_v29, %v9767_v47  ;;  %v9769_v19 = vpop.f32.mrb[253].mxu0 }
 0x6b3   : > { %v9770_v61 = vpop.f32.mrb[254].mxu0 }
 0x6b4   : > { %v9988_v48 = vadd.f32 %v17267_v11, %v9768_v40  ;;  %v9771_v41 = vadd.f32 %v17174_v50, %v9770_v61  ;;  %v9772_v8 = vpop.f32.mrb[255].mxu0  ;;  %13080 = vmatprep.mubr.msk.bf16.mxu1 %vm19692_vm7, %v10108_v59  ;;  %v13258_v50 = vld [vmem:[%s18145_s10 + $0x34] ss:$8 sps:$4 sm:$0xff]   ;;  %vm19708_vm7 = vmmov %vm19651_vm0 }
 0x6b5   : > { %10898 = vmatprep.subr.bf16.mxu1 %v13258_v50 }
 0x6b6   : > { %v9989_v46 = vadd.f32 %v17267_v11, %v9771_v41  ;;  %v10052_v17 = vmax.f32 %v9988_v48, 0.0  ;;  %10899 = vmatpush1.bf16.msra.mxu1 %v13256_v15 }
 0x6b8   : > { %v10053_v10 = vmax.f32 %v9989_v46, 0.0  ;;  %v17377_v13 = vpop.f32.mrb[20].mxu1 }
 0x6b9   : > { %v9775_v44 = vpop.f32.mrb[0].mxu0  ;;  %v17385_v36 = vpop.f32.mrb[21].mxu1 }
 0x6ba   : > { %v10109_v4 = vpack.c.bf16 %v10053_v10, %v10052_v17  ;;  %v9776_v55 = vadd.f32 %v9775_v44, %v17186_v60  ;;  %v9777_v29 = vpop.f32.mrb[1].mxu0  ;;  %v17389_v51 = vpop.f32.mrb[22].mxu1 }
 0x6bb   : > { %v9778_v12 = vpop.f32.mrb[2].mxu0  ;;  %v17392_v28 = vpop.f32.mrb[23].mxu1  ;;  %v13259_v29 = vld [vmem:[%s18145_s10 + $0x40] ss:$8 sps:$4 sm:$0xff]  }
 0x6bc   : > { %v9990_v30 = vadd.f32 %v17267_v11, %v9776_v55  ;;  %v9779_v49 = vadd.f32 %v9778_v12, %v17192_v57  ;;  %v9780_v60 = vpop.f32.mrb[3].mxu0  ;;  %13081 = vmatmul.mubr.msk.bf16.gmra.mrb[44].mxu1 %vm19693_vm14, %v10109_v4  ;;  %vm19709_vm14 = vmmov %vm19651_vm0 }
 0x6be   : > { %v9991_v25 = vadd.f32 %v17267_v11, %v9779_v49  ;;  %v10054_v62 = vmax.f32 %v9990_v30, 0.0 }
 0x6c0   : > { %v10055_v16 = vmax.f32 %v9991_v25, 0.0 }
 0x6c1   : > { %v9783_v47 = vpop.f32.mrb[4].mxu0 }
 0x6c2   : > { %v10110_v59 = vpack.c.bf16 %v10055_v16, %v10054_v62  ;;  %v9784_v40 = vadd.f32 %v17184_v7, %v9783_v47  ;;  %v9785_v19 = vpop.f32.mrb[5].mxu0 }
 0x6c3   : > { %v9786_v61 = vpop.f32.mrb[6].mxu0 }
 0x6c4   : > { %v9992_v57 = vadd.f32 %v17267_v11, %v9784_v40  ;;  %v9787_v48 = vadd.f32 %v17188_v38, %v9786_v61  ;;  %v9788_v41 = vpop.f32.mrb[7].mxu0  ;;  %13084 = vmatprep.mubr.msk.bf16.mxu1 %vm19694_vm10, %v10110_v59  ;;  %v13261_v38 = vld [vmem:[%s18145_s10 + $0x44] ss:$8 sps:$4 sm:$0xff]   ;;  %vm19710_vm10 = vmmov %vm19651_vm0 }
 0x6c5   : > { %10900 = vmatprep.subr.bf16.mxu1 %v13261_v38 }
 0x6c6   : > { %v9993_v8 = vadd.f32 %v17267_v11, %v9787_v48  ;;  %v10056_v46 = vmax.f32 %v9992_v57, 0.0  ;;  %10901 = vmatpush1.bf16.msra.mxu1 %v13259_v29 }
 0x6c8   : > { %v10057_v17 = vmax.f32 %v9993_v8, 0.0  ;;  %v17401_v55 = vpop.f32.mrb[24].mxu1 }
 0x6c9   : > { %v9791_v10 = vpop.f32.mrb[8].mxu0  ;;  %v17409_v15 = vpop.f32.mrb[25].mxu1 }
 0x6ca   : > { %v10111_v44 = vpack.c.bf16 %v10057_v17, %v10056_v46  ;;  %v9792_v4 = vadd.f32 %v9791_v10, %v17202_v9  ;;  %v9793_v7 = vpop.f32.mrb[9].mxu0  ;;  %v17413_v49 = vpop.f32.mrb[26].mxu1 }
 0x6cb   : > { %v9794_v50 = vpop.f32.mrb[10].mxu0  ;;  %v17416_v60 = vpop.f32.mrb[27].mxu1  ;;  %v13262_v7 = vld [vmem:[%s18145_s10 + $0x50] ss:$8 sps:$4 sm:$0xff]  }
 0x6cc   : > { %v9994_v12 = vadd.f32 %v17267_v11, %v9792_v4  ;;  %v9795_v30 = vadd.f32 %v9794_v50, %v17208_v31  ;;  %v9796_v9 = vpop.f32.mrb[11].mxu0  ;;  %13085 = vmatmul.mubr.msk.bf16.gmra.mrb[48].mxu1 %vm19695_vm12, %v10111_v44  ;;  %vm19711_vm12 = vmmov %vm19651_vm0 }
 0x6ce   : > { %v9995_v25 = vadd.f32 %v17267_v11, %v9795_v30  ;;  %v10058_v62 = vmax.f32 %v9994_v12, 0.0 }
 0x6d0   : > { %v10059_v16 = vmax.f32 %v9995_v25, 0.0 }
 0x6d1   : > { %v9799_v47 = vpop.f32.mrb[12].mxu0 }
 0x6d2   : > { %v10112_v59 = vpack.c.bf16 %v10059_v16, %v10058_v62  ;;  %v9800_v40 = vadd.f32 %v17200_v20, %v9799_v47  ;;  %v9801_v19 = vpop.f32.mrb[13].mxu0 }
 0x6d3   : > { %v9802_v61 = vpop.f32.mrb[14].mxu0 }
 0x6d4   : > { %v9996_v31 = vadd.f32 %v17267_v11, %v9800_v40  ;;  %v9803_v57 = vadd.f32 %v17204_v34, %v9802_v61  ;;  %v9804_v48 = vpop.f32.mrb[15].mxu0  ;;  %13088 = vmatprep.mubr.msk.bf16.mxu1 %vm19696_vm2, %v10112_v59  ;;  %v13264_v34 = vld [vmem:[%s18145_s10 + $0x54] ss:$8 sps:$4 sm:$0xff]   ;;  %vm19712_vm2 = vmmov %vm19651_vm0 }
 0x6d5   : > { %10902 = vmatprep.subr.bf16.mxu1 %v13264_v34 }
 0x6d6   : > { %v9997_v41 = vadd.f32 %v17267_v11, %v9803_v57  ;;  %v10060_v8 = vmax.f32 %v9996_v31, 0.0  ;;  %10903 = vmatpush1.bf16.msra.mxu1 %v13262_v7 }
 0x6d8   : > { %v10061_v46 = vmax.f32 %v9997_v41, 0.0  ;;  %v17425_v4 = vpop.f32.mrb[28].mxu1 }
 0x6d9   : > { %v9807_v17 = vpop.f32.mrb[16].mxu0  ;;  %v17433_v29 = vpop.f32.mrb[29].mxu1 }
 0x6da   : > { %v10113_v10 = vpack.c.bf16 %v10061_v46, %v10060_v8  ;;  %v9808_v44 = vadd.f32 %v9807_v17, %v17218_v35  ;;  %v9809_v20 = vpop.f32.mrb[17].mxu0  ;;  %v17437_v30 = vpop.f32.mrb[30].mxu1  ;;  %v13265_v17 = vld [vmem:[%s18147_s12] sm:$0xff]  }
 0x6db   : > { %v9810_v38 = vpop.f32.mrb[18].mxu0  ;;  %v17440_v9 = vpop.f32.mrb[31].mxu1  ;;  %v13268_v20 = vld [vmem:[%s18145_s10 + $0x64] ss:$8 sps:$4 sm:$0xff]   ;;  %11573 = vmatpush1.bf16.msra.mxu0 %v13265_v17  ;;  %v13272_v17 = vld [vmem:[%s18145_s10 + $0x74] ss:$8 sps:$4 sm:$0xff]  }
 0x6dc   : > { %v9998_v50 = vadd.f32 %v17267_v11, %v9808_v44  ;;  %v9811_v12 = vadd.f32 %v9810_v38, %v17224_v6  ;;  %v9812_v35 = vpop.f32.mrb[19].mxu0  ;;  %13089 = vmatmul.mubr.msk.bf16.gmra.mrb[52].mxu1 %vm19697_vm6, %v10113_v10  ;;  %10904 = vmatprep.subr.bf16.mxu1 %v13268_v20  ;;  %vm19713_vm6 = vmmov %vm19651_vm0 }
 0x6de   : > { %v9999_v25 = vadd.f32 %v17267_v11, %v9811_v12  ;;  %v10062_v62 = vmax.f32 %v9998_v50, 0.0 }
 0x6e0   : > { %v10063_v16 = vmax.f32 %v9999_v25, 0.0 }
 0x6e1   : > { %v9815_v47 = vpop.f32.mrb[20].mxu0 }
 0x6e2   : > { %v10114_v59 = vpack.c.bf16 %v10063_v16, %v10062_v62  ;;  %v9816_v40 = vadd.f32 %v17216_v58, %v9815_v47  ;;  %v9817_v19 = vpop.f32.mrb[21].mxu0 }
 0x6e3   : > { %v9818_v61 = vpop.f32.mrb[22].mxu0 }
 0x6e4   : > { %v10000_v6 = vadd.f32 %v17267_v11, %v9816_v40  ;;  %v9819_v31 = vadd.f32 %v17220_v33, %v9818_v61  ;;  %v9820_v57 = vpop.f32.mrb[23].mxu0  ;;  %13092 = vmatprep.mubr.msk.bf16.mxu1 %vm19698_vm8, %v10114_v59  ;;  %v13266_v33 = vld [vmem:[%s18145_s10 + $0x60] ss:$8 sps:$4 sm:$0xff]   ;;  %vm19718_vm8 = vmmov %vm19651_vm0 }
 0x6e5   : > { %10905 = vmatpush1.bf16.msra.mxu1 %v13266_v33 }
 0x6e6   : > { %v10001_v48 = vadd.f32 %v17267_v11, %v9819_v31  ;;  %v10064_v41 = vmax.f32 %v10000_v6, 0.0  ;;  %10906 = vmatprep.subr.bf16.mxu1 %v13272_v17 }
 0x6e8   : > { %v10065_v8 = vmax.f32 %v10001_v48, 0.0 }
 0x6e9   : > { %v9823_v46 = vpop.f32.mrb[24].mxu0 }
 0x6ea   : > { %v10115_v10 = vpack.c.bf16 %v10065_v8, %v10064_v41  ;;  %v9824_v58 = vadd.f32 %v9823_v46, %v17234_v45  ;;  %v9825_v44 = vpop.f32.mrb[25].mxu0  ;;  %v19700_v45 = vmov 0   ;;  %v13269_v41 = vld [vmem:[%s18147_s12 + $0x8] sm:$0xff]  }
 0x6eb   : > { %v9826_v7 = vpop.f32.mrb[26].mxu0  ;;  %11574 = vmatprep.subr.bf16.mxu0 %v19700_v45 }
 0x6ec   : > { %v10002_v34 = vadd.f32 %v17267_v11, %v9824_v58  ;;  %v9827_v38 = vadd.f32 %v9826_v7, %v17240_v37  ;;  %v9828_v50 = vpop.f32.mrb[27].mxu0  ;;  %13093 = vmatmul.mubr.msk.bf16.gmra.mrb[56].mxu1 %vm19699_vm9, %v10115_v10  ;;  %11575 = vmatpush1.bf16.msra.mxu0 %v13269_v41  ;;  %vm19719_vm9 = vmmov %vm19651_vm0 }
 0x6ed   : > { %11576 = vmatprep.subr.bf16.mxu0 %v19700_v45 }
 0x6ee   : > { %v10003_v12 = vadd.f32 %v17267_v11, %v9827_v38  ;;  %v10066_v35 = vmax.f32 %v10002_v34, 0.0 }
 0x6f0   : > { %v10067_v25 = vmax.f32 %v10003_v12, 0.0 }
 0x6f1   : > { %v9831_v62 = vpop.f32.mrb[28].mxu0 }
 0x6f2   : > { %v10116_v16 = vpack.c.bf16 %v10067_v25, %v10066_v35  ;;  %v9832_v47 = vadd.f32 %v17232_v43, %v9831_v62  ;;  %v9833_v59 = vpop.f32.mrb[29].mxu0 }
 0x6f3   : > { %v9834_v40 = vpop.f32.mrb[30].mxu0 }
 0x6f4   : > { %v10004_v19 = vadd.f32 %v17267_v11, %v9832_v47  ;;  %v9835_v37 = vadd.f32 %v17236_v32, %v9834_v40  ;;  %v9836_v61 = vpop.f32.mrb[31].mxu0  ;;  %13096 = vmatprep.mubr.msk.bf16.mxu1 %vm19701_vm15, %v10116_v16  ;;  %v13270_v32 = vld [vmem:[%s18145_s10 + $0x70] ss:$8 sps:$4 sm:$0xff]   ;;  %vm19724_vm15 = vmmov %vm19651_vm0 }
 0x6f5   : > { %10907 = vmatpush1.bf16.msra.mxu1 %v13270_v32 }
 0x6f6   : > { %v10005_v6 = vadd.f32 %v17267_v11, %v9835_v37  ;;  %v10068_v31 = vmax.f32 %v10004_v19, 0.0  ;;  %v13273_v19 = vld [vmem:[%s18147_s12 + $0x10] sm:$0xff]  }
 0x6f7   : > { %11577 = vmatpush1.bf16.msra.mxu0 %v13273_v19 }
 0x6f8   : > { %v10069_v57 = vmax.f32 %v10005_v6, 0.0  ;;  %11578 = vmatprep.subr.bf16.mxu0 %v19700_v45 }
 0x6f9   : > { %v9839_v48 = vpop.f32.mrb[32].mxu0 }
 0x6fa   : > { %v10117_v8 = vpack.c.bf16 %v10069_v57, %v10068_v31  ;;  %v9840_v43 = vadd.f32 %v9839_v48, %v17250_v24  ;;  %v9841_v46 = vpop.f32.mrb[33].mxu0 }
 0x6fb   : > { %v9842_v10 = vpop.f32.mrb[34].mxu0 }
 0x6fc   : > { %v10006_v58 = vadd.f32 %v17267_v11, %v9840_v43  ;;  %v9843_v44 = vadd.f32 %v9842_v10, %v17256_v27  ;;  %v9844_v33 = vpop.f32.mrb[35].mxu0  ;;  %13097 = vmatmul.mubr.msk.bf16.gmra.mrb[60].mxu1 %vm19651_vm0, %v10117_v8 }
 0x6fe   : > { %v10007_v24 = vadd.f32 %v17267_v11, %v9843_v44  ;;  %v10070_v20 = vmax.f32 %v10006_v58, 0.0 }
 0x700   : > { %v10071_v7 = vmax.f32 %v10007_v24, 0.0 }
 0x701   : > { %v9847_v34 = vpop.f32.mrb[36].mxu0 }
 0x702   : > { %v10118_v38 = vpack.c.bf16 %v10071_v7, %v10070_v20  ;;  %v9848_v50 = vadd.f32 %v17248_v14, %v9847_v34  ;;  %v9849_v12 = vpop.f32.mrb[37].mxu0  ;;  %v13274_v7 = vld [vmem:[%s18147_s12 + $0x18] sm:$0xff]  }
 0x703   : > { %v9850_v35 = vpop.f32.mrb[38].mxu0  ;;  %11579 = vmatpush1.bf16.msra.mxu0 %v13274_v7 }
 0x704   : > { %v10008_v25 = vadd.f32 %v17267_v11, %v9848_v50  ;;  %v9851_v27 = vadd.f32 %v17252_v26, %v9850_v35  ;;  %v9852_v62 = vpop.f32.mrb[39].mxu0  ;;  %13100 = vmatprep.mubr.msk.bf16.mxu1 %vm19702_vm11, %v10118_v38  ;;  %11580 = vmatprep.subr.bf16.mxu0 %v19700_v45  ;;  %vm11861_vm11 = vcmask 7168  }
 0x706   : > { %v10009_v16 = vadd.f32 %v17267_v11, %v9851_v27  ;;  %v10072_v47 = vmax.f32 %v10008_v25, 0.0 }
 0x708   : > { %v10073_v59 = vmax.f32 %v10009_v16, 0.0 }
 0x709   : > { %v9855_v40 = vpop.f32.mrb[40].mxu0 }
 0x70a   : > { %v10119_v37 = vpack.c.bf16 %v10073_v59, %v10072_v47  ;;  %v9856_v14 = vadd.f32 %v9855_v40, %v17272_v3  ;;  %v9857_v61 = vpop.f32.mrb[41].mxu0 }
 0x70b   : > { %v9858_v6 = vpop.f32.mrb[42].mxu0 }
 0x70c   : > { %v10010_v26 = vadd.f32 %v17267_v11, %v9856_v14  ;;  %v9859_v31 = vadd.f32 %v9858_v6, %v17281_v52  ;;  %v9860_v57 = vpop.f32.mrb[43].mxu0  ;;  %13101 = vmatmul.mubr.msk.bf16.gmra.mrb[64].mxu1 %vm19703_vm1, %v10119_v37 }
 0x70e   : > { %v10011_v48 = vadd.f32 %v17267_v11, %v9859_v31  ;;  %v10074_v41 = vmax.f32 %v10010_v26, 0.0  ;;  %v13275_v31 = vld [vmem:[%s18147_s12 + $0x20] sm:$0xff]  }
 0x70f   : > { %11581 = vmatpush1.bf16.msra.mxu0 %v13275_v31 }
 0x710   : > { %v10075_v8 = vmax.f32 %v10011_v48, 0.0  ;;  %11582 = vmatprep.subr.bf16.mxu0 %v19700_v45 }
 0x711   : > { %v9863_v43 = vpop.f32.mrb[44].mxu0 }
 0x712   : > { %v10120_v46 = vpack.c.bf16 %v10075_v8, %v10074_v41  ;;  %v9864_v3 = vadd.f32 %v17270_v0, %v9863_v43  ;;  %v9865_v32 = vpop.f32.mrb[45].mxu0 }
 0x713   : > { %v9866_v17 = vpop.f32.mrb[46].mxu0 }
 0x714   : > { %v10012_v10 = vadd.f32 %v17267_v11, %v9864_v3  ;;  %v9867_v58 = vadd.f32 %v17276_v21, %v9866_v17  ;;  %v9868_v52 = vpop.f32.mrb[47].mxu0  ;;  %13104 = vmatprep.mubr.msk.bf16.mxu1 %vm19704_vm13, %v10120_v46 }
 0x716   : > { %v10013_v44 = vadd.f32 %v17267_v11, %v9867_v58  ;;  %v10076_v33 = vmax.f32 %v10012_v10, 0.0 }
 0x718   : > { %v10077_v24 = vmax.f32 %v10013_v44, 0.0 }
 0x719   : > { %v9871_v20 = vpop.f32.mrb[48].mxu0 }
 0x71a   : > { %v10121_v34 = vpack.c.bf16 %v10077_v24, %v10076_v33  ;;  %v9872_v0 = vadd.f32 %v9871_v20, %v17303_v63  ;;  %v9873_v38 = vpop.f32.mrb[49].mxu0 }
 0x71b   : > { %v9874_v50 = vpop.f32.mrb[50].mxu0 }
 0x71c   : > { %v10014_v21 = vadd.f32 %v17267_v11, %v9872_v0  ;;  %v9875_v12 = vadd.f32 %v9874_v50, %v17312_v53  ;;  %v9876_v35 = vpop.f32.mrb[51].mxu0  ;;  %13105 = vmatmul.mubr.msk.bf16.gmra.mrb[68].mxu1 %vm19705_vm4, %v10121_v34  ;;  %v13276_v0 = vld [vmem:[%s18147_s12 + $0x28] sm:$0xff]  }
 0x71d   : > { %11583 = vmatpush1.bf16.msra.mxu0 %v13276_v0 }
 0x71e   : > { %v10015_v25 = vadd.f32 %v17267_v11, %v9875_v12  ;;  %v10078_v27 = vmax.f32 %v10014_v21, 0.0  ;;  %11584 = vmatprep.subr.bf16.mxu0 %v19700_v45 }
 0x720   : > { %v10079_v62 = vmax.f32 %v10015_v25, 0.0 }
 0x721   : > { %v9879_v16 = vpop.f32.mrb[52].mxu0 }
 0x722   : > { %v10122_v47 = vpack.c.bf16 %v10079_v62, %v10078_v27  ;;  %v9880_v63 = vadd.f32 %v17295_v23, %v9879_v16  ;;  %v9881_v59 = vpop.f32.mrb[53].mxu0 }
 0x723   : > { %v9882_v40 = vpop.f32.mrb[54].mxu0 }
 0x724   : > { %v10016_v19 = vadd.f32 %v17267_v11, %v9880_v63  ;;  %v9883_v37 = vadd.f32 %v17307_v39, %v9882_v40  ;;  %v9884_v53 = vpop.f32.mrb[55].mxu0  ;;  %13108 = vmatprep.mubr.msk.bf16.mxu1 %vm19706_vm3, %v10122_v47 }
 0x726   : > { %v10017_v14 = vadd.f32 %v17267_v11, %v9883_v37  ;;  %v10080_v61 = vmax.f32 %v10016_v19, 0.0 }
 0x728   : > { %v10081_v6 = vmax.f32 %v10017_v14, 0.0 }
 0x729   : > { %v9887_v26 = vpop.f32.mrb[56].mxu0 }
 0x72a   : > { %v10123_v57 = vpack.c.bf16 %v10081_v6, %v10080_v61  ;;  %v9888_v23 = vadd.f32 %v9887_v26, %v17335_v18  ;;  %v9889_v48 = vpop.f32.mrb[57].mxu0  ;;  %v13277_v6 = vld [vmem:[%s18147_s12 + $0x30] sm:$0xff]  }
 0x72b   : > { %v9890_v41 = vpop.f32.mrb[58].mxu0  ;;  %11585 = vmatpush1.bf16.msra.mxu0 %v13277_v6 }
 0x72c   : > { %v10018_v39 = vadd.f32 %v17267_v11, %v9888_v23  ;;  %v9891_v8 = vadd.f32 %v9890_v41, %v17344_v54  ;;  %v9892_v43 = vpop.f32.mrb[59].mxu0  ;;  %13109 = vmatmul.mubr.msk.bf16.gmra.mrb[72].mxu1 %vm19707_vm5, %v10123_v57  ;;  %11586 = vmatprep.subr.bf16.mxu0 %v19700_v45 }
 0x72e   : > { %v10019_v46 = vadd.f32 %v17267_v11, %v9891_v8  ;;  %v10082_v3 = vmax.f32 %v10018_v39, 0.0 }
 0x730   : > { %v10083_v32 = vmax.f32 %v10019_v46, 0.0 }
 0x731   : > { %v9895_v17 = vpop.f32.mrb[60].mxu0 }
 0x732   : > { %v10124_v10 = vpack.c.bf16 %v10083_v32, %v10082_v3  ;;  %v9896_v18 = vadd.f32 %v17327_v56, %v9895_v17  ;;  %v9897_v58 = vpop.f32.mrb[61].mxu0 }
 0x733   : > { %v9898_v52 = vpop.f32.mrb[62].mxu0 }
 0x734   : > { %v10020_v44 = vadd.f32 %v17267_v11, %v9896_v18  ;;  %v9899_v33 = vadd.f32 %v17339_v5, %v9898_v52  ;;  %v9900_v54 = vpop.f32.mrb[63].mxu0  ;;  %13112 = vmatprep.mubr.msk.bf16.mxu1 %vm19708_vm7, %v10124_v10 }
 0x736   : > { %v10021_v24 = vadd.f32 %v17267_v11, %v9899_v33  ;;  %v10084_v20 = vmax.f32 %v10020_v44, 0.0  ;;  %v13278_v33 = vld [vmem:[%s18147_s12 + $0x38] sm:$0xff]  }
 0x737   : > { %11587 = vmatpush1.bf16.msra.mxu0 %v13278_v33  ;;  %v19720_v33 = vld [vmem:[#allocation131_spill] sm:$0xff] }
 0x738   : > { %v10085_v7 = vmax.f32 %v10021_v24, 0.0  ;;  %11588 = vmatprep.subr.bf16.mxu0 %v19700_v45 }
 0x739   : > { %v9903_v34 = vpop.f32.mrb[64].mxu0 }
 0x73a   : > { %v10125_v38 = vpack.c.bf16 %v10085_v7, %v10084_v20  ;;  %v9904_v56 = vadd.f32 %v9903_v34, %v17361_v2  ;;  %v9905_v50 = vpop.f32.mrb[65].mxu0 }
 0x73b   : > { %v9906_v21 = vpop.f32.mrb[66].mxu0 }
 0x73c   : > { %v10022_v5 = vadd.f32 %v17267_v11, %v9904_v56  ;;  %v9907_v12 = vadd.f32 %v9906_v21, %v17368_v22  ;;  %v9908_v35 = vpop.f32.mrb[67].mxu0  ;;  %13113 = vmatmul.mubr.msk.bf16.gmra.mrb[76].mxu1 %vm19709_vm14, %v10125_v38  ;;  %v17570_v56 = vld [vmem:[%s18144_s9 + $0x1] ss:$0 sm:$0xff] }
 0x73d   : > { %v19714_v21 = vld [vmem:[#allocation106_spill] sm:$0xff]  ;;  %v19715_v35 = vld [vmem:[#allocation97_spill] sm:$0xff] }
 0x73e   : > { %v10023_v25 = vadd.f32 %v17267_v11, %v9907_v12  ;;  %v10086_v27 = vmax.f32 %v10022_v5, 0.0 }
 0x740   : > { %v10087_v62 = vmax.f32 %v10023_v25, 0.0 }
 0x741   : > { %v9911_v16 = vpop.f32.mrb[68].mxu0 }
 0x742   : > { %v10126_v47 = vpack.c.bf16 %v10087_v62, %v10086_v27  ;;  %v9912_v2 = vadd.f32 %v17353_v42, %v9911_v16  ;;  %v9913_v63 = vpop.f32.mrb[69].mxu0 }
 0x743   : > { %v9914_v59 = vpop.f32.mrb[70].mxu0 }
 0x744   : > { %v10024_v40 = vadd.f32 %v17267_v11, %v9912_v2  ;;  %v9915_v19 = vadd.f32 %v17365_v1, %v9914_v59  ;;  %v9916_v22 = vpop.f32.mrb[71].mxu0  ;;  %13116 = vmatprep.mubr.msk.bf16.mxu1 %vm19710_vm10, %v10126_v47  ;;  %v19716_v2 = vld [vmem:[#allocation98_spill] sm:$0xff] }
 0x745   : > { %v19717_v22 = vld [vmem:[#allocation120_spill] sm:$0xff] }
 0x746   : > { %v10025_v37 = vadd.f32 %v17267_v11, %v9915_v19  ;;  %v10088_v53 = vmax.f32 %v10024_v40, 0.0 }
 0x748   : > { %v10089_v14 = vmax.f32 %v10025_v37, 0.0 }
 0x749   : > { %v9919_v61 = vpop.f32.mrb[72].mxu0 }
 0x74a   : > { %v10127_v26 = vpack.c.bf16 %v10089_v14, %v10088_v53  ;;  %v9920_v42 = vadd.f32 %v9919_v61, %v17385_v36  ;;  %v9921_v31 = vpop.f32.mrb[73].mxu0 }
 0x74b   : > { %v9922_v57 = vpop.f32.mrb[74].mxu0 }
 0x74c   : > { %v10026_v1 = vadd.f32 %v17267_v11, %v9920_v42  ;;  %v9923_v23 = vadd.f32 %v9922_v57, %v17392_v28  ;;  %v9924_v48 = vpop.f32.mrb[75].mxu0  ;;  %13117 = vmatmul.mubr.msk.bf16.gmra.mrb[80].mxu1 %vm19711_vm12, %v10127_v26 }
 0x74e   : > { %v10027_v41 = vadd.f32 %v17267_v11, %v9923_v23  ;;  %v10090_v39 = vmax.f32 %v10026_v1, 0.0 }
 0x750   : > { %v10091_v8 = vmax.f32 %v10027_v41, 0.0 }
 0x751   : > { %v9927_v43 = vpop.f32.mrb[76].mxu0 }
 0x752   : > { %v10128_v46 = vpack.c.bf16 %v10091_v8, %v10090_v39  ;;  %v9928_v36 = vadd.f32 %v17377_v13, %v9927_v43  ;;  %v9929_v3 = vpop.f32.mrb[77].mxu0 }
 0x753   : > { %v9930_v32 = vpop.f32.mrb[78].mxu0 }
 0x754   : > { %v10028_v17 = vadd.f32 %v17267_v11, %v9928_v36  ;;  %v9931_v10 = vadd.f32 %v17389_v51, %v9930_v32  ;;  %v9932_v28 = vpop.f32.mrb[79].mxu0  ;;  %13120 = vmatprep.mubr.msk.bf16.mxu1 %vm19712_vm2, %v10128_v46 }
 0x756   : > { %v10029_v18 = vadd.f32 %v17267_v11, %v9931_v10  ;;  %v10092_v58 = vmax.f32 %v10028_v17, 0.0 }
 0x758   : > { %v10093_v52 = vmax.f32 %v10029_v18, 0.0 }
 0x759   : > { %v9935_v44 = vpop.f32.mrb[80].mxu0 }
 0x75a   : > { %v10129_v54 = vpack.c.bf16 %v10093_v52, %v10092_v58  ;;  %v9936_v13 = vadd.f32 %v9935_v44, %v17409_v15  ;;  %v9937_v24 = vpop.f32.mrb[81].mxu0 }
 0x75b   : > { %v9938_v20 = vpop.f32.mrb[82].mxu0 }
 0x75c   : > { %v10030_v51 = vadd.f32 %v17267_v11, %v9936_v13  ;;  %v9939_v7 = vadd.f32 %v9938_v20, %v17416_v60  ;;  %v9940_v34 = vpop.f32.mrb[83].mxu0  ;;  %13121 = vmatmul.mubr.msk.bf16.gmra.mrb[84].mxu1 %vm19713_vm6, %v10129_v54  ;;  %v19721_v13 = vld [vmem:[#allocation105_spill] sm:$0xff] }
 0x75e   : > { %v10031_v0 = vadd.f32 %v17267_v11, %v9939_v7  ;;  %v10094_v15 = vmax.f32 %v10030_v51, 0.0 }
 0x75f   : > { %v13070_v38 = vpop.f32.mrb[32].mxu1 }
 0x760   : > { %v10095_v50 = vmax.f32 %v10031_v0, 0.0  ;;  %v10554_v5 = vadd.f32 %v13070_v38, %v19714_v21  ;;  %v10297_v12 = vpop.f32.mrb[33].mxu1  ;;  %v19722_v0 = vld [vmem:[#allocation128_spill] sm:$0xff]  ;;  %v19723_v21 = vld [vmem:[#allocation127_spill] sm:$0xff] }
 0x761   : > { %v10552_v60 = vadd.f32 %v10297_v12, %v19715_v35  ;;  %v9943_v25 = vpop.f32.mrb[84].mxu0  ;;  %v13071_v27 = vpop.f32.mrb[34].mxu1  ;;  %v13289_v35 = vld [vmem:[%s18142_s7 + $0x1] ss:$0 sm:$0xff] }
 0x762   : > { %v10130_v62 = vpack.c.bf16 %v10095_v50, %v10094_v15  ;;  %v10626_v16 = vadd.f32 %v17570_v56, %v10554_v5  ;;  %v9944_v47 = vadd.f32 %v17401_v55, %v9943_v25  ;;  %v10555_v63 = vadd.f32 %v13071_v27, %v19716_v2  ;;  %v9945_v59 = vpop.f32.mrb[85].mxu0  ;;  %v10300_v40 = vpop.f32.mrb[35].mxu1 }
 0x763   : > { %v10624_v19 = vadd.f32 %v17570_v56, %v10552_v60  ;;  %v10553_v37 = vadd.f32 %v10300_v40, %v19717_v22  ;;  %v9946_v53 = vpop.f32.mrb[86].mxu0 }
 0x764   : > { %v10032_v14 = vadd.f32 %v17267_v11, %v9944_v47  ;;  %v10627_v61 = vadd.f32 %v17570_v56, %v10555_v63  ;;  %v9947_v6 = vadd.f32 %v17413_v49, %v9946_v53  ;;  %v9948_v26 = vpop.f32.mrb[87].mxu0  ;;  %13124 = vmatprep.mubr.msk.bf16.mxu1 %vm19718_vm8, %v10130_v62  ;;  %v10690_v42 = vmax.f32 %v10626_v16, 0.0  ;;  %v13279_v49 = vld [vmem:[%s18147_s12 + $0x40] sm:$0xff]   ;;  %v13280_v53 = vld [vmem:[%s18147_s12 + $0x48] sm:$0xff]  }
 0x765   : > { %v10625_v55 = vadd.f32 %v17570_v56, %v10553_v37  ;;  %v10688_v1 = vmax.f32 %v10624_v19, 0.0  ;;  %11589 = vmatpush1.bf16.msra.mxu0 %v13279_v49 }
 0x766   : > { %v10691_v31 = vmax.f32 %v10627_v61, 0.0  ;;  %v10033_v57 = vadd.f32 %v17267_v11, %v9947_v6  ;;  %v10096_v48 = vmax.f32 %v10032_v14, 0.0  ;;  %11590 = vmatprep.subr.bf16.mxu0 %v19700_v45  ;;  %v19725_v61 = vld [vmem:[#allocation133_spill] sm:$0xff] }
 0x767   : > { %v10689_v23 = vmax.f32 %v10625_v55, 0.0  ;;  %v19726_v55 = vld [vmem:[#allocation130_spill] sm:$0xff] }
 0x768   : > { %v17585_v41 = vpack.c.bf16 %v10691_v31, %v10690_v42  ;;  %v10097_v39 = vmax.f32 %v10033_v57, 0.0 }
 0x769   : > { %v17587_v8 = vpack.c.bf16 %v10689_v23, %v10688_v1  ;;  %v9951_v43 = vpop.f32.mrb[88].mxu0  ;;  %11591 = vmatpush1.bf16.msra.mxu0 %v13280_v53  ;;  %v19727_v1 = vld [vmem:[#allocation110_spill] sm:$0xff] }
 0x76a   : > { %v10131_v46 = vpack.c.bf16 %v10097_v39, %v10096_v48  ;;  %v9952_v36 = vadd.f32 %v9951_v43, %v17433_v29  ;;  %v9953_v3 = vpop.f32.mrb[89].mxu0  ;;  %11592 = vmatprep.subr.bf16.mxu0 %v19700_v45  ;;  %v19728_v43 = vld [vmem:[#allocation132_spill] sm:$0xff] }
 0x76b   : > { %v9954_v32 = vpop.f32.mrb[90].mxu0 }
 0x76c   : > { %v10034_v17 = vadd.f32 %v17267_v11, %v9952_v36  ;;  %v9955_v10 = vadd.f32 %v9954_v32, %v17440_v9  ;;  %v9956_v28 = vpop.f32.mrb[91].mxu0  ;;  %13125 = vmatmul.mubr.msk.bf16.gmra.mrb[88].mxu1 %vm19719_vm9, %v10131_v46 }
 0x76e   : > { %v10035_v18 = vadd.f32 %v17267_v11, %v9955_v10  ;;  %v10098_v52 = vmax.f32 %v10034_v17, 0.0 }
 0x76f   : > { %v13074_v58 = vpop.f32.mrb[36].mxu1 }
 0x770   : > { %v10099_v44 = vmax.f32 %v10035_v18, 0.0  ;;  %v10558_v54 = vadd.f32 %v13074_v58, %v19720_v33  ;;  %v10313_v29 = vpop.f32.mrb[37].mxu1  ;;  %v13281_v58 = vld [vmem:[%s18147_s12 + $0x50] sm:$0xff]  }
 0x771   : > { %v10556_v24 = vadd.f32 %v10313_v29, %v19721_v13  ;;  %v9959_v20 = vpop.f32.mrb[92].mxu0  ;;  %v13075_v51 = vpop.f32.mrb[38].mxu1  ;;  %11593 = vmatpush1.bf16.msra.mxu0 %v13281_v58 }
 0x772   : > { %v10132_v7 = vpack.c.bf16 %v10099_v44, %v10098_v52  ;;  %v10630_v9 = vadd.f32 %v17570_v56, %v10558_v54  ;;  %v9960_v34 = vadd.f32 %v17425_v4, %v9959_v20  ;;  %v10559_v38 = vadd.f32 %v13075_v51, %v19722_v0  ;;  %v9961_v15 = vpop.f32.mrb[93].mxu0  ;;  %v10316_v50 = vpop.f32.mrb[39].mxu1  ;;  %11594 = vmatprep.subr.bf16.mxu0 %v19700_v45  ;;  %v19729_v52 = vld [vmem:[#allocation135_spill] sm:$0xff]  ;;  %v19730_v54 = vld [vmem:[#allocation136_spill] sm:$0xff]  ;;  %v19731_v20 = vld [vmem:[#allocation137_spill] sm:$0xff] }
 0x773   : > { %v10628_v11 = vadd.f32 %v17570_v56, %v10556_v24  ;;  %v10557_v5 = vadd.f32 %v10316_v50, %v19723_v21  ;;  %v9962_v12 = vpop.f32.mrb[94].mxu0 }
 0x774   : > { %v10036_v60 = vadd.f32 %v13289_v35, %v9960_v34  ;;  %v10631_v25 = vadd.f32 %v17570_v56, %v10559_v38  ;;  %v9963_v27 = vadd.f32 %v17437_v30, %v9962_v12  ;;  %v9964_v62 = vpop.f32.mrb[95].mxu0  ;;  %13128 = vmatprep.mubr.msk.bf16.mxu1 %vm19724_vm15, %v10132_v7  ;;  %v10694_v16 = vmax.f32 %v10630_v9, 0.0  ;;  %v19732_v34 = vld [vmem:[#allocation139_spill] sm:$0xff] }
 0x775   : > { %v10629_v4 = vadd.f32 %v17570_v56, %v10557_v5  ;;  %v10692_v63 = vmax.f32 %v10628_v11, 0.0 }
 0x776   : > { %v10695_v47 = vmax.f32 %v10631_v25, 0.0  ;;  %v10037_v2 = vadd.f32 %v13289_v35, %v9963_v27  ;;  %v10100_v40 = vmax.f32 %v10036_v60, 0.0  ;;  %v13282_v35 = vld [vmem:[%s18147_s12 + $0x58] sm:$0xff]   ;;  %v19733_v25 = vld [vmem:[#allocation140_spill] sm:$0xff] }
 0x777   : > { %v10693_v59 = vmax.f32 %v10629_v4, 0.0  ;;  %11595 = vmatpush1.bf16.msra.mxu0 %v13282_v35  ;;  %v19734_v4 = vld [vmem:[#allocation138_spill] sm:$0xff] }
 0x778   : > { %v10755_v19 = vpack.c.bf16 %v10695_v47, %v10694_v16  ;;  %v10101_v22 = vmax.f32 %v10037_v2, 0.0  ;;  %11596 = vmatprep.subr.bf16.mxu0 %v19700_v45 }
 0x779   : > { %v10754_v37 = vpack.c.bf16 %v10693_v59, %v10692_v63  ;;  %v19735_v63 = vld [vmem:[#allocation142_spill] sm:$0xff] }
 0x77a   : > { %v10133_v14 = vpack.c.bf16 %v10101_v22, %v10100_v40 }
 0x77c   : > { %13129 = vmatmul.mubr.msk.bf16.gmra.mrb[92].mxu1 %vm19651_vm0, %v10133_v14 }
 0x77d   : > { %10924 = vmatprep.mubr.bf16.mxu1 %v19700_v45 }
 0x77f   : > { %v13078_v30 = vpop.f32.mrb[40].mxu1 }
 0x780   : > { %v10562_v6 = vadd.f32 %v13078_v30, %v19725_v61  ;;  %v10329_v26 = vpop.f32.mrb[41].mxu1 }
 0x781   : > { %v10560_v42 = vadd.f32 %v10329_v26, %v19726_v55  ;;  %v13079_v31 = vpop.f32.mrb[42].mxu1 }
 0x782   : > { %v10634_v57 = vadd.f32 %v17570_v56, %v10562_v6  ;;  %v10563_v23 = vadd.f32 %v13079_v31, %v19727_v1  ;;  %v10332_v48 = vpop.f32.mrb[43].mxu1  ;;  %v13283_v31 = vld [vmem:[%s18147_s12 + $0x60] sm:$0xff]   ;;  %v19737_v1 = vld [vmem:[#allocation143_spill] sm:$0xff] }
 0x783   : > { %v10632_v39 = vadd.f32 %v17570_v56, %v10560_v42  ;;  %v10561_v49 = vadd.f32 %v10332_v48, %v19728_v43  ;;  %11597 = vmatpush1.bf16.msra.mxu0 %v13283_v31 }
 0x784   : > { %v10635_v46 = vadd.f32 %v17570_v56, %v10563_v23  ;;  %10925 = vmatmul.mubr.bf16.vlgmr.msra.gmra.mrb[96].mxu1 %v17587_v8  ;;  %v10698_v3 = vmax.f32 %v10634_v57, 0.0  ;;  %11598 = vmatprep.subr.bf16.mxu0 %v19700_v45 }
 0x785   : > { %v10633_v36 = vadd.f32 %v17570_v56, %v10561_v49  ;;  %10934 = vmatprep.mubr.bf16.mxu1 %v19700_v45  ;;  %v10696_v17 = vmax.f32 %v10632_v39, 0.0  ;;  %v19738_v39 = vld [vmem:[#allocation141_spill] sm:$0xff] }
 0x786   : > { %v10699_v32 = vmax.f32 %v10635_v46, 0.0 }
 0x787   : > { %v10697_v10 = vmax.f32 %v10633_v36, 0.0  ;;  %v19739_v36 = vld [vmem:[#allocation146_spill] sm:$0xff] }
 0x788   : > { %v10757_v28 = vpack.c.bf16 %v10699_v32, %v10698_v3 }
 0x789   : > { %v10756_v18 = vpack.c.bf16 %v10697_v10, %v10696_v17  ;;  %v19740_v10 = vld [vmem:[#allocation145_spill] sm:$0xff] }
 0x78c   : > { %10935 = vmatmul.mubr.bf16.gmra.mrb[100].mxu1 %v17585_v41 }
 0x78d   : > { %10944 = vmatprep.mubr.bf16.mxu1 %v19700_v45 }
 0x78f   : > { %v13082_v8 = vpop.f32.mrb[44].mxu1 }
 0x790   : > { %v10566_v44 = vadd.f32 %v13082_v8, %v19729_v52  ;;  %v10345_v33 = vpop.f32.mrb[45].mxu1 }
 0x791   : > { %v10564_v29 = vadd.f32 %v10345_v33, %v19730_v54  ;;  %v13083_v13 = vpop.f32.mrb[46].mxu1 }
 0x792   : > { %v10638_v24 = vadd.f32 %v17570_v56, %v10566_v44  ;;  %v10567_v51 = vadd.f32 %v13083_v13, %v19731_v20  ;;  %v10348_v7 = vpop.f32.mrb[47].mxu1  ;;  %v13284_v13 = vld [vmem:[%s18147_s12 + $0x68] sm:$0xff]   ;;  %v19741_v20 = vld [vmem:[#allocation148_spill] sm:$0xff] }
 0x793   : > { %v10636_v9 = vadd.f32 %v17570_v56, %v10564_v29  ;;  %v10565_v41 = vadd.f32 %v10348_v7, %v19732_v34  ;;  %11599 = vmatpush1.bf16.msra.mxu0 %v13284_v13 }
 0x794   : > { %v10639_v0 = vadd.f32 %v17570_v56, %v10567_v51  ;;  %10945 = vmatmul.mubr.bf16.gmra.mrb[104].mxu1 %v10754_v37  ;;  %v10702_v15 = vmax.f32 %v10638_v24, 0.0  ;;  %v19736_v37 = vld [vmem:[#allocation117_spill] sm:$0xff]  ;;  %11600 = vmatprep.subr.bf16.mxu0 %v19700_v45 }
 0x795   : > { %v10637_v38 = vadd.f32 %v17570_v56, %v10565_v41  ;;  %10954 = vmatprep.mubr.bf16.mxu1 %v19700_v45  ;;  %v10700_v11 = vmax.f32 %v10636_v9, 0.0  ;;  %v19742_v9 = vld [vmem:[#allocation147_spill] sm:$0xff] }
 0x796   : > { %v10703_v50 = vmax.f32 %v10639_v0, 0.0 }
 0x797   : > { %v10701_v21 = vmax.f32 %v10637_v38, 0.0  ;;  %v19743_v38 = vld [vmem:[#allocation122_spill] sm:$0xff] }
 0x798   : > { %v10759_v5 = vpack.c.bf16 %v10703_v50, %v10702_v15 }
 0x799   : > { %v10758_v12 = vpack.c.bf16 %v10701_v21, %v10700_v11  ;;  %v19744_v21 = vld [vmem:[#allocation121_spill] sm:$0xff] }
 0x79c   : > { %10955 = vmatmul.mubr.bf16.gmra.mrb[108].mxu1 %v10755_v19 }
 0x79d   : > { %10964 = vmatprep.mubr.bf16.mxu1 %v19700_v45 }
 0x79f   : > { %v13086_v60 = vpop.f32.mrb[48].mxu1 }
 0x7a0   : > { %v10570_v27 = vadd.f32 %v13086_v60, %v19733_v25  ;;  %v10361_v62 = vpop.f32.mrb[49].mxu1 }
 0x7a1   : > { %v10568_v16 = vadd.f32 %v10361_v62, %v19734_v4  ;;  %v13087_v47 = vpop.f32.mrb[50].mxu1 }
 0x7a2   : > { %v10642_v2 = vadd.f32 %v17570_v56, %v10570_v27  ;;  %v10571_v59 = vadd.f32 %v13087_v47, %v19735_v63  ;;  %v10364_v40 = vpop.f32.mrb[51].mxu1  ;;  %v13285_v47 = vld [vmem:[%s18147_s12 + $0x70] sm:$0xff]  }
 0x7a3   : > { %v10640_v22 = vadd.f32 %v17570_v56, %v10568_v16  ;;  %v10569_v19 = vadd.f32 %v10364_v40, %v19736_v37  ;;  %11601 = vmatpush1.bf16.msra.mxu0 %v13285_v47  ;;  %v19745_v63 = vld [vmem:[#allocation152_spill] sm:$0xff] }
 0x7a4   : > { %v10643_v53 = vadd.f32 %v17570_v56, %v10571_v59  ;;  %10965 = vmatmul.mubr.bf16.gmra.mrb[112].mxu1 %v10756_v18  ;;  %v10706_v30 = vmax.f32 %v10642_v2, 0.0  ;;  %11602 = vmatprep.subr.bf16.mxu0 %v19700_v45 }
 0x7a5   : > { %v10641_v14 = vadd.f32 %v17570_v56, %v10569_v19  ;;  %10974 = vmatprep.mubr.bf16.mxu1 %v19700_v45  ;;  %v10704_v6 = vmax.f32 %v10640_v22, 0.0  ;;  %v19746_v22 = vld [vmem:[#allocation149_spill] sm:$0xff] }
 0x7a6   : > { %v10707_v61 = vmax.f32 %v10643_v53, 0.0 }
 0x7a7   : > { %v10705_v26 = vmax.f32 %v10641_v14, 0.0  ;;  %v19747_v14 = vld [vmem:[#allocation123_spill] sm:$0xff] }
 0x7a8   : > { %v10761_v55 = vpack.c.bf16 %v10707_v61, %v10706_v30 }
 0x7a9   : > { %v10760_v42 = vpack.c.bf16 %v10705_v26, %v10704_v6  ;;  %v19748_v26 = vld [vmem:[#allocation151_spill] sm:$0xff] }
 0x7ac   : > { %10975 = vmatmul.mubr.bf16.gmra.mrb[116].mxu1 %v10757_v28 }
 0x7ad   : > { %10984 = vmatprep.mubr.bf16.mxu1 %v19700_v45 }
 0x7af   : > { %v13090_v57 = vpop.f32.mrb[52].mxu1 }
 0x7b0   : > { %v10574_v23 = vadd.f32 %v13090_v57, %v19737_v1  ;;  %v10377_v48 = vpop.f32.mrb[53].mxu1 }
 0x7b1   : > { %v10572_v43 = vadd.f32 %v10377_v48, %v19738_v39  ;;  %v13091_v49 = vpop.f32.mrb[54].mxu1 }
 0x7b2   : > { %v10646_v46 = vadd.f32 %v17570_v56, %v10574_v23  ;;  %v10575_v3 = vadd.f32 %v13091_v49, %v19739_v36  ;;  %v10380_v32 = vpop.f32.mrb[55].mxu1  ;;  %v13286_v49 = vld [vmem:[%s18147_s12 + $0x78] sm:$0xff]   ;;  %v19749_v36 = vld [vmem:[#allocation156_spill] sm:$0xff] }
 0x7b3   : > { %v10644_v17 = vadd.f32 %v17570_v56, %v10572_v43  ;;  %v10573_v28 = vadd.f32 %v10380_v32, %v19740_v10  ;;  %11603 = vmatpush1.bf16.msra.mxu0 %v13286_v49 }
 0x7b4   : > { %v10647_v18 = vadd.f32 %v17570_v56, %v10575_v3  ;;  %10985 = vmatmul.mubr.bf16.gmra.mrb[120].mxu1 %v10758_v12  ;;  %v10710_v8 = vmax.f32 %v10646_v46, 0.0 }
 0x7b5   : > { %v10645_v58 = vadd.f32 %v17570_v56, %v10573_v28  ;;  %10994 = vmatprep.mubr.bf16.mxu1 %v19700_v45  ;;  %v10708_v44 = vmax.f32 %v10644_v17, 0.0  ;;  %v19750_v17 = vld [vmem:[#allocation153_spill] sm:$0xff] }
 0x7b6   : > { %v10711_v52 = vmax.f32 %v10647_v18, 0.0 }
 0x7b7   : > { %v10709_v33 = vmax.f32 %v10645_v58, 0.0  ;;  %v19751_v58 = vld [vmem:[#allocation5_spill] sm:$0xff] }
 0x7b8   : > { %v10763_v54 = vpack.c.bf16 %v10711_v52, %v10710_v8 }
 0x7b9   : > { %v10762_v29 = vpack.c.bf16 %v10709_v33, %v10708_v44  ;;  %v19752_v33 = vld [vmem:[#allocation2_spill] sm:$0xff] }
 0x7bc   : > { %10995 = vmatmul.mubr.bf16.gmra.mrb[124].mxu1 %v10759_v5 }
 0x7bd   : > { %11004 = vmatprep.mubr.bf16.mxu1 %v19700_v45 }
 0x7bf   : > { %v13094_v24 = vpop.f32.mrb[56].mxu1 }
 0x7c0   : > { %v10578_v51 = vadd.f32 %v13094_v24, %v19741_v20  ;;  %v10393_v7 = vpop.f32.mrb[57].mxu1 }
 0x7c1   : > { %v10576_v34 = vadd.f32 %v10393_v7, %v19742_v9  ;;  %v13095_v41 = vpop.f32.mrb[58].mxu1 }
 0x7c2   : > { %v10650_v0 = vadd.f32 %v17570_v56, %v10578_v51  ;;  %v10579_v15 = vadd.f32 %v13095_v41, %v19743_v38  ;;  %v10396_v50 = vpop.f32.mrb[59].mxu1 }
 0x7c3   : > { %v10648_v11 = vadd.f32 %v17570_v56, %v10576_v34  ;;  %v10577_v5 = vadd.f32 %v10396_v50, %v19744_v21  ;;  %v19754_v50 = vld [vmem:[#allocation155_spill] sm:$0xff] }
 0x7c4   : > { %v10651_v12 = vadd.f32 %v17570_v56, %v10579_v15  ;;  %11005 = vmatmul.mubr.bf16.gmra.mrb[128].mxu1 %v10760_v42  ;;  %v10714_v60 = vmax.f32 %v10650_v0, 0.0  ;;  %v19753_v0 = vld [vmem:[#allocation157_spill] sm:$0xff] }
 0x7c5   : > { %v10649_v35 = vadd.f32 %v17570_v56, %v10577_v5  ;;  %11014 = vmatprep.mubr.bf16.mxu1 %v19700_v45  ;;  %v10712_v27 = vmax.f32 %v10648_v11, 0.0 }
 0x7c6   : > { %v10715_v25 = vmax.f32 %v10651_v12, 0.0  ;;  %v19755_v12 = vld [vmem:[#allocation4_spill] sm:$0xff] }
 0x7c7   : > { %v10713_v62 = vmax.f32 %v10649_v35, 0.0 }
 0x7c8   : > { %v10765_v4 = vpack.c.bf16 %v10715_v25, %v10714_v60 }
 0x7c9   : > { %v10764_v16 = vpack.c.bf16 %v10713_v62, %v10712_v27  ;;  %v19756_v27 = vld [vmem:[#allocation9_spill] sm:$0xff] }
 0x7cc   : > { %11015 = vmatmul.mubr.bf16.gmra.mrb[132].mxu1 %v10761_v55 }
 0x7cd   : > { %11024 = vmatprep.mubr.bf16.mxu1 %v19700_v45 }
 0x7cf   : > { %v13098_v2 = vpop.f32.mrb[60].mxu1 }
 0x7d0   : > { %v10582_v59 = vadd.f32 %v13098_v2, %v19745_v63  ;;  %v10409_v40 = vpop.f32.mrb[61].mxu1 }
 0x7d1   : > { %v10580_v37 = vadd.f32 %v10409_v40, %v19746_v22  ;;  %v13099_v19 = vpop.f32.mrb[62].mxu1 }
 0x7d2   : > { %v10654_v53 = vadd.f32 %v17570_v56, %v10582_v59  ;;  %v10583_v30 = vadd.f32 %v13099_v19, %v19747_v14  ;;  %v10412_v61 = vpop.f32.mrb[63].mxu1  ;;  %v19757_v19 = vld [vmem:[#allocation7_spill] sm:$0xff] }
 0x7d3   : > { %v10652_v6 = vadd.f32 %v17570_v56, %v10580_v37  ;;  %v10581_v55 = vadd.f32 %v10412_v61, %v19748_v26 }
 0x7d4   : > { %v10655_v42 = vadd.f32 %v17570_v56, %v10583_v30  ;;  %11025 = vmatmul.mubr.bf16.gmra.mrb[136].mxu1 %v10762_v29  ;;  %v10718_v57 = vmax.f32 %v10654_v53, 0.0  ;;  %v19758_v30 = vld [vmem:[#allocation3_spill] sm:$0xff] }
 0x7d5   : > { %v10653_v31 = vadd.f32 %v17570_v56, %v10581_v55  ;;  %11034 = vmatprep.mubr.bf16.mxu1 %v19700_v45  ;;  %v10716_v23 = vmax.f32 %v10652_v6, 0.0  ;;  %v19759_v55 = vld [vmem:[#allocation8_spill] sm:$0xff] }
 0x7d6   : > { %v10719_v1 = vmax.f32 %v10655_v42, 0.0 }
 0x7d7   : > { %v10717_v48 = vmax.f32 %v10653_v31, 0.0 }
 0x7d8   : > { %v10767_v39 = vpack.c.bf16 %v10719_v1, %v10718_v57  ;;  %v19760_v1 = vld [vmem:[#allocation6_spill] sm:$0xff] }
 0x7d9   : > { %v10766_v43 = vpack.c.bf16 %v10717_v48, %v10716_v23 }
 0x7dc   : > { %11035 = vmatmul.mubr.bf16.gmra.mrb[140].mxu1 %v10763_v54 }
 0x7dd   : > { %11044 = vmatprep.mubr.bf16.mxu1 %v19700_v45 }
 0x7df   : > { %v13102_v46 = vpop.f32.mrb[64].mxu1 }
 0x7e0   : > { %v10586_v3 = vadd.f32 %v13102_v46, %v19749_v36  ;;  %v10425_v32 = vpop.f32.mrb[65].mxu1 }
 0x7e1   : > { %v10584_v10 = vadd.f32 %v10425_v32, %v19750_v17  ;;  %v13103_v28 = vpop.f32.mrb[66].mxu1 }
 0x7e2   : > { %v10658_v18 = vadd.f32 %v17570_v56, %v10586_v3  ;;  %v10587_v8 = vadd.f32 %v13103_v28, %v19751_v58  ;;  %v10428_v52 = vpop.f32.mrb[67].mxu1  ;;  %v19762_v58 = vld [vmem:[#allocation11_spill] sm:$0xff] }
 0x7e3   : > { %v10656_v44 = vadd.f32 %v17570_v56, %v10584_v10  ;;  %v10585_v29 = vadd.f32 %v10428_v52, %v19752_v33  ;;  %v19761_v10 = vld [vmem:[#allocation13_spill] sm:$0xff]  ;;  %v19763_v33 = vld [vmem:[#allocation12_spill] sm:$0xff] }
 0x7e4   : > { %v10659_v54 = vadd.f32 %v17570_v56, %v10587_v8  ;;  %11045 = vmatmul.mubr.bf16.gmra.mrb[144].mxu1 %v10764_v16  ;;  %v10722_v24 = vmax.f32 %v10658_v18, 0.0 }
 0x7e5   : > { %v10657_v13 = vadd.f32 %v17570_v56, %v10585_v29  ;;  %11054 = vmatprep.mubr.bf16.mxu1 %v19700_v45  ;;  %v10720_v51 = vmax.f32 %v10656_v44, 0.0 }
 0x7e6   : > { %v10723_v20 = vmax.f32 %v10659_v54, 0.0 }
 0x7e7   : > { %v10721_v7 = vmax.f32 %v10657_v13, 0.0 }
 0x7e8   : > { %v10769_v9 = vpack.c.bf16 %v10723_v20, %v10722_v24  ;;  %v19764_v24 = vld [vmem:[#allocation10_spill] sm:$0xff] }
 0x7e9   : > { %v10768_v34 = vpack.c.bf16 %v10721_v7, %v10720_v51 }
 0x7ec   : > { %11055 = vmatmul.mubr.bf16.gmra.mrb[148].mxu1 %v10765_v4 }
 0x7ed   : > { %11064 = vmatprep.mubr.bf16.mxu1 %v19700_v45 }
 0x7ef   : > { %v13106_v41 = vpop.f32.mrb[68].mxu1 }
 0x7f0   : > { %v10590_v38 = vadd.f32 %v13106_v41, %v19753_v0  ;;  %v10441_v15 = vpop.f32.mrb[69].mxu1 }
 0x7f1   : > { %v10588_v11 = vadd.f32 %v10441_v15, %v19754_v50  ;;  %v13107_v21 = vpop.f32.mrb[70].mxu1 }
 0x7f2   : > { %v10662_v5 = vadd.f32 %v17570_v56, %v10590_v38  ;;  %v10591_v35 = vadd.f32 %v13107_v21, %v19755_v12  ;;  %v10444_v60 = vpop.f32.mrb[71].mxu1  ;;  %v19766_v12 = vld [vmem:[#allocation14_spill] sm:$0xff] }
 0x7f3   : > { %v10660_v25 = vadd.f32 %v17570_v56, %v10588_v11  ;;  %v10589_v62 = vadd.f32 %v10444_v60, %v19756_v27  ;;  %v19765_v11 = vld [vmem:[#allocation15_spill] sm:$0xff]  ;;  %v19767_v27 = vld [vmem:[#allocation16_spill] sm:$0xff] }
 0x7f4   : > { %v10663_v4 = vadd.f32 %v17570_v56, %v10591_v35  ;;  %11065 = vmatmul.mubr.bf16.gmra.mrb[152].mxu1 %v10766_v43  ;;  %v10726_v47 = vmax.f32 %v10662_v5, 0.0 }
 0x7f5   : > { %v10661_v16 = vadd.f32 %v17570_v56, %v10589_v62  ;;  %11074 = vmatprep.mubr.bf16.mxu1 %v19700_v45  ;;  %v10724_v63 = vmax.f32 %v10660_v25, 0.0 }
 0x7f6   : > { %v10727_v2 = vmax.f32 %v10663_v4, 0.0 }
 0x7f7   : > { %v10725_v59 = vmax.f32 %v10661_v16, 0.0 }
 0x7f8   : > { %v10771_v40 = vpack.c.bf16 %v10727_v2, %v10726_v47  ;;  %v19768_v47 = vld [vmem:[#allocation17_spill] sm:$0xff] }
 0x7f9   : > { %v10770_v22 = vpack.c.bf16 %v10725_v59, %v10724_v63 }
 0x7fc   : > { %11075 = vmatmul.mubr.bf16.gmra.mrb[156].mxu1 %v10767_v39 }
 0x7fd   : > { %11084 = vmatprep.mubr.bf16.mxu1 %v19700_v45 }
 0x7ff   : > { %v13110_v37 = vpop.f32.mrb[72].mxu1 }
 0x800   : > { %v10594_v53 = vadd.f32 %v13110_v37, %v19757_v19  ;;  %v10457_v14 = vpop.f32.mrb[73].mxu1 }
 0x801   : > { %v10592_v61 = vadd.f32 %v10457_v14, %v19758_v30  ;;  %v13111_v6 = vpop.f32.mrb[74].mxu1 }
 0x802   : > { %v10666_v26 = vadd.f32 %v17570_v56, %v10594_v53  ;;  %v10595_v42 = vadd.f32 %v13111_v6, %v19759_v55  ;;  %v10460_v31 = vpop.f32.mrb[75].mxu1  ;;  %v19770_v55 = vld [vmem:[#allocation18_spill] sm:$0xff] }
 0x803   : > { %v10664_v57 = vadd.f32 %v17570_v56, %v10592_v61  ;;  %v10593_v23 = vadd.f32 %v10460_v31, %v19760_v1  ;;  %v19769_v61 = vld [vmem:[#allocation19_spill] sm:$0xff]  ;;  %v19771_v1 = vld [vmem:[#allocation20_spill] sm:$0xff] }
 0x804   : > { %v10667_v48 = vadd.f32 %v17570_v56, %v10595_v42  ;;  %11085 = vmatmul.mubr.bf16.gmra.mrb[160].mxu1 %v10768_v34  ;;  %v10730_v43 = vmax.f32 %v10666_v26, 0.0 }
 0x805   : > { %v10665_v39 = vadd.f32 %v17570_v56, %v10593_v23  ;;  %11094 = vmatprep.mubr.bf16.mxu1 %v19700_v45  ;;  %v10728_v46 = vmax.f32 %v10664_v57, 0.0 }
 0x806   : > { %v10731_v49 = vmax.f32 %v10667_v48, 0.0 }
 0x807   : > { %v10729_v36 = vmax.f32 %v10665_v39, 0.0 }
 0x808   : > { %v10773_v3 = vpack.c.bf16 %v10731_v49, %v10730_v43  ;;  %v19772_v43 = vld [vmem:[#allocation21_spill] sm:$0xff] }
 0x809   : > { %v10772_v32 = vpack.c.bf16 %v10729_v36, %v10728_v46 }
 0x80c   : > { %11095 = vmatmul.mubr.bf16.gmra.mrb[164].mxu1 %v10769_v9 }
 0x80d   : > { %11104 = vmatprep.mubr.bf16.mxu1 %v19700_v45 }
 0x80f   : > { %v13114_v17 = vpop.f32.mrb[76].mxu1 }
 0x810   : > { %v10598_v28 = vadd.f32 %v13114_v17, %v19761_v10  ;;  %v10473_v18 = vpop.f32.mrb[77].mxu1 }
 0x811   : > { %v10596_v8 = vadd.f32 %v10473_v18, %v19762_v58  ;;  %v13115_v52 = vpop.f32.mrb[78].mxu1 }
 0x812   : > { %v10670_v44 = vadd.f32 %v17570_v56, %v10598_v28  ;;  %v10599_v29 = vadd.f32 %v13115_v52, %v19763_v33  ;;  %v10476_v54 = vpop.f32.mrb[79].mxu1  ;;  %v19774_v33 = vld [vmem:[#allocation22_spill] sm:$0xff] }
 0x813   : > { %v10668_v13 = vadd.f32 %v17570_v56, %v10596_v8  ;;  %v10597_v20 = vadd.f32 %v10476_v54, %v19764_v24  ;;  %v19773_v8 = vld [vmem:[#allocation23_spill] sm:$0xff]  ;;  %v19775_v24 = vld [vmem:[#allocation24_spill] sm:$0xff] }
 0x814   : > { %v10671_v51 = vadd.f32 %v17570_v56, %v10599_v29  ;;  %11105 = vmatmul.mubr.bf16.gmra.mrb[168].mxu1 %v10770_v22  ;;  %v10734_v9 = vmax.f32 %v10670_v44, 0.0 }
 0x815   : > { %v10669_v7 = vadd.f32 %v17570_v56, %v10597_v20  ;;  %11114 = vmatprep.mubr.bf16.mxu1 %v19700_v45  ;;  %v10732_v41 = vmax.f32 %v10668_v13, 0.0 }
 0x816   : > { %v10735_v34 = vmax.f32 %v10671_v51, 0.0 }
 0x817   : > { %v10733_v0 = vmax.f32 %v10669_v7, 0.0 }
 0x818   : > { %v10775_v38 = vpack.c.bf16 %v10735_v34, %v10734_v9  ;;  %v19776_v9 = vld [vmem:[#allocation25_spill] sm:$0xff] }
 0x819   : > { %v10774_v15 = vpack.c.bf16 %v10733_v0, %v10732_v41 }
 0x81c   : > { %11115 = vmatmul.mubr.bf16.gmra.mrb[172].mxu1 %v10771_v40 }
 0x81d   : > { %11124 = vmatprep.mubr.bf16.mxu1 %v19700_v45 }
 0x81f   : > { %v13118_v50 = vpop.f32.mrb[80].mxu1 }
 0x820   : > { %v10602_v21 = vadd.f32 %v13118_v50, %v19765_v11  ;;  %v10489_v5 = vpop.f32.mrb[81].mxu1 }
 0x821   : > { %v10600_v35 = vadd.f32 %v10489_v5, %v19766_v12  ;;  %v13119_v60 = vpop.f32.mrb[82].mxu1 }
 0x822   : > { %v10674_v25 = vadd.f32 %v17570_v56, %v10602_v21  ;;  %v10603_v62 = vadd.f32 %v13119_v60, %v19767_v27  ;;  %v10492_v4 = vpop.f32.mrb[83].mxu1  ;;  %v19778_v27 = vld [vmem:[#allocation66_spill] sm:$0xff] }
 0x823   : > { %v10672_v16 = vadd.f32 %v17570_v56, %v10600_v35  ;;  %v10601_v2 = vadd.f32 %v10492_v4, %v19768_v47  ;;  %v19777_v35 = vld [vmem:[#allocation27_spill] sm:$0xff]  ;;  %v19779_v4 = vld [vmem:[#allocation26_spill] sm:$0xff] }
 0x824   : > { %v10675_v63 = vadd.f32 %v17570_v56, %v10603_v62  ;;  %11125 = vmatmul.mubr.bf16.gmra.mrb[176].mxu1 %v10772_v32  ;;  %v10738_v40 = vmax.f32 %v10674_v25, 0.0  ;;  %v10804_v62 = vsub.s32 0, %v19778_v27 }
 0x825   : > { %v10673_v59 = vadd.f32 %v17570_v56, %v10601_v2  ;;  %11134 = vmatprep.mubr.bf16.mxu1 %v19700_v45  ;;  %v10736_v37 = vmax.f32 %v10672_v16, 0.0  ;;  %v10800_v2 = vld [vmem:[%s18146_s11] sm:$0x3] }
 0x826   : > { %v10739_v22 = vmax.f32 %v10675_v63, 0.0  ;;  %v10808_v63 = vsub.s32 1, %v19778_v27 }
 0x827   : > { %v10737_v19 = vmax.f32 %v10673_v59, 0.0 }
 0x828   : > { %v10777_v53 = vpack.c.bf16 %v10739_v22, %v10738_v40  ;;  %v19780_v40 = vld [vmem:[#allocation28_spill] sm:$0xff] }
 0x829   : > { %v10776_v14 = vpack.c.bf16 %v10737_v19, %v10736_v37 }
 0x82c   : > { %11135 = vmatmul.mubr.bf16.gmra.mrb[180].mxu1 %v10773_v3 }
 0x82d   : > { %11144 = vmatprep.mubr.bf16.mxu1 %v19700_v45 }
 0x82f   : > { %v13122_v30 = vpop.f32.mrb[84].mxu1 }
 0x830   : > { %v10606_v6 = vadd.f32 %v13122_v30, %v19769_v61  ;;  %v10505_v26 = vpop.f32.mrb[85].mxu1  ;;  %v17787_v61 = vrot.slane %v10800_v2, %v10804_v62 }
 0x831   : > { %v10604_v42 = vadd.f32 %v10505_v26, %v19770_v55  ;;  %v13123_v31 = vpop.f32.mrb[86].mxu1  ;;  %v17790_v26 = vrot.slane %v10800_v2, %v10808_v63 }
 0x832   : > { %v10678_v57 = vadd.f32 %v17570_v56, %v10606_v6  ;;  %v10607_v23 = vadd.f32 %v13123_v31, %v19771_v1  ;;  %v10508_v48 = vpop.f32.mrb[87].mxu1 }
 0x833   : > { %v10676_v39 = vadd.f32 %v17570_v56, %v10604_v42  ;;  %v10605_v49 = vadd.f32 %v10508_v48, %v19772_v43 }
 0x834   : > { %v10679_v46 = vadd.f32 %v17570_v56, %v10607_v23  ;;  %11145 = vmatmul.mubr.bf16.gmra.mrb[184].mxu1 %v10774_v15  ;;  %v10742_v3 = vmax.f32 %v10678_v57, 0.0 }
 0x835   : > { %v10677_v36 = vadd.f32 %v17570_v56, %v10605_v49  ;;  %11154 = vmatprep.mubr.bf16.mxu1 %v19700_v45  ;;  %v10740_v17 = vmax.f32 %v10676_v39, 0.0 }
 0x836   : > { %v10743_v32 = vmax.f32 %v10679_v46, 0.0 }
 0x837   : > { %v10741_v10 = vmax.f32 %v10677_v36, 0.0 }
 0x838   : > { %v10779_v28 = vpack.c.bf16 %v10743_v32, %v10742_v3 }
 0x839   : > { %v10778_v18 = vpack.c.bf16 %v10741_v10, %v10740_v17 }
 0x83c   : > { %11155 = vmatmul.mubr.bf16.gmra.mrb[188].mxu1 %v10775_v38 }
 0x83d   : > { %11164 = vmatprep.mubr.bf16.mxu1 %v19700_v45 }
 0x83f   : > { %v13126_v58 = vpop.f32.mrb[88].mxu1 }
 0x840   : > { %v10610_v52 = vadd.f32 %v13126_v58, %v19773_v8  ;;  %v10521_v44 = vpop.f32.mrb[89].mxu1 }
 0x841   : > { %v10608_v29 = vadd.f32 %v10521_v44, %v19774_v33  ;;  %v13127_v54 = vpop.f32.mrb[90].mxu1 }
 0x842   : > { %v10682_v13 = vadd.f32 %v17570_v56, %v10610_v52  ;;  %v10611_v20 = vadd.f32 %v13127_v54, %v19775_v24  ;;  %v10524_v51 = vpop.f32.mrb[91].mxu1 }
 0x843   : > { %v10680_v7 = vadd.f32 %v17570_v56, %v10608_v29  ;;  %v10609_v34 = vadd.f32 %v10524_v51, %v19776_v9 }
 0x844   : > { %v10683_v41 = vadd.f32 %v17570_v56, %v10611_v20  ;;  %11165 = vmatmul.mubr.bf16.gmra.mrb[192].mxu1 %v10776_v14  ;;  %v10746_v38 = vmax.f32 %v10682_v13, 0.0 }
 0x845   : > { %v10681_v0 = vadd.f32 %v17570_v56, %v10609_v34  ;;  %11174 = vmatprep.mubr.bf16.mxu1 %v19700_v45  ;;  %v10744_v50 = vmax.f32 %v10680_v7, 0.0 }
 0x846   : > { %v10747_v15 = vmax.f32 %v10683_v41, 0.0 }
 0x847   : > { %v10745_v11 = vmax.f32 %v10681_v0, 0.0 }
 0x848   : > { %v17772_v21 = vpack.c.bf16 %v10747_v15, %v10746_v38 }
 0x849   : > { %v10780_v5 = vpack.c.bf16 %v10745_v11, %v10744_v50 }
 0x84c   : > { %11175 = vmatmul.mubr.bf16.gmra.mrb[196].mxu1 %v10777_v53  ;;  %v19781_v53 = vld [vmem:[#allocation29_spill] sm:$0xff] }
 0x84d   : > { %11184 = vmatprep.mubr.bf16.mxu1 %v19700_v45 }
 0x84f   : > { %v13130_v12 = vpop.f32.mrb[92].mxu1 }
 0x850   : > { %v10614_v60 = vadd.f32 %v13130_v12, %v19777_v35  ;;  %v10537_v25 = vpop.f32.mrb[93].mxu1 }
 0x851   : > { %v10612_v16 = vadd.f32 %v10537_v25, %v19779_v4  ;;  %v13131_v47 = vpop.f32.mrb[94].mxu1 }
 0x852   : > { %v10686_v59 = vadd.f32 %v17570_v56, %v10614_v60  ;;  %v10615_v22 = vadd.f32 %v13131_v47, %v19780_v40  ;;  %v10540_v37 = vpop.f32.mrb[95].mxu1 }
 0x853   : > { %v10684_v19 = vadd.f32 %v17570_v56, %v10612_v16  ;;  %v10613_v14 = vadd.f32 %v10540_v37, %v19781_v53 }
 0x854   : > { %v10687_v30 = vadd.f32 %v17570_v56, %v10615_v22  ;;  %11185 = vmatmul.mubr.bf16.gmra.mrb[200].mxu1 %v10778_v18  ;;  %v10750_v55 = vmax.f32 %v10686_v59, 0.0 }
 0x855   : > { %v10685_v6 = vadd.f32 %v17570_v56, %v10613_v14  ;;  %11194 = vmatprep.mubr.bf16.mxu1 %v19700_v45  ;;  %v10748_v31 = vmax.f32 %v10684_v19, 0.0 }
 0x856   : > { %v10751_v42 = vmax.f32 %v10687_v30, 0.0 }
 0x857   : > { %v10749_v57 = vmax.f32 %v10685_v6, 0.0  ;;  %v10926_v1 = vpop.f32.mrb[96].mxu1 }
 0x858   : > { %v17793_v23 = vpack.c.bf16 %v10751_v42, %v10750_v55  ;;  %v10927_v48 = vadd.f32 %v10926_v1, %v17787_v61  ;;  %v10928_v39 = vpop.f32.mrb[97].mxu1 }
 0x859   : > { %v10782_v43 = vpack.c.bf16 %v10749_v57, %v10748_v31  ;;  %v10929_v49 = vadd.f32 %v10928_v39, %v17790_v26  ;;  %v10930_v46 = vpop.f32.mrb[98].mxu1 }
 0x85a   : > { %v10931_v56 = vadd.f32 %v10930_v46, %v17787_v61  ;;  %v10932_v36 = vpop.f32.mrb[99].mxu1  ;;  %v11245_v32 = vmax.f32 %v10927_v48, 0.0 }
 0x85b   : > { %v10933_v3 = vadd.f32 %v10932_v36, %v17790_v26  ;;  %v11246_v10 = vmax.f32 %v10929_v49, 0.0 }
 0x85c   : > { %v11247_v17 = vmax.f32 %v10931_v56, 0.0  ;;  %11195 = vmatmul.mubr.bf16.gmra.mrb[204].mxu1 %v10779_v28 }
 0x85d   : > { %v11248_v18 = vmax.f32 %v10933_v3, 0.0  ;;  %11204 = vmatprep.mubr.bf16.mxu1 %v19700_v45 }
 0x85e   : > { %v11373_v58 = vpack.c.bf16 %v11247_v17, %v11245_v32 }
 0x85f   : > { %v11374_v8 = vpack.c.bf16 %v11248_v18, %v11246_v10  ;;  %v10936_v52 = vpop.f32.mrb[100].mxu1 }
 0x860   : > { %v10937_v44 = vadd.f32 %v10936_v52, %v17787_v61  ;;  %v10938_v33 = vpop.f32.mrb[101].mxu1 }
 0x861   : > { %v10939_v29 = vadd.f32 %v10938_v33, %v17790_v26  ;;  %v10940_v54 = vpop.f32.mrb[102].mxu1  ;;  %11604 = vmatprep.mubr.bf16.mxu0 %v11374_v8 }
 0x862   : > { %v10941_v13 = vadd.f32 %v10940_v54, %v17787_v61  ;;  %v10942_v24 = vpop.f32.mrb[103].mxu1  ;;  %11605 = vmatmul.mubr.bf16.vlgmr.msra.gmra.mrb[96].mxu0 %v11373_v58  ;;  %v11249_v20 = vmax.f32 %v10937_v44, 0.0 }
 0x863   : > { %v10943_v28 = vadd.f32 %v10942_v24, %v17790_v26  ;;  %v11250_v7 = vmax.f32 %v10939_v29, 0.0 }
 0x864   : > { %v11251_v51 = vmax.f32 %v10941_v13, 0.0  ;;  %11205 = vmatmul.mubr.bf16.gmra.mrb[208].mxu1 %v10780_v5 }
 0x865   : > { %v11252_v9 = vmax.f32 %v10943_v28, 0.0  ;;  %11214 = vmatprep.mubr.bf16.mxu1 %v19700_v45 }
 0x866   : > { %v11375_v34 = vpack.c.bf16 %v11251_v51, %v11249_v20 }
 0x867   : > { %v11376_v41 = vpack.c.bf16 %v11252_v9, %v11250_v7  ;;  %v10946_v0 = vpop.f32.mrb[104].mxu1 }
 0x868   : > { %v10947_v38 = vadd.f32 %v10946_v0, %v17787_v61  ;;  %v10948_v15 = vpop.f32.mrb[105].mxu1 }
 0x869   : > { %v10949_v50 = vadd.f32 %v10948_v15, %v17790_v26  ;;  %v10950_v11 = vpop.f32.mrb[106].mxu1  ;;  %11612 = vmatprep.mubr.bf16.mxu0 %v11376_v41 }
 0x86a   : > { %v10951_v12 = vadd.f32 %v10950_v11, %v17787_v61  ;;  %v10952_v35 = vpop.f32.mrb[107].mxu1  ;;  %11613 = vmatmul.mubr.bf16.gmra.mrb[100].mxu0 %v11375_v34  ;;  %v11253_v60 = vmax.f32 %v10947_v38, 0.0 }
 0x86b   : > { %v10953_v5 = vadd.f32 %v10952_v35, %v17790_v26  ;;  %v11254_v27 = vmax.f32 %v10949_v50, 0.0 }
 0x86c   : > { %v11255_v25 = vmax.f32 %v10951_v12, 0.0  ;;  %11215 = vmatmul.mubr.bf16.gmra.mrb[212].mxu1 %v17772_v21 }
 0x86d   : > { %v11256_v62 = vmax.f32 %v10953_v5, 0.0  ;;  %11224 = vmatprep.mubr.bf16.mxu1 %v19700_v45 }
 0x86e   : > { %v11377_v4 = vpack.c.bf16 %v11255_v25, %v11253_v60 }
 0x86f   : > { %v11378_v16 = vpack.c.bf16 %v11256_v62, %v11254_v27  ;;  %v10956_v47 = vpop.f32.mrb[108].mxu1 }
 0x870   : > { %v10957_v2 = vadd.f32 %v10956_v47, %v17787_v61  ;;  %v10958_v63 = vpop.f32.mrb[109].mxu1 }
 0x871   : > { %v10959_v59 = vadd.f32 %v10958_v63, %v17790_v26  ;;  %v10960_v40 = vpop.f32.mrb[110].mxu1  ;;  %11620 = vmatprep.mubr.bf16.mxu0 %v11378_v16 }
 0x872   : > { %v10961_v22 = vadd.f32 %v10960_v40, %v17787_v61  ;;  %v10962_v37 = vpop.f32.mrb[111].mxu1  ;;  %11621 = vmatmul.mubr.bf16.gmra.mrb[104].mxu0 %v11377_v4  ;;  %v11257_v19 = vmax.f32 %v10957_v2, 0.0 }
 0x873   : > { %v10963_v21 = vadd.f32 %v10962_v37, %v17790_v26  ;;  %v11258_v14 = vmax.f32 %v10959_v59, 0.0 }
 0x874   : > { %v11259_v53 = vmax.f32 %v10961_v22, 0.0  ;;  %11225 = vmatmul.mubr.bf16.gmra.mrb[216].mxu1 %v10782_v43 }
 0x875   : > { %v11260_v30 = vmax.f32 %v10963_v21, 0.0  ;;  %11234 = vmatprep.mubr.bf16.mxu1 %v19700_v45 }
 0x876   : > { %v11379_v6 = vpack.c.bf16 %v11259_v53, %v11257_v19 }
 0x877   : > { %v11380_v55 = vpack.c.bf16 %v11260_v30, %v11258_v14  ;;  %v10966_v42 = vpop.f32.mrb[112].mxu1 }
 0x878   : > { %v10967_v31 = vadd.f32 %v10966_v42, %v17787_v61  ;;  %v10968_v57 = vpop.f32.mrb[113].mxu1 }
 0x879   : > { %v10969_v1 = vadd.f32 %v10968_v57, %v17790_v26  ;;  %v10970_v48 = vpop.f32.mrb[114].mxu1  ;;  %11628 = vmatprep.mubr.bf16.mxu0 %v11380_v55 }
 0x87a   : > { %v10971_v39 = vadd.f32 %v10970_v48, %v17787_v61  ;;  %v10972_v49 = vpop.f32.mrb[115].mxu1  ;;  %11629 = vmatmul.mubr.bf16.gmra.mrb[108].mxu0 %v11379_v6  ;;  %v11261_v46 = vmax.f32 %v10967_v31, 0.0 }
 0x87b   : > { %v10973_v43 = vadd.f32 %v10972_v49, %v17790_v26  ;;  %v11262_v45 = vmax.f32 %v10969_v1, 0.0 }
 0x87c   : > { %v11263_v56 = vmax.f32 %v10971_v39, 0.0  ;;  %11235 = vmatmul.mubr.bf16.gmra.mrb[220].mxu1 %v17793_v23 }
 0x87d   : > { %v11264_v36 = vmax.f32 %v10973_v43, 0.0 }
 0x87e   : > { %v11381_v3 = vpack.c.bf16 %v11263_v56, %v11261_v46 }
 0x87f   : > { %v11382_v32 = vpack.c.bf16 %v11264_v36, %v11262_v45  ;;  %v10976_v17 = vpop.f32.mrb[116].mxu1 }
 0x880   : > { %v10977_v10 = vadd.f32 %v10976_v17, %v17787_v61  ;;  %v10978_v18 = vpop.f32.mrb[117].mxu1 }
 0x881   : > { %v10979_v58 = vadd.f32 %v10978_v18, %v17790_v26  ;;  %v10980_v8 = vpop.f32.mrb[118].mxu1  ;;  %11636 = vmatprep.mubr.bf16.mxu0 %v11382_v32 }
 0x882   : > { %v10981_v52 = vadd.f32 %v10980_v8, %v17787_v61  ;;  %v10982_v44 = vpop.f32.mrb[119].mxu1  ;;  %11637 = vmatmul.mubr.bf16.gmra.mrb[112].mxu0 %v11381_v3  ;;  %v11265_v29 = vmax.f32 %v10977_v10, 0.0 }
 0x883   : > { %v10983_v33 = vadd.f32 %v10982_v44, %v17790_v26  ;;  %v11266_v54 = vmax.f32 %v10979_v58, 0.0 }
 0x884   : > { %v11267_v23 = vmax.f32 %v10981_v52, 0.0 }
 0x885   : > { %v11268_v13 = vmax.f32 %v10983_v33, 0.0 }
 0x886   : > { %v11383_v24 = vpack.c.bf16 %v11267_v23, %v11265_v29 }
 0x887   : > { %v11384_v28 = vpack.c.bf16 %v11268_v13, %v11266_v54  ;;  %v10986_v20 = vpop.f32.mrb[120].mxu1 }
 0x888   : > { %v10987_v51 = vadd.f32 %v10986_v20, %v17787_v61  ;;  %v10988_v7 = vpop.f32.mrb[121].mxu1 }
 0x889   : > { %v10989_v9 = vadd.f32 %v10988_v7, %v17790_v26  ;;  %v10990_v34 = vpop.f32.mrb[122].mxu1  ;;  %11644 = vmatprep.mubr.bf16.mxu0 %v11384_v28 }
 0x88a   : > { %v10991_v41 = vadd.f32 %v10990_v34, %v17787_v61  ;;  %v10992_v0 = vpop.f32.mrb[123].mxu1  ;;  %11645 = vmatmul.mubr.bf16.gmra.mrb[116].mxu0 %v11383_v24  ;;  %v11269_v15 = vmax.f32 %v10987_v51, 0.0 }
 0x88b   : > { %v10993_v38 = vadd.f32 %v10992_v0, %v17790_v26  ;;  %v11270_v11 = vmax.f32 %v10989_v9, 0.0 }
 0x88c   : > { %v11271_v50 = vmax.f32 %v10991_v41, 0.0 }
 0x88d   : > { %v11272_v12 = vmax.f32 %v10993_v38, 0.0 }
 0x88e   : > { %v11385_v35 = vpack.c.bf16 %v11271_v50, %v11269_v15 }
 0x88f   : > { %v11386_v5 = vpack.c.bf16 %v11272_v12, %v11270_v11  ;;  %v10996_v60 = vpop.f32.mrb[124].mxu1 }
 0x890   : > { %v10997_v25 = vadd.f32 %v10996_v60, %v17787_v61  ;;  %v10998_v27 = vpop.f32.mrb[125].mxu1 }
 0x891   : > { %v10999_v62 = vadd.f32 %v10998_v27, %v17790_v26  ;;  %v11000_v4 = vpop.f32.mrb[126].mxu1  ;;  %11652 = vmatprep.mubr.bf16.mxu0 %v11386_v5 }
 0x892   : > { %v11001_v16 = vadd.f32 %v11000_v4, %v17787_v61  ;;  %v11002_v47 = vpop.f32.mrb[127].mxu1  ;;  %11653 = vmatmul.mubr.bf16.gmra.mrb[120].mxu0 %v11385_v35  ;;  %v11273_v63 = vmax.f32 %v10997_v25, 0.0 }
 0x893   : > { %v11003_v2 = vadd.f32 %v11002_v47, %v17790_v26  ;;  %v11274_v40 = vmax.f32 %v10999_v62, 0.0 }
 0x894   : > { %v11275_v59 = vmax.f32 %v11001_v16, 0.0 }
 0x895   : > { %v11276_v22 = vmax.f32 %v11003_v2, 0.0 }
 0x896   : > { %v11387_v37 = vpack.c.bf16 %v11275_v59, %v11273_v63 }
 0x897   : > { %v11388_v21 = vpack.c.bf16 %v11276_v22, %v11274_v40  ;;  %v11006_v19 = vpop.f32.mrb[128].mxu1 }
 0x898   : > { %v11007_v53 = vadd.f32 %v11006_v19, %v17787_v61  ;;  %v11008_v14 = vpop.f32.mrb[129].mxu1 }
 0x899   : > { %v11009_v30 = vadd.f32 %v11008_v14, %v17790_v26  ;;  %v11010_v6 = vpop.f32.mrb[130].mxu1  ;;  %11660 = vmatprep.mubr.bf16.mxu0 %v11388_v21 }
 0x89a   : > { %v11011_v55 = vadd.f32 %v11010_v6, %v17787_v61  ;;  %v11012_v42 = vpop.f32.mrb[131].mxu1  ;;  %11661 = vmatmul.mubr.bf16.gmra.mrb[124].mxu0 %v11387_v37  ;;  %v11277_v57 = vmax.f32 %v11007_v53, 0.0 }
 0x89b   : > { %v11013_v31 = vadd.f32 %v11012_v42, %v17790_v26  ;;  %v11278_v48 = vmax.f32 %v11009_v30, 0.0 }
 0x89c   : > { %v11279_v1 = vmax.f32 %v11011_v55, 0.0 }
 0x89d   : > { %v11280_v39 = vmax.f32 %v11013_v31, 0.0 }
 0x89e   : > { %v11389_v49 = vpack.c.bf16 %v11279_v1, %v11277_v57 }
 0x89f   : > { %v11390_v43 = vpack.c.bf16 %v11280_v39, %v11278_v48  ;;  %v11016_v46 = vpop.f32.mrb[132].mxu1 }
 0x8a0   : > { %v11017_v56 = vadd.f32 %v11016_v46, %v17787_v61  ;;  %v11018_v45 = vpop.f32.mrb[133].mxu1 }
 0x8a1   : > { %v11019_v36 = vadd.f32 %v11018_v45, %v17790_v26  ;;  %v11020_v3 = vpop.f32.mrb[134].mxu1  ;;  %11668 = vmatprep.mubr.bf16.mxu0 %v11390_v43 }
 0x8a2   : > { %v11021_v32 = vadd.f32 %v11020_v3, %v17787_v61  ;;  %v11022_v17 = vpop.f32.mrb[135].mxu1  ;;  %11669 = vmatmul.mubr.bf16.gmra.mrb[128].mxu0 %v11389_v49  ;;  %v11281_v18 = vmax.f32 %v11017_v56, 0.0 }
 0x8a3   : > { %v11023_v10 = vadd.f32 %v11022_v17, %v17790_v26  ;;  %v11282_v8 = vmax.f32 %v11019_v36, 0.0 }
 0x8a4   : > { %v11283_v58 = vmax.f32 %v11021_v32, 0.0 }
 0x8a5   : > { %v11284_v52 = vmax.f32 %v11023_v10, 0.0 }
 0x8a6   : > { %v11391_v44 = vpack.c.bf16 %v11283_v58, %v11281_v18 }
 0x8a7   : > { %v11392_v33 = vpack.c.bf16 %v11284_v52, %v11282_v8  ;;  %v11026_v29 = vpop.f32.mrb[136].mxu1 }
 0x8a8   : > { %v11027_v23 = vadd.f32 %v11026_v29, %v17787_v61  ;;  %v11028_v54 = vpop.f32.mrb[137].mxu1 }
 0x8a9   : > { %v11029_v13 = vadd.f32 %v11028_v54, %v17790_v26  ;;  %v11030_v24 = vpop.f32.mrb[138].mxu1  ;;  %11676 = vmatprep.mubr.bf16.mxu0 %v11392_v33 }
 0x8aa   : > { %v11031_v28 = vadd.f32 %v11030_v24, %v17787_v61  ;;  %v11032_v20 = vpop.f32.mrb[139].mxu1  ;;  %11677 = vmatmul.mubr.bf16.gmra.mrb[132].mxu0 %v11391_v44  ;;  %v11285_v7 = vmax.f32 %v11027_v23, 0.0 }
 0x8ab   : > { %v11033_v51 = vadd.f32 %v11032_v20, %v17790_v26  ;;  %v11286_v34 = vmax.f32 %v11029_v13, 0.0 }
 0x8ac   : > { %v11287_v9 = vmax.f32 %v11031_v28, 0.0 }
 0x8ad   : > { %v11288_v41 = vmax.f32 %v11033_v51, 0.0 }
 0x8ae   : > { %v11393_v0 = vpack.c.bf16 %v11287_v9, %v11285_v7 }
 0x8af   : > { %v11394_v38 = vpack.c.bf16 %v11288_v41, %v11286_v34  ;;  %v11036_v15 = vpop.f32.mrb[140].mxu1 }
 0x8b0   : > { %v11037_v50 = vadd.f32 %v11036_v15, %v17787_v61  ;;  %v11038_v11 = vpop.f32.mrb[141].mxu1 }
 0x8b1   : > { %v11039_v12 = vadd.f32 %v11038_v11, %v17790_v26  ;;  %v11040_v35 = vpop.f32.mrb[142].mxu1  ;;  %11684 = vmatprep.mubr.bf16.mxu0 %v11394_v38 }
 0x8b2   : > { %v11041_v5 = vadd.f32 %v11040_v35, %v17787_v61  ;;  %v11042_v60 = vpop.f32.mrb[143].mxu1  ;;  %11685 = vmatmul.mubr.bf16.gmra.mrb[136].mxu0 %v11393_v0  ;;  %v11289_v27 = vmax.f32 %v11037_v50, 0.0 }
 0x8b3   : > { %v11043_v25 = vadd.f32 %v11042_v60, %v17790_v26  ;;  %v11290_v4 = vmax.f32 %v11039_v12, 0.0 }
 0x8b4   : > { %v11291_v62 = vmax.f32 %v11041_v5, 0.0 }
 0x8b5   : > { %v11292_v16 = vmax.f32 %v11043_v25, 0.0 }
 0x8b6   : > { %v11395_v47 = vpack.c.bf16 %v11291_v62, %v11289_v27 }
 0x8b7   : > { %v11396_v2 = vpack.c.bf16 %v11292_v16, %v11290_v4  ;;  %v11046_v63 = vpop.f32.mrb[144].mxu1 }
 0x8b8   : > { %v11047_v59 = vadd.f32 %v11046_v63, %v17787_v61  ;;  %v11048_v40 = vpop.f32.mrb[145].mxu1 }
 0x8b9   : > { %v11049_v22 = vadd.f32 %v11048_v40, %v17790_v26  ;;  %v11050_v37 = vpop.f32.mrb[146].mxu1  ;;  %11692 = vmatprep.mubr.bf16.mxu0 %v11396_v2 }
 0x8ba   : > { %v11051_v21 = vadd.f32 %v11050_v37, %v17787_v61  ;;  %v11052_v19 = vpop.f32.mrb[147].mxu1  ;;  %11693 = vmatmul.mubr.bf16.gmra.mrb[140].mxu0 %v11395_v47  ;;  %v11293_v14 = vmax.f32 %v11047_v59, 0.0 }
 0x8bb   : > { %v11053_v53 = vadd.f32 %v11052_v19, %v17790_v26  ;;  %v11294_v6 = vmax.f32 %v11049_v22, 0.0 }
 0x8bc   : > { %v11295_v30 = vmax.f32 %v11051_v21, 0.0 }
 0x8bd   : > { %v11296_v55 = vmax.f32 %v11053_v53, 0.0 }
 0x8be   : > { %v11397_v42 = vpack.c.bf16 %v11295_v30, %v11293_v14 }
 0x8bf   : > { %v11398_v31 = vpack.c.bf16 %v11296_v55, %v11294_v6  ;;  %v11056_v57 = vpop.f32.mrb[148].mxu1 }
 0x8c0   : > { %v11057_v1 = vadd.f32 %v11056_v57, %v17787_v61  ;;  %v11058_v48 = vpop.f32.mrb[149].mxu1 }
 0x8c1   : > { %v11059_v39 = vadd.f32 %v11058_v48, %v17790_v26  ;;  %v11060_v49 = vpop.f32.mrb[150].mxu1  ;;  %11700 = vmatprep.mubr.bf16.mxu0 %v11398_v31 }
 0x8c2   : > { %v11061_v43 = vadd.f32 %v11060_v49, %v17787_v61  ;;  %v11062_v46 = vpop.f32.mrb[151].mxu1  ;;  %11701 = vmatmul.mubr.bf16.gmra.mrb[144].mxu0 %v11397_v42  ;;  %v11297_v45 = vmax.f32 %v11057_v1, 0.0 }
 0x8c3   : > { %v11063_v56 = vadd.f32 %v11062_v46, %v17790_v26  ;;  %v11298_v3 = vmax.f32 %v11059_v39, 0.0 }
 0x8c4   : > { %v11299_v36 = vmax.f32 %v11061_v43, 0.0 }
 0x8c5   : > { %v11300_v32 = vmax.f32 %v11063_v56, 0.0 }
 0x8c6   : > { %v11399_v17 = vpack.c.bf16 %v11299_v36, %v11297_v45 }
 0x8c7   : > { %v11400_v10 = vpack.c.bf16 %v11300_v32, %v11298_v3  ;;  %v11066_v18 = vpop.f32.mrb[152].mxu1 }
 0x8c8   : > { %v11067_v58 = vadd.f32 %v11066_v18, %v17787_v61  ;;  %v11068_v8 = vpop.f32.mrb[153].mxu1 }
 0x8c9   : > { %v11069_v52 = vadd.f32 %v11068_v8, %v17790_v26  ;;  %v11070_v44 = vpop.f32.mrb[154].mxu1  ;;  %11708 = vmatprep.mubr.bf16.mxu0 %v11400_v10 }
 0x8ca   : > { %v11071_v33 = vadd.f32 %v11070_v44, %v17787_v61  ;;  %v11072_v29 = vpop.f32.mrb[155].mxu1  ;;  %11709 = vmatmul.mubr.bf16.gmra.mrb[148].mxu0 %v11399_v17  ;;  %v11301_v54 = vmax.f32 %v11067_v58, 0.0 }
 0x8cb   : > { %v11073_v23 = vadd.f32 %v11072_v29, %v17790_v26  ;;  %v11302_v24 = vmax.f32 %v11069_v52, 0.0 }
 0x8cc   : > { %v11303_v13 = vmax.f32 %v11071_v33, 0.0 }
 0x8cd   : > { %v11304_v28 = vmax.f32 %v11073_v23, 0.0 }
 0x8ce   : > { %v11401_v20 = vpack.c.bf16 %v11303_v13, %v11301_v54 }
 0x8cf   : > { %v11402_v51 = vpack.c.bf16 %v11304_v28, %v11302_v24  ;;  %v11076_v7 = vpop.f32.mrb[156].mxu1 }
 0x8d0   : > { %v11077_v9 = vadd.f32 %v11076_v7, %v17787_v61  ;;  %v11078_v34 = vpop.f32.mrb[157].mxu1 }
 0x8d1   : > { %v11079_v41 = vadd.f32 %v11078_v34, %v17790_v26  ;;  %v11080_v0 = vpop.f32.mrb[158].mxu1  ;;  %11716 = vmatprep.mubr.bf16.mxu0 %v11402_v51 }
 0x8d2   : > { %v11081_v38 = vadd.f32 %v11080_v0, %v17787_v61  ;;  %v11082_v15 = vpop.f32.mrb[159].mxu1  ;;  %11717 = vmatmul.mubr.bf16.gmra.mrb[152].mxu0 %v11401_v20  ;;  %v11305_v11 = vmax.f32 %v11077_v9, 0.0 }
 0x8d3   : > { %v11083_v50 = vadd.f32 %v11082_v15, %v17790_v26  ;;  %v11306_v35 = vmax.f32 %v11079_v41, 0.0 }
 0x8d4   : > { %v11307_v12 = vmax.f32 %v11081_v38, 0.0 }
 0x8d5   : > { %v11308_v5 = vmax.f32 %v11083_v50, 0.0 }
 0x8d6   : > { %v11403_v60 = vpack.c.bf16 %v11307_v12, %v11305_v11 }
 0x8d7   : > { %v11404_v25 = vpack.c.bf16 %v11308_v5, %v11306_v35  ;;  %v11086_v27 = vpop.f32.mrb[160].mxu1 }
 0x8d8   : > { %v11087_v62 = vadd.f32 %v11086_v27, %v17787_v61  ;;  %v11088_v4 = vpop.f32.mrb[161].mxu1 }
 0x8d9   : > { %v11089_v16 = vadd.f32 %v11088_v4, %v17790_v26  ;;  %v11090_v47 = vpop.f32.mrb[162].mxu1  ;;  %11724 = vmatprep.mubr.bf16.mxu0 %v11404_v25 }
 0x8da   : > { %v11091_v2 = vadd.f32 %v11090_v47, %v17787_v61  ;;  %v11092_v63 = vpop.f32.mrb[163].mxu1  ;;  %11725 = vmatmul.mubr.bf16.gmra.mrb[156].mxu0 %v11403_v60  ;;  %v11309_v40 = vmax.f32 %v11087_v62, 0.0 }
 0x8db   : > { %v11093_v59 = vadd.f32 %v11092_v63, %v17790_v26  ;;  %v11310_v37 = vmax.f32 %v11089_v16, 0.0 }
 0x8dc   : > { %v11311_v22 = vmax.f32 %v11091_v2, 0.0 }
 0x8dd   : > { %v11312_v21 = vmax.f32 %v11093_v59, 0.0 }
 0x8de   : > { %v11405_v19 = vpack.c.bf16 %v11311_v22, %v11309_v40 }
 0x8df   : > { %v11406_v53 = vpack.c.bf16 %v11312_v21, %v11310_v37  ;;  %v11096_v14 = vpop.f32.mrb[164].mxu1 }
 0x8e0   : > { %v11097_v30 = vadd.f32 %v11096_v14, %v17787_v61  ;;  %v11098_v6 = vpop.f32.mrb[165].mxu1 }
 0x8e1   : > { %v11099_v55 = vadd.f32 %v11098_v6, %v17790_v26  ;;  %v11100_v42 = vpop.f32.mrb[166].mxu1  ;;  %11732 = vmatprep.mubr.bf16.mxu0 %v11406_v53 }
 0x8e2   : > { %v11101_v31 = vadd.f32 %v11100_v42, %v17787_v61  ;;  %v11102_v57 = vpop.f32.mrb[167].mxu1  ;;  %11733 = vmatmul.mubr.bf16.gmra.mrb[160].mxu0 %v11405_v19  ;;  %v11313_v48 = vmax.f32 %v11097_v30, 0.0 }
 0x8e3   : > { %v11103_v1 = vadd.f32 %v11102_v57, %v17790_v26  ;;  %v11314_v49 = vmax.f32 %v11099_v55, 0.0 }
 0x8e4   : > { %v11315_v39 = vmax.f32 %v11101_v31, 0.0 }
 0x8e5   : > { %v11316_v43 = vmax.f32 %v11103_v1, 0.0 }
 0x8e6   : > { %v11407_v46 = vpack.c.bf16 %v11315_v39, %v11313_v48 }
 0x8e7   : > { %v11408_v56 = vpack.c.bf16 %v11316_v43, %v11314_v49  ;;  %v11106_v45 = vpop.f32.mrb[168].mxu1 }
 0x8e8   : > { %v11107_v36 = vadd.f32 %v11106_v45, %v17787_v61  ;;  %v11108_v3 = vpop.f32.mrb[169].mxu1 }
 0x8e9   : > { %v11109_v32 = vadd.f32 %v11108_v3, %v17790_v26  ;;  %v11110_v17 = vpop.f32.mrb[170].mxu1  ;;  %11740 = vmatprep.mubr.bf16.mxu0 %v11408_v56 }
 0x8ea   : > { %v11111_v10 = vadd.f32 %v11110_v17, %v17787_v61  ;;  %v11112_v18 = vpop.f32.mrb[171].mxu1  ;;  %11741 = vmatmul.mubr.bf16.gmra.mrb[164].mxu0 %v11407_v46  ;;  %v11317_v8 = vmax.f32 %v11107_v36, 0.0 }
 0x8eb   : > { %v11113_v58 = vadd.f32 %v11112_v18, %v17790_v26  ;;  %v11318_v44 = vmax.f32 %v11109_v32, 0.0 }
 0x8ec   : > { %v11319_v52 = vmax.f32 %v11111_v10, 0.0 }
 0x8ed   : > { %v11320_v33 = vmax.f32 %v11113_v58, 0.0 }
 0x8ee   : > { %v11409_v29 = vpack.c.bf16 %v11319_v52, %v11317_v8 }
 0x8ef   : > { %v11410_v23 = vpack.c.bf16 %v11320_v33, %v11318_v44  ;;  %v11116_v54 = vpop.f32.mrb[172].mxu1 }
 0x8f0   : > { %v11117_v13 = vadd.f32 %v11116_v54, %v17787_v61  ;;  %v11118_v24 = vpop.f32.mrb[173].mxu1 }
 0x8f1   : > { %v11119_v28 = vadd.f32 %v11118_v24, %v17790_v26  ;;  %v11120_v20 = vpop.f32.mrb[174].mxu1  ;;  %11748 = vmatprep.mubr.bf16.mxu0 %v11410_v23 }
 0x8f2   : > { %v11121_v51 = vadd.f32 %v11120_v20, %v17787_v61  ;;  %v11122_v7 = vpop.f32.mrb[175].mxu1  ;;  %11749 = vmatmul.mubr.bf16.gmra.mrb[168].mxu0 %v11409_v29  ;;  %v11321_v34 = vmax.f32 %v11117_v13, 0.0 }
 0x8f3   : > { %v11123_v9 = vadd.f32 %v11122_v7, %v17790_v26  ;;  %v11322_v0 = vmax.f32 %v11119_v28, 0.0 }
 0x8f4   : > { %v11323_v41 = vmax.f32 %v11121_v51, 0.0 }
 0x8f5   : > { %v11324_v38 = vmax.f32 %v11123_v9, 0.0 }
 0x8f6   : > { %v11411_v15 = vpack.c.bf16 %v11323_v41, %v11321_v34 }
 0x8f7   : > { %v11412_v50 = vpack.c.bf16 %v11324_v38, %v11322_v0  ;;  %v11126_v11 = vpop.f32.mrb[176].mxu1 }
 0x8f8   : > { %v11127_v12 = vadd.f32 %v11126_v11, %v17787_v61  ;;  %v11128_v35 = vpop.f32.mrb[177].mxu1 }
 0x8f9   : > { %v11129_v5 = vadd.f32 %v11128_v35, %v17790_v26  ;;  %v11130_v60 = vpop.f32.mrb[178].mxu1  ;;  %11756 = vmatprep.mubr.bf16.mxu0 %v11412_v50 }
 0x8fa   : > { %v11131_v25 = vadd.f32 %v11130_v60, %v17787_v61  ;;  %v11132_v27 = vpop.f32.mrb[179].mxu1  ;;  %11757 = vmatmul.mubr.bf16.gmra.mrb[172].mxu0 %v11411_v15  ;;  %v11325_v4 = vmax.f32 %v11127_v12, 0.0 }
 0x8fb   : > { %v11133_v62 = vadd.f32 %v11132_v27, %v17790_v26  ;;  %v11326_v47 = vmax.f32 %v11129_v5, 0.0 }
 0x8fc   : > { %v11327_v16 = vmax.f32 %v11131_v25, 0.0 }
 0x8fd   : > { %v11328_v2 = vmax.f32 %v11133_v62, 0.0 }
 0x8fe   : > { %v11413_v63 = vpack.c.bf16 %v11327_v16, %v11325_v4 }
 0x8ff   : > { %v11414_v59 = vpack.c.bf16 %v11328_v2, %v11326_v47  ;;  %v11136_v40 = vpop.f32.mrb[180].mxu1 }
 0x900   : > { %v11137_v22 = vadd.f32 %v11136_v40, %v17787_v61  ;;  %v11138_v37 = vpop.f32.mrb[181].mxu1 }
 0x901   : > { %v11139_v21 = vadd.f32 %v11138_v37, %v17790_v26  ;;  %v11140_v19 = vpop.f32.mrb[182].mxu1  ;;  %11764 = vmatprep.mubr.bf16.mxu0 %v11414_v59 }
 0x902   : > { %v11141_v53 = vadd.f32 %v11140_v19, %v17787_v61  ;;  %v11142_v14 = vpop.f32.mrb[183].mxu1  ;;  %11765 = vmatmul.mubr.bf16.gmra.mrb[176].mxu0 %v11413_v63  ;;  %v11329_v6 = vmax.f32 %v11137_v22, 0.0 }
 0x903   : > { %v11143_v30 = vadd.f32 %v11142_v14, %v17790_v26  ;;  %v11330_v42 = vmax.f32 %v11139_v21, 0.0 }
 0x904   : > { %v11331_v55 = vmax.f32 %v11141_v53, 0.0 }
 0x905   : > { %v11332_v31 = vmax.f32 %v11143_v30, 0.0 }
 0x906   : > { %v11415_v57 = vpack.c.bf16 %v11331_v55, %v11329_v6 }
 0x907   : > { %v11416_v1 = vpack.c.bf16 %v11332_v31, %v11330_v42  ;;  %v11146_v48 = vpop.f32.mrb[184].mxu1 }
 0x908   : > { %v11147_v39 = vadd.f32 %v11146_v48, %v17787_v61  ;;  %v11148_v49 = vpop.f32.mrb[185].mxu1 }
 0x909   : > { %v11149_v43 = vadd.f32 %v11148_v49, %v17790_v26  ;;  %v11150_v46 = vpop.f32.mrb[186].mxu1  ;;  %11772 = vmatprep.mubr.bf16.mxu0 %v11416_v1 }
 0x90a   : > { %v11151_v56 = vadd.f32 %v11150_v46, %v17787_v61  ;;  %v11152_v45 = vpop.f32.mrb[187].mxu1  ;;  %11773 = vmatmul.mubr.bf16.gmra.mrb[180].mxu0 %v11415_v57  ;;  %v11333_v3 = vmax.f32 %v11147_v39, 0.0 }
 0x90b   : > { %v11153_v36 = vadd.f32 %v11152_v45, %v17790_v26  ;;  %v11334_v17 = vmax.f32 %v11149_v43, 0.0 }
 0x90c   : > { %v11335_v32 = vmax.f32 %v11151_v56, 0.0 }
 0x90d   : > { %v11336_v10 = vmax.f32 %v11153_v36, 0.0 }
 0x90e   : > { %v11417_v18 = vpack.c.bf16 %v11335_v32, %v11333_v3 }
 0x90f   : > { %v11418_v58 = vpack.c.bf16 %v11336_v10, %v11334_v17  ;;  %v11156_v8 = vpop.f32.mrb[188].mxu1 }
 0x910   : > { %v11157_v52 = vadd.f32 %v11156_v8, %v17787_v61  ;;  %v11158_v44 = vpop.f32.mrb[189].mxu1 }
 0x911   : > { %v11159_v33 = vadd.f32 %v11158_v44, %v17790_v26  ;;  %v11160_v29 = vpop.f32.mrb[190].mxu1  ;;  %11780 = vmatprep.mubr.bf16.mxu0 %v11418_v58  ;;  %v17917_v44 = vld [vmem:[%s18148_s13] ss:$0 sm:$0xff] }
 0x912   : > { %v11161_v23 = vadd.f32 %v11160_v29, %v17787_v61  ;;  %v11162_v54 = vpop.f32.mrb[191].mxu1  ;;  %11781 = vmatmul.mubr.bf16.gmra.mrb[184].mxu0 %v11417_v18  ;;  %v11337_v24 = vmax.f32 %v11157_v52, 0.0 }
 0x913   : > { %v11163_v13 = vadd.f32 %v11162_v54, %v17790_v26  ;;  %v11338_v20 = vmax.f32 %v11159_v33, 0.0 }
 0x914   : > { %v11339_v28 = vmax.f32 %v11161_v23, 0.0 }
 0x915   : > { %v11340_v51 = vmax.f32 %v11163_v13, 0.0 }
 0x916   : > { %v11419_v7 = vpack.c.bf16 %v11339_v28, %v11337_v24 }
 0x917   : > { %v11420_v9 = vpack.c.bf16 %v11340_v51, %v11338_v20  ;;  %v11166_v34 = vpop.f32.mrb[192].mxu1 }
 0x918   : > { %v11167_v41 = vadd.f32 %v11166_v34, %v17787_v61  ;;  %v11168_v0 = vpop.f32.mrb[193].mxu1 }
 0x919   : > { %v11169_v38 = vadd.f32 %v11168_v0, %v17790_v26  ;;  %v11170_v15 = vpop.f32.mrb[194].mxu1  ;;  %11788 = vmatprep.mubr.bf16.mxu0 %v11420_v9 }
 0x91a   : > { %v11171_v50 = vadd.f32 %v11170_v15, %v17787_v61  ;;  %v11172_v11 = vpop.f32.mrb[195].mxu1  ;;  %11789 = vmatmul.mubr.bf16.gmra.mrb[188].mxu0 %v11419_v7  ;;  %v11341_v35 = vmax.f32 %v11167_v41, 0.0 }
 0x91b   : > { %v11173_v12 = vadd.f32 %v11172_v11, %v17790_v26  ;;  %v11342_v60 = vmax.f32 %v11169_v38, 0.0 }
 0x91c   : > { %v11343_v5 = vmax.f32 %v11171_v50, 0.0 }
 0x91d   : > { %v11344_v25 = vmax.f32 %v11173_v12, 0.0 }
 0x91e   : > { %v11421_v27 = vpack.c.bf16 %v11343_v5, %v11341_v35 }
 0x91f   : > { %v11422_v62 = vpack.c.bf16 %v11344_v25, %v11342_v60  ;;  %v11176_v4 = vpop.f32.mrb[196].mxu1 }
 0x920   : > { %v11177_v16 = vadd.f32 %v11176_v4, %v17787_v61  ;;  %v11178_v47 = vpop.f32.mrb[197].mxu1 }
 0x921   : > { %v11179_v2 = vadd.f32 %v11178_v47, %v17790_v26  ;;  %v11180_v63 = vpop.f32.mrb[198].mxu1  ;;  %11796 = vmatprep.mubr.bf16.mxu0 %v11422_v62 }
 0x922   : > { %v11181_v59 = vadd.f32 %v11180_v63, %v17787_v61  ;;  %v11182_v40 = vpop.f32.mrb[199].mxu1  ;;  %11797 = vmatmul.mubr.bf16.gmra.mrb[192].mxu0 %v11421_v27  ;;  %v11345_v37 = vmax.f32 %v11177_v16, 0.0 }
 0x923   : > { %v11183_v22 = vadd.f32 %v11182_v40, %v17790_v26  ;;  %v11346_v19 = vmax.f32 %v11179_v2, 0.0 }
 0x924   : > { %v11347_v21 = vmax.f32 %v11181_v59, 0.0 }
 0x925   : > { %v11348_v53 = vmax.f32 %v11183_v22, 0.0 }
 0x926   : > { %v11423_v14 = vpack.c.bf16 %v11347_v21, %v11345_v37 }
 0x927   : > { %v11424_v30 = vpack.c.bf16 %v11348_v53, %v11346_v19  ;;  %v11186_v6 = vpop.f32.mrb[200].mxu1 }
 0x928   : > { %v11187_v55 = vadd.f32 %v11186_v6, %v17787_v61  ;;  %v11188_v42 = vpop.f32.mrb[201].mxu1 }
 0x929   : > { %v11189_v31 = vadd.f32 %v11188_v42, %v17790_v26  ;;  %v11190_v57 = vpop.f32.mrb[202].mxu1  ;;  %11804 = vmatprep.mubr.bf16.mxu0 %v11424_v30 }
 0x92a   : > { %v11191_v1 = vadd.f32 %v11190_v57, %v17787_v61  ;;  %v11192_v48 = vpop.f32.mrb[203].mxu1  ;;  %11805 = vmatmul.mubr.bf16.gmra.mrb[196].mxu0 %v11423_v14  ;;  %v11349_v49 = vmax.f32 %v11187_v55, 0.0 }
 0x92b   : > { %v11193_v39 = vadd.f32 %v11192_v48, %v17790_v26  ;;  %v11350_v46 = vmax.f32 %v11189_v31, 0.0 }
 0x92c   : > { %v11351_v43 = vmax.f32 %v11191_v1, 0.0 }
 0x92d   : > { %v11352_v56 = vmax.f32 %v11193_v39, 0.0 }
 0x92e   : > { %v11425_v45 = vpack.c.bf16 %v11351_v43, %v11349_v49 }
 0x92f   : > { %v11426_v36 = vpack.c.bf16 %v11352_v56, %v11350_v46  ;;  %v11196_v3 = vpop.f32.mrb[204].mxu1 }
 0x930   : > { %v11197_v32 = vadd.f32 %v11196_v3, %v17787_v61  ;;  %v11198_v17 = vpop.f32.mrb[205].mxu1 }
 0x931   : > { %v11199_v10 = vadd.f32 %v11198_v17, %v17790_v26  ;;  %v11200_v18 = vpop.f32.mrb[206].mxu1  ;;  %11812 = vmatprep.mubr.bf16.mxu0 %v11426_v36 }
 0x932   : > { %v11201_v58 = vadd.f32 %v11200_v18, %v17787_v61  ;;  %v11202_v8 = vpop.f32.mrb[207].mxu1  ;;  %11813 = vmatmul.mubr.bf16.gmra.mrb[200].mxu0 %v11425_v45  ;;  %v11353_v33 = vmax.f32 %v11197_v32, 0.0 }
 0x933   : > { %v11203_v52 = vadd.f32 %v11202_v8, %v17790_v26  ;;  %v11354_v23 = vmax.f32 %v11199_v10, 0.0 }
 0x934   : > { %v11355_v29 = vmax.f32 %v11201_v58, 0.0 }
 0x935   : > { %v11356_v54 = vmax.f32 %v11203_v52, 0.0  ;;  %v11606_v13 = vpop.f32.mrb[96].mxu0 }
 0x936   : > { %v11427_v24 = vpack.c.bf16 %v11355_v29, %v11353_v33  ;;  %v11607_v28 = vadd.f32 %v17917_v44, %v11606_v13  ;;  %v11608_v20 = vpop.f32.mrb[97].mxu0 }
 0x937   : > { %v11428_v51 = vpack.c.bf16 %v11356_v54, %v11354_v23  ;;  %v11206_v7 = vpop.f32.mrb[208].mxu1  ;;  %v11609_v9 = vpop.f32.mrb[98].mxu0 }
 0x938   : > { %11862 = vst.msk [vmem:[%s17922_s26] sm:$0xff] %vm11861_vm11, %v11607_v28  ;;  %v11207_v34 = vadd.f32 %v11206_v7, %v17787_v61  ;;  %v11610_v41 = vadd.f32 %v17917_v44, %v11609_v9  ;;  %v11208_v0 = vpop.f32.mrb[209].mxu1  ;;  %v11611_v38 = vpop.f32.mrb[99].mxu0 }
 0x939   : > { %v11209_v15 = vadd.f32 %v11208_v0, %v17790_v26  ;;  %v11210_v50 = vpop.f32.mrb[210].mxu1  ;;  %11820 = vmatprep.mubr.bf16.mxu0 %v11428_v51 }
 0x93a   : > { %11863 = vst.msk [vmem:[%s17922_s26 + $0x8] sm:$0xff] %vm11861_vm11, %v11610_v41  ;;  %v11211_v11 = vadd.f32 %v11210_v50, %v17787_v61  ;;  %v11212_v12 = vpop.f32.mrb[211].mxu1  ;;  %11821 = vmatmul.mubr.bf16.gmra.mrb[204].mxu0 %v11427_v24  ;;  %v11357_v5 = vmax.f32 %v11207_v34, 0.0 }
 0x93b   : > { %v11213_v35 = vadd.f32 %v11212_v12, %v17790_v26  ;;  %v11358_v25 = vmax.f32 %v11209_v15, 0.0 }
 0x93c   : > { %v11359_v60 = vmax.f32 %v11211_v11, 0.0 }
 0x93d   : > { %v11360_v27 = vmax.f32 %v11213_v35, 0.0  ;;  %v11614_v62 = vpop.f32.mrb[100].mxu0 }
 0x93e   : > { %v11429_v4 = vpack.c.bf16 %v11359_v60, %v11357_v5  ;;  %v11615_v16 = vadd.f32 %v17917_v44, %v11614_v62  ;;  %v11616_v47 = vpop.f32.mrb[101].mxu0 }
 0x93f   : > { %v11430_v2 = vpack.c.bf16 %v11360_v27, %v11358_v25  ;;  %v11216_v63 = vpop.f32.mrb[212].mxu1  ;;  %v11617_v59 = vpop.f32.mrb[102].mxu0 }
 0x940   : > { %11864 = vst.msk [vmem:[%s17922_s26 + $0x10] sm:$0xff] %vm11861_vm11, %v11615_v16  ;;  %v11217_v40 = vadd.f32 %v11216_v63, %v17787_v61  ;;  %v11618_v22 = vadd.f32 %v17917_v44, %v11617_v59  ;;  %v11218_v37 = vpop.f32.mrb[213].mxu1  ;;  %v11619_v21 = vpop.f32.mrb[103].mxu0 }
 0x941   : > { %v11219_v19 = vadd.f32 %v11218_v37, %v17790_v26  ;;  %v11220_v53 = vpop.f32.mrb[214].mxu1  ;;  %11828 = vmatprep.mubr.bf16.mxu0 %v11430_v2 }
 0x942   : > { %11865 = vst.msk [vmem:[%s17922_s26 + $0x18] sm:$0xff] %vm11861_vm11, %v11618_v22  ;;  %v11221_v14 = vadd.f32 %v11220_v53, %v17787_v61  ;;  %v11222_v30 = vpop.f32.mrb[215].mxu1  ;;  %11829 = vmatmul.mubr.bf16.gmra.mrb[208].mxu0 %v11429_v4  ;;  %v11361_v55 = vmax.f32 %v11217_v40, 0.0 }
 0x943   : > { %v11223_v6 = vadd.f32 %v11222_v30, %v17790_v26  ;;  %v11362_v31 = vmax.f32 %v11219_v19, 0.0 }
 0x944   : > { %v11363_v42 = vmax.f32 %v11221_v14, 0.0 }
 0x945   : > { %v11364_v57 = vmax.f32 %v11223_v6, 0.0  ;;  %v11622_v1 = vpop.f32.mrb[104].mxu0 }
 0x946   : > { %v11431_v48 = vpack.c.bf16 %v11363_v42, %v11361_v55  ;;  %v11623_v39 = vadd.f32 %v17917_v44, %v11622_v1  ;;  %v11624_v49 = vpop.f32.mrb[105].mxu0 }
 0x947   : > { %v11432_v43 = vpack.c.bf16 %v11364_v57, %v11362_v31  ;;  %v11226_v46 = vpop.f32.mrb[216].mxu1  ;;  %v11625_v56 = vpop.f32.mrb[106].mxu0 }
 0x948   : > { %11866 = vst.msk [vmem:[%s17922_s26 + $0x20] sm:$0xff] %vm11861_vm11, %v11623_v39  ;;  %v11227_v45 = vadd.f32 %v11226_v46, %v17787_v61  ;;  %v11626_v36 = vadd.f32 %v17917_v44, %v11625_v56  ;;  %v11228_v3 = vpop.f32.mrb[217].mxu1  ;;  %v11627_v32 = vpop.f32.mrb[107].mxu0 }
 0x949   : > { %v11229_v17 = vadd.f32 %v11228_v3, %v17790_v26  ;;  %v11230_v10 = vpop.f32.mrb[218].mxu1  ;;  %11836 = vmatprep.mubr.bf16.mxu0 %v11432_v43 }
 0x94a   : > { %11867 = vst.msk [vmem:[%s17922_s26 + $0x28] sm:$0xff] %vm11861_vm11, %v11626_v36  ;;  %v11231_v18 = vadd.f32 %v11230_v10, %v17787_v61  ;;  %v11232_v58 = vpop.f32.mrb[219].mxu1  ;;  %11837 = vmatmul.mubr.bf16.gmra.mrb[212].mxu0 %v11431_v48  ;;  %v11365_v52 = vmax.f32 %v11227_v45, 0.0 }
 0x94b   : > { %v11233_v8 = vadd.f32 %v11232_v58, %v17790_v26  ;;  %v11366_v29 = vmax.f32 %v11229_v17, 0.0 }
 0x94c   : > { %v11367_v33 = vmax.f32 %v11231_v18, 0.0 }
 0x94d   : > { %v11368_v23 = vmax.f32 %v11233_v8, 0.0  ;;  %v11630_v54 = vpop.f32.mrb[108].mxu0 }
 0x94e   : > { %v11433_v13 = vpack.c.bf16 %v11367_v33, %v11365_v52  ;;  %v11631_v24 = vadd.f32 %v17917_v44, %v11630_v54  ;;  %v11632_v28 = vpop.f32.mrb[109].mxu0 }
 0x94f   : > { %v11434_v20 = vpack.c.bf16 %v11368_v23, %v11366_v29  ;;  %v11236_v51 = vpop.f32.mrb[220].mxu1  ;;  %v11633_v7 = vpop.f32.mrb[110].mxu0 }
 0x950   : > { %11868 = vst.msk [vmem:[%s17922_s26 + $0x30] sm:$0xff] %vm11861_vm11, %v11631_v24  ;;  %v11237_v9 = vadd.f32 %v11236_v51, %v17787_v61  ;;  %v11634_v34 = vadd.f32 %v17917_v44, %v11633_v7  ;;  %v11238_v41 = vpop.f32.mrb[221].mxu1  ;;  %v11635_v0 = vpop.f32.mrb[111].mxu0 }
 0x951   : > { %v11239_v38 = vadd.f32 %v11238_v41, %v17790_v26  ;;  %v11240_v15 = vpop.f32.mrb[222].mxu1  ;;  %11844 = vmatprep.mubr.bf16.mxu0 %v11434_v20 }
 0x952   : > { %11869 = vst.msk [vmem:[%s17922_s26 + $0x38] sm:$0xff] %vm11861_vm11, %v11634_v34  ;;  %v11241_v50 = vadd.f32 %v11240_v15, %v17787_v61  ;;  %v11242_v11 = vpop.f32.mrb[223].mxu1  ;;  %11845 = vmatmul.mubr.bf16.gmra.mrb[216].mxu0 %v11433_v13  ;;  %v11369_v35 = vmax.f32 %v11237_v9, 0.0 }
 0x953   : > { %v11243_v12 = vadd.f32 %v11242_v11, %v17790_v26  ;;  %v11370_v60 = vmax.f32 %v11239_v38, 0.0 }
 0x954   : > { %v11371_v5 = vmax.f32 %v11241_v50, 0.0 }
 0x955   : > { %v11372_v25 = vmax.f32 %v11243_v12, 0.0  ;;  %v11638_v27 = vpop.f32.mrb[112].mxu0 }
 0x956   : > { %v11435_v62 = vpack.c.bf16 %v11371_v5, %v11369_v35  ;;  %v11639_v4 = vadd.f32 %v17917_v44, %v11638_v27  ;;  %v11640_v16 = vpop.f32.mrb[113].mxu0 }
 0x957   : > { %v11436_v47 = vpack.c.bf16 %v11372_v25, %v11370_v60  ;;  %v11641_v2 = vpop.f32.mrb[114].mxu0 }
 0x958   : > { %11870 = vst.msk [vmem:[%s17922_s26 + $0x40] sm:$0xff] %vm11861_vm11, %v11639_v4  ;;  %v11642_v61 = vadd.f32 %v17917_v44, %v11641_v2  ;;  %v11643_v63 = vpop.f32.mrb[115].mxu0 }
 0x959   : > { %11852 = vmatprep.mubr.bf16.mxu0 %v11436_v47 }
 0x95a   : > { %11871 = vst.msk [vmem:[%s17922_s26 + $0x48] sm:$0xff] %vm11861_vm11, %v11642_v61  ;;  %11853 = vmatmul.mubr.bf16.gmra.mrb[220].mxu0 %v11435_v62 }
 0x95d   : > { %v11646_v26 = vpop.f32.mrb[116].mxu0 }
 0x95e   : > { %v11647_v59 = vadd.f32 %v17917_v44, %v11646_v26  ;;  %v11648_v40 = vpop.f32.mrb[117].mxu0 }
 0x95f   : > { %v11649_v22 = vpop.f32.mrb[118].mxu0 }
 0x960   : > { %11872 = vst.msk [vmem:[%s17922_s26 + $0x50] sm:$0xff] %vm11861_vm11, %v11647_v59  ;;  %v11650_v37 = vadd.f32 %v17917_v44, %v11649_v22  ;;  %v11651_v21 = vpop.f32.mrb[119].mxu0 }
 0x962   : > { %11873 = vst.msk [vmem:[%s17922_s26 + $0x58] sm:$0xff] %vm11861_vm11, %v11650_v37 }
 0x965   : > { %v11654_v19 = vpop.f32.mrb[120].mxu0 }
 0x966   : > { %v11655_v53 = vadd.f32 %v17917_v44, %v11654_v19  ;;  %v11656_v14 = vpop.f32.mrb[121].mxu0 }
 0x967   : > { %v11657_v30 = vpop.f32.mrb[122].mxu0 }
 0x968   : > { %11874 = vst.msk [vmem:[%s17922_s26 + $0x60] sm:$0xff] %vm11861_vm11, %v11655_v53  ;;  %v11658_v6 = vadd.f32 %v17917_v44, %v11657_v30  ;;  %v11659_v55 = vpop.f32.mrb[123].mxu0 }
 0x96a   : > { %11875 = vst.msk [vmem:[%s17922_s26 + $0x68] sm:$0xff] %vm11861_vm11, %v11658_v6 }
 0x96d   : > { %v11662_v42 = vpop.f32.mrb[124].mxu0 }
 0x96e   : > { %v11663_v31 = vadd.f32 %v17917_v44, %v11662_v42  ;;  %v11664_v57 = vpop.f32.mrb[125].mxu0 }
 0x96f   : > { %v11665_v1 = vpop.f32.mrb[126].mxu0 }
 0x970   : > { %11876 = vst.msk [vmem:[%s17922_s26 + $0x70] sm:$0xff] %vm11861_vm11, %v11663_v31  ;;  %v11666_v48 = vadd.f32 %v17917_v44, %v11665_v1  ;;  %v11667_v39 = vpop.f32.mrb[127].mxu0 }
 0x972   : > { %11877 = vst.msk [vmem:[%s17922_s26 + $0x78] sm:$0xff] %vm11861_vm11, %v11666_v48 }
 0x975   : > { %v11670_v49 = vpop.f32.mrb[128].mxu0 }
 0x976   : > { %v11671_v43 = vadd.f32 %v17917_v44, %v11670_v49  ;;  %v11672_v46 = vpop.f32.mrb[129].mxu0 }
 0x977   : > { %v11673_v56 = vpop.f32.mrb[130].mxu0 }
 0x978   : > { %11878 = vst.msk [vmem:[%s17922_s26 + $0x80] sm:$0xff] %vm11861_vm11, %v11671_v43  ;;  %v11674_v45 = vadd.f32 %v17917_v44, %v11673_v56  ;;  %v11675_v36 = vpop.f32.mrb[131].mxu0 }
 0x97a   : > { %11879 = vst.msk [vmem:[%s17922_s26 + $0x88] sm:$0xff] %vm11861_vm11, %v11674_v45 }
 0x97d   : > { %v11678_v3 = vpop.f32.mrb[132].mxu0 }
 0x97e   : > { %v11679_v32 = vadd.f32 %v17917_v44, %v11678_v3  ;;  %v11680_v17 = vpop.f32.mrb[133].mxu0 }
 0x97f   : > { %v11681_v10 = vpop.f32.mrb[134].mxu0 }
 0x980   : > { %11880 = vst.msk [vmem:[%s17922_s26 + $0x90] sm:$0xff] %vm11861_vm11, %v11679_v32  ;;  %v11682_v18 = vadd.f32 %v17917_v44, %v11681_v10  ;;  %v11683_v58 = vpop.f32.mrb[135].mxu0 }
 0x982   : > { %11881 = vst.msk [vmem:[%s17922_s26 + $0x98] sm:$0xff] %vm11861_vm11, %v11682_v18 }
 0x985   : > { %v11686_v8 = vpop.f32.mrb[136].mxu0 }
 0x986   : > { %v11687_v52 = vadd.f32 %v17917_v44, %v11686_v8  ;;  %v11688_v33 = vpop.f32.mrb[137].mxu0 }
 0x987   : > { %v11689_v29 = vpop.f32.mrb[138].mxu0 }
 0x988   : > { %11882 = vst.msk [vmem:[%s17922_s26 + $0xa0] sm:$0xff] %vm11861_vm11, %v11687_v52  ;;  %v11690_v23 = vadd.f32 %v17917_v44, %v11689_v29  ;;  %v11691_v54 = vpop.f32.mrb[139].mxu0 }
 0x98a   : > { %11883 = vst.msk [vmem:[%s17922_s26 + $0xa8] sm:$0xff] %vm11861_vm11, %v11690_v23 }
 0x98d   : > { %v11694_v13 = vpop.f32.mrb[140].mxu0 }
 0x98e   : > { %v11695_v24 = vadd.f32 %v17917_v44, %v11694_v13  ;;  %v11696_v28 = vpop.f32.mrb[141].mxu0 }
 0x98f   : > { %v11697_v20 = vpop.f32.mrb[142].mxu0 }
 0x990   : > { %11884 = vst.msk [vmem:[%s17922_s26 + $0xb0] sm:$0xff] %vm11861_vm11, %v11695_v24  ;;  %v11698_v51 = vadd.f32 %v17917_v44, %v11697_v20  ;;  %v11699_v7 = vpop.f32.mrb[143].mxu0 }
 0x992   : > { %11885 = vst.msk [vmem:[%s17922_s26 + $0xb8] sm:$0xff] %vm11861_vm11, %v11698_v51 }
 0x995   : > { %v11702_v9 = vpop.f32.mrb[144].mxu0 }
 0x996   : > { %v11703_v34 = vadd.f32 %v17917_v44, %v11702_v9  ;;  %v11704_v41 = vpop.f32.mrb[145].mxu0 }
 0x997   : > { %v11705_v0 = vpop.f32.mrb[146].mxu0 }
 0x998   : > { %11886 = vst.msk [vmem:[%s17922_s26 + $0xc0] sm:$0xff] %vm11861_vm11, %v11703_v34  ;;  %v11706_v38 = vadd.f32 %v17917_v44, %v11705_v0  ;;  %v11707_v15 = vpop.f32.mrb[147].mxu0 }
 0x99a   : > { %11887 = vst.msk [vmem:[%s17922_s26 + $0xc8] sm:$0xff] %vm11861_vm11, %v11706_v38 }
 0x99d   : > { %v11710_v50 = vpop.f32.mrb[148].mxu0 }
 0x99e   : > { %v11711_v11 = vadd.f32 %v17917_v44, %v11710_v50  ;;  %v11712_v12 = vpop.f32.mrb[149].mxu0 }
 0x99f   : > { %v11713_v35 = vpop.f32.mrb[150].mxu0 }
 0x9a0   : > { %11888 = vst.msk [vmem:[%s17922_s26 + $0xd0] sm:$0xff] %vm11861_vm11, %v11711_v11  ;;  %v11714_v5 = vadd.f32 %v17917_v44, %v11713_v35  ;;  %v11715_v60 = vpop.f32.mrb[151].mxu0 }
 0x9a2   : > { %11889 = vst.msk [vmem:[%s17922_s26 + $0xd8] sm:$0xff] %vm11861_vm11, %v11714_v5 }
 0x9a5   : > { %v11718_v25 = vpop.f32.mrb[152].mxu0 }
 0x9a6   : > { %v11719_v27 = vadd.f32 %v17917_v44, %v11718_v25  ;;  %v11720_v62 = vpop.f32.mrb[153].mxu0 }
 0x9a7   : > { %v11721_v4 = vpop.f32.mrb[154].mxu0 }
 0x9a8   : > { %11890 = vst.msk [vmem:[%s17922_s26 + $0xe0] sm:$0xff] %vm11861_vm11, %v11719_v27  ;;  %v11722_v16 = vadd.f32 %v17917_v44, %v11721_v4  ;;  %v11723_v47 = vpop.f32.mrb[155].mxu0 }
 0x9aa   : > { %11891 = vst.msk [vmem:[%s17922_s26 + $0xe8] sm:$0xff] %vm11861_vm11, %v11722_v16 }
 0x9ad   : > { %v11726_v2 = vpop.f32.mrb[156].mxu0 }
 0x9ae   : > { %v11727_v61 = vadd.f32 %v17917_v44, %v11726_v2  ;;  %v11728_v63 = vpop.f32.mrb[157].mxu0 }
 0x9af   : > { %v11729_v26 = vpop.f32.mrb[158].mxu0 }
 0x9b0   : > { %11892 = vst.msk [vmem:[%s17922_s26 + $0xf0] sm:$0xff] %vm11861_vm11, %v11727_v61  ;;  %v11730_v59 = vadd.f32 %v17917_v44, %v11729_v26  ;;  %v11731_v40 = vpop.f32.mrb[159].mxu0 }
 0x9b2   : > { %11893 = vst.msk [vmem:[%s17922_s26 + $0xf8] sm:$0xff] %vm11861_vm11, %v11730_v59 }
 0x9b5   : > { %v11734_v22 = vpop.f32.mrb[160].mxu0 }
 0x9b6   : > { %v11735_v37 = vadd.f32 %v17917_v44, %v11734_v22  ;;  %v11736_v21 = vpop.f32.mrb[161].mxu0 }
 0x9b7   : > { %v11737_v19 = vpop.f32.mrb[162].mxu0 }
 0x9b8   : > { %11894 = vst.msk [vmem:[%s17922_s26 + $0x100] sm:$0xff] %vm11861_vm11, %v11735_v37  ;;  %v11738_v53 = vadd.f32 %v17917_v44, %v11737_v19  ;;  %v11739_v14 = vpop.f32.mrb[163].mxu0 }
 0x9ba   : > { %11895 = vst.msk [vmem:[%s17922_s26 + $0x108] sm:$0xff] %vm11861_vm11, %v11738_v53 }
 0x9bd   : > { %v11742_v30 = vpop.f32.mrb[164].mxu0 }
 0x9be   : > { %v11743_v6 = vadd.f32 %v17917_v44, %v11742_v30  ;;  %v11744_v55 = vpop.f32.mrb[165].mxu0 }
 0x9bf   : > { %v11745_v42 = vpop.f32.mrb[166].mxu0 }
 0x9c0   : > { %11896 = vst.msk [vmem:[%s17922_s26 + $0x110] sm:$0xff] %vm11861_vm11, %v11743_v6  ;;  %v11746_v31 = vadd.f32 %v17917_v44, %v11745_v42  ;;  %v11747_v57 = vpop.f32.mrb[167].mxu0 }
 0x9c2   : > { %11897 = vst.msk [vmem:[%s17922_s26 + $0x118] sm:$0xff] %vm11861_vm11, %v11746_v31 }
 0x9c5   : > { %v11750_v1 = vpop.f32.mrb[168].mxu0 }
 0x9c6   : > { %v11751_v48 = vadd.f32 %v17917_v44, %v11750_v1  ;;  %v11752_v39 = vpop.f32.mrb[169].mxu0 }
 0x9c7   : > { %v11753_v49 = vpop.f32.mrb[170].mxu0 }
 0x9c8   : > { %11898 = vst.msk [vmem:[%s17922_s26 + $0x120] sm:$0xff] %vm11861_vm11, %v11751_v48  ;;  %v11754_v43 = vadd.f32 %v17917_v44, %v11753_v49  ;;  %v11755_v46 = vpop.f32.mrb[171].mxu0 }
 0x9ca   : > { %11899 = vst.msk [vmem:[%s17922_s26 + $0x128] sm:$0xff] %vm11861_vm11, %v11754_v43 }
 0x9cd   : > { %v11758_v56 = vpop.f32.mrb[172].mxu0 }
 0x9ce   : > { %v11759_v45 = vadd.f32 %v17917_v44, %v11758_v56  ;;  %v11760_v36 = vpop.f32.mrb[173].mxu0 }
 0x9cf   : > { %v11761_v3 = vpop.f32.mrb[174].mxu0 }
 0x9d0   : > { %11900 = vst.msk [vmem:[%s17922_s26 + $0x130] sm:$0xff] %vm11861_vm11, %v11759_v45  ;;  %v11762_v32 = vadd.f32 %v17917_v44, %v11761_v3  ;;  %v11763_v17 = vpop.f32.mrb[175].mxu0 }
 0x9d2   : > { %11901 = vst.msk [vmem:[%s17922_s26 + $0x138] sm:$0xff] %vm11861_vm11, %v11762_v32 }
 0x9d5   : > { %v11766_v10 = vpop.f32.mrb[176].mxu0 }
 0x9d6   : > { %v11767_v18 = vadd.f32 %v17917_v44, %v11766_v10  ;;  %v11768_v58 = vpop.f32.mrb[177].mxu0 }
 0x9d7   : > { %v11769_v8 = vpop.f32.mrb[178].mxu0 }
 0x9d8   : > { %11902 = vst.msk [vmem:[%s17922_s26 + $0x140] sm:$0xff] %vm11861_vm11, %v11767_v18  ;;  %v11770_v52 = vadd.f32 %v17917_v44, %v11769_v8  ;;  %v11771_v33 = vpop.f32.mrb[179].mxu0 }
 0x9da   : > { %11903 = vst.msk [vmem:[%s17922_s26 + $0x148] sm:$0xff] %vm11861_vm11, %v11770_v52 }
 0x9dd   : > { %v11774_v29 = vpop.f32.mrb[180].mxu0 }
 0x9de   : > { %v11775_v23 = vadd.f32 %v17917_v44, %v11774_v29  ;;  %v11776_v54 = vpop.f32.mrb[181].mxu0 }
 0x9df   : > { %v11777_v13 = vpop.f32.mrb[182].mxu0 }
 0x9e0   : > { %11904 = vst.msk [vmem:[%s17922_s26 + $0x150] sm:$0xff] %vm11861_vm11, %v11775_v23  ;;  %v11778_v24 = vadd.f32 %v17917_v44, %v11777_v13  ;;  %v11779_v28 = vpop.f32.mrb[183].mxu0 }
 0x9e2   : > { %11905 = vst.msk [vmem:[%s17922_s26 + $0x158] sm:$0xff] %vm11861_vm11, %v11778_v24 }
 0x9e5   : > { %v11782_v20 = vpop.f32.mrb[184].mxu0 }
 0x9e6   : > { %v11783_v51 = vadd.f32 %v17917_v44, %v11782_v20  ;;  %v11784_v7 = vpop.f32.mrb[185].mxu0 }
 0x9e7   : > { %v11785_v9 = vpop.f32.mrb[186].mxu0 }
 0x9e8   : > { %11906 = vst.msk [vmem:[%s17922_s26 + $0x160] sm:$0xff] %vm11861_vm11, %v11783_v51  ;;  %v11786_v34 = vadd.f32 %v17917_v44, %v11785_v9  ;;  %v11787_v41 = vpop.f32.mrb[187].mxu0 }
 0x9ea   : > { %11907 = vst.msk [vmem:[%s17922_s26 + $0x168] sm:$0xff] %vm11861_vm11, %v11786_v34 }
 0x9ed   : > { %v11790_v0 = vpop.f32.mrb[188].mxu0 }
 0x9ee   : > { %v11791_v38 = vadd.f32 %v17917_v44, %v11790_v0  ;;  %v11792_v15 = vpop.f32.mrb[189].mxu0 }
 0x9ef   : > { %v11793_v50 = vpop.f32.mrb[190].mxu0 }
 0x9f0   : > { %11908 = vst.msk [vmem:[%s17922_s26 + $0x170] sm:$0xff] %vm11861_vm11, %v11791_v38  ;;  %v11794_v11 = vadd.f32 %v17917_v44, %v11793_v50  ;;  %v11795_v12 = vpop.f32.mrb[191].mxu0 }
 0x9f2   : > { %11909 = vst.msk [vmem:[%s17922_s26 + $0x178] sm:$0xff] %vm11861_vm11, %v11794_v11 }
 0x9f5   : > { %v11798_v35 = vpop.f32.mrb[192].mxu0 }
 0x9f6   : > { %v11799_v5 = vadd.f32 %v17917_v44, %v11798_v35  ;;  %v11800_v60 = vpop.f32.mrb[193].mxu0 }
 0x9f7   : > { %v11801_v25 = vpop.f32.mrb[194].mxu0 }
 0x9f8   : > { %11910 = vst.msk [vmem:[%s17922_s26 + $0x180] sm:$0xff] %vm11861_vm11, %v11799_v5  ;;  %v11802_v27 = vadd.f32 %v17917_v44, %v11801_v25  ;;  %v11803_v62 = vpop.f32.mrb[195].mxu0 }
 0x9fa   : > { %11911 = vst.msk [vmem:[%s17922_s26 + $0x188] sm:$0xff] %vm11861_vm11, %v11802_v27 }
 0x9fd   : > { %v11806_v4 = vpop.f32.mrb[196].mxu0 }
 0x9fe   : > { %v11807_v16 = vadd.f32 %v17917_v44, %v11806_v4  ;;  %v11808_v47 = vpop.f32.mrb[197].mxu0 }
 0x9ff   : > { %v11809_v2 = vpop.f32.mrb[198].mxu0 }
 0xa00   : > { %11912 = vst.msk [vmem:[%s17922_s26 + $0x190] sm:$0xff] %vm11861_vm11, %v11807_v16  ;;  %v11810_v61 = vadd.f32 %v17917_v44, %v11809_v2  ;;  %v11811_v63 = vpop.f32.mrb[199].mxu0 }
 0xa02   : > { %11913 = vst.msk [vmem:[%s17922_s26 + $0x198] sm:$0xff] %vm11861_vm11, %v11810_v61 }
 0xa05   : > { %v11814_v26 = vpop.f32.mrb[200].mxu0 }
 0xa06   : > { %v11815_v59 = vadd.f32 %v17917_v44, %v11814_v26  ;;  %v11816_v40 = vpop.f32.mrb[201].mxu0 }
 0xa07   : > { %v11817_v22 = vpop.f32.mrb[202].mxu0 }
 0xa08   : > { %11914 = vst.msk [vmem:[%s17922_s26 + $0x1a0] sm:$0xff] %vm11861_vm11, %v11815_v59  ;;  %v11818_v37 = vadd.f32 %v17917_v44, %v11817_v22  ;;  %v11819_v21 = vpop.f32.mrb[203].mxu0 }
 0xa0a   : > { %11915 = vst.msk [vmem:[%s17922_s26 + $0x1a8] sm:$0xff] %vm11861_vm11, %v11818_v37 }
 0xa0d   : > { %v11822_v19 = vpop.f32.mrb[204].mxu0 }
 0xa0e   : > { %v11823_v53 = vadd.f32 %v17917_v44, %v11822_v19  ;;  %v11824_v14 = vpop.f32.mrb[205].mxu0 }
 0xa0f   : > { %v11825_v30 = vpop.f32.mrb[206].mxu0 }
 0xa10   : > { %11916 = vst.msk [vmem:[%s17922_s26 + $0x1b0] sm:$0xff] %vm11861_vm11, %v11823_v53  ;;  %v11826_v6 = vadd.f32 %v17917_v44, %v11825_v30  ;;  %v11827_v55 = vpop.f32.mrb[207].mxu0 }
 0xa12   : > { %11917 = vst.msk [vmem:[%s17922_s26 + $0x1b8] sm:$0xff] %vm11861_vm11, %v11826_v6 }
 0xa15   : > { %v11830_v42 = vpop.f32.mrb[208].mxu0 }
 0xa16   : > { %v11831_v31 = vadd.f32 %v17917_v44, %v11830_v42  ;;  %v11832_v57 = vpop.f32.mrb[209].mxu0 }
 0xa17   : > { %v11833_v1 = vpop.f32.mrb[210].mxu0 }
 0xa18   : > { %11918 = vst.msk [vmem:[%s17922_s26 + $0x1c0] sm:$0xff] %vm11861_vm11, %v11831_v31  ;;  %v11834_v48 = vadd.f32 %v17917_v44, %v11833_v1  ;;  %v11835_v39 = vpop.f32.mrb[211].mxu0 }
 0xa1a   : > { %11919 = vst.msk [vmem:[%s17922_s26 + $0x1c8] sm:$0xff] %vm11861_vm11, %v11834_v48 }
 0xa1d   : > { %v11838_v49 = vpop.f32.mrb[212].mxu0 }
 0xa1e   : > { %v11839_v43 = vadd.f32 %v17917_v44, %v11838_v49  ;;  %v11840_v46 = vpop.f32.mrb[213].mxu0 }
 0xa1f   : > { %v11841_v56 = vpop.f32.mrb[214].mxu0 }
 0xa20   : > { %11920 = vst.msk [vmem:[%s17922_s26 + $0x1d0] sm:$0xff] %vm11861_vm11, %v11839_v43  ;;  %v11842_v45 = vadd.f32 %v17917_v44, %v11841_v56  ;;  %v11843_v36 = vpop.f32.mrb[215].mxu0 }
 0xa22   : > { %11921 = vst.msk [vmem:[%s17922_s26 + $0x1d8] sm:$0xff] %vm11861_vm11, %v11842_v45 }
 0xa25   : > { %v11846_v3 = vpop.f32.mrb[216].mxu0 }
 0xa26   : > { %v11847_v32 = vadd.f32 %v17917_v44, %v11846_v3  ;;  %v11848_v17 = vpop.f32.mrb[217].mxu0 }
 0xa27   : > { %v11849_v10 = vpop.f32.mrb[218].mxu0 }
 0xa28   : > { %11922 = vst.msk [vmem:[%s17922_s26 + $0x1e0] sm:$0xff] %vm11861_vm11, %v11847_v32  ;;  %v11850_v18 = vadd.f32 %v17917_v44, %v11849_v10  ;;  %v11851_v58 = vpop.f32.mrb[219].mxu0 }
 0xa2a   : > { %11923 = vst.msk [vmem:[%s17922_s26 + $0x1e8] sm:$0xff] %vm11861_vm11, %v11850_v18 }
 0xa2d   : > { %v11854_v8 = vpop.f32.mrb[220].mxu0 }
 0xa2e   : > { %v11855_v52 = vadd.f32 %v17917_v44, %v11854_v8  ;;  %v11856_v33 = vpop.f32.mrb[221].mxu0 }
 0xa2f   : > { %v11857_v29 = vpop.f32.mrb[222].mxu0 }
 0xa30   : > { %11924 = vst.msk [vmem:[%s17922_s26 + $0x1f0] sm:$0xff] %vm11861_vm11, %v11855_v52  ;;  %v11858_v23 = vadd.f32 %v17917_v44, %v11857_v29  ;;  %v11859_v54 = vpop.f32.mrb[223].mxu0 }
 0xa32   : > { %11925 = vst.msk [vmem:[%s17922_s26 + $0x1f8] sm:$0xff] %vm11861_vm11, %v11858_v23 }
 0xa33 PF: > { %s24_s29 = sadd.s32 1, %s13296_s29  }
 0xa34   : > { %p21_p4 = scmp.ge.s32.totalorder %s24_s29, 4  }
 0xa36   :  { %23 = sbr.rel (!%p21_p4) target bundleno = 1 (0x1), region = 113 }

</bundles_post_ra>
